<compile_context>
chip_gen: v7x
topology: tpu7x:2x2x1
jax: 0.10.0
libtpu: 0.0.40
codegen_flags: <defaults>
</compile_context>

<pallas_src>
import functools

import numpy as np
import jax
import jax.numpy as jnp
from jax.experimental import pallas as pl
from jax.experimental.pallas import tpu as pltpu


DEFAULT_COMPUTE_DTYPE = jnp.bfloat16  # MXU operand dtype; accumulation is f32.


# ----------------------------------------------------------------------------
# Fused kernel: 4 x [conv4x4/s2/p1 as 16 selection matmuls] + bias + ReLU(1..3)
# ----------------------------------------------------------------------------
def _fused_encoder_kernel(*refs, num_layers, compute_dtype):
    x_ref = refs[0]
    out_ref = refs[-1]

    a = x_ref[...].astype(jnp.float32)              # (N*H*W, Cin) activation
    for layer in range(num_layers):
        g_ref, w_ref, b_ref = refs[1 + 3 * layer: 4 + 3 * layer]
        n_offsets, m_out, _ = g_ref.shape           # (16, N*Ho*Wo, N*H*W)
        c_out = w_ref.shape[-1]

        a_c = a.astype(compute_dtype)               # bf16 operands for the MXU
        acc = jnp.zeros((m_out, c_out), jnp.float32)
        for k in range(n_offsets):                  # 16 kernel offsets (kh, kw)
            # Shifted / zero-padded im2col view via 0/1 selection matrix (MXU).
            v = jnp.dot(g_ref[k], a_c,
                        preferred_element_type=jnp.float32).astype(compute_dtype)
            # Conv contribution of this offset; f32 accumulation.
            acc = acc + jnp.dot(v, w_ref[k], preferred_element_type=jnp.float32)
        acc = acc + b_ref[...]                      # f32 bias
        if layer < num_layers - 1:
            acc = jnp.maximum(acc, 0.0)             # f32 ReLU epilogue (v5e-safe)
        a = acc                                     # stays on-chip

    out_ref[...] = a.astype(out_ref.dtype)


# ----------------------------------------------------------------------------
# Host-side helpers (computed once per shape, cached)
# ----------------------------------------------------------------------------
@functools.lru_cache(maxsize=None)
def _gather_stack_np(n, h, w, k, s, p):
    """0/1 selection matrices G[k] s.t. (G[k] @ A)[m] = padded input pixel for
    output pixel m at kernel offset k (k = kh*ksize + kw)."""
    ho = (h + 2 * p - k) // s + 1
    wo = (w + 2 * p - k) // s + 1
    m_out, m_in = n * ho * wo, n * h * w
    g = np.zeros((k * k, m_out, m_in), np.float32)
    for kh in range(k):
        for kw in range(k):
            kk = kh * k + kw
            for b in range(n):
                for i in range(ho):
                    hh = s * i + kh - p
                    if not (0 <= hh < h):
                        continue
                    for j in range(wo):
                        ww = s * j + kw - p
                        if 0 <= ww < w:
                            g[kk, b * ho * wo + i * wo + j,
                              b * h * w + hh * w + ww] = 1.0
    return g, ho, wo


def _full_spec(shape):
    zeros = (0,) * len(shape)
    return pl.BlockSpec(shape, lambda i, _z=zeros: _z)


# ----------------------------------------------------------------------------
# Parameters: weight layout transform pre-folded (once, at init)
# ----------------------------------------------------------------------------
def init_image_encoder_params(key, in_channels=3, latent_dim=64,
                              compute_dtype=DEFAULT_COMPUTE_DTYPE):
    """Returns [(w_stack (16, Cin, Cout) compute_dtype, bias (1, Cout) f32), ...]
    with w_stack[kh*4+kw, c, o] == torch_weight[o, c, kh, kw]."""
    layer_channels = [(in_channels, 32), (32, 64), (64, 128), (128, latent_dim)]
    params = []
    for i, (cin, cout) in enumerate(layer_channels):
        kw_key, kb_key = jax.random.split(jax.random.fold_in(key, i))
        fan_in = cin * 4 * 4
        scale = 1.0 / float(fan_in) ** 0.5
        w = jax.random.uniform(kw_key, (cout, cin, 4, 4), jnp.float32, -scale, scale)
        w_stack = (jnp.transpose(w, (2, 3, 1, 0))
                   .reshape(16, cin, cout).astype(compute_dtype))
        b = jax.random.uniform(kb_key, (1, cout), jnp.float32, -scale, scale)
        params.append((w_stack, b))
    return params


# ----------------------------------------------------------------------------
# Forward: NCHW in -> NCHW out, single fused pallas_call
# ----------------------------------------------------------------------------
def image_encoder_forward(params, x_nchw):
    n, c_in, h, w = x_nchw.shape
    compute_dtype = params[0][0].dtype

    # NCHW -> flat (N*H*W, C) with channels on the lane axis.
    x2d = (jnp.transpose(x_nchw, (0, 2, 3, 1))
           .reshape(n * h * w, c_in).astype(jnp.float32))

    kernel_inputs = [x2d]
    flops = 0
    cur_h, cur_w, cur_c = h, w, c_in
    for (w_stack, bias) in params:
        kk, layer_cin, layer_cout = w_stack.shape
        assert layer_cin == cur_c
        g_np, ho, wo = _gather_stack_np(n, cur_h, cur_w, 4, 2, 1)
        g = jnp.asarray(g_np, compute_dtype)
        kernel_inputs += [g, w_stack, bias]
        m_out, m_in = n * ho * wo, n * cur_h * cur_w
        flops += 2 * kk * m_out * m_in * cur_c          # gather matmuls
        flops += 2 * kk * m_out * cur_c * layer_cout    # conv matmuls
        cur_h, cur_w, cur_c = ho, wo, layer_cout

    m_final = n * cur_h * cur_w
    bytes_accessed = sum(int(a.size) * a.dtype.itemsize for a in kernel_inputs)
    bytes_accessed += m_final * cur_c * 4

    kernel = functools.partial(_fused_encoder_kernel,
                               num_layers=len(params),
                               compute_dtype=compute_dtype)

    y2d = pl.pallas_call(
        kernel,
        out_shape=jax.ShapeDtypeStruct((m_final, cur_c), jnp.float32),
        grid=(1,),
        in_specs=[_full_spec(a.shape) for a in kernel_inputs],
        out_specs=_full_spec((m_final, cur_c)),
        compiler_params=pltpu.CompilerParams(
            dimension_semantics=("arbitrary",),
            vmem_limit_bytes=32 * 1024 * 1024),
        cost_estimate=pl.CostEstimate(flops=int(flops), transcendentals=0,
                                      bytes_accessed=int(bytes_accessed)),
    )(*kernel_inputs)

    y = y2d.reshape(n, cur_h, cur_w, cur_c)
    return jnp.transpose(y, (0, 3, 1, 2))               # back to NCHW


if __name__ == "__main__":
    key = jax.random.PRNGKey(0)
    pkey, xkey = jax.random.split(key)

    params = init_image_encoder_params(pkey, in_channels=3, latent_dim=64)
    x = jax.random.normal(xkey, (2, 3, 16, 16), dtype=jnp.float32)   # NCHW

    out = jax.jit(image_encoder_forward)(params, x)
    out = jax.block_until_ready(out)

    assert out.shape == (2, 64, 1, 1), out.shape   # 16 -> 8 -> 4 -> 2 -> 1
    print("KERNEL_OK")
</pallas_src>

<mosaic_0001>
module attributes {stable_mosaic.version = 11 : i64} {
  func.func @_fused_encoder_kernel(%arg0: i32, %arg1: memref<512x3xf32, #tpu.memory_space<vmem>>, %arg2: memref<16x128x512xbf16, #tpu.memory_space<vmem>>, %arg3: memref<16x3x32xbf16, #tpu.memory_space<vmem>>, %arg4: memref<1x32xf32, #tpu.memory_space<vmem>>, %arg5: memref<16x32x128xbf16, #tpu.memory_space<vmem>>, %arg6: memref<16x32x64xbf16, #tpu.memory_space<vmem>>, %arg7: memref<1x64xf32, #tpu.memory_space<vmem>>, %arg8: memref<16x8x32xbf16, #tpu.memory_space<vmem>>, %arg9: memref<16x64x128xbf16, #tpu.memory_space<vmem>>, %arg10: memref<1x128xf32, #tpu.memory_space<vmem>>, %arg11: memref<16x2x8xbf16, #tpu.memory_space<vmem>>, %arg12: memref<16x128x64xbf16, #tpu.memory_space<vmem>>, %arg13: memref<1x64xf32, #tpu.memory_space<vmem>>, %arg14: memref<2x64xf32, #tpu.memory_space<vmem>>) attributes {dimension_semantics = [#tpu.dimension_semantics<arbitrary>], iteration_bounds = array<i64: 1>, scalar_prefetch = 0 : i64, scratch_operands = 0 : i64, tpu.core_type = #tpu.core_type<tc>, window_params = [{pipeline_mode = #tpu.pipeline_mode<synchronous>, transform_indices = @transform_0, window_bounds = array<i64: 512, 3>}, {pipeline_mode = #tpu.pipeline_mode<synchronous>, transform_indices = @transform_1, window_bounds = array<i64: 16, 128, 512>}, {pipeline_mode = #tpu.pipeline_mode<synchronous>, transform_indices = @transform_2, window_bounds = array<i64: 16, 3, 32>}, {pipeline_mode = #tpu.pipeline_mode<synchronous>, transform_indices = @transform_3, window_bounds = array<i64: 1, 32>}, {pipeline_mode = #tpu.pipeline_mode<synchronous>, transform_indices = @transform_4, window_bounds = array<i64: 16, 32, 128>}, {pipeline_mode = #tpu.pipeline_mode<synchronous>, transform_indices = @transform_5, window_bounds = array<i64: 16, 32, 64>}, {pipeline_mode = #tpu.pipeline_mode<synchronous>, transform_indices = @transform_6, window_bounds = array<i64: 1, 64>}, {pipeline_mode = #tpu.pipeline_mode<synchronous>, transform_indices = @transform_7, window_bounds = array<i64: 16, 8, 32>}, {pipeline_mode = #tpu.pipeline_mode<synchronous>, transform_indices = @transform_8, window_bounds = array<i64: 16, 64, 128>}, {pipeline_mode = #tpu.pipeline_mode<synchronous>, transform_indices = @transform_9, window_bounds = array<i64: 1, 128>}, {pipeline_mode = #tpu.pipeline_mode<synchronous>, transform_indices = @transform_10, window_bounds = array<i64: 16, 2, 8>}, {pipeline_mode = #tpu.pipeline_mode<synchronous>, transform_indices = @transform_11, window_bounds = array<i64: 16, 128, 64>}, {pipeline_mode = #tpu.pipeline_mode<synchronous>, transform_indices = @transform_12, window_bounds = array<i64: 1, 64>}, {pipeline_mode = #tpu.pipeline_mode<synchronous>, transform_indices = @transform_13, window_bounds = array<i64: 2, 64>}]} {
    %c0 = arith.constant 0 : index
    %c0_0 = arith.constant 0 : index
    %0 = vector.load %arg1[%c0, %c0_0] : memref<512x3xf32, #tpu.memory_space<vmem>>, vector<512x3xf32>
    %1 = arith.truncf %0 : vector<512x3xf32> to vector<512x3xbf16>
    %cst = arith.constant 0.000000e+00 : f32
    %2 = vector.broadcast %cst : f32 to vector<128x32xf32>
    %c0_1 = arith.constant 0 : index
    %c0_2 = arith.constant 0 : index
    %c0_3 = arith.constant 0 : index
    %3 = vector.load %arg2[%c0_1, %c0_2, %c0_3] : memref<16x128x512xbf16, #tpu.memory_space<vmem>>, vector<1x128x512xbf16>
    %4 = vector.shape_cast %3 : vector<1x128x512xbf16> to vector<128x512xbf16>
    %cst_4 = arith.constant dense<0.000000e+00> : vector<128x3xf32>
    %5 = tpu.matmul %4, %1, %cst_4 {dimension_numbers = #tpu.dot_dimension_numbers<[1], [0], [0], [1], [0, 0, 1, 1], [], []>} : vector<128x512xbf16>, vector<512x3xbf16>, vector<128x3xf32> -> vector<128x3xf32>
    %6 = arith.truncf %5 : vector<128x3xf32> to vector<128x3xbf16>
    %c0_5 = arith.constant 0 : index
    %c0_6 = arith.constant 0 : index
    %c0_7 = arith.constant 0 : index
    %7 = vector.load %arg3[%c0_5, %c0_6, %c0_7] : memref<16x3x32xbf16, #tpu.memory_space<vmem>>, vector<1x3x32xbf16>
    %8 = vector.shape_cast %7 : vector<1x3x32xbf16> to vector<3x32xbf16>
    %cst_8 = arith.constant dense<0.000000e+00> : vector<128x32xf32>
    %9 = tpu.matmul %6, %8, %cst_8 {dimension_numbers = #tpu.dot_dimension_numbers<[1], [0], [0], [1], [0, 0, 1, 1], [], []>} : vector<128x3xbf16>, vector<3x32xbf16>, vector<128x32xf32> -> vector<128x32xf32>
    %10 = arith.addf %2, %9 : vector<128x32xf32>
    %c1 = arith.constant 1 : index
    %c0_9 = arith.constant 0 : index
    %c0_10 = arith.constant 0 : index
    %11 = vector.load %arg2[%c1, %c0_9, %c0_10] : memref<16x128x512xbf16, #tpu.memory_space<vmem>>, vector<1x128x512xbf16>
    %12 = vector.shape_cast %11 : vector<1x128x512xbf16> to vector<128x512xbf16>
    %cst_11 = arith.constant dense<0.000000e+00> : vector<128x3xf32>
    %13 = tpu.matmul %12, %1, %cst_11 {dimension_numbers = #tpu.dot_dimension_numbers<[1], [0], [0], [1], [0, 0, 1, 1], [], []>} : vector<128x512xbf16>, vector<512x3xbf16>, vector<128x3xf32> -> vector<128x3xf32>
    %14 = arith.truncf %13 : vector<128x3xf32> to vector<128x3xbf16>
    %c1_12 = arith.constant 1 : index
    %c0_13 = arith.constant 0 : index
    %c0_14 = arith.constant 0 : index
    %15 = vector.load %arg3[%c1_12, %c0_13, %c0_14] : memref<16x3x32xbf16, #tpu.memory_space<vmem>>, vector<1x3x32xbf16>
    %16 = vector.shape_cast %15 : vector<1x3x32xbf16> to vector<3x32xbf16>
    %cst_15 = arith.constant dense<0.000000e+00> : vector<128x32xf32>
    %17 = tpu.matmul %14, %16, %cst_15 {dimension_numbers = #tpu.dot_dimension_numbers<[1], [0], [0], [1], [0, 0, 1, 1], [], []>} : vector<128x3xbf16>, vector<3x32xbf16>, vector<128x32xf32> -> vector<128x32xf32>
    %18 = arith.addf %10, %17 : vector<128x32xf32>
    %c2 = arith.constant 2 : index
    %c0_16 = arith.constant 0 : index
    %c0_17 = arith.constant 0 : index
    %19 = vector.load %arg2[%c2, %c0_16, %c0_17] : memref<16x128x512xbf16, #tpu.memory_space<vmem>>, vector<1x128x512xbf16>
    %20 = vector.shape_cast %19 : vector<1x128x512xbf16> to vector<128x512xbf16>
    %cst_18 = arith.constant dense<0.000000e+00> : vector<128x3xf32>
    %21 = tpu.matmul %20, %1, %cst_18 {dimension_numbers = #tpu.dot_dimension_numbers<[1], [0], [0], [1], [0, 0, 1, 1], [], []>} : vector<128x512xbf16>, vector<512x3xbf16>, vector<128x3xf32> -> vector<128x3xf32>
    %22 = arith.truncf %21 : vector<128x3xf32> to vector<128x3xbf16>
    %c2_19 = arith.constant 2 : index
    %c0_20 = arith.constant 0 : index
    %c0_21 = arith.constant 0 : index
    %23 = vector.load %arg3[%c2_19, %c0_20, %c0_21] : memref<16x3x32xbf16, #tpu.memory_space<vmem>>, vector<1x3x32xbf16>
    %24 = vector.shape_cast %23 : vector<1x3x32xbf16> to vector<3x32xbf16>
    %cst_22 = arith.constant dense<0.000000e+00> : vector<128x32xf32>
    %25 = tpu.matmul %22, %24, %cst_22 {dimension_numbers = #tpu.dot_dimension_numbers<[1], [0], [0], [1], [0, 0, 1, 1], [], []>} : vector<128x3xbf16>, vector<3x32xbf16>, vector<128x32xf32> -> vector<128x32xf32>
    %26 = arith.addf %18, %25 : vector<128x32xf32>
    %c3 = arith.constant 3 : index
    %c0_23 = arith.constant 0 : index
    %c0_24 = arith.constant 0 : index
    %27 = vector.load %arg2[%c3, %c0_23, %c0_24] : memref<16x128x512xbf16, #tpu.memory_space<vmem>>, vector<1x128x512xbf16>
    %28 = vector.shape_cast %27 : vector<1x128x512xbf16> to vector<128x512xbf16>
    %cst_25 = arith.constant dense<0.000000e+00> : vector<128x3xf32>
    %29 = tpu.matmul %28, %1, %cst_25 {dimension_numbers = #tpu.dot_dimension_numbers<[1], [0], [0], [1], [0, 0, 1, 1], [], []>} : vector<128x512xbf16>, vector<512x3xbf16>, vector<128x3xf32> -> vector<128x3xf32>
    %30 = arith.truncf %29 : vector<128x3xf32> to vector<128x3xbf16>
    %c3_26 = arith.constant 3 : index
    %c0_27 = arith.constant 0 : index
    %c0_28 = arith.constant 0 : index
    %31 = vector.load %arg3[%c3_26, %c0_27, %c0_28] : memref<16x3x32xbf16, #tpu.memory_space<vmem>>, vector<1x3x32xbf16>
    %32 = vector.shape_cast %31 : vector<1x3x32xbf16> to vector<3x32xbf16>
    %cst_29 = arith.constant dense<0.000000e+00> : vector<128x32xf32>
    %33 = tpu.matmul %30, %32, %cst_29 {dimension_numbers = #tpu.dot_dimension_numbers<[1], [0], [0], [1], [0, 0, 1, 1], [], []>} : vector<128x3xbf16>, vector<3x32xbf16>, vector<128x32xf32> -> vector<128x32xf32>
    %34 = arith.addf %26, %33 : vector<128x32xf32>
    %c4 = arith.constant 4 : index
    %c0_30 = arith.constant 0 : index
    %c0_31 = arith.constant 0 : index
    %35 = vector.load %arg2[%c4, %c0_30, %c0_31] : memref<16x128x512xbf16, #tpu.memory_space<vmem>>, vector<1x128x512xbf16>
    %36 = vector.shape_cast %35 : vector<1x128x512xbf16> to vector<128x512xbf16>
    %cst_32 = arith.constant dense<0.000000e+00> : vector<128x3xf32>
    %37 = tpu.matmul %36, %1, %cst_32 {dimension_numbers = #tpu.dot_dimension_numbers<[1], [0], [0], [1], [0, 0, 1, 1], [], []>} : vector<128x512xbf16>, vector<512x3xbf16>, vector<128x3xf32> -> vector<128x3xf32>
    %38 = arith.truncf %37 : vector<128x3xf32> to vector<128x3xbf16>
    %c4_33 = arith.constant 4 : index
    %c0_34 = arith.constant 0 : index
    %c0_35 = arith.constant 0 : index
    %39 = vector.load %arg3[%c4_33, %c0_34, %c0_35] : memref<16x3x32xbf16, #tpu.memory_space<vmem>>, vector<1x3x32xbf16>
    %40 = vector.shape_cast %39 : vector<1x3x32xbf16> to vector<3x32xbf16>
    %cst_36 = arith.constant dense<0.000000e+00> : vector<128x32xf32>
    %41 = tpu.matmul %38, %40, %cst_36 {dimension_numbers = #tpu.dot_dimension_numbers<[1], [0], [0], [1], [0, 0, 1, 1], [], []>} : vector<128x3xbf16>, vector<3x32xbf16>, vector<128x32xf32> -> vector<128x32xf32>
    %42 = arith.addf %34, %41 : vector<128x32xf32>
    %c5 = arith.constant 5 : index
    %c0_37 = arith.constant 0 : index
    %c0_38 = arith.constant 0 : index
    %43 = vector.load %arg2[%c5, %c0_37, %c0_38] : memref<16x128x512xbf16, #tpu.memory_space<vmem>>, vector<1x128x512xbf16>
    %44 = vector.shape_cast %43 : vector<1x128x512xbf16> to vector<128x512xbf16>
    %cst_39 = arith.constant dense<0.000000e+00> : vector<128x3xf32>
    %45 = tpu.matmul %44, %1, %cst_39 {dimension_numbers = #tpu.dot_dimension_numbers<[1], [0], [0], [1], [0, 0, 1, 1], [], []>} : vector<128x512xbf16>, vector<512x3xbf16>, vector<128x3xf32> -> vector<128x3xf32>
    %46 = arith.truncf %45 : vector<128x3xf32> to vector<128x3xbf16>
    %c5_40 = arith.constant 5 : index
    %c0_41 = arith.constant 0 : index
    %c0_42 = arith.constant 0 : index
    %47 = vector.load %arg3[%c5_40, %c0_41, %c0_42] : memref<16x3x32xbf16, #tpu.memory_space<vmem>>, vector<1x3x32xbf16>
    %48 = vector.shape_cast %47 : vector<1x3x32xbf16> to vector<3x32xbf16>
    %cst_43 = arith.constant dense<0.000000e+00> : vector<128x32xf32>
    %49 = tpu.matmul %46, %48, %cst_43 {dimension_numbers = #tpu.dot_dimension_numbers<[1], [0], [0], [1], [0, 0, 1, 1], [], []>} : vector<128x3xbf16>, vector<3x32xbf16>, vector<128x32xf32> -> vector<128x32xf32>
    %50 = arith.addf %42, %49 : vector<128x32xf32>
    %c6 = arith.constant 6 : index
    %c0_44 = arith.constant 0 : index
    %c0_45 = arith.constant 0 : index
    %51 = vector.load %arg2[%c6, %c0_44, %c0_45] : memref<16x128x512xbf16, #tpu.memory_space<vmem>>, vector<1x128x512xbf16>
    %52 = vector.shape_cast %51 : vector<1x128x512xbf16> to vector<128x512xbf16>
    %cst_46 = arith.constant dense<0.000000e+00> : vector<128x3xf32>
    %53 = tpu.matmul %52, %1, %cst_46 {dimension_numbers = #tpu.dot_dimension_numbers<[1], [0], [0], [1], [0, 0, 1, 1], [], []>} : vector<128x512xbf16>, vector<512x3xbf16>, vector<128x3xf32> -> vector<128x3xf32>
    %54 = arith.truncf %53 : vector<128x3xf32> to vector<128x3xbf16>
    %c6_47 = arith.constant 6 : index
    %c0_48 = arith.constant 0 : index
    %c0_49 = arith.constant 0 : index
    %55 = vector.load %arg3[%c6_47, %c0_48, %c0_49] : memref<16x3x32xbf16, #tpu.memory_space<vmem>>, vector<1x3x32xbf16>
    %56 = vector.shape_cast %55 : vector<1x3x32xbf16> to vector<3x32xbf16>
    %cst_50 = arith.constant dense<0.000000e+00> : vector<128x32xf32>
    %57 = tpu.matmul %54, %56, %cst_50 {dimension_numbers = #tpu.dot_dimension_numbers<[1], [0], [0], [1], [0, 0, 1, 1], [], []>} : vector<128x3xbf16>, vector<3x32xbf16>, vector<128x32xf32> -> vector<128x32xf32>
    %58 = arith.addf %50, %57 : vector<128x32xf32>
    %c7 = arith.constant 7 : index
    %c0_51 = arith.constant 0 : index
    %c0_52 = arith.constant 0 : index
    %59 = vector.load %arg2[%c7, %c0_51, %c0_52] : memref<16x128x512xbf16, #tpu.memory_space<vmem>>, vector<1x128x512xbf16>
    %60 = vector.shape_cast %59 : vector<1x128x512xbf16> to vector<128x512xbf16>
    %cst_53 = arith.constant dense<0.000000e+00> : vector<128x3xf32>
    %61 = tpu.matmul %60, %1, %cst_53 {dimension_numbers = #tpu.dot_dimension_numbers<[1], [0], [0], [1], [0, 0, 1, 1], [], []>} : vector<128x512xbf16>, vector<512x3xbf16>, vector<128x3xf32> -> vector<128x3xf32>
    %62 = arith.truncf %61 : vector<128x3xf32> to vector<128x3xbf16>
    %c7_54 = arith.constant 7 : index
    %c0_55 = arith.constant 0 : index
    %c0_56 = arith.constant 0 : index
    %63 = vector.load %arg3[%c7_54, %c0_55, %c0_56] : memref<16x3x32xbf16, #tpu.memory_space<vmem>>, vector<1x3x32xbf16>
    %64 = vector.shape_cast %63 : vector<1x3x32xbf16> to vector<3x32xbf16>
    %cst_57 = arith.constant dense<0.000000e+00> : vector<128x32xf32>
    %65 = tpu.matmul %62, %64, %cst_57 {dimension_numbers = #tpu.dot_dimension_numbers<[1], [0], [0], [1], [0, 0, 1, 1], [], []>} : vector<128x3xbf16>, vector<3x32xbf16>, vector<128x32xf32> -> vector<128x32xf32>
    %66 = arith.addf %58, %65 : vector<128x32xf32>
    %c8 = arith.constant 8 : index
    %c0_58 = arith.constant 0 : index
    %c0_59 = arith.constant 0 : index
    %67 = vector.load %arg2[%c8, %c0_58, %c0_59] : memref<16x128x512xbf16, #tpu.memory_space<vmem>>, vector<1x128x512xbf16>
    %68 = vector.shape_cast %67 : vector<1x128x512xbf16> to vector<128x512xbf16>
    %cst_60 = arith.constant dense<0.000000e+00> : vector<128x3xf32>
    %69 = tpu.matmul %68, %1, %cst_60 {dimension_numbers = #tpu.dot_dimension_numbers<[1], [0], [0], [1], [0, 0, 1, 1], [], []>} : vector<128x512xbf16>, vector<512x3xbf16>, vector<128x3xf32> -> vector<128x3xf32>
    %70 = arith.truncf %69 : vector<128x3xf32> to vector<128x3xbf16>
    %c8_61 = arith.constant 8 : index
    %c0_62 = arith.constant 0 : index
    %c0_63 = arith.constant 0 : index
    %71 = vector.load %arg3[%c8_61, %c0_62, %c0_63] : memref<16x3x32xbf16, #tpu.memory_space<vmem>>, vector<1x3x32xbf16>
    %72 = vector.shape_cast %71 : vector<1x3x32xbf16> to vector<3x32xbf16>
    %cst_64 = arith.constant dense<0.000000e+00> : vector<128x32xf32>
    %73 = tpu.matmul %70, %72, %cst_64 {dimension_numbers = #tpu.dot_dimension_numbers<[1], [0], [0], [1], [0, 0, 1, 1], [], []>} : vector<128x3xbf16>, vector<3x32xbf16>, vector<128x32xf32> -> vector<128x32xf32>
    %74 = arith.addf %66, %73 : vector<128x32xf32>
    %c9 = arith.constant 9 : index
    %c0_65 = arith.constant 0 : index
    %c0_66 = arith.constant 0 : index
    %75 = vector.load %arg2[%c9, %c0_65, %c0_66] : memref<16x128x512xbf16, #tpu.memory_space<vmem>>, vector<1x128x512xbf16>
    %76 = vector.shape_cast %75 : vector<1x128x512xbf16> to vector<128x512xbf16>
    %cst_67 = arith.constant dense<0.000000e+00> : vector<128x3xf32>
    %77 = tpu.matmul %76, %1, %cst_67 {dimension_numbers = #tpu.dot_dimension_numbers<[1], [0], [0], [1], [0, 0, 1, 1], [], []>} : vector<128x512xbf16>, vector<512x3xbf16>, vector<128x3xf32> -> vector<128x3xf32>
    %78 = arith.truncf %77 : vector<128x3xf32> to vector<128x3xbf16>
    %c9_68 = arith.constant 9 : index
    %c0_69 = arith.constant 0 : index
    %c0_70 = arith.constant 0 : index
    %79 = vector.load %arg3[%c9_68, %c0_69, %c0_70] : memref<16x3x32xbf16, #tpu.memory_space<vmem>>, vector<1x3x32xbf16>
    %80 = vector.shape_cast %79 : vector<1x3x32xbf16> to vector<3x32xbf16>
    %cst_71 = arith.constant dense<0.000000e+00> : vector<128x32xf32>
    %81 = tpu.matmul %78, %80, %cst_71 {dimension_numbers = #tpu.dot_dimension_numbers<[1], [0], [0], [1], [0, 0, 1, 1], [], []>} : vector<128x3xbf16>, vector<3x32xbf16>, vector<128x32xf32> -> vector<128x32xf32>
    %82 = arith.addf %74, %81 : vector<128x32xf32>
    %c10 = arith.constant 10 : index
    %c0_72 = arith.constant 0 : index
    %c0_73 = arith.constant 0 : index
    %83 = vector.load %arg2[%c10, %c0_72, %c0_73] : memref<16x128x512xbf16, #tpu.memory_space<vmem>>, vector<1x128x512xbf16>
    %84 = vector.shape_cast %83 : vector<1x128x512xbf16> to vector<128x512xbf16>
    %cst_74 = arith.constant dense<0.000000e+00> : vector<128x3xf32>
    %85 = tpu.matmul %84, %1, %cst_74 {dimension_numbers = #tpu.dot_dimension_numbers<[1], [0], [0], [1], [0, 0, 1, 1], [], []>} : vector<128x512xbf16>, vector<512x3xbf16>, vector<128x3xf32> -> vector<128x3xf32>
    %86 = arith.truncf %85 : vector<128x3xf32> to vector<128x3xbf16>
    %c10_75 = arith.constant 10 : index
    %c0_76 = arith.constant 0 : index
    %c0_77 = arith.constant 0 : index
    %87 = vector.load %arg3[%c10_75, %c0_76, %c0_77] : memref<16x3x32xbf16, #tpu.memory_space<vmem>>, vector<1x3x32xbf16>
    %88 = vector.shape_cast %87 : vector<1x3x32xbf16> to vector<3x32xbf16>
    %cst_78 = arith.constant dense<0.000000e+00> : vector<128x32xf32>
    %89 = tpu.matmul %86, %88, %cst_78 {dimension_numbers = #tpu.dot_dimension_numbers<[1], [0], [0], [1], [0, 0, 1, 1], [], []>} : vector<128x3xbf16>, vector<3x32xbf16>, vector<128x32xf32> -> vector<128x32xf32>
    %90 = arith.addf %82, %89 : vector<128x32xf32>
    %c11 = arith.constant 11 : index
    %c0_79 = arith.constant 0 : index
    %c0_80 = arith.constant 0 : index
    %91 = vector.load %arg2[%c11, %c0_79, %c0_80] : memref<16x128x512xbf16, #tpu.memory_space<vmem>>, vector<1x128x512xbf16>
    %92 = vector.shape_cast %91 : vector<1x128x512xbf16> to vector<128x512xbf16>
    %cst_81 = arith.constant dense<0.000000e+00> : vector<128x3xf32>
    %93 = tpu.matmul %92, %1, %cst_81 {dimension_numbers = #tpu.dot_dimension_numbers<[1], [0], [0], [1], [0, 0, 1, 1], [], []>} : vector<128x512xbf16>, vector<512x3xbf16>, vector<128x3xf32> -> vector<128x3xf32>
    %94 = arith.truncf %93 : vector<128x3xf32> to vector<128x3xbf16>
    %c11_82 = arith.constant 11 : index
    %c0_83 = arith.constant 0 : index
    %c0_84 = arith.constant 0 : index
    %95 = vector.load %arg3[%c11_82, %c0_83, %c0_84] : memref<16x3x32xbf16, #tpu.memory_space<vmem>>, vector<1x3x32xbf16>
    %96 = vector.shape_cast %95 : vector<1x3x32xbf16> to vector<3x32xbf16>
    %cst_85 = arith.constant dense<0.000000e+00> : vector<128x32xf32>
    %97 = tpu.matmul %94, %96, %cst_85 {dimension_numbers = #tpu.dot_dimension_numbers<[1], [0], [0], [1], [0, 0, 1, 1], [], []>} : vector<128x3xbf16>, vector<3x32xbf16>, vector<128x32xf32> -> vector<128x32xf32>
    %98 = arith.addf %90, %97 : vector<128x32xf32>
    %c12 = arith.constant 12 : index
    %c0_86 = arith.constant 0 : index
    %c0_87 = arith.constant 0 : index
    %99 = vector.load %arg2[%c12, %c0_86, %c0_87] : memref<16x128x512xbf16, #tpu.memory_space<vmem>>, vector<1x128x512xbf16>
    %100 = vector.shape_cast %99 : vector<1x128x512xbf16> to vector<128x512xbf16>
    %cst_88 = arith.constant dense<0.000000e+00> : vector<128x3xf32>
    %101 = tpu.matmul %100, %1, %cst_88 {dimension_numbers = #tpu.dot_dimension_numbers<[1], [0], [0], [1], [0, 0, 1, 1], [], []>} : vector<128x512xbf16>, vector<512x3xbf16>, vector<128x3xf32> -> vector<128x3xf32>
    %102 = arith.truncf %101 : vector<128x3xf32> to vector<128x3xbf16>
    %c12_89 = arith.constant 12 : index
    %c0_90 = arith.constant 0 : index
    %c0_91 = arith.constant 0 : index
    %103 = vector.load %arg3[%c12_89, %c0_90, %c0_91] : memref<16x3x32xbf16, #tpu.memory_space<vmem>>, vector<1x3x32xbf16>
    %104 = vector.shape_cast %103 : vector<1x3x32xbf16> to vector<3x32xbf16>
    %cst_92 = arith.constant dense<0.000000e+00> : vector<128x32xf32>
    %105 = tpu.matmul %102, %104, %cst_92 {dimension_numbers = #tpu.dot_dimension_numbers<[1], [0], [0], [1], [0, 0, 1, 1], [], []>} : vector<128x3xbf16>, vector<3x32xbf16>, vector<128x32xf32> -> vector<128x32xf32>
    %106 = arith.addf %98, %105 : vector<128x32xf32>
    %c13 = arith.constant 13 : index
    %c0_93 = arith.constant 0 : index
    %c0_94 = arith.constant 0 : index
    %107 = vector.load %arg2[%c13, %c0_93, %c0_94] : memref<16x128x512xbf16, #tpu.memory_space<vmem>>, vector<1x128x512xbf16>
    %108 = vector.shape_cast %107 : vector<1x128x512xbf16> to vector<128x512xbf16>
    %cst_95 = arith.constant dense<0.000000e+00> : vector<128x3xf32>
    %109 = tpu.matmul %108, %1, %cst_95 {dimension_numbers = #tpu.dot_dimension_numbers<[1], [0], [0], [1], [0, 0, 1, 1], [], []>} : vector<128x512xbf16>, vector<512x3xbf16>, vector<128x3xf32> -> vector<128x3xf32>
    %110 = arith.truncf %109 : vector<128x3xf32> to vector<128x3xbf16>
    %c13_96 = arith.constant 13 : index
    %c0_97 = arith.constant 0 : index
    %c0_98 = arith.constant 0 : index
    %111 = vector.load %arg3[%c13_96, %c0_97, %c0_98] : memref<16x3x32xbf16, #tpu.memory_space<vmem>>, vector<1x3x32xbf16>
    %112 = vector.shape_cast %111 : vector<1x3x32xbf16> to vector<3x32xbf16>
    %cst_99 = arith.constant dense<0.000000e+00> : vector<128x32xf32>
    %113 = tpu.matmul %110, %112, %cst_99 {dimension_numbers = #tpu.dot_dimension_numbers<[1], [0], [0], [1], [0, 0, 1, 1], [], []>} : vector<128x3xbf16>, vector<3x32xbf16>, vector<128x32xf32> -> vector<128x32xf32>
    %114 = arith.addf %106, %113 : vector<128x32xf32>
    %c14 = arith.constant 14 : index
    %c0_100 = arith.constant 0 : index
    %c0_101 = arith.constant 0 : index
    %115 = vector.load %arg2[%c14, %c0_100, %c0_101] : memref<16x128x512xbf16, #tpu.memory_space<vmem>>, vector<1x128x512xbf16>
    %116 = vector.shape_cast %115 : vector<1x128x512xbf16> to vector<128x512xbf16>
    %cst_102 = arith.constant dense<0.000000e+00> : vector<128x3xf32>
    %117 = tpu.matmul %116, %1, %cst_102 {dimension_numbers = #tpu.dot_dimension_numbers<[1], [0], [0], [1], [0, 0, 1, 1], [], []>} : vector<128x512xbf16>, vector<512x3xbf16>, vector<128x3xf32> -> vector<128x3xf32>
    %118 = arith.truncf %117 : vector<128x3xf32> to vector<128x3xbf16>
    %c14_103 = arith.constant 14 : index
    %c0_104 = arith.constant 0 : index
    %c0_105 = arith.constant 0 : index
    %119 = vector.load %arg3[%c14_103, %c0_104, %c0_105] : memref<16x3x32xbf16, #tpu.memory_space<vmem>>, vector<1x3x32xbf16>
    %120 = vector.shape_cast %119 : vector<1x3x32xbf16> to vector<3x32xbf16>
    %cst_106 = arith.constant dense<0.000000e+00> : vector<128x32xf32>
    %121 = tpu.matmul %118, %120, %cst_106 {dimension_numbers = #tpu.dot_dimension_numbers<[1], [0], [0], [1], [0, 0, 1, 1], [], []>} : vector<128x3xbf16>, vector<3x32xbf16>, vector<128x32xf32> -> vector<128x32xf32>
    %122 = arith.addf %114, %121 : vector<128x32xf32>
    %c15 = arith.constant 15 : index
    %c0_107 = arith.constant 0 : index
    %c0_108 = arith.constant 0 : index
    %123 = vector.load %arg2[%c15, %c0_107, %c0_108] : memref<16x128x512xbf16, #tpu.memory_space<vmem>>, vector<1x128x512xbf16>
    %124 = vector.shape_cast %123 : vector<1x128x512xbf16> to vector<128x512xbf16>
    %cst_109 = arith.constant dense<0.000000e+00> : vector<128x3xf32>
    %125 = tpu.matmul %124, %1, %cst_109 {dimension_numbers = #tpu.dot_dimension_numbers<[1], [0], [0], [1], [0, 0, 1, 1], [], []>} : vector<128x512xbf16>, vector<512x3xbf16>, vector<128x3xf32> -> vector<128x3xf32>
    %126 = arith.truncf %125 : vector<128x3xf32> to vector<128x3xbf16>
    %c15_110 = arith.constant 15 : index
    %c0_111 = arith.constant 0 : index
    %c0_112 = arith.constant 0 : index
    %127 = vector.load %arg3[%c15_110, %c0_111, %c0_112] : memref<16x3x32xbf16, #tpu.memory_space<vmem>>, vector<1x3x32xbf16>
    %128 = vector.shape_cast %127 : vector<1x3x32xbf16> to vector<3x32xbf16>
    %cst_113 = arith.constant dense<0.000000e+00> : vector<128x32xf32>
    %129 = tpu.matmul %126, %128, %cst_113 {dimension_numbers = #tpu.dot_dimension_numbers<[1], [0], [0], [1], [0, 0, 1, 1], [], []>} : vector<128x3xbf16>, vector<3x32xbf16>, vector<128x32xf32> -> vector<128x32xf32>
    %130 = arith.addf %122, %129 : vector<128x32xf32>
    %c0_114 = arith.constant 0 : index
    %c0_115 = arith.constant 0 : index
    %131 = vector.load %arg4[%c0_114, %c0_115] : memref<1x32xf32, #tpu.memory_space<vmem>>, vector<1x32xf32>
    %132 = vector.broadcast %131 : vector<1x32xf32> to vector<128x32xf32>
    %133 = arith.addf %130, %132 : vector<128x32xf32>
    %cst_116 = arith.constant 0.000000e+00 : f32
    %134 = vector.broadcast %cst_116 : f32 to vector<128x32xf32>
    %135 = arith.maximumf %133, %134 : vector<128x32xf32>
    %136 = arith.truncf %135 : vector<128x32xf32> to vector<128x32xbf16>
    %cst_117 = arith.constant 0.000000e+00 : f32
    %137 = vector.broadcast %cst_117 : f32 to vector<32x64xf32>
    %c0_118 = arith.constant 0 : index
    %c0_119 = arith.constant 0 : index
    %c0_120 = arith.constant 0 : index
    %138 = vector.load %arg5[%c0_118, %c0_119, %c0_120] : memref<16x32x128xbf16, #tpu.memory_space<vmem>>, vector<1x32x128xbf16>
    %139 = vector.shape_cast %138 : vector<1x32x128xbf16> to vector<32x128xbf16>
    %cst_121 = arith.constant dense<0.000000e+00> : vector<32x32xf32>
    %140 = tpu.matmul %139, %136, %cst_121 {dimension_numbers = #tpu.dot_dimension_numbers<[1], [0], [0], [1], [0, 0, 1, 1], [], []>} : vector<32x128xbf16>, vector<128x32xbf16>, vector<32x32xf32> -> vector<32x32xf32>
    %141 = arith.truncf %140 : vector<32x32xf32> to vector<32x32xbf16>
    %c0_122 = arith.constant 0 : index
    %c0_123 = arith.constant 0 : index
    %c0_124 = arith.constant 0 : index
    %142 = vector.load %arg6[%c0_122, %c0_123, %c0_124] : memref<16x32x64xbf16, #tpu.memory_space<vmem>>, vector<1x32x64xbf16>
    %143 = vector.shape_cast %142 : vector<1x32x64xbf16> to vector<32x64xbf16>
    %cst_125 = arith.constant dense<0.000000e+00> : vector<32x64xf32>
    %144 = tpu.matmul %141, %143, %cst_125 {dimension_numbers = #tpu.dot_dimension_numbers<[1], [0], [0], [1], [0, 0, 1, 1], [], []>} : vector<32x32xbf16>, vector<32x64xbf16>, vector<32x64xf32> -> vector<32x64xf32>
    %145 = arith.addf %137, %144 : vector<32x64xf32>
    %c1_126 = arith.constant 1 : index
    %c0_127 = arith.constant 0 : index
    %c0_128 = arith.constant 0 : index
    %146 = vector.load %arg5[%c1_126, %c0_127, %c0_128] : memref<16x32x128xbf16, #tpu.memory_space<vmem>>, vector<1x32x128xbf16>
    %147 = vector.shape_cast %146 : vector<1x32x128xbf16> to vector<32x128xbf16>
    %cst_129 = arith.constant dense<0.000000e+00> : vector<32x32xf32>
    %148 = tpu.matmul %147, %136, %cst_129 {dimension_numbers = #tpu.dot_dimension_numbers<[1], [0], [0], [1], [0, 0, 1, 1], [], []>} : vector<32x128xbf16>, vector<128x32xbf16>, vector<32x32xf32> -> vector<32x32xf32>
    %149 = arith.truncf %148 : vector<32x32xf32> to vector<32x32xbf16>
    %c1_130 = arith.constant 1 : index
    %c0_131 = arith.constant 0 : index
    %c0_132 = arith.constant 0 : index
    %150 = vector.load %arg6[%c1_130, %c0_131, %c0_132] : memref<16x32x64xbf16, #tpu.memory_space<vmem>>, vector<1x32x64xbf16>
    %151 = vector.shape_cast %150 : vector<1x32x64xbf16> to vector<32x64xbf16>
    %cst_133 = arith.constant dense<0.000000e+00> : vector<32x64xf32>
    %152 = tpu.matmul %149, %151, %cst_133 {dimension_numbers = #tpu.dot_dimension_numbers<[1], [0], [0], [1], [0, 0, 1, 1], [], []>} : vector<32x32xbf16>, vector<32x64xbf16>, vector<32x64xf32> -> vector<32x64xf32>
    %153 = arith.addf %145, %152 : vector<32x64xf32>
    %c2_134 = arith.constant 2 : index
    %c0_135 = arith.constant 0 : index
    %c0_136 = arith.constant 0 : index
    %154 = vector.load %arg5[%c2_134, %c0_135, %c0_136] : memref<16x32x128xbf16, #tpu.memory_space<vmem>>, vector<1x32x128xbf16>
    %155 = vector.shape_cast %154 : vector<1x32x128xbf16> to vector<32x128xbf16>
    %cst_137 = arith.constant dense<0.000000e+00> : vector<32x32xf32>
    %156 = tpu.matmul %155, %136, %cst_137 {dimension_numbers = #tpu.dot_dimension_numbers<[1], [0], [0], [1], [0, 0, 1, 1], [], []>} : vector<32x128xbf16>, vector<128x32xbf16>, vector<32x32xf32> -> vector<32x32xf32>
    %157 = arith.truncf %156 : vector<32x32xf32> to vector<32x32xbf16>
    %c2_138 = arith.constant 2 : index
    %c0_139 = arith.constant 0 : index
    %c0_140 = arith.constant 0 : index
    %158 = vector.load %arg6[%c2_138, %c0_139, %c0_140] : memref<16x32x64xbf16, #tpu.memory_space<vmem>>, vector<1x32x64xbf16>
    %159 = vector.shape_cast %158 : vector<1x32x64xbf16> to vector<32x64xbf16>
    %cst_141 = arith.constant dense<0.000000e+00> : vector<32x64xf32>
    %160 = tpu.matmul %157, %159, %cst_141 {dimension_numbers = #tpu.dot_dimension_numbers<[1], [0], [0], [1], [0, 0, 1, 1], [], []>} : vector<32x32xbf16>, vector<32x64xbf16>, vector<32x64xf32> -> vector<32x64xf32>
    %161 = arith.addf %153, %160 : vector<32x64xf32>
    %c3_142 = arith.constant 3 : index
    %c0_143 = arith.constant 0 : index
    %c0_144 = arith.constant 0 : index
    %162 = vector.load %arg5[%c3_142, %c0_143, %c0_144] : memref<16x32x128xbf16, #tpu.memory_space<vmem>>, vector<1x32x128xbf16>
    %163 = vector.shape_cast %162 : vector<1x32x128xbf16> to vector<32x128xbf16>
    %cst_145 = arith.constant dense<0.000000e+00> : vector<32x32xf32>
    %164 = tpu.matmul %163, %136, %cst_145 {dimension_numbers = #tpu.dot_dimension_numbers<[1], [0], [0], [1], [0, 0, 1, 1], [], []>} : vector<32x128xbf16>, vector<128x32xbf16>, vector<32x32xf32> -> vector<32x32xf32>
    %165 = arith.truncf %164 : vector<32x32xf32> to vector<32x32xbf16>
    %c3_146 = arith.constant 3 : index
    %c0_147 = arith.constant 0 : index
    %c0_148 = arith.constant 0 : index
    %166 = vector.load %arg6[%c3_146, %c0_147, %c0_148] : memref<16x32x64xbf16, #tpu.memory_space<vmem>>, vector<1x32x64xbf16>
    %167 = vector.shape_cast %166 : vector<1x32x64xbf16> to vector<32x64xbf16>
    %cst_149 = arith.constant dense<0.000000e+00> : vector<32x64xf32>
    %168 = tpu.matmul %165, %167, %cst_149 {dimension_numbers = #tpu.dot_dimension_numbers<[1], [0], [0], [1], [0, 0, 1, 1], [], []>} : vector<32x32xbf16>, vector<32x64xbf16>, vector<32x64xf32> -> vector<32x64xf32>
    %169 = arith.addf %161, %168 : vector<32x64xf32>
    %c4_150 = arith.constant 4 : index
    %c0_151 = arith.constant 0 : index
    %c0_152 = arith.constant 0 : index
    %170 = vector.load %arg5[%c4_150, %c0_151, %c0_152] : memref<16x32x128xbf16, #tpu.memory_space<vmem>>, vector<1x32x128xbf16>
    %171 = vector.shape_cast %170 : vector<1x32x128xbf16> to vector<32x128xbf16>
    %cst_153 = arith.constant dense<0.000000e+00> : vector<32x32xf32>
    %172 = tpu.matmul %171, %136, %cst_153 {dimension_numbers = #tpu.dot_dimension_numbers<[1], [0], [0], [1], [0, 0, 1, 1], [], []>} : vector<32x128xbf16>, vector<128x32xbf16>, vector<32x32xf32> -> vector<32x32xf32>
    %173 = arith.truncf %172 : vector<32x32xf32> to vector<32x32xbf16>
    %c4_154 = arith.constant 4 : index
    %c0_155 = arith.constant 0 : index
    %c0_156 = arith.constant 0 : index
    %174 = vector.load %arg6[%c4_154, %c0_155, %c0_156] : memref<16x32x64xbf16, #tpu.memory_space<vmem>>, vector<1x32x64xbf16>
    %175 = vector.shape_cast %174 : vector<1x32x64xbf16> to vector<32x64xbf16>
    %cst_157 = arith.constant dense<0.000000e+00> : vector<32x64xf32>
    %176 = tpu.matmul %173, %175, %cst_157 {dimension_numbers = #tpu.dot_dimension_numbers<[1], [0], [0], [1], [0, 0, 1, 1], [], []>} : vector<32x32xbf16>, vector<32x64xbf16>, vector<32x64xf32> -> vector<32x64xf32>
    %177 = arith.addf %169, %176 : vector<32x64xf32>
    %c5_158 = arith.constant 5 : index
    %c0_159 = arith.constant 0 : index
    %c0_160 = arith.constant 0 : index
    %178 = vector.load %arg5[%c5_158, %c0_159, %c0_160] : memref<16x32x128xbf16, #tpu.memory_space<vmem>>, vector<1x32x128xbf16>
    %179 = vector.shape_cast %178 : vector<1x32x128xbf16> to vector<32x128xbf16>
    %cst_161 = arith.constant dense<0.000000e+00> : vector<32x32xf32>
    %180 = tpu.matmul %179, %136, %cst_161 {dimension_numbers = #tpu.dot_dimension_numbers<[1], [0], [0], [1], [0, 0, 1, 1], [], []>} : vector<32x128xbf16>, vector<128x32xbf16>, vector<32x32xf32> -> vector<32x32xf32>
    %181 = arith.truncf %180 : vector<32x32xf32> to vector<32x32xbf16>
    %c5_162 = arith.constant 5 : index
    %c0_163 = arith.constant 0 : index
    %c0_164 = arith.constant 0 : index
    %182 = vector.load %arg6[%c5_162, %c0_163, %c0_164] : memref<16x32x64xbf16, #tpu.memory_space<vmem>>, vector<1x32x64xbf16>
    %183 = vector.shape_cast %182 : vector<1x32x64xbf16> to vector<32x64xbf16>
    %cst_165 = arith.constant dense<0.000000e+00> : vector<32x64xf32>
    %184 = tpu.matmul %181, %183, %cst_165 {dimension_numbers = #tpu.dot_dimension_numbers<[1], [0], [0], [1], [0, 0, 1, 1], [], []>} : vector<32x32xbf16>, vector<32x64xbf16>, vector<32x64xf32> -> vector<32x64xf32>
    %185 = arith.addf %177, %184 : vector<32x64xf32>
    %c6_166 = arith.constant 6 : index
    %c0_167 = arith.constant 0 : index
    %c0_168 = arith.constant 0 : index
    %186 = vector.load %arg5[%c6_166, %c0_167, %c0_168] : memref<16x32x128xbf16, #tpu.memory_space<vmem>>, vector<1x32x128xbf16>
    %187 = vector.shape_cast %186 : vector<1x32x128xbf16> to vector<32x128xbf16>
    %cst_169 = arith.constant dense<0.000000e+00> : vector<32x32xf32>
    %188 = tpu.matmul %187, %136, %cst_169 {dimension_numbers = #tpu.dot_dimension_numbers<[1], [0], [0], [1], [0, 0, 1, 1], [], []>} : vector<32x128xbf16>, vector<128x32xbf16>, vector<32x32xf32> -> vector<32x32xf32>
    %189 = arith.truncf %188 : vector<32x32xf32> to vector<32x32xbf16>
    %c6_170 = arith.constant 6 : index
    %c0_171 = arith.constant 0 : index
    %c0_172 = arith.constant 0 : index
    %190 = vector.load %arg6[%c6_170, %c0_171, %c0_172] : memref<16x32x64xbf16, #tpu.memory_space<vmem>>, vector<1x32x64xbf16>
    %191 = vector.shape_cast %190 : vector<1x32x64xbf16> to vector<32x64xbf16>
    %cst_173 = arith.constant dense<0.000000e+00> : vector<32x64xf32>
    %192 = tpu.matmul %189, %191, %cst_173 {dimension_numbers = #tpu.dot_dimension_numbers<[1], [0], [0], [1], [0, 0, 1, 1], [], []>} : vector<32x32xbf16>, vector<32x64xbf16>, vector<32x64xf32> -> vector<32x64xf32>
    %193 = arith.addf %185, %192 : vector<32x64xf32>
    %c7_174 = arith.constant 7 : index
    %c0_175 = arith.constant 0 : index
    %c0_176 = arith.constant 0 : index
    %194 = vector.load %arg5[%c7_174, %c0_175, %c0_176] : memref<16x32x128xbf16, #tpu.memory_space<vmem>>, vector<1x32x128xbf16>
    %195 = vector.shape_cast %194 : vector<1x32x128xbf16> to vector<32x128xbf16>
    %cst_177 = arith.constant dense<0.000000e+00> : vector<32x32xf32>
    %196 = tpu.matmul %195, %136, %cst_177 {dimension_numbers = #tpu.dot_dimension_numbers<[1], [0], [0], [1], [0, 0, 1, 1], [], []>} : vector<32x128xbf16>, vector<128x32xbf16>, vector<32x32xf32> -> vector<32x32xf32>
    %197 = arith.truncf %196 : vector<32x32xf32> to vector<32x32xbf16>
    %c7_178 = arith.constant 7 : index
    %c0_179 = arith.constant 0 : index
    %c0_180 = arith.constant 0 : index
    %198 = vector.load %arg6[%c7_178, %c0_179, %c0_180] : memref<16x32x64xbf16, #tpu.memory_space<vmem>>, vector<1x32x64xbf16>
    %199 = vector.shape_cast %198 : vector<1x32x64xbf16> to vector<32x64xbf16>
    %cst_181 = arith.constant dense<0.000000e+00> : vector<32x64xf32>
    %200 = tpu.matmul %197, %199, %cst_181 {dimension_numbers = #tpu.dot_dimension_numbers<[1], [0], [0], [1], [0, 0, 1, 1], [], []>} : vector<32x32xbf16>, vector<32x64xbf16>, vector<32x64xf32> -> vector<32x64xf32>
    %201 = arith.addf %193, %200 : vector<32x64xf32>
    %c8_182 = arith.constant 8 : index
    %c0_183 = arith.constant 0 : index
    %c0_184 = arith.constant 0 : index
    %202 = vector.load %arg5[%c8_182, %c0_183, %c0_184] : memref<16x32x128xbf16, #tpu.memory_space<vmem>>, vector<1x32x128xbf16>
    %203 = vector.shape_cast %202 : vector<1x32x128xbf16> to vector<32x128xbf16>
    %cst_185 = arith.constant dense<0.000000e+00> : vector<32x32xf32>
    %204 = tpu.matmul %203, %136, %cst_185 {dimension_numbers = #tpu.dot_dimension_numbers<[1], [0], [0], [1], [0, 0, 1, 1], [], []>} : vector<32x128xbf16>, vector<128x32xbf16>, vector<32x32xf32> -> vector<32x32xf32>
    %205 = arith.truncf %204 : vector<32x32xf32> to vector<32x32xbf16>
    %c8_186 = arith.constant 8 : index
    %c0_187 = arith.constant 0 : index
    %c0_188 = arith.constant 0 : index
    %206 = vector.load %arg6[%c8_186, %c0_187, %c0_188] : memref<16x32x64xbf16, #tpu.memory_space<vmem>>, vector<1x32x64xbf16>
    %207 = vector.shape_cast %206 : vector<1x32x64xbf16> to vector<32x64xbf16>
    %cst_189 = arith.constant dense<0.000000e+00> : vector<32x64xf32>
    %208 = tpu.matmul %205, %207, %cst_189 {dimension_numbers = #tpu.dot_dimension_numbers<[1], [0], [0], [1], [0, 0, 1, 1], [], []>} : vector<32x32xbf16>, vector<32x64xbf16>, vector<32x64xf32> -> vector<32x64xf32>
    %209 = arith.addf %201, %208 : vector<32x64xf32>
    %c9_190 = arith.constant 9 : index
    %c0_191 = arith.constant 0 : index
    %c0_192 = arith.constant 0 : index
    %210 = vector.load %arg5[%c9_190, %c0_191, %c0_192] : memref<16x32x128xbf16, #tpu.memory_space<vmem>>, vector<1x32x128xbf16>
    %211 = vector.shape_cast %210 : vector<1x32x128xbf16> to vector<32x128xbf16>
    %cst_193 = arith.constant dense<0.000000e+00> : vector<32x32xf32>
    %212 = tpu.matmul %211, %136, %cst_193 {dimension_numbers = #tpu.dot_dimension_numbers<[1], [0], [0], [1], [0, 0, 1, 1], [], []>} : vector<32x128xbf16>, vector<128x32xbf16>, vector<32x32xf32> -> vector<32x32xf32>
    %213 = arith.truncf %212 : vector<32x32xf32> to vector<32x32xbf16>
    %c9_194 = arith.constant 9 : index
    %c0_195 = arith.constant 0 : index
    %c0_196 = arith.constant 0 : index
    %214 = vector.load %arg6[%c9_194, %c0_195, %c0_196] : memref<16x32x64xbf16, #tpu.memory_space<vmem>>, vector<1x32x64xbf16>
    %215 = vector.shape_cast %214 : vector<1x32x64xbf16> to vector<32x64xbf16>
    %cst_197 = arith.constant dense<0.000000e+00> : vector<32x64xf32>
    %216 = tpu.matmul %213, %215, %cst_197 {dimension_numbers = #tpu.dot_dimension_numbers<[1], [0], [0], [1], [0, 0, 1, 1], [], []>} : vector<32x32xbf16>, vector<32x64xbf16>, vector<32x64xf32> -> vector<32x64xf32>
    %217 = arith.addf %209, %216 : vector<32x64xf32>
    %c10_198 = arith.constant 10 : index
    %c0_199 = arith.constant 0 : index
    %c0_200 = arith.constant 0 : index
    %218 = vector.load %arg5[%c10_198, %c0_199, %c0_200] : memref<16x32x128xbf16, #tpu.memory_space<vmem>>, vector<1x32x128xbf16>
    %219 = vector.shape_cast %218 : vector<1x32x128xbf16> to vector<32x128xbf16>
    %cst_201 = arith.constant dense<0.000000e+00> : vector<32x32xf32>
    %220 = tpu.matmul %219, %136, %cst_201 {dimension_numbers = #tpu.dot_dimension_numbers<[1], [0], [0], [1], [0, 0, 1, 1], [], []>} : vector<32x128xbf16>, vector<128x32xbf16>, vector<32x32xf32> -> vector<32x32xf32>
    %221 = arith.truncf %220 : vector<32x32xf32> to vector<32x32xbf16>
    %c10_202 = arith.constant 10 : index
    %c0_203 = arith.constant 0 : index
    %c0_204 = arith.constant 0 : index
    %222 = vector.load %arg6[%c10_202, %c0_203, %c0_204] : memref<16x32x64xbf16, #tpu.memory_space<vmem>>, vector<1x32x64xbf16>
    %223 = vector.shape_cast %222 : vector<1x32x64xbf16> to vector<32x64xbf16>
    %cst_205 = arith.constant dense<0.000000e+00> : vector<32x64xf32>
    %224 = tpu.matmul %221, %223, %cst_205 {dimension_numbers = #tpu.dot_dimension_numbers<[1], [0], [0], [1], [0, 0, 1, 1], [], []>} : vector<32x32xbf16>, vector<32x64xbf16>, vector<32x64xf32> -> vector<32x64xf32>
    %225 = arith.addf %217, %224 : vector<32x64xf32>
    %c11_206 = arith.constant 11 : index
    %c0_207 = arith.constant 0 : index
    %c0_208 = arith.constant 0 : index
    %226 = vector.load %arg5[%c11_206, %c0_207, %c0_208] : memref<16x32x128xbf16, #tpu.memory_space<vmem>>, vector<1x32x128xbf16>
    %227 = vector.shape_cast %226 : vector<1x32x128xbf16> to vector<32x128xbf16>
    %cst_209 = arith.constant dense<0.000000e+00> : vector<32x32xf32>
    %228 = tpu.matmul %227, %136, %cst_209 {dimension_numbers = #tpu.dot_dimension_numbers<[1], [0], [0], [1], [0, 0, 1, 1], [], []>} : vector<32x128xbf16>, vector<128x32xbf16>, vector<32x32xf32> -> vector<32x32xf32>
    %229 = arith.truncf %228 : vector<32x32xf32> to vector<32x32xbf16>
    %c11_210 = arith.constant 11 : index
    %c0_211 = arith.constant 0 : index
    %c0_212 = arith.constant 0 : index
    %230 = vector.load %arg6[%c11_210, %c0_211, %c0_212] : memref<16x32x64xbf16, #tpu.memory_space<vmem>>, vector<1x32x64xbf16>
    %231 = vector.shape_cast %230 : vector<1x32x64xbf16> to vector<32x64xbf16>
    %cst_213 = arith.constant dense<0.000000e+00> : vector<32x64xf32>
    %232 = tpu.matmul %229, %231, %cst_213 {dimension_numbers = #tpu.dot_dimension_numbers<[1], [0], [0], [1], [0, 0, 1, 1], [], []>} : vector<32x32xbf16>, vector<32x64xbf16>, vector<32x64xf32> -> vector<32x64xf32>
    %233 = arith.addf %225, %232 : vector<32x64xf32>
    %c12_214 = arith.constant 12 : index
    %c0_215 = arith.constant 0 : index
    %c0_216 = arith.constant 0 : index
    %234 = vector.load %arg5[%c12_214, %c0_215, %c0_216] : memref<16x32x128xbf16, #tpu.memory_space<vmem>>, vector<1x32x128xbf16>
    %235 = vector.shape_cast %234 : vector<1x32x128xbf16> to vector<32x128xbf16>
    %cst_217 = arith.constant dense<0.000000e+00> : vector<32x32xf32>
    %236 = tpu.matmul %235, %136, %cst_217 {dimension_numbers = #tpu.dot_dimension_numbers<[1], [0], [0], [1], [0, 0, 1, 1], [], []>} : vector<32x128xbf16>, vector<128x32xbf16>, vector<32x32xf32> -> vector<32x32xf32>
    %237 = arith.truncf %236 : vector<32x32xf32> to vector<32x32xbf16>
    %c12_218 = arith.constant 12 : index
    %c0_219 = arith.constant 0 : index
    %c0_220 = arith.constant 0 : index
    %238 = vector.load %arg6[%c12_218, %c0_219, %c0_220] : memref<16x32x64xbf16, #tpu.memory_space<vmem>>, vector<1x32x64xbf16>
    %239 = vector.shape_cast %238 : vector<1x32x64xbf16> to vector<32x64xbf16>
    %cst_221 = arith.constant dense<0.000000e+00> : vector<32x64xf32>
    %240 = tpu.matmul %237, %239, %cst_221 {dimension_numbers = #tpu.dot_dimension_numbers<[1], [0], [0], [1], [0, 0, 1, 1], [], []>} : vector<32x32xbf16>, vector<32x64xbf16>, vector<32x64xf32> -> vector<32x64xf32>
    %241 = arith.addf %233, %240 : vector<32x64xf32>
    %c13_222 = arith.constant 13 : index
    %c0_223 = arith.constant 0 : index
    %c0_224 = arith.constant 0 : index
    %242 = vector.load %arg5[%c13_222, %c0_223, %c0_224] : memref<16x32x128xbf16, #tpu.memory_space<vmem>>, vector<1x32x128xbf16>
    %243 = vector.shape_cast %242 : vector<1x32x128xbf16> to vector<32x128xbf16>
    %cst_225 = arith.constant dense<0.000000e+00> : vector<32x32xf32>
    %244 = tpu.matmul %243, %136, %cst_225 {dimension_numbers = #tpu.dot_dimension_numbers<[1], [0], [0], [1], [0, 0, 1, 1], [], []>} : vector<32x128xbf16>, vector<128x32xbf16>, vector<32x32xf32> -> vector<32x32xf32>
    %245 = arith.truncf %244 : vector<32x32xf32> to vector<32x32xbf16>
    %c13_226 = arith.constant 13 : index
    %c0_227 = arith.constant 0 : index
    %c0_228 = arith.constant 0 : index
    %246 = vector.load %arg6[%c13_226, %c0_227, %c0_228] : memref<16x32x64xbf16, #tpu.memory_space<vmem>>, vector<1x32x64xbf16>
    %247 = vector.shape_cast %246 : vector<1x32x64xbf16> to vector<32x64xbf16>
    %cst_229 = arith.constant dense<0.000000e+00> : vector<32x64xf32>
    %248 = tpu.matmul %245, %247, %cst_229 {dimension_numbers = #tpu.dot_dimension_numbers<[1], [0], [0], [1], [0, 0, 1, 1], [], []>} : vector<32x32xbf16>, vector<32x64xbf16>, vector<32x64xf32> -> vector<32x64xf32>
    %249 = arith.addf %241, %248 : vector<32x64xf32>
    %c14_230 = arith.constant 14 : index
    %c0_231 = arith.constant 0 : index
    %c0_232 = arith.constant 0 : index
    %250 = vector.load %arg5[%c14_230, %c0_231, %c0_232] : memref<16x32x128xbf16, #tpu.memory_space<vmem>>, vector<1x32x128xbf16>
    %251 = vector.shape_cast %250 : vector<1x32x128xbf16> to vector<32x128xbf16>
    %cst_233 = arith.constant dense<0.000000e+00> : vector<32x32xf32>
    %252 = tpu.matmul %251, %136, %cst_233 {dimension_numbers = #tpu.dot_dimension_numbers<[1], [0], [0], [1], [0, 0, 1, 1], [], []>} : vector<32x128xbf16>, vector<128x32xbf16>, vector<32x32xf32> -> vector<32x32xf32>
    %253 = arith.truncf %252 : vector<32x32xf32> to vector<32x32xbf16>
    %c14_234 = arith.constant 14 : index
    %c0_235 = arith.constant 0 : index
    %c0_236 = arith.constant 0 : index
    %254 = vector.load %arg6[%c14_234, %c0_235, %c0_236] : memref<16x32x64xbf16, #tpu.memory_space<vmem>>, vector<1x32x64xbf16>
    %255 = vector.shape_cast %254 : vector<1x32x64xbf16> to vector<32x64xbf16>
    %cst_237 = arith.constant dense<0.000000e+00> : vector<32x64xf32>
    %256 = tpu.matmul %253, %255, %cst_237 {dimension_numbers = #tpu.dot_dimension_numbers<[1], [0], [0], [1], [0, 0, 1, 1], [], []>} : vector<32x32xbf16>, vector<32x64xbf16>, vector<32x64xf32> -> vector<32x64xf32>
    %257 = arith.addf %249, %256 : vector<32x64xf32>
    %c15_238 = arith.constant 15 : index
    %c0_239 = arith.constant 0 : index
    %c0_240 = arith.constant 0 : index
    %258 = vector.load %arg5[%c15_238, %c0_239, %c0_240] : memref<16x32x128xbf16, #tpu.memory_space<vmem>>, vector<1x32x128xbf16>
    %259 = vector.shape_cast %258 : vector<1x32x128xbf16> to vector<32x128xbf16>
    %cst_241 = arith.constant dense<0.000000e+00> : vector<32x32xf32>
    %260 = tpu.matmul %259, %136, %cst_241 {dimension_numbers = #tpu.dot_dimension_numbers<[1], [0], [0], [1], [0, 0, 1, 1], [], []>} : vector<32x128xbf16>, vector<128x32xbf16>, vector<32x32xf32> -> vector<32x32xf32>
    %261 = arith.truncf %260 : vector<32x32xf32> to vector<32x32xbf16>
    %c15_242 = arith.constant 15 : index
    %c0_243 = arith.constant 0 : index
    %c0_244 = arith.constant 0 : index
    %262 = vector.load %arg6[%c15_242, %c0_243, %c0_244] : memref<16x32x64xbf16, #tpu.memory_space<vmem>>, vector<1x32x64xbf16>
    %263 = vector.shape_cast %262 : vector<1x32x64xbf16> to vector<32x64xbf16>
    %cst_245 = arith.constant dense<0.000000e+00> : vector<32x64xf32>
    %264 = tpu.matmul %261, %263, %cst_245 {dimension_numbers = #tpu.dot_dimension_numbers<[1], [0], [0], [1], [0, 0, 1, 1], [], []>} : vector<32x32xbf16>, vector<32x64xbf16>, vector<32x64xf32> -> vector<32x64xf32>
    %265 = arith.addf %257, %264 : vector<32x64xf32>
    %c0_246 = arith.constant 0 : index
    %c0_247 = arith.constant 0 : index
    %266 = vector.load %arg7[%c0_246, %c0_247] : memref<1x64xf32, #tpu.memory_space<vmem>>, vector<1x64xf32>
    %267 = vector.broadcast %266 : vector<1x64xf32> to vector<32x64xf32>
    %268 = arith.addf %265, %267 : vector<32x64xf32>
    %cst_248 = arith.constant 0.000000e+00 : f32
    %269 = vector.broadcast %cst_248 : f32 to vector<32x64xf32>
    %270 = arith.maximumf %268, %269 : vector<32x64xf32>
    %271 = arith.truncf %270 : vector<32x64xf32> to vector<32x64xbf16>
    %cst_249 = arith.constant 0.000000e+00 : f32
    %272 = vector.broadcast %cst_249 : f32 to vector<8x128xf32>
    %c0_250 = arith.constant 0 : index
    %c0_251 = arith.constant 0 : index
    %c0_252 = arith.constant 0 : index
    %273 = vector.load %arg8[%c0_250, %c0_251, %c0_252] : memref<16x8x32xbf16, #tpu.memory_space<vmem>>, vector<1x8x32xbf16>
    %274 = vector.shape_cast %273 : vector<1x8x32xbf16> to vector<8x32xbf16>
    %cst_253 = arith.constant dense<0.000000e+00> : vector<8x64xf32>
    %275 = tpu.matmul %274, %271, %cst_253 {dimension_numbers = #tpu.dot_dimension_numbers<[1], [0], [0], [1], [0, 0, 1, 1], [], []>} : vector<8x32xbf16>, vector<32x64xbf16>, vector<8x64xf32> -> vector<8x64xf32>
    %276 = arith.truncf %275 : vector<8x64xf32> to vector<8x64xbf16>
    %c0_254 = arith.constant 0 : index
    %c0_255 = arith.constant 0 : index
    %c0_256 = arith.constant 0 : index
    %277 = vector.load %arg9[%c0_254, %c0_255, %c0_256] : memref<16x64x128xbf16, #tpu.memory_space<vmem>>, vector<1x64x128xbf16>
    %278 = vector.shape_cast %277 : vector<1x64x128xbf16> to vector<64x128xbf16>
    %cst_257 = arith.constant dense<0.000000e+00> : vector<8x128xf32>
    %279 = tpu.matmul %276, %278, %cst_257 {dimension_numbers = #tpu.dot_dimension_numbers<[1], [0], [0], [1], [0, 0, 1, 1], [], []>} : vector<8x64xbf16>, vector<64x128xbf16>, vector<8x128xf32> -> vector<8x128xf32>
    %280 = arith.addf %272, %279 : vector<8x128xf32>
    %c1_258 = arith.constant 1 : index
    %c0_259 = arith.constant 0 : index
    %c0_260 = arith.constant 0 : index
    %281 = vector.load %arg8[%c1_258, %c0_259, %c0_260] : memref<16x8x32xbf16, #tpu.memory_space<vmem>>, vector<1x8x32xbf16>
    %282 = vector.shape_cast %281 : vector<1x8x32xbf16> to vector<8x32xbf16>
    %cst_261 = arith.constant dense<0.000000e+00> : vector<8x64xf32>
    %283 = tpu.matmul %282, %271, %cst_261 {dimension_numbers = #tpu.dot_dimension_numbers<[1], [0], [0], [1], [0, 0, 1, 1], [], []>} : vector<8x32xbf16>, vector<32x64xbf16>, vector<8x64xf32> -> vector<8x64xf32>
    %284 = arith.truncf %283 : vector<8x64xf32> to vector<8x64xbf16>
    %c1_262 = arith.constant 1 : index
    %c0_263 = arith.constant 0 : index
    %c0_264 = arith.constant 0 : index
    %285 = vector.load %arg9[%c1_262, %c0_263, %c0_264] : memref<16x64x128xbf16, #tpu.memory_space<vmem>>, vector<1x64x128xbf16>
    %286 = vector.shape_cast %285 : vector<1x64x128xbf16> to vector<64x128xbf16>
    %cst_265 = arith.constant dense<0.000000e+00> : vector<8x128xf32>
    %287 = tpu.matmul %284, %286, %cst_265 {dimension_numbers = #tpu.dot_dimension_numbers<[1], [0], [0], [1], [0, 0, 1, 1], [], []>} : vector<8x64xbf16>, vector<64x128xbf16>, vector<8x128xf32> -> vector<8x128xf32>
    %288 = arith.addf %280, %287 : vector<8x128xf32>
    %c2_266 = arith.constant 2 : index
    %c0_267 = arith.constant 0 : index
    %c0_268 = arith.constant 0 : index
    %289 = vector.load %arg8[%c2_266, %c0_267, %c0_268] : memref<16x8x32xbf16, #tpu.memory_space<vmem>>, vector<1x8x32xbf16>
    %290 = vector.shape_cast %289 : vector<1x8x32xbf16> to vector<8x32xbf16>
    %cst_269 = arith.constant dense<0.000000e+00> : vector<8x64xf32>
    %291 = tpu.matmul %290, %271, %cst_269 {dimension_numbers = #tpu.dot_dimension_numbers<[1], [0], [0], [1], [0, 0, 1, 1], [], []>} : vector<8x32xbf16>, vector<32x64xbf16>, vector<8x64xf32> -> vector<8x64xf32>
    %292 = arith.truncf %291 : vector<8x64xf32> to vector<8x64xbf16>
    %c2_270 = arith.constant 2 : index
    %c0_271 = arith.constant 0 : index
    %c0_272 = arith.constant 0 : index
    %293 = vector.load %arg9[%c2_270, %c0_271, %c0_272] : memref<16x64x128xbf16, #tpu.memory_space<vmem>>, vector<1x64x128xbf16>
    %294 = vector.shape_cast %293 : vector<1x64x128xbf16> to vector<64x128xbf16>
    %cst_273 = arith.constant dense<0.000000e+00> : vector<8x128xf32>
    %295 = tpu.matmul %292, %294, %cst_273 {dimension_numbers = #tpu.dot_dimension_numbers<[1], [0], [0], [1], [0, 0, 1, 1], [], []>} : vector<8x64xbf16>, vector<64x128xbf16>, vector<8x128xf32> -> vector<8x128xf32>
    %296 = arith.addf %288, %295 : vector<8x128xf32>
    %c3_274 = arith.constant 3 : index
    %c0_275 = arith.constant 0 : index
    %c0_276 = arith.constant 0 : index
    %297 = vector.load %arg8[%c3_274, %c0_275, %c0_276] : memref<16x8x32xbf16, #tpu.memory_space<vmem>>, vector<1x8x32xbf16>
    %298 = vector.shape_cast %297 : vector<1x8x32xbf16> to vector<8x32xbf16>
    %cst_277 = arith.constant dense<0.000000e+00> : vector<8x64xf32>
    %299 = tpu.matmul %298, %271, %cst_277 {dimension_numbers = #tpu.dot_dimension_numbers<[1], [0], [0], [1], [0, 0, 1, 1], [], []>} : vector<8x32xbf16>, vector<32x64xbf16>, vector<8x64xf32> -> vector<8x64xf32>
    %300 = arith.truncf %299 : vector<8x64xf32> to vector<8x64xbf16>
    %c3_278 = arith.constant 3 : index
    %c0_279 = arith.constant 0 : index
    %c0_280 = arith.constant 0 : index
    %301 = vector.load %arg9[%c3_278, %c0_279, %c0_280] : memref<16x64x128xbf16, #tpu.memory_space<vmem>>, vector<1x64x128xbf16>
    %302 = vector.shape_cast %301 : vector<1x64x128xbf16> to vector<64x128xbf16>
    %cst_281 = arith.constant dense<0.000000e+00> : vector<8x128xf32>
    %303 = tpu.matmul %300, %302, %cst_281 {dimension_numbers = #tpu.dot_dimension_numbers<[1], [0], [0], [1], [0, 0, 1, 1], [], []>} : vector<8x64xbf16>, vector<64x128xbf16>, vector<8x128xf32> -> vector<8x128xf32>
    %304 = arith.addf %296, %303 : vector<8x128xf32>
    %c4_282 = arith.constant 4 : index
    %c0_283 = arith.constant 0 : index
    %c0_284 = arith.constant 0 : index
    %305 = vector.load %arg8[%c4_282, %c0_283, %c0_284] : memref<16x8x32xbf16, #tpu.memory_space<vmem>>, vector<1x8x32xbf16>
    %306 = vector.shape_cast %305 : vector<1x8x32xbf16> to vector<8x32xbf16>
    %cst_285 = arith.constant dense<0.000000e+00> : vector<8x64xf32>
    %307 = tpu.matmul %306, %271, %cst_285 {dimension_numbers = #tpu.dot_dimension_numbers<[1], [0], [0], [1], [0, 0, 1, 1], [], []>} : vector<8x32xbf16>, vector<32x64xbf16>, vector<8x64xf32> -> vector<8x64xf32>
    %308 = arith.truncf %307 : vector<8x64xf32> to vector<8x64xbf16>
    %c4_286 = arith.constant 4 : index
    %c0_287 = arith.constant 0 : index
    %c0_288 = arith.constant 0 : index
    %309 = vector.load %arg9[%c4_286, %c0_287, %c0_288] : memref<16x64x128xbf16, #tpu.memory_space<vmem>>, vector<1x64x128xbf16>
    %310 = vector.shape_cast %309 : vector<1x64x128xbf16> to vector<64x128xbf16>
    %cst_289 = arith.constant dense<0.000000e+00> : vector<8x128xf32>
    %311 = tpu.matmul %308, %310, %cst_289 {dimension_numbers = #tpu.dot_dimension_numbers<[1], [0], [0], [1], [0, 0, 1, 1], [], []>} : vector<8x64xbf16>, vector<64x128xbf16>, vector<8x128xf32> -> vector<8x128xf32>
    %312 = arith.addf %304, %311 : vector<8x128xf32>
    %c5_290 = arith.constant 5 : index
    %c0_291 = arith.constant 0 : index
    %c0_292 = arith.constant 0 : index
    %313 = vector.load %arg8[%c5_290, %c0_291, %c0_292] : memref<16x8x32xbf16, #tpu.memory_space<vmem>>, vector<1x8x32xbf16>
    %314 = vector.shape_cast %313 : vector<1x8x32xbf16> to vector<8x32xbf16>
    %cst_293 = arith.constant dense<0.000000e+00> : vector<8x64xf32>
    %315 = tpu.matmul %314, %271, %cst_293 {dimension_numbers = #tpu.dot_dimension_numbers<[1], [0], [0], [1], [0, 0, 1, 1], [], []>} : vector<8x32xbf16>, vector<32x64xbf16>, vector<8x64xf32> -> vector<8x64xf32>
    %316 = arith.truncf %315 : vector<8x64xf32> to vector<8x64xbf16>
    %c5_294 = arith.constant 5 : index
    %c0_295 = arith.constant 0 : index
    %c0_296 = arith.constant 0 : index
    %317 = vector.load %arg9[%c5_294, %c0_295, %c0_296] : memref<16x64x128xbf16, #tpu.memory_space<vmem>>, vector<1x64x128xbf16>
    %318 = vector.shape_cast %317 : vector<1x64x128xbf16> to vector<64x128xbf16>
    %cst_297 = arith.constant dense<0.000000e+00> : vector<8x128xf32>
    %319 = tpu.matmul %316, %318, %cst_297 {dimension_numbers = #tpu.dot_dimension_numbers<[1], [0], [0], [1], [0, 0, 1, 1], [], []>} : vector<8x64xbf16>, vector<64x128xbf16>, vector<8x128xf32> -> vector<8x128xf32>
    %320 = arith.addf %312, %319 : vector<8x128xf32>
    %c6_298 = arith.constant 6 : index
    %c0_299 = arith.constant 0 : index
    %c0_300 = arith.constant 0 : index
    %321 = vector.load %arg8[%c6_298, %c0_299, %c0_300] : memref<16x8x32xbf16, #tpu.memory_space<vmem>>, vector<1x8x32xbf16>
    %322 = vector.shape_cast %321 : vector<1x8x32xbf16> to vector<8x32xbf16>
    %cst_301 = arith.constant dense<0.000000e+00> : vector<8x64xf32>
    %323 = tpu.matmul %322, %271, %cst_301 {dimension_numbers = #tpu.dot_dimension_numbers<[1], [0], [0], [1], [0, 0, 1, 1], [], []>} : vector<8x32xbf16>, vector<32x64xbf16>, vector<8x64xf32> -> vector<8x64xf32>
    %324 = arith.truncf %323 : vector<8x64xf32> to vector<8x64xbf16>
    %c6_302 = arith.constant 6 : index
    %c0_303 = arith.constant 0 : index
    %c0_304 = arith.constant 0 : index
    %325 = vector.load %arg9[%c6_302, %c0_303, %c0_304] : memref<16x64x128xbf16, #tpu.memory_space<vmem>>, vector<1x64x128xbf16>
    %326 = vector.shape_cast %325 : vector<1x64x128xbf16> to vector<64x128xbf16>
    %cst_305 = arith.constant dense<0.000000e+00> : vector<8x128xf32>
    %327 = tpu.matmul %324, %326, %cst_305 {dimension_numbers = #tpu.dot_dimension_numbers<[1], [0], [0], [1], [0, 0, 1, 1], [], []>} : vector<8x64xbf16>, vector<64x128xbf16>, vector<8x128xf32> -> vector<8x128xf32>
    %328 = arith.addf %320, %327 : vector<8x128xf32>
    %c7_306 = arith.constant 7 : index
    %c0_307 = arith.constant 0 : index
    %c0_308 = arith.constant 0 : index
    %329 = vector.load %arg8[%c7_306, %c0_307, %c0_308] : memref<16x8x32xbf16, #tpu.memory_space<vmem>>, vector<1x8x32xbf16>
    %330 = vector.shape_cast %329 : vector<1x8x32xbf16> to vector<8x32xbf16>
    %cst_309 = arith.constant dense<0.000000e+00> : vector<8x64xf32>
    %331 = tpu.matmul %330, %271, %cst_309 {dimension_numbers = #tpu.dot_dimension_numbers<[1], [0], [0], [1], [0, 0, 1, 1], [], []>} : vector<8x32xbf16>, vector<32x64xbf16>, vector<8x64xf32> -> vector<8x64xf32>
    %332 = arith.truncf %331 : vector<8x64xf32> to vector<8x64xbf16>
    %c7_310 = arith.constant 7 : index
    %c0_311 = arith.constant 0 : index
    %c0_312 = arith.constant 0 : index
    %333 = vector.load %arg9[%c7_310, %c0_311, %c0_312] : memref<16x64x128xbf16, #tpu.memory_space<vmem>>, vector<1x64x128xbf16>
    %334 = vector.shape_cast %333 : vector<1x64x128xbf16> to vector<64x128xbf16>
    %cst_313 = arith.constant dense<0.000000e+00> : vector<8x128xf32>
    %335 = tpu.matmul %332, %334, %cst_313 {dimension_numbers = #tpu.dot_dimension_numbers<[1], [0], [0], [1], [0, 0, 1, 1], [], []>} : vector<8x64xbf16>, vector<64x128xbf16>, vector<8x128xf32> -> vector<8x128xf32>
    %336 = arith.addf %328, %335 : vector<8x128xf32>
    %c8_314 = arith.constant 8 : index
    %c0_315 = arith.constant 0 : index
    %c0_316 = arith.constant 0 : index
    %337 = vector.load %arg8[%c8_314, %c0_315, %c0_316] : memref<16x8x32xbf16, #tpu.memory_space<vmem>>, vector<1x8x32xbf16>
    %338 = vector.shape_cast %337 : vector<1x8x32xbf16> to vector<8x32xbf16>
    %cst_317 = arith.constant dense<0.000000e+00> : vector<8x64xf32>
    %339 = tpu.matmul %338, %271, %cst_317 {dimension_numbers = #tpu.dot_dimension_numbers<[1], [0], [0], [1], [0, 0, 1, 1], [], []>} : vector<8x32xbf16>, vector<32x64xbf16>, vector<8x64xf32> -> vector<8x64xf32>
    %340 = arith.truncf %339 : vector<8x64xf32> to vector<8x64xbf16>
    %c8_318 = arith.constant 8 : index
    %c0_319 = arith.constant 0 : index
    %c0_320 = arith.constant 0 : index
    %341 = vector.load %arg9[%c8_318, %c0_319, %c0_320] : memref<16x64x128xbf16, #tpu.memory_space<vmem>>, vector<1x64x128xbf16>
    %342 = vector.shape_cast %341 : vector<1x64x128xbf16> to vector<64x128xbf16>
    %cst_321 = arith.constant dense<0.000000e+00> : vector<8x128xf32>
    %343 = tpu.matmul %340, %342, %cst_321 {dimension_numbers = #tpu.dot_dimension_numbers<[1], [0], [0], [1], [0, 0, 1, 1], [], []>} : vector<8x64xbf16>, vector<64x128xbf16>, vector<8x128xf32> -> vector<8x128xf32>
    %344 = arith.addf %336, %343 : vector<8x128xf32>
    %c9_322 = arith.constant 9 : index
    %c0_323 = arith.constant 0 : index
    %c0_324 = arith.constant 0 : index
    %345 = vector.load %arg8[%c9_322, %c0_323, %c0_324] : memref<16x8x32xbf16, #tpu.memory_space<vmem>>, vector<1x8x32xbf16>
    %346 = vector.shape_cast %345 : vector<1x8x32xbf16> to vector<8x32xbf16>
    %cst_325 = arith.constant dense<0.000000e+00> : vector<8x64xf32>
    %347 = tpu.matmul %346, %271, %cst_325 {dimension_numbers = #tpu.dot_dimension_numbers<[1], [0], [0], [1], [0, 0, 1, 1], [], []>} : vector<8x32xbf16>, vector<32x64xbf16>, vector<8x64xf32> -> vector<8x64xf32>
    %348 = arith.truncf %347 : vector<8x64xf32> to vector<8x64xbf16>
    %c9_326 = arith.constant 9 : index
    %c0_327 = arith.constant 0 : index
    %c0_328 = arith.constant 0 : index
    %349 = vector.load %arg9[%c9_326, %c0_327, %c0_328] : memref<16x64x128xbf16, #tpu.memory_space<vmem>>, vector<1x64x128xbf16>
    %350 = vector.shape_cast %349 : vector<1x64x128xbf16> to vector<64x128xbf16>
    %cst_329 = arith.constant dense<0.000000e+00> : vector<8x128xf32>
    %351 = tpu.matmul %348, %350, %cst_329 {dimension_numbers = #tpu.dot_dimension_numbers<[1], [0], [0], [1], [0, 0, 1, 1], [], []>} : vector<8x64xbf16>, vector<64x128xbf16>, vector<8x128xf32> -> vector<8x128xf32>
    %352 = arith.addf %344, %351 : vector<8x128xf32>
    %c10_330 = arith.constant 10 : index
    %c0_331 = arith.constant 0 : index
    %c0_332 = arith.constant 0 : index
    %353 = vector.load %arg8[%c10_330, %c0_331, %c0_332] : memref<16x8x32xbf16, #tpu.memory_space<vmem>>, vector<1x8x32xbf16>
    %354 = vector.shape_cast %353 : vector<1x8x32xbf16> to vector<8x32xbf16>
    %cst_333 = arith.constant dense<0.000000e+00> : vector<8x64xf32>
    %355 = tpu.matmul %354, %271, %cst_333 {dimension_numbers = #tpu.dot_dimension_numbers<[1], [0], [0], [1], [0, 0, 1, 1], [], []>} : vector<8x32xbf16>, vector<32x64xbf16>, vector<8x64xf32> -> vector<8x64xf32>
    %356 = arith.truncf %355 : vector<8x64xf32> to vector<8x64xbf16>
    %c10_334 = arith.constant 10 : index
    %c0_335 = arith.constant 0 : index
    %c0_336 = arith.constant 0 : index
    %357 = vector.load %arg9[%c10_334, %c0_335, %c0_336] : memref<16x64x128xbf16, #tpu.memory_space<vmem>>, vector<1x64x128xbf16>
    %358 = vector.shape_cast %357 : vector<1x64x128xbf16> to vector<64x128xbf16>
    %cst_337 = arith.constant dense<0.000000e+00> : vector<8x128xf32>
    %359 = tpu.matmul %356, %358, %cst_337 {dimension_numbers = #tpu.dot_dimension_numbers<[1], [0], [0], [1], [0, 0, 1, 1], [], []>} : vector<8x64xbf16>, vector<64x128xbf16>, vector<8x128xf32> -> vector<8x128xf32>
    %360 = arith.addf %352, %359 : vector<8x128xf32>
    %c11_338 = arith.constant 11 : index
    %c0_339 = arith.constant 0 : index
    %c0_340 = arith.constant 0 : index
    %361 = vector.load %arg8[%c11_338, %c0_339, %c0_340] : memref<16x8x32xbf16, #tpu.memory_space<vmem>>, vector<1x8x32xbf16>
    %362 = vector.shape_cast %361 : vector<1x8x32xbf16> to vector<8x32xbf16>
    %cst_341 = arith.constant dense<0.000000e+00> : vector<8x64xf32>
    %363 = tpu.matmul %362, %271, %cst_341 {dimension_numbers = #tpu.dot_dimension_numbers<[1], [0], [0], [1], [0, 0, 1, 1], [], []>} : vector<8x32xbf16>, vector<32x64xbf16>, vector<8x64xf32> -> vector<8x64xf32>
    %364 = arith.truncf %363 : vector<8x64xf32> to vector<8x64xbf16>
    %c11_342 = arith.constant 11 : index
    %c0_343 = arith.constant 0 : index
    %c0_344 = arith.constant 0 : index
    %365 = vector.load %arg9[%c11_342, %c0_343, %c0_344] : memref<16x64x128xbf16, #tpu.memory_space<vmem>>, vector<1x64x128xbf16>
    %366 = vector.shape_cast %365 : vector<1x64x128xbf16> to vector<64x128xbf16>
    %cst_345 = arith.constant dense<0.000000e+00> : vector<8x128xf32>
    %367 = tpu.matmul %364, %366, %cst_345 {dimension_numbers = #tpu.dot_dimension_numbers<[1], [0], [0], [1], [0, 0, 1, 1], [], []>} : vector<8x64xbf16>, vector<64x128xbf16>, vector<8x128xf32> -> vector<8x128xf32>
    %368 = arith.addf %360, %367 : vector<8x128xf32>
    %c12_346 = arith.constant 12 : index
    %c0_347 = arith.constant 0 : index
    %c0_348 = arith.constant 0 : index
    %369 = vector.load %arg8[%c12_346, %c0_347, %c0_348] : memref<16x8x32xbf16, #tpu.memory_space<vmem>>, vector<1x8x32xbf16>
    %370 = vector.shape_cast %369 : vector<1x8x32xbf16> to vector<8x32xbf16>
    %cst_349 = arith.constant dense<0.000000e+00> : vector<8x64xf32>
    %371 = tpu.matmul %370, %271, %cst_349 {dimension_numbers = #tpu.dot_dimension_numbers<[1], [0], [0], [1], [0, 0, 1, 1], [], []>} : vector<8x32xbf16>, vector<32x64xbf16>, vector<8x64xf32> -> vector<8x64xf32>
    %372 = arith.truncf %371 : vector<8x64xf32> to vector<8x64xbf16>
    %c12_350 = arith.constant 12 : index
    %c0_351 = arith.constant 0 : index
    %c0_352 = arith.constant 0 : index
    %373 = vector.load %arg9[%c12_350, %c0_351, %c0_352] : memref<16x64x128xbf16, #tpu.memory_space<vmem>>, vector<1x64x128xbf16>
    %374 = vector.shape_cast %373 : vector<1x64x128xbf16> to vector<64x128xbf16>
    %cst_353 = arith.constant dense<0.000000e+00> : vector<8x128xf32>
    %375 = tpu.matmul %372, %374, %cst_353 {dimension_numbers = #tpu.dot_dimension_numbers<[1], [0], [0], [1], [0, 0, 1, 1], [], []>} : vector<8x64xbf16>, vector<64x128xbf16>, vector<8x128xf32> -> vector<8x128xf32>
    %376 = arith.addf %368, %375 : vector<8x128xf32>
    %c13_354 = arith.constant 13 : index
    %c0_355 = arith.constant 0 : index
    %c0_356 = arith.constant 0 : index
    %377 = vector.load %arg8[%c13_354, %c0_355, %c0_356] : memref<16x8x32xbf16, #tpu.memory_space<vmem>>, vector<1x8x32xbf16>
    %378 = vector.shape_cast %377 : vector<1x8x32xbf16> to vector<8x32xbf16>
    %cst_357 = arith.constant dense<0.000000e+00> : vector<8x64xf32>
    %379 = tpu.matmul %378, %271, %cst_357 {dimension_numbers = #tpu.dot_dimension_numbers<[1], [0], [0], [1], [0, 0, 1, 1], [], []>} : vector<8x32xbf16>, vector<32x64xbf16>, vector<8x64xf32> -> vector<8x64xf32>
    %380 = arith.truncf %379 : vector<8x64xf32> to vector<8x64xbf16>
    %c13_358 = arith.constant 13 : index
    %c0_359 = arith.constant 0 : index
    %c0_360 = arith.constant 0 : index
    %381 = vector.load %arg9[%c13_358, %c0_359, %c0_360] : memref<16x64x128xbf16, #tpu.memory_space<vmem>>, vector<1x64x128xbf16>
    %382 = vector.shape_cast %381 : vector<1x64x128xbf16> to vector<64x128xbf16>
    %cst_361 = arith.constant dense<0.000000e+00> : vector<8x128xf32>
    %383 = tpu.matmul %380, %382, %cst_361 {dimension_numbers = #tpu.dot_dimension_numbers<[1], [0], [0], [1], [0, 0, 1, 1], [], []>} : vector<8x64xbf16>, vector<64x128xbf16>, vector<8x128xf32> -> vector<8x128xf32>
    %384 = arith.addf %376, %383 : vector<8x128xf32>
    %c14_362 = arith.constant 14 : index
    %c0_363 = arith.constant 0 : index
    %c0_364 = arith.constant 0 : index
    %385 = vector.load %arg8[%c14_362, %c0_363, %c0_364] : memref<16x8x32xbf16, #tpu.memory_space<vmem>>, vector<1x8x32xbf16>
    %386 = vector.shape_cast %385 : vector<1x8x32xbf16> to vector<8x32xbf16>
    %cst_365 = arith.constant dense<0.000000e+00> : vector<8x64xf32>
    %387 = tpu.matmul %386, %271, %cst_365 {dimension_numbers = #tpu.dot_dimension_numbers<[1], [0], [0], [1], [0, 0, 1, 1], [], []>} : vector<8x32xbf16>, vector<32x64xbf16>, vector<8x64xf32> -> vector<8x64xf32>
    %388 = arith.truncf %387 : vector<8x64xf32> to vector<8x64xbf16>
    %c14_366 = arith.constant 14 : index
    %c0_367 = arith.constant 0 : index
    %c0_368 = arith.constant 0 : index
    %389 = vector.load %arg9[%c14_366, %c0_367, %c0_368] : memref<16x64x128xbf16, #tpu.memory_space<vmem>>, vector<1x64x128xbf16>
    %390 = vector.shape_cast %389 : vector<1x64x128xbf16> to vector<64x128xbf16>
    %cst_369 = arith.constant dense<0.000000e+00> : vector<8x128xf32>
    %391 = tpu.matmul %388, %390, %cst_369 {dimension_numbers = #tpu.dot_dimension_numbers<[1], [0], [0], [1], [0, 0, 1, 1], [], []>} : vector<8x64xbf16>, vector<64x128xbf16>, vector<8x128xf32> -> vector<8x128xf32>
    %392 = arith.addf %384, %391 : vector<8x128xf32>
    %c15_370 = arith.constant 15 : index
    %c0_371 = arith.constant 0 : index
    %c0_372 = arith.constant 0 : index
    %393 = vector.load %arg8[%c15_370, %c0_371, %c0_372] : memref<16x8x32xbf16, #tpu.memory_space<vmem>>, vector<1x8x32xbf16>
    %394 = vector.shape_cast %393 : vector<1x8x32xbf16> to vector<8x32xbf16>
    %cst_373 = arith.constant dense<0.000000e+00> : vector<8x64xf32>
    %395 = tpu.matmul %394, %271, %cst_373 {dimension_numbers = #tpu.dot_dimension_numbers<[1], [0], [0], [1], [0, 0, 1, 1], [], []>} : vector<8x32xbf16>, vector<32x64xbf16>, vector<8x64xf32> -> vector<8x64xf32>
    %396 = arith.truncf %395 : vector<8x64xf32> to vector<8x64xbf16>
    %c15_374 = arith.constant 15 : index
    %c0_375 = arith.constant 0 : index
    %c0_376 = arith.constant 0 : index
    %397 = vector.load %arg9[%c15_374, %c0_375, %c0_376] : memref<16x64x128xbf16, #tpu.memory_space<vmem>>, vector<1x64x128xbf16>
    %398 = vector.shape_cast %397 : vector<1x64x128xbf16> to vector<64x128xbf16>
    %cst_377 = arith.constant dense<0.000000e+00> : vector<8x128xf32>
    %399 = tpu.matmul %396, %398, %cst_377 {dimension_numbers = #tpu.dot_dimension_numbers<[1], [0], [0], [1], [0, 0, 1, 1], [], []>} : vector<8x64xbf16>, vector<64x128xbf16>, vector<8x128xf32> -> vector<8x128xf32>
    %400 = arith.addf %392, %399 : vector<8x128xf32>
    %c0_378 = arith.constant 0 : index
    %c0_379 = arith.constant 0 : index
    %401 = vector.load %arg10[%c0_378, %c0_379] : memref<1x128xf32, #tpu.memory_space<vmem>>, vector<1x128xf32>
    %402 = vector.broadcast %401 : vector<1x128xf32> to vector<8x128xf32>
    %403 = arith.addf %400, %402 : vector<8x128xf32>
    %cst_380 = arith.constant 0.000000e+00 : f32
    %404 = vector.broadcast %cst_380 : f32 to vector<8x128xf32>
    %405 = arith.maximumf %403, %404 : vector<8x128xf32>
    %406 = arith.truncf %405 : vector<8x128xf32> to vector<8x128xbf16>
    %cst_381 = arith.constant 0.000000e+00 : f32
    %407 = vector.broadcast %cst_381 : f32 to vector<2x64xf32>
    %c0_382 = arith.constant 0 : index
    %c0_383 = arith.constant 0 : index
    %c0_384 = arith.constant 0 : index
    %408 = vector.load %arg11[%c0_382, %c0_383, %c0_384] : memref<16x2x8xbf16, #tpu.memory_space<vmem>>, vector<1x2x8xbf16>
    %409 = vector.shape_cast %408 : vector<1x2x8xbf16> to vector<2x8xbf16>
    %cst_385 = arith.constant dense<0.000000e+00> : vector<2x128xf32>
    %410 = tpu.matmul %409, %406, %cst_385 {dimension_numbers = #tpu.dot_dimension_numbers<[1], [0], [0], [1], [0, 0, 1, 1], [], []>} : vector<2x8xbf16>, vector<8x128xbf16>, vector<2x128xf32> -> vector<2x128xf32>
    %411 = arith.truncf %410 : vector<2x128xf32> to vector<2x128xbf16>
    %c0_386 = arith.constant 0 : index
    %c0_387 = arith.constant 0 : index
    %c0_388 = arith.constant 0 : index
    %412 = vector.load %arg12[%c0_386, %c0_387, %c0_388] : memref<16x128x64xbf16, #tpu.memory_space<vmem>>, vector<1x128x64xbf16>
    %413 = vector.shape_cast %412 : vector<1x128x64xbf16> to vector<128x64xbf16>
    %cst_389 = arith.constant dense<0.000000e+00> : vector<2x64xf32>
    %414 = tpu.matmul %411, %413, %cst_389 {dimension_numbers = #tpu.dot_dimension_numbers<[1], [0], [0], [1], [0, 0, 1, 1], [], []>} : vector<2x128xbf16>, vector<128x64xbf16>, vector<2x64xf32> -> vector<2x64xf32>
    %415 = arith.addf %407, %414 : vector<2x64xf32>
    %c1_390 = arith.constant 1 : index
    %c0_391 = arith.constant 0 : index
    %c0_392 = arith.constant 0 : index
    %416 = vector.load %arg11[%c1_390, %c0_391, %c0_392] : memref<16x2x8xbf16, #tpu.memory_space<vmem>>, vector<1x2x8xbf16>
    %417 = vector.shape_cast %416 : vector<1x2x8xbf16> to vector<2x8xbf16>
    %cst_393 = arith.constant dense<0.000000e+00> : vector<2x128xf32>
    %418 = tpu.matmul %417, %406, %cst_393 {dimension_numbers = #tpu.dot_dimension_numbers<[1], [0], [0], [1], [0, 0, 1, 1], [], []>} : vector<2x8xbf16>, vector<8x128xbf16>, vector<2x128xf32> -> vector<2x128xf32>
    %419 = arith.truncf %418 : vector<2x128xf32> to vector<2x128xbf16>
    %c1_394 = arith.constant 1 : index
    %c0_395 = arith.constant 0 : index
    %c0_396 = arith.constant 0 : index
    %420 = vector.load %arg12[%c1_394, %c0_395, %c0_396] : memref<16x128x64xbf16, #tpu.memory_space<vmem>>, vector<1x128x64xbf16>
    %421 = vector.shape_cast %420 : vector<1x128x64xbf16> to vector<128x64xbf16>
    %cst_397 = arith.constant dense<0.000000e+00> : vector<2x64xf32>
    %422 = tpu.matmul %419, %421, %cst_397 {dimension_numbers = #tpu.dot_dimension_numbers<[1], [0], [0], [1], [0, 0, 1, 1], [], []>} : vector<2x128xbf16>, vector<128x64xbf16>, vector<2x64xf32> -> vector<2x64xf32>
    %423 = arith.addf %415, %422 : vector<2x64xf32>
    %c2_398 = arith.constant 2 : index
    %c0_399 = arith.constant 0 : index
    %c0_400 = arith.constant 0 : index
    %424 = vector.load %arg11[%c2_398, %c0_399, %c0_400] : memref<16x2x8xbf16, #tpu.memory_space<vmem>>, vector<1x2x8xbf16>
    %425 = vector.shape_cast %424 : vector<1x2x8xbf16> to vector<2x8xbf16>
    %cst_401 = arith.constant dense<0.000000e+00> : vector<2x128xf32>
    %426 = tpu.matmul %425, %406, %cst_401 {dimension_numbers = #tpu.dot_dimension_numbers<[1], [0], [0], [1], [0, 0, 1, 1], [], []>} : vector<2x8xbf16>, vector<8x128xbf16>, vector<2x128xf32> -> vector<2x128xf32>
    %427 = arith.truncf %426 : vector<2x128xf32> to vector<2x128xbf16>
    %c2_402 = arith.constant 2 : index
    %c0_403 = arith.constant 0 : index
    %c0_404 = arith.constant 0 : index
    %428 = vector.load %arg12[%c2_402, %c0_403, %c0_404] : memref<16x128x64xbf16, #tpu.memory_space<vmem>>, vector<1x128x64xbf16>
    %429 = vector.shape_cast %428 : vector<1x128x64xbf16> to vector<128x64xbf16>
    %cst_405 = arith.constant dense<0.000000e+00> : vector<2x64xf32>
    %430 = tpu.matmul %427, %429, %cst_405 {dimension_numbers = #tpu.dot_dimension_numbers<[1], [0], [0], [1], [0, 0, 1, 1], [], []>} : vector<2x128xbf16>, vector<128x64xbf16>, vector<2x64xf32> -> vector<2x64xf32>
    %431 = arith.addf %423, %430 : vector<2x64xf32>
    %c3_406 = arith.constant 3 : index
    %c0_407 = arith.constant 0 : index
    %c0_408 = arith.constant 0 : index
    %432 = vector.load %arg11[%c3_406, %c0_407, %c0_408] : memref<16x2x8xbf16, #tpu.memory_space<vmem>>, vector<1x2x8xbf16>
    %433 = vector.shape_cast %432 : vector<1x2x8xbf16> to vector<2x8xbf16>
    %cst_409 = arith.constant dense<0.000000e+00> : vector<2x128xf32>
    %434 = tpu.matmul %433, %406, %cst_409 {dimension_numbers = #tpu.dot_dimension_numbers<[1], [0], [0], [1], [0, 0, 1, 1], [], []>} : vector<2x8xbf16>, vector<8x128xbf16>, vector<2x128xf32> -> vector<2x128xf32>
    %435 = arith.truncf %434 : vector<2x128xf32> to vector<2x128xbf16>
    %c3_410 = arith.constant 3 : index
    %c0_411 = arith.constant 0 : index
    %c0_412 = arith.constant 0 : index
    %436 = vector.load %arg12[%c3_410, %c0_411, %c0_412] : memref<16x128x64xbf16, #tpu.memory_space<vmem>>, vector<1x128x64xbf16>
    %437 = vector.shape_cast %436 : vector<1x128x64xbf16> to vector<128x64xbf16>
    %cst_413 = arith.constant dense<0.000000e+00> : vector<2x64xf32>
    %438 = tpu.matmul %435, %437, %cst_413 {dimension_numbers = #tpu.dot_dimension_numbers<[1], [0], [0], [1], [0, 0, 1, 1], [], []>} : vector<2x128xbf16>, vector<128x64xbf16>, vector<2x64xf32> -> vector<2x64xf32>
    %439 = arith.addf %431, %438 : vector<2x64xf32>
    %c4_414 = arith.constant 4 : index
    %c0_415 = arith.constant 0 : index
    %c0_416 = arith.constant 0 : index
    %440 = vector.load %arg11[%c4_414, %c0_415, %c0_416] : memref<16x2x8xbf16, #tpu.memory_space<vmem>>, vector<1x2x8xbf16>
    %441 = vector.shape_cast %440 : vector<1x2x8xbf16> to vector<2x8xbf16>
    %cst_417 = arith.constant dense<0.000000e+00> : vector<2x128xf32>
    %442 = tpu.matmul %441, %406, %cst_417 {dimension_numbers = #tpu.dot_dimension_numbers<[1], [0], [0], [1], [0, 0, 1, 1], [], []>} : vector<2x8xbf16>, vector<8x128xbf16>, vector<2x128xf32> -> vector<2x128xf32>
    %443 = arith.truncf %442 : vector<2x128xf32> to vector<2x128xbf16>
    %c4_418 = arith.constant 4 : index
    %c0_419 = arith.constant 0 : index
    %c0_420 = arith.constant 0 : index
    %444 = vector.load %arg12[%c4_418, %c0_419, %c0_420] : memref<16x128x64xbf16, #tpu.memory_space<vmem>>, vector<1x128x64xbf16>
    %445 = vector.shape_cast %444 : vector<1x128x64xbf16> to vector<128x64xbf16>
    %cst_421 = arith.constant dense<0.000000e+00> : vector<2x64xf32>
    %446 = tpu.matmul %443, %445, %cst_421 {dimension_numbers = #tpu.dot_dimension_numbers<[1], [0], [0], [1], [0, 0, 1, 1], [], []>} : vector<2x128xbf16>, vector<128x64xbf16>, vector<2x64xf32> -> vector<2x64xf32>
    %447 = arith.addf %439, %446 : vector<2x64xf32>
    %c5_422 = arith.constant 5 : index
    %c0_423 = arith.constant 0 : index
    %c0_424 = arith.constant 0 : index
    %448 = vector.load %arg11[%c5_422, %c0_423, %c0_424] : memref<16x2x8xbf16, #tpu.memory_space<vmem>>, vector<1x2x8xbf16>
    %449 = vector.shape_cast %448 : vector<1x2x8xbf16> to vector<2x8xbf16>
    %cst_425 = arith.constant dense<0.000000e+00> : vector<2x128xf32>
    %450 = tpu.matmul %449, %406, %cst_425 {dimension_numbers = #tpu.dot_dimension_numbers<[1], [0], [0], [1], [0, 0, 1, 1], [], []>} : vector<2x8xbf16>, vector<8x128xbf16>, vector<2x128xf32> -> vector<2x128xf32>
    %451 = arith.truncf %450 : vector<2x128xf32> to vector<2x128xbf16>
    %c5_426 = arith.constant 5 : index
    %c0_427 = arith.constant 0 : index
    %c0_428 = arith.constant 0 : index
    %452 = vector.load %arg12[%c5_426, %c0_427, %c0_428] : memref<16x128x64xbf16, #tpu.memory_space<vmem>>, vector<1x128x64xbf16>
    %453 = vector.shape_cast %452 : vector<1x128x64xbf16> to vector<128x64xbf16>
    %cst_429 = arith.constant dense<0.000000e+00> : vector<2x64xf32>
    %454 = tpu.matmul %451, %453, %cst_429 {dimension_numbers = #tpu.dot_dimension_numbers<[1], [0], [0], [1], [0, 0, 1, 1], [], []>} : vector<2x128xbf16>, vector<128x64xbf16>, vector<2x64xf32> -> vector<2x64xf32>
    %455 = arith.addf %447, %454 : vector<2x64xf32>
    %c6_430 = arith.constant 6 : index
    %c0_431 = arith.constant 0 : index
    %c0_432 = arith.constant 0 : index
    %456 = vector.load %arg11[%c6_430, %c0_431, %c0_432] : memref<16x2x8xbf16, #tpu.memory_space<vmem>>, vector<1x2x8xbf16>
    %457 = vector.shape_cast %456 : vector<1x2x8xbf16> to vector<2x8xbf16>
    %cst_433 = arith.constant dense<0.000000e+00> : vector<2x128xf32>
    %458 = tpu.matmul %457, %406, %cst_433 {dimension_numbers = #tpu.dot_dimension_numbers<[1], [0], [0], [1], [0, 0, 1, 1], [], []>} : vector<2x8xbf16>, vector<8x128xbf16>, vector<2x128xf32> -> vector<2x128xf32>
    %459 = arith.truncf %458 : vector<2x128xf32> to vector<2x128xbf16>
    %c6_434 = arith.constant 6 : index
    %c0_435 = arith.constant 0 : index
    %c0_436 = arith.constant 0 : index
    %460 = vector.load %arg12[%c6_434, %c0_435, %c0_436] : memref<16x128x64xbf16, #tpu.memory_space<vmem>>, vector<1x128x64xbf16>
    %461 = vector.shape_cast %460 : vector<1x128x64xbf16> to vector<128x64xbf16>
    %cst_437 = arith.constant dense<0.000000e+00> : vector<2x64xf32>
    %462 = tpu.matmul %459, %461, %cst_437 {dimension_numbers = #tpu.dot_dimension_numbers<[1], [0], [0], [1], [0, 0, 1, 1], [], []>} : vector<2x128xbf16>, vector<128x64xbf16>, vector<2x64xf32> -> vector<2x64xf32>
    %463 = arith.addf %455, %462 : vector<2x64xf32>
    %c7_438 = arith.constant 7 : index
    %c0_439 = arith.constant 0 : index
    %c0_440 = arith.constant 0 : index
    %464 = vector.load %arg11[%c7_438, %c0_439, %c0_440] : memref<16x2x8xbf16, #tpu.memory_space<vmem>>, vector<1x2x8xbf16>
    %465 = vector.shape_cast %464 : vector<1x2x8xbf16> to vector<2x8xbf16>
    %cst_441 = arith.constant dense<0.000000e+00> : vector<2x128xf32>
    %466 = tpu.matmul %465, %406, %cst_441 {dimension_numbers = #tpu.dot_dimension_numbers<[1], [0], [0], [1], [0, 0, 1, 1], [], []>} : vector<2x8xbf16>, vector<8x128xbf16>, vector<2x128xf32> -> vector<2x128xf32>
    %467 = arith.truncf %466 : vector<2x128xf32> to vector<2x128xbf16>
    %c7_442 = arith.constant 7 : index
    %c0_443 = arith.constant 0 : index
    %c0_444 = arith.constant 0 : index
    %468 = vector.load %arg12[%c7_442, %c0_443, %c0_444] : memref<16x128x64xbf16, #tpu.memory_space<vmem>>, vector<1x128x64xbf16>
    %469 = vector.shape_cast %468 : vector<1x128x64xbf16> to vector<128x64xbf16>
    %cst_445 = arith.constant dense<0.000000e+00> : vector<2x64xf32>
    %470 = tpu.matmul %467, %469, %cst_445 {dimension_numbers = #tpu.dot_dimension_numbers<[1], [0], [0], [1], [0, 0, 1, 1], [], []>} : vector<2x128xbf16>, vector<128x64xbf16>, vector<2x64xf32> -> vector<2x64xf32>
    %471 = arith.addf %463, %470 : vector<2x64xf32>
    %c8_446 = arith.constant 8 : index
    %c0_447 = arith.constant 0 : index
    %c0_448 = arith.constant 0 : index
    %472 = vector.load %arg11[%c8_446, %c0_447, %c0_448] : memref<16x2x8xbf16, #tpu.memory_space<vmem>>, vector<1x2x8xbf16>
    %473 = vector.shape_cast %472 : vector<1x2x8xbf16> to vector<2x8xbf16>
    %cst_449 = arith.constant dense<0.000000e+00> : vector<2x128xf32>
    %474 = tpu.matmul %473, %406, %cst_449 {dimension_numbers = #tpu.dot_dimension_numbers<[1], [0], [0], [1], [0, 0, 1, 1], [], []>} : vector<2x8xbf16>, vector<8x128xbf16>, vector<2x128xf32> -> vector<2x128xf32>
    %475 = arith.truncf %474 : vector<2x128xf32> to vector<2x128xbf16>
    %c8_450 = arith.constant 8 : index
    %c0_451 = arith.constant 0 : index
    %c0_452 = arith.constant 0 : index
    %476 = vector.load %arg12[%c8_450, %c0_451, %c0_452] : memref<16x128x64xbf16, #tpu.memory_space<vmem>>, vector<1x128x64xbf16>
    %477 = vector.shape_cast %476 : vector<1x128x64xbf16> to vector<128x64xbf16>
    %cst_453 = arith.constant dense<0.000000e+00> : vector<2x64xf32>
    %478 = tpu.matmul %475, %477, %cst_453 {dimension_numbers = #tpu.dot_dimension_numbers<[1], [0], [0], [1], [0, 0, 1, 1], [], []>} : vector<2x128xbf16>, vector<128x64xbf16>, vector<2x64xf32> -> vector<2x64xf32>
    %479 = arith.addf %471, %478 : vector<2x64xf32>
    %c9_454 = arith.constant 9 : index
    %c0_455 = arith.constant 0 : index
    %c0_456 = arith.constant 0 : index
    %480 = vector.load %arg11[%c9_454, %c0_455, %c0_456] : memref<16x2x8xbf16, #tpu.memory_space<vmem>>, vector<1x2x8xbf16>
    %481 = vector.shape_cast %480 : vector<1x2x8xbf16> to vector<2x8xbf16>
    %cst_457 = arith.constant dense<0.000000e+00> : vector<2x128xf32>
    %482 = tpu.matmul %481, %406, %cst_457 {dimension_numbers = #tpu.dot_dimension_numbers<[1], [0], [0], [1], [0, 0, 1, 1], [], []>} : vector<2x8xbf16>, vector<8x128xbf16>, vector<2x128xf32> -> vector<2x128xf32>
    %483 = arith.truncf %482 : vector<2x128xf32> to vector<2x128xbf16>
    %c9_458 = arith.constant 9 : index
    %c0_459 = arith.constant 0 : index
    %c0_460 = arith.constant 0 : index
    %484 = vector.load %arg12[%c9_458, %c0_459, %c0_460] : memref<16x128x64xbf16, #tpu.memory_space<vmem>>, vector<1x128x64xbf16>
    %485 = vector.shape_cast %484 : vector<1x128x64xbf16> to vector<128x64xbf16>
    %cst_461 = arith.constant dense<0.000000e+00> : vector<2x64xf32>
    %486 = tpu.matmul %483, %485, %cst_461 {dimension_numbers = #tpu.dot_dimension_numbers<[1], [0], [0], [1], [0, 0, 1, 1], [], []>} : vector<2x128xbf16>, vector<128x64xbf16>, vector<2x64xf32> -> vector<2x64xf32>
    %487 = arith.addf %479, %486 : vector<2x64xf32>
    %c10_462 = arith.constant 10 : index
    %c0_463 = arith.constant 0 : index
    %c0_464 = arith.constant 0 : index
    %488 = vector.load %arg11[%c10_462, %c0_463, %c0_464] : memref<16x2x8xbf16, #tpu.memory_space<vmem>>, vector<1x2x8xbf16>
    %489 = vector.shape_cast %488 : vector<1x2x8xbf16> to vector<2x8xbf16>
    %cst_465 = arith.constant dense<0.000000e+00> : vector<2x128xf32>
    %490 = tpu.matmul %489, %406, %cst_465 {dimension_numbers = #tpu.dot_dimension_numbers<[1], [0], [0], [1], [0, 0, 1, 1], [], []>} : vector<2x8xbf16>, vector<8x128xbf16>, vector<2x128xf32> -> vector<2x128xf32>
    %491 = arith.truncf %490 : vector<2x128xf32> to vector<2x128xbf16>
    %c10_466 = arith.constant 10 : index
    %c0_467 = arith.constant 0 : index
    %c0_468 = arith.constant 0 : index
    %492 = vector.load %arg12[%c10_466, %c0_467, %c0_468] : memref<16x128x64xbf16, #tpu.memory_space<vmem>>, vector<1x128x64xbf16>
    %493 = vector.shape_cast %492 : vector<1x128x64xbf16> to vector<128x64xbf16>
    %cst_469 = arith.constant dense<0.000000e+00> : vector<2x64xf32>
    %494 = tpu.matmul %491, %493, %cst_469 {dimension_numbers = #tpu.dot_dimension_numbers<[1], [0], [0], [1], [0, 0, 1, 1], [], []>} : vector<2x128xbf16>, vector<128x64xbf16>, vector<2x64xf32> -> vector<2x64xf32>
    %495 = arith.addf %487, %494 : vector<2x64xf32>
    %c11_470 = arith.constant 11 : index
    %c0_471 = arith.constant 0 : index
    %c0_472 = arith.constant 0 : index
    %496 = vector.load %arg11[%c11_470, %c0_471, %c0_472] : memref<16x2x8xbf16, #tpu.memory_space<vmem>>, vector<1x2x8xbf16>
    %497 = vector.shape_cast %496 : vector<1x2x8xbf16> to vector<2x8xbf16>
    %cst_473 = arith.constant dense<0.000000e+00> : vector<2x128xf32>
    %498 = tpu.matmul %497, %406, %cst_473 {dimension_numbers = #tpu.dot_dimension_numbers<[1], [0], [0], [1], [0, 0, 1, 1], [], []>} : vector<2x8xbf16>, vector<8x128xbf16>, vector<2x128xf32> -> vector<2x128xf32>
    %499 = arith.truncf %498 : vector<2x128xf32> to vector<2x128xbf16>
    %c11_474 = arith.constant 11 : index
    %c0_475 = arith.constant 0 : index
    %c0_476 = arith.constant 0 : index
    %500 = vector.load %arg12[%c11_474, %c0_475, %c0_476] : memref<16x128x64xbf16, #tpu.memory_space<vmem>>, vector<1x128x64xbf16>
    %501 = vector.shape_cast %500 : vector<1x128x64xbf16> to vector<128x64xbf16>
    %cst_477 = arith.constant dense<0.000000e+00> : vector<2x64xf32>
    %502 = tpu.matmul %499, %501, %cst_477 {dimension_numbers = #tpu.dot_dimension_numbers<[1], [0], [0], [1], [0, 0, 1, 1], [], []>} : vector<2x128xbf16>, vector<128x64xbf16>, vector<2x64xf32> -> vector<2x64xf32>
    %503 = arith.addf %495, %502 : vector<2x64xf32>
    %c12_478 = arith.constant 12 : index
    %c0_479 = arith.constant 0 : index
    %c0_480 = arith.constant 0 : index
    %504 = vector.load %arg11[%c12_478, %c0_479, %c0_480] : memref<16x2x8xbf16, #tpu.memory_space<vmem>>, vector<1x2x8xbf16>
    %505 = vector.shape_cast %504 : vector<1x2x8xbf16> to vector<2x8xbf16>
    %cst_481 = arith.constant dense<0.000000e+00> : vector<2x128xf32>
    %506 = tpu.matmul %505, %406, %cst_481 {dimension_numbers = #tpu.dot_dimension_numbers<[1], [0], [0], [1], [0, 0, 1, 1], [], []>} : vector<2x8xbf16>, vector<8x128xbf16>, vector<2x128xf32> -> vector<2x128xf32>
    %507 = arith.truncf %506 : vector<2x128xf32> to vector<2x128xbf16>
    %c12_482 = arith.constant 12 : index
    %c0_483 = arith.constant 0 : index
    %c0_484 = arith.constant 0 : index
    %508 = vector.load %arg12[%c12_482, %c0_483, %c0_484] : memref<16x128x64xbf16, #tpu.memory_space<vmem>>, vector<1x128x64xbf16>
    %509 = vector.shape_cast %508 : vector<1x128x64xbf16> to vector<128x64xbf16>
    %cst_485 = arith.constant dense<0.000000e+00> : vector<2x64xf32>
    %510 = tpu.matmul %507, %509, %cst_485 {dimension_numbers = #tpu.dot_dimension_numbers<[1], [0], [0], [1], [0, 0, 1, 1], [], []>} : vector<2x128xbf16>, vector<128x64xbf16>, vector<2x64xf32> -> vector<2x64xf32>
    %511 = arith.addf %503, %510 : vector<2x64xf32>
    %c13_486 = arith.constant 13 : index
    %c0_487 = arith.constant 0 : index
    %c0_488 = arith.constant 0 : index
    %512 = vector.load %arg11[%c13_486, %c0_487, %c0_488] : memref<16x2x8xbf16, #tpu.memory_space<vmem>>, vector<1x2x8xbf16>
    %513 = vector.shape_cast %512 : vector<1x2x8xbf16> to vector<2x8xbf16>
    %cst_489 = arith.constant dense<0.000000e+00> : vector<2x128xf32>
    %514 = tpu.matmul %513, %406, %cst_489 {dimension_numbers = #tpu.dot_dimension_numbers<[1], [0], [0], [1], [0, 0, 1, 1], [], []>} : vector<2x8xbf16>, vector<8x128xbf16>, vector<2x128xf32> -> vector<2x128xf32>
    %515 = arith.truncf %514 : vector<2x128xf32> to vector<2x128xbf16>
    %c13_490 = arith.constant 13 : index
    %c0_491 = arith.constant 0 : index
    %c0_492 = arith.constant 0 : index
    %516 = vector.load %arg12[%c13_490, %c0_491, %c0_492] : memref<16x128x64xbf16, #tpu.memory_space<vmem>>, vector<1x128x64xbf16>
    %517 = vector.shape_cast %516 : vector<1x128x64xbf16> to vector<128x64xbf16>
    %cst_493 = arith.constant dense<0.000000e+00> : vector<2x64xf32>
    %518 = tpu.matmul %515, %517, %cst_493 {dimension_numbers = #tpu.dot_dimension_numbers<[1], [0], [0], [1], [0, 0, 1, 1], [], []>} : vector<2x128xbf16>, vector<128x64xbf16>, vector<2x64xf32> -> vector<2x64xf32>
    %519 = arith.addf %511, %518 : vector<2x64xf32>
    %c14_494 = arith.constant 14 : index
    %c0_495 = arith.constant 0 : index
    %c0_496 = arith.constant 0 : index
    %520 = vector.load %arg11[%c14_494, %c0_495, %c0_496] : memref<16x2x8xbf16, #tpu.memory_space<vmem>>, vector<1x2x8xbf16>
    %521 = vector.shape_cast %520 : vector<1x2x8xbf16> to vector<2x8xbf16>
    %cst_497 = arith.constant dense<0.000000e+00> : vector<2x128xf32>
    %522 = tpu.matmul %521, %406, %cst_497 {dimension_numbers = #tpu.dot_dimension_numbers<[1], [0], [0], [1], [0, 0, 1, 1], [], []>} : vector<2x8xbf16>, vector<8x128xbf16>, vector<2x128xf32> -> vector<2x128xf32>
    %523 = arith.truncf %522 : vector<2x128xf32> to vector<2x128xbf16>
    %c14_498 = arith.constant 14 : index
    %c0_499 = arith.constant 0 : index
    %c0_500 = arith.constant 0 : index
    %524 = vector.load %arg12[%c14_498, %c0_499, %c0_500] : memref<16x128x64xbf16, #tpu.memory_space<vmem>>, vector<1x128x64xbf16>
    %525 = vector.shape_cast %524 : vector<1x128x64xbf16> to vector<128x64xbf16>
    %cst_501 = arith.constant dense<0.000000e+00> : vector<2x64xf32>
    %526 = tpu.matmul %523, %525, %cst_501 {dimension_numbers = #tpu.dot_dimension_numbers<[1], [0], [0], [1], [0, 0, 1, 1], [], []>} : vector<2x128xbf16>, vector<128x64xbf16>, vector<2x64xf32> -> vector<2x64xf32>
    %527 = arith.addf %519, %526 : vector<2x64xf32>
    %c15_502 = arith.constant 15 : index
    %c0_503 = arith.constant 0 : index
    %c0_504 = arith.constant 0 : index
    %528 = vector.load %arg11[%c15_502, %c0_503, %c0_504] : memref<16x2x8xbf16, #tpu.memory_space<vmem>>, vector<1x2x8xbf16>
    %529 = vector.shape_cast %528 : vector<1x2x8xbf16> to vector<2x8xbf16>
    %cst_505 = arith.constant dense<0.000000e+00> : vector<2x128xf32>
    %530 = tpu.matmul %529, %406, %cst_505 {dimension_numbers = #tpu.dot_dimension_numbers<[1], [0], [0], [1], [0, 0, 1, 1], [], []>} : vector<2x8xbf16>, vector<8x128xbf16>, vector<2x128xf32> -> vector<2x128xf32>
    %531 = arith.truncf %530 : vector<2x128xf32> to vector<2x128xbf16>
    %c15_506 = arith.constant 15 : index
    %c0_507 = arith.constant 0 : index
    %c0_508 = arith.constant 0 : index
    %532 = vector.load %arg12[%c15_506, %c0_507, %c0_508] : memref<16x128x64xbf16, #tpu.memory_space<vmem>>, vector<1x128x64xbf16>
    %533 = vector.shape_cast %532 : vector<1x128x64xbf16> to vector<128x64xbf16>
    %cst_509 = arith.constant dense<0.000000e+00> : vector<2x64xf32>
    %534 = tpu.matmul %531, %533, %cst_509 {dimension_numbers = #tpu.dot_dimension_numbers<[1], [0], [0], [1], [0, 0, 1, 1], [], []>} : vector<2x128xbf16>, vector<128x64xbf16>, vector<2x64xf32> -> vector<2x64xf32>
    %535 = arith.addf %527, %534 : vector<2x64xf32>
    %c0_510 = arith.constant 0 : index
    %c0_511 = arith.constant 0 : index
    %536 = vector.load %arg13[%c0_510, %c0_511] : memref<1x64xf32, #tpu.memory_space<vmem>>, vector<1x64xf32>
    %537 = vector.broadcast %536 : vector<1x64xf32> to vector<2x64xf32>
    %538 = arith.addf %535, %537 : vector<2x64xf32>
    %c0_512 = arith.constant 0 : index
    %c0_513 = arith.constant 0 : index
    %539 = vector.load %arg14[%c0_512, %c0_513] : memref<2x64xf32, #tpu.memory_space<vmem>>, vector<2x64xf32>
    tpu.vector_store %arg14[%c0_512, %c0_513], %538 {strides = array<i32>} : memref<2x64xf32, #tpu.memory_space<vmem>>, vector<2x64xf32>,
    return
  }
  func.func @transform_0(%arg0: i32) -> (i32, i32) {
    %c0_i32 = arith.constant 0 : i32
    %c0_i32_0 = arith.constant 0 : i32
    %c0_i32_1 = arith.constant 0 : i32
    return %c0_i32, %c0_i32_0 : i32, i32
  }
  func.func @transform_1(%arg0: i32) -> (i32, i32, i32) {
    %c0_i32 = arith.constant 0 : i32
    %c0_i32_0 = arith.constant 0 : i32
    %c0_i32_1 = arith.constant 0 : i32
    %c0_i32_2 = arith.constant 0 : i32
    return %c0_i32, %c0_i32_0, %c0_i32_1 : i32, i32, i32
  }
  func.func @transform_2(%arg0: i32) -> (i32, i32, i32) {
    %c0_i32 = arith.constant 0 : i32
    %c0_i32_0 = arith.constant 0 : i32
    %c0_i32_1 = arith.constant 0 : i32
    %c0_i32_2 = arith.constant 0 : i32
    return %c0_i32, %c0_i32_0, %c0_i32_1 : i32, i32, i32
  }
  func.func @transform_3(%arg0: i32) -> (i32, i32) {
    %c0_i32 = arith.constant 0 : i32
    %c0_i32_0 = arith.constant 0 : i32
    %c0_i32_1 = arith.constant 0 : i32
    return %c0_i32, %c0_i32_0 : i32, i32
  }
  func.func @transform_4(%arg0: i32) -> (i32, i32, i32) {
    %c0_i32 = arith.constant 0 : i32
    %c0_i32_0 = arith.constant 0 : i32
    %c0_i32_1 = arith.constant 0 : i32
    %c0_i32_2 = arith.constant 0 : i32
    return %c0_i32, %c0_i32_0, %c0_i32_1 : i32, i32, i32
  }
  func.func @transform_5(%arg0: i32) -> (i32, i32, i32) {
    %c0_i32 = arith.constant 0 : i32
    %c0_i32_0 = arith.constant 0 : i32
    %c0_i32_1 = arith.constant 0 : i32
    %c0_i32_2 = arith.constant 0 : i32
    return %c0_i32, %c0_i32_0, %c0_i32_1 : i32, i32, i32
  }
  func.func @transform_6(%arg0: i32) -> (i32, i32) {
    %c0_i32 = arith.constant 0 : i32
    %c0_i32_0 = arith.constant 0 : i32
    %c0_i32_1 = arith.constant 0 : i32
    return %c0_i32, %c0_i32_0 : i32, i32
  }
  func.func @transform_7(%arg0: i32) -> (i32, i32, i32) {
    %c0_i32 = arith.constant 0 : i32
    %c0_i32_0 = arith.constant 0 : i32
    %c0_i32_1 = arith.constant 0 : i32
    %c0_i32_2 = arith.constant 0 : i32
    return %c0_i32, %c0_i32_0, %c0_i32_1 : i32, i32, i32
  }
  func.func @transform_8(%arg0: i32) -> (i32, i32, i32) {
    %c0_i32 = arith.constant 0 : i32
    %c0_i32_0 = arith.constant 0 : i32
    %c0_i32_1 = arith.constant 0 : i32
    %c0_i32_2 = arith.constant 0 : i32
    return %c0_i32, %c0_i32_0, %c0_i32_1 : i32, i32, i32
  }
  func.func @transform_9(%arg0: i32) -> (i32, i32) {
    %c0_i32 = arith.constant 0 : i32
    %c0_i32_0 = arith.constant 0 : i32
    %c0_i32_1 = arith.constant 0 : i32
    return %c0_i32, %c0_i32_0 : i32, i32
  }
  func.func @transform_10(%arg0: i32) -> (i32, i32, i32) {
    %c0_i32 = arith.constant 0 : i32
    %c0_i32_0 = arith.constant 0 : i32
    %c0_i32_1 = arith.constant 0 : i32
    %c0_i32_2 = arith.constant 0 : i32
    return %c0_i32, %c0_i32_0, %c0_i32_1 : i32, i32, i32
  }
  func.func @transform_11(%arg0: i32) -> (i32, i32, i32) {
    %c0_i32 = arith.constant 0 : i32
    %c0_i32_0 = arith.constant 0 : i32
    %c0_i32_1 = arith.constant 0 : i32
    %c0_i32_2 = arith.constant 0 : i32
    return %c0_i32, %c0_i32_0, %c0_i32_1 : i32, i32, i32
  }
  func.func @transform_12(%arg0: i32) -> (i32, i32) {
    %c0_i32 = arith.constant 0 : i32
    %c0_i32_0 = arith.constant 0 : i32
    %c0_i32_1 = arith.constant 0 : i32
    return %c0_i32, %c0_i32_0 : i32, i32
  }
  func.func @transform_13(%arg0: i32) -> (i32, i32) {
    %c0_i32 = arith.constant 0 : i32
    %c0_i32_0 = arith.constant 0 : i32
    %c0_i32_1 = arith.constant 0 : i32
    return %c0_i32, %c0_i32_0 : i32, i32
  }
}

</mosaic_0001>

<bundles_post_ra>
// kernel: image_encoder_forward.1
= control target key start
LH: loop header
LB: loop body
LE: loop exit
PB: predicated region body
PF: predicated region fallthrough
CT: control target
= control target key end

     0   :  { %vm959_vm0 = vcmask 1040384   ;;  %vm960_vm1 = vcmask 1041408   ;;  %vm934_vm2 = vcmask 23552   ;;  %s28355_s0 = inlined_call_operand.vmem [shape: f32[512,3], index: 0, kind: input, shape index: {}]   ;;  %s28356_s1 = inlined_call_operand.vmem [shape: bf16[16,128,512], index: 1, kind: input, shape index: {}]   ;;  %s28357_s2 = inlined_call_operand.vmem [shape: bf16[16,3,32], index: 2, kind: input, shape index: {}]   ;;  %s28358_s3 = inlined_call_operand.vmem [shape: f32[1,32], index: 3, kind: input, shape index: {}]   ;;  %s28359_s4 = inlined_call_operand.vmem [shape: bf16[16,32,128], index: 4, kind: input, shape index: {}]   ;;  %s28360_s5 = inlined_call_operand.vmem [shape: bf16[16,32,64], index: 5, kind: input, shape index: {}]   ;;  %s28361_s6 = inlined_call_operand.vmem [shape: f32[1,64], index: 6, kind: input, shape index: {}]   ;;  %s28362_s7 = inlined_call_operand.vmem [shape: bf16[16,8,32], index: 7, kind: input, shape index: {}]   ;;  %s28363_s8 = inlined_call_operand.vmem [shape: bf16[16,64,128], index: 8, kind: input, shape index: {}]   ;;  %s28364_s9 = inlined_call_operand.vmem [shape: f32[1,128], index: 9, kind: input, shape index: {}]   ;;  %s28365_s10 = inlined_call_operand.vmem [shape: bf16[16,2,8], index: 10, kind: input, shape index: {}]   ;;  %s28366_s11 = inlined_call_operand.vmem [shape: bf16[16,128,64], index: 11, kind: input, shape index: {}]   ;;  %s28367_s12 = inlined_call_operand.vmem [shape: f32[1,64], index: 12, kind: input, shape index: {}]   ;;  %s28368_s13 = inlined_call_operand.hbm [shape: f32[2,64], index: 13, kind: output, shape index: {}]  }
   0x1   :  { %v62_v0 = vld [vmem:[%s28355_s0 + $0x80] sm:$0xff]  ;;  %v63_v1 = vld [vmem:[%s28355_s0 + $0x88] sm:$0xff]  ;;  %v64_v11 = vld [vmem:[%s28355_s0 + $0x90] sm:$0xff] }
   0x2   :  { %v94_v2 = vld [vmem:[%s28355_s0 + $0x180] sm:$0xff]  ;;  %v23108_v3 = vpack.c.bf16 %v63_v1, %v62_v0  ;;  %v95_v4 = vld [vmem:[%s28355_s0 + $0x188] sm:$0xff]  ;;  %v65_v13 = vld [vmem:[%s28355_s0 + $0x98] sm:$0xff] }
   0x3   :  { %v46_v5 = vld [vmem:[%s28355_s0] sm:$0xff]  ;;  %v47_v6 = vld [vmem:[%s28355_s0 + $0x8] sm:$0xff]  ;;  %v23119_v7 = vpack.c.bf16 %v95_v4, %v94_v2  ;;  %v96_v14 = vld [vmem:[%s28355_s0 + $0x190] sm:$0xff]  ;;  %v23146_v16 = vpack.c.bf16 %v65_v13, %v64_v11 }
   0x4   :  { %28453 = vst [vmem:[#allocation5_spill] sm:$0xff] %v23108_v3  ;;  %v23121_v8 = vpack.c.bf16 %v47_v6, %v46_v5  ;;  %v78_v9 = vld [vmem:[%s28355_s0 + $0x100] sm:$0xff]  ;;  %v79_v10 = vld [vmem:[%s28355_s0 + $0x108] sm:$0xff]  ;;  %17481 = vmatprep.subr.bf16.mxu0 %v23108_v3  ;;  %v97_v15 = vld [vmem:[%s28355_s0 + $0x198] sm:$0xff] }
   0x5   :  { %28454 = vst [vmem:[#allocation6_spill] sm:$0xff] %v23119_v7  ;;  %v23133_v12 = vpack.c.bf16 %v79_v10, %v78_v9  ;;  %17545 = vmatprep.subr.bf16.mxu1 %v23119_v7  ;;  %v23148_v17 = vpack.c.bf16 %v97_v15, %v96_v14  ;;  %v48_v18 = vld [vmem:[%s28355_s0 + $0x10] sm:$0xff]  ;;  %v49_v19 = vld [vmem:[%s28355_s0 + $0x18] sm:$0xff]  ;;  %v66_v23 = vld [vmem:[%s28355_s0 + $0xa0] sm:$0xff] }
   0x6   :  { %17482 = vmatpush3.bf16.msra.mxu0 %v23121_v8  ;;  %v80_v20 = vld [vmem:[%s28355_s0 + $0x110] sm:$0xff]  ;;  %v23160_v21 = vpack.c.bf16 %v49_v19, %v48_v18  ;;  %v81_v22 = vld [vmem:[%s28355_s0 + $0x118] sm:$0xff]  ;;  %v67_v24 = vld [vmem:[%s28355_s0 + $0xa8] sm:$0xff] }
   0x7   :  { %28455 = vst [vmem:[#allocation7_spill] sm:$0xff] %v23148_v17  ;;  %17546 = vmatpush3.bf16.msra.mxu1 %v23133_v12  ;;  %17483 = vmatprep.subr.bf16.mxu0 %v23146_v16  ;;  %v23173_v25 = vpack.c.bf16 %v81_v22, %v80_v20  ;;  %v23175_v26 = vpack.c.bf16 %v67_v24, %v66_v23  ;;  %v98_v27 = vld [vmem:[%s28355_s0 + $0x1a0] sm:$0xff]  ;;  %v99_v28 = vld [vmem:[%s28355_s0 + $0x1a8] sm:$0xff]  ;;  %v68_v35 = vld [vmem:[%s28355_s0 + $0xb0] sm:$0xff] }
   0x8   :  { %17547 = vmatprep.subr.bf16.mxu1 %v23148_v17  ;;  %v50_v29 = vld [vmem:[%s28355_s0 + $0x20] sm:$0xff]  ;;  %v23186_v30 = vpack.c.bf16 %v99_v28, %v98_v27  ;;  %v51_v31 = vld [vmem:[%s28355_s0 + $0x28] sm:$0xff]  ;;  %v69_v36 = vld [vmem:[%s28355_s0 + $0xb8] sm:$0xff] }
   0x9   :  { %28456 = vst [vmem:[#allocation8_spill] sm:$0xff] %v23173_v25  ;;  %v82_v32 = vld [vmem:[%s28355_s0 + $0x120] sm:$0xff]  ;;  %v83_v33 = vld [vmem:[%s28355_s0 + $0x128] sm:$0xff]  ;;  %v23198_v34 = vpack.c.bf16 %v51_v31, %v50_v29  ;;  %v100_v37 = vld [vmem:[%s28355_s0 + $0x1b0] sm:$0xff]  ;;  %v23213_v39 = vpack.c.bf16 %v69_v36, %v68_v35 }
   0xa   :  { %28457 = vst [vmem:[#allocation9_spill] sm:$0xff] %v23186_v30  ;;  %17484 = vmatpush3.bf16.msra.mxu0 %v23160_v21  ;;  %v23211_v38 = vpack.c.bf16 %v83_v33, %v82_v32  ;;  %v101_v40 = vld [vmem:[%s28355_s0 + $0x1b8] sm:$0xff]  ;;  %v52_v41 = vld [vmem:[%s28355_s0 + $0x30] sm:$0xff]  ;;  %v70_v46 = vld [vmem:[%s28355_s0 + $0xc0] sm:$0xff] }
   0xb   :  { %17548 = vmatpush3.bf16.msra.mxu1 %v23173_v25  ;;  %17485 = vmatprep.subr.bf16.mxu0 %v23175_v26  ;;  %v53_v42 = vld [vmem:[%s28355_s0 + $0x38] sm:$0xff]  ;;  %v23225_v43 = vpack.c.bf16 %v101_v40, %v100_v37  ;;  %v84_v44 = vld [vmem:[%s28355_s0 + $0x130] sm:$0xff]  ;;  %v71_v47 = vld [vmem:[%s28355_s0 + $0xc8] sm:$0xff] }
   0xc   :  { %28458 = vst [vmem:[#allocation10_spill] sm:$0xff] %v23211_v38  ;;  %17549 = vmatprep.subr.bf16.mxu1 %v23186_v30  ;;  %v85_v45 = vld [vmem:[%s28355_s0 + $0x138] sm:$0xff]  ;;  %v102_v48 = vld [vmem:[%s28355_s0 + $0x1c0] sm:$0xff]  ;;  %v103_v49 = vld [vmem:[%s28355_s0 + $0x1c8] sm:$0xff]  ;;  %v23246_v50 = vpack.c.bf16 %v53_v42, %v52_v41  ;;  %v23252_v52 = vpack.c.bf16 %v71_v47, %v70_v46 }
   0xd   :  { %28459 = vst [vmem:[#allocation11_spill] sm:$0xff] %v23225_v43  ;;  %v23250_v51 = vpack.c.bf16 %v85_v45, %v84_v44  ;;  %v54_v53 = vld [vmem:[%s28355_s0 + $0x40] sm:$0xff]  ;;  %v55_v54 = vld [vmem:[%s28355_s0 + $0x48] sm:$0xff]  ;;  %v23264_v56 = vpack.c.bf16 %v103_v49, %v102_v48  ;;  %v72_v58 = vld [vmem:[%s28355_s0 + $0xd0] sm:$0xff] }
   0xe   :  { %17486 = vmatpush3.bf16.msra.mxu0 %v23198_v34  ;;  %v86_v55 = vld [vmem:[%s28355_s0 + $0x140] sm:$0xff]  ;;  %v87_v57 = vld [vmem:[%s28355_s0 + $0x148] sm:$0xff]  ;;  %v73_v59 = vld [vmem:[%s28355_s0 + $0xd8] sm:$0xff]  ;;  %v23282_v62 = vpack.c.bf16 %v55_v54, %v54_v53 }
   0xf   :  { %17550 = vmatpush3.bf16.msra.mxu1 %v23211_v38  ;;  %17487 = vmatprep.subr.bf16.mxu0 %v23213_v39  ;;  %28460 = vst [vmem:[#allocation12_spill] sm:$0xff] %v23250_v51  ;;  %28461 = vst [vmem:[#allocation13_spill] sm:$0xff] %v23264_v56  ;;  %v104_v60 = vld [vmem:[%s28355_s0 + $0x1d0] sm:$0xff]  ;;  %v105_v61 = vld [vmem:[%s28355_s0 + $0x1d8] sm:$0xff]  ;;  %v23289_v0 = vpack.c.bf16 %v87_v57, %v86_v55  ;;  %v23291_v1 = vpack.c.bf16 %v73_v59, %v72_v58 }
  0x10   :  { %17551 = vmatprep.subr.bf16.mxu1 %v23225_v43  ;;  %v56_v63 = vld [vmem:[%s28355_s0 + $0x50] sm:$0xff]  ;;  %v57_v2 = vld [vmem:[%s28355_s0 + $0x58] sm:$0xff]  ;;  %v23303_v6 = vpack.c.bf16 %v105_v61, %v104_v60  ;;  %v74_v9 = vld [vmem:[%s28355_s0 + $0xe0] sm:$0xff] }
  0x11   :  { %28462 = vst [vmem:[#allocation14_spill] sm:$0xff] %v23289_v0  ;;  %28463 = vst [vmem:[#allocation15_spill] sm:$0xff] %v23291_v1  ;;  %v88_v4 = vld [vmem:[%s28355_s0 + $0x150] sm:$0xff]  ;;  %v89_v5 = vld [vmem:[%s28355_s0 + $0x158] sm:$0xff]  ;;  %v23324_v18 = vpack.c.bf16 %v57_v2, %v56_v63 }
  0x12   :  { %17488 = vmatpush3.bf16.msra.mxu0 %v23246_v50  ;;  %28464 = vst [vmem:[#allocation16_spill] sm:$0xff] %v23303_v6  ;;  %v75_v10 = vld [vmem:[%s28355_s0 + $0xe8] sm:$0xff]  ;;  %v106_v11 = vld [vmem:[%s28355_s0 + $0x1e0] sm:$0xff]  ;;  %v76_v22 = vld [vmem:[%s28355_s0 + $0xf0] sm:$0xff]  ;;  %v23337_v23 = vpack.c.bf16 %v89_v5, %v88_v4 }
  0x13   :  { %17552 = vmatpush3.bf16.msra.mxu1 %v23250_v51  ;;  %17489 = vmatprep.subr.bf16.mxu0 %v23252_v52  ;;  %v107_v13 = vld [vmem:[%s28355_s0 + $0x1e8] sm:$0xff]  ;;  %v58_v14 = vld [vmem:[%s28355_s0 + $0x60] sm:$0xff]  ;;  %28465 = vst [vmem:[#allocation17_spill] sm:$0xff] %v23324_v18  ;;  %v23339_v24 = vpack.c.bf16 %v75_v10, %v74_v9  ;;  %v77_v27 = vld [vmem:[%s28355_s0 + $0xf8] sm:$0xff] }
  0x14   :  { %17553 = vmatprep.subr.bf16.mxu1 %v23264_v56  ;;  %v59_v15 = vld [vmem:[%s28355_s0 + $0x68] sm:$0xff]  ;;  %v90_v19 = vld [vmem:[%s28355_s0 + $0x160] sm:$0xff]  ;;  %28466 = vst [vmem:[#allocation18_spill] sm:$0xff] %v23337_v23  ;;  %v23345_v28 = vpack.c.bf16 %v107_v13, %v106_v11  ;;  %v108_v29 = vld [vmem:[%s28355_s0 + $0x1f0] sm:$0xff]  ;;  %v23369_v40 = vpack.c.bf16 %v77_v27, %v76_v22 }
  0x15   :  { %v91_v20 = vld [vmem:[%s28355_s0 + $0x168] sm:$0xff]  ;;  %28467 = vst [vmem:[#allocation19_spill] sm:$0xff] %v23339_v24  ;;  %v21979_v31 = vld [vmem:[%s28356_s1 + $0x4] ss:$16 sps:$4 sm:$0xff]   ;;  %v109_v32 = vld [vmem:[%s28355_s0 + $0x1f8] sm:$0xff]  ;;  %v23360_v35 = vpack.c.bf16 %v59_v15, %v58_v14 }
  0x16   :  { %17490 = vmatpush3.bf16.msra.mxu0 %v23282_v62  ;;  %28468 = vst [vmem:[#allocation20_spill] sm:$0xff] %v23345_v28  ;;  %v21982_v33 = vld [vmem:[%s28356_s1 + $0xc] ss:$16 sps:$4 sm:$0xff]   ;;  %v60_v36 = vld [vmem:[%s28355_s0 + $0x70] sm:$0xff]  ;;  %366 = vmatprep.mubr.bf16.mxu0 %v21979_v31  ;;  %v23367_v37 = vpack.c.bf16 %v91_v20, %v90_v19  ;;  %28471 = vst [vmem:[#allocation23_spill] sm:$0xff] %v23369_v40  ;;  %v23375_v42 = vpack.c.bf16 %v109_v32, %v108_v29 }
  0x17   :  { %17554 = vmatpush3.bf16.msra.mxu1 %v23289_v0  ;;  %17491 = vmatprep.subr.bf16.mxu0 %v23291_v1  ;;  %28469 = vst [vmem:[#allocation21_spill] sm:$0xff] %v23360_v35  ;;  %v61_v41 = vld [vmem:[%s28355_s0 + $0x78] sm:$0xff]  ;;  %v92_v44 = vld [vmem:[%s28355_s0 + $0x170] sm:$0xff] }
  0x18   :  { %17555 = vmatprep.subr.bf16.mxu1 %v23303_v6  ;;  %28470 = vst [vmem:[#allocation22_spill] sm:$0xff] %v23367_v37  ;;  %28472 = vst [vmem:[#allocation24_spill] sm:$0xff] %v23375_v42  ;;  %v93_v45 = vld [vmem:[%s28355_s0 + $0x178] sm:$0xff]  ;;  %463 = vmatprep.mubr.bf16.mxu1 %v21982_v33  ;;  %v23384_v46 = vpack.c.bf16 %v61_v41, %v60_v36  ;;  %v21977_v48 = vld [vmem:[%s28356_s1] ss:$16 sps:$4 sm:$0xff]  }
  0x19   :  { %v23388_v47 = vpack.c.bf16 %v93_v45, %v92_v44  ;;  %v21980_v49 = vld [vmem:[%s28356_s1 + $0x8] ss:$16 sps:$4 sm:$0xff]   ;;  %v21983_v53 = vld [vmem:[%s28356_s1 + $0x24] ss:$16 sps:$4 sm:$0xff]   ;;  %v21985_v54 = vld [vmem:[%s28356_s1 + $0x2c] ss:$16 sps:$4 sm:$0xff]  }
  0x1a   :  { %17492 = vmatpush3.bf16.msra.mxu0 %v23324_v18  ;;  %28473 = vst [vmem:[#allocation25_spill] sm:$0xff] %v23384_v46  ;;  %v21987_v55 = vld [vmem:[%s28356_s1 + $0x20] ss:$16 sps:$4 sm:$0xff]   ;;  %v21988_v57 = vld [vmem:[%s28356_s1 + $0x28] ss:$16 sps:$4 sm:$0xff]  }
  0x1b   :  { %17556 = vmatpush3.bf16.msra.mxu1 %v23337_v23  ;;  %17493 = vmatprep.subr.bf16.mxu0 %v23339_v24  ;;  %28474 = vst [vmem:[#allocation26_spill] sm:$0xff] %v23388_v47  ;;  %v21989_v58 = vld [vmem:[%s28356_s1 + $0x44] ss:$16 sps:$4 sm:$0xff]   ;;  %v21991_v59 = vld [vmem:[%s28356_s1 + $0x4c] ss:$16 sps:$4 sm:$0xff]  }
  0x1c   :  { %17557 = vmatprep.subr.bf16.mxu1 %v23345_v28  ;;  %v21993_v60 = vld [vmem:[%s28356_s1 + $0x40] ss:$16 sps:$4 sm:$0xff]   ;;  %v21994_v61 = vld [vmem:[%s28356_s1 + $0x48] ss:$16 sps:$4 sm:$0xff]   ;;  %v21995_v63 = vld [vmem:[%s28356_s1 + $0x64] ss:$16 sps:$4 sm:$0xff]  }
  0x1d   :  { %v21997_v2 = vld [vmem:[%s28356_s1 + $0x6c] ss:$16 sps:$4 sm:$0xff]   ;;  %v21999_v4 = vld [vmem:[%s28356_s1 + $0x60] ss:$16 sps:$4 sm:$0xff]   ;;  %v22000_v5 = vld [vmem:[%s28356_s1 + $0x68] ss:$16 sps:$4 sm:$0xff]  }
  0x1e   :  { %17494 = vmatpush3.bf16.msra.mxu0 %v23360_v35  ;;  %v22001_v9 = vld [vmem:[%s28356_s1 + $0x84] ss:$16 sps:$4 sm:$0xff]   ;;  %v22003_v10 = vld [vmem:[%s28356_s1 + $0x8c] ss:$16 sps:$4 sm:$0xff]   ;;  %v22005_v11 = vld [vmem:[%s28356_s1 + $0x80] ss:$16 sps:$4 sm:$0xff]  }
  0x1f   :  { %17558 = vmatpush3.bf16.msra.mxu1 %v23367_v37  ;;  %17495 = vmatprep.subr.bf16.mxu0 %v23369_v40  ;;  %v22006_v13 = vld [vmem:[%s28356_s1 + $0x88] ss:$16 sps:$4 sm:$0xff]   ;;  %v22007_v14 = vld [vmem:[%s28356_s1 + $0xa4] ss:$16 sps:$4 sm:$0xff]   ;;  %v22009_v15 = vld [vmem:[%s28356_s1 + $0xac] ss:$16 sps:$4 sm:$0xff]  }
  0x20   :  { %17559 = vmatprep.subr.bf16.mxu1 %v23375_v42  ;;  %v22011_v19 = vld [vmem:[%s28356_s1 + $0xa0] ss:$16 sps:$4 sm:$0xff]   ;;  %v22012_v20 = vld [vmem:[%s28356_s1 + $0xa8] ss:$16 sps:$4 sm:$0xff]   ;;  %v22013_v22 = vld [vmem:[%s28356_s1 + $0xc4] ss:$16 sps:$4 sm:$0xff]  }
  0x21   :  { %v22015_v27 = vld [vmem:[%s28356_s1 + $0xcc] ss:$16 sps:$4 sm:$0xff]   ;;  %v22017_v29 = vld [vmem:[%s28356_s1 + $0xc0] ss:$16 sps:$4 sm:$0xff]   ;;  %v22018_v31 = vld [vmem:[%s28356_s1 + $0xc8] ss:$16 sps:$4 sm:$0xff]  }
  0x22   :  { %17496 = vmatpush3.bf16.msra.mxu0 %v23384_v46  ;;  %v22019_v32 = vld [vmem:[%s28356_s1 + $0xe4] ss:$16 sps:$4 sm:$0xff]   ;;  %v22021_v33 = vld [vmem:[%s28356_s1 + $0xec] ss:$16 sps:$4 sm:$0xff]   ;;  %v22023_v36 = vld [vmem:[%s28356_s1 + $0xe0] ss:$16 sps:$4 sm:$0xff]  }
  0x23   :  { %17560 = vmatpush3.bf16.msra.mxu1 %v23388_v47  ;;  %17609 = vmatprep.subr.bf16.mxu0 %v23108_v3  ;;  %v22024_v41 = vld [vmem:[%s28356_s1 + $0xe8] ss:$16 sps:$4 sm:$0xff]   ;;  %v22027_v44 = vld [vmem:[%s28356_s1 + $0x104] ss:$16 sps:$4 sm:$0xff]   ;;  %v22030_v45 = vld [vmem:[%s28356_s1 + $0x10c] ss:$16 sps:$4 sm:$0xff]  }
  0x24   :  { %17673 = vmatprep.subr.bf16.mxu1 %v23119_v7 }
  0x25   :  { %367 = vmatmul.mubr.bf16.vlgmr.msra.gmra.mrb[0].mxu0 %v21977_v48  ;;  %v22025_v48 = vld [vmem:[%s28356_s1 + $0x100] ss:$16 sps:$4 sm:$0xff]  }
  0x26   :  { %464 = vmatmul.mubr.bf16.vlgmr.msra.gmra.mrb[0].mxu1 %v21980_v49  ;;  %374 = vmatprep.mubr.bf16.mxu0 %v21983_v53  ;;  %v22028_v49 = vld [vmem:[%s28356_s1 + $0x108] ss:$16 sps:$4 sm:$0xff]   ;;  %v22031_v53 = vld [vmem:[%s28356_s1 + $0x124] ss:$16 sps:$4 sm:$0xff]  }
  0x27   :  { %471 = vmatprep.mubr.bf16.mxu1 %v21985_v54  ;;  %17610 = vmatpush3.bf16.msra.mxu0 %v23121_v8  ;;  %v22033_v54 = vld [vmem:[%s28356_s1 + $0x12c] ss:$16 sps:$4 sm:$0xff]  }
  0x28   :  { %17674 = vmatpush3.bf16.msra.mxu1 %v23133_v12  ;;  %17611 = vmatprep.subr.bf16.mxu0 %v23146_v16 }
  0x29   :  { %17675 = vmatprep.subr.bf16.mxu1 %v23148_v17 }
  0x2b   :  { %17612 = vmatpush3.bf16.msra.mxu0 %v23160_v21 }
  0x2c   :  { %17676 = vmatpush3.bf16.msra.mxu1 %v23173_v25  ;;  %17613 = vmatprep.subr.bf16.mxu0 %v23175_v26 }
  0x2d   :  { %375 = vmatmul.mubr.bf16.gmra.mrb[4].mxu0 %v21987_v55  ;;  %17677 = vmatprep.subr.bf16.mxu1 %v23186_v30  ;;  %v22035_v55 = vld [vmem:[%s28356_s1 + $0x120] ss:$16 sps:$4 sm:$0xff]  }
  0x2e   :  { %472 = vmatmul.mubr.bf16.gmra.mrb[4].mxu1 %v21988_v57  ;;  %382 = vmatprep.mubr.bf16.mxu0 %v21989_v58  ;;  %v22036_v57 = vld [vmem:[%s28356_s1 + $0x128] ss:$16 sps:$4 sm:$0xff]   ;;  %v22037_v58 = vld [vmem:[%s28356_s1 + $0x144] ss:$16 sps:$4 sm:$0xff]  }
  0x2f   :  { %479 = vmatprep.mubr.bf16.mxu1 %v21991_v59  ;;  %17614 = vmatpush3.bf16.msra.mxu0 %v23198_v34  ;;  %v22039_v59 = vld [vmem:[%s28356_s1 + $0x14c] ss:$16 sps:$4 sm:$0xff]  }
  0x30   :  { %17678 = vmatpush3.bf16.msra.mxu1 %v23211_v38  ;;  %17615 = vmatprep.subr.bf16.mxu0 %v23213_v39 }
  0x31   :  { %17679 = vmatprep.subr.bf16.mxu1 %v23225_v43 }
  0x33   :  { %17616 = vmatpush3.bf16.msra.mxu0 %v23246_v50 }
  0x34   :  { %17680 = vmatpush3.bf16.msra.mxu1 %v23250_v51  ;;  %17617 = vmatprep.subr.bf16.mxu0 %v23252_v52 }
  0x35   :  { %383 = vmatmul.mubr.bf16.gmra.mrb[8].mxu0 %v21993_v60  ;;  %17681 = vmatprep.subr.bf16.mxu1 %v23264_v56  ;;  %v22041_v60 = vld [vmem:[%s28356_s1 + $0x140] ss:$16 sps:$4 sm:$0xff]  }
  0x36   :  { %480 = vmatmul.mubr.bf16.gmra.mrb[8].mxu1 %v21994_v61  ;;  %390 = vmatprep.mubr.bf16.mxu0 %v21995_v63  ;;  %v22042_v61 = vld [vmem:[%s28356_s1 + $0x148] ss:$16 sps:$4 sm:$0xff]   ;;  %v22043_v63 = vld [vmem:[%s28356_s1 + $0x164] ss:$16 sps:$4 sm:$0xff]  }
  0x37   :  { %487 = vmatprep.mubr.bf16.mxu1 %v21997_v2  ;;  %17618 = vmatpush3.bf16.msra.mxu0 %v23282_v62  ;;  %v22045_v2 = vld [vmem:[%s28356_s1 + $0x16c] ss:$16 sps:$4 sm:$0xff]  }
  0x38   :  { %17682 = vmatpush3.bf16.msra.mxu1 %v23289_v0  ;;  %17619 = vmatprep.subr.bf16.mxu0 %v23291_v1 }
  0x39   :  { %17683 = vmatprep.subr.bf16.mxu1 %v23303_v6 }
  0x3b   :  { %17620 = vmatpush3.bf16.msra.mxu0 %v23324_v18 }
  0x3c   :  { %17684 = vmatpush3.bf16.msra.mxu1 %v23337_v23  ;;  %17621 = vmatprep.subr.bf16.mxu0 %v23339_v24 }
  0x3d   :  { %391 = vmatmul.mubr.bf16.gmra.mrb[12].mxu0 %v21999_v4  ;;  %17685 = vmatprep.subr.bf16.mxu1 %v23345_v28  ;;  %v22047_v4 = vld [vmem:[%s28356_s1 + $0x160] ss:$16 sps:$4 sm:$0xff]  }
  0x3e   :  { %488 = vmatmul.mubr.bf16.gmra.mrb[12].mxu1 %v22000_v5  ;;  %398 = vmatprep.mubr.bf16.mxu0 %v22001_v9  ;;  %v22048_v5 = vld [vmem:[%s28356_s1 + $0x168] ss:$16 sps:$4 sm:$0xff]   ;;  %v22049_v9 = vld [vmem:[%s28356_s1 + $0x184] ss:$16 sps:$4 sm:$0xff]  }
  0x3f   :  { %495 = vmatprep.mubr.bf16.mxu1 %v22003_v10  ;;  %17622 = vmatpush3.bf16.msra.mxu0 %v23360_v35  ;;  %v22051_v10 = vld [vmem:[%s28356_s1 + $0x18c] ss:$16 sps:$4 sm:$0xff]  }
  0x40   :  { %17686 = vmatpush3.bf16.msra.mxu1 %v23367_v37  ;;  %17623 = vmatprep.subr.bf16.mxu0 %v23369_v40 }
  0x41   :  { %17687 = vmatprep.subr.bf16.mxu1 %v23375_v42 }
  0x43   :  { %17624 = vmatpush3.bf16.msra.mxu0 %v23384_v46 }
  0x44   :  { %17688 = vmatpush3.bf16.msra.mxu1 %v23388_v47 }
  0x45   :  { %399 = vmatmul.mubr.bf16.gmra.mrb[16].mxu0 %v22005_v11  ;;  %17755 = vmatprep.subr.bf16.mxu1 %v23108_v3  ;;  %v22053_v11 = vld [vmem:[%s28356_s1 + $0x180] ss:$16 sps:$4 sm:$0xff]  }
  0x46   :  { %496 = vmatmul.mubr.bf16.gmra.mrb[16].mxu1 %v22006_v13  ;;  %406 = vmatprep.mubr.bf16.mxu0 %v22007_v14  ;;  %v22054_v13 = vld [vmem:[%s28356_s1 + $0x188] ss:$16 sps:$4 sm:$0xff]   ;;  %v22055_v14 = vld [vmem:[%s28356_s1 + $0x1a4] ss:$16 sps:$4 sm:$0xff]  }
  0x47   :  { %503 = vmatprep.mubr.bf16.mxu1 %v22009_v15  ;;  %v22057_v15 = vld [vmem:[%s28356_s1 + $0x1ac] ss:$16 sps:$4 sm:$0xff]  }
  0x4d   :  { %407 = vmatmul.mubr.bf16.gmra.mrb[20].mxu0 %v22011_v19  ;;  %v22059_v19 = vld [vmem:[%s28356_s1 + $0x1a0] ss:$16 sps:$4 sm:$0xff]  }
  0x4e   :  { %504 = vmatmul.mubr.bf16.gmra.mrb[20].mxu1 %v22012_v20  ;;  %414 = vmatprep.mubr.bf16.mxu0 %v22013_v22  ;;  %v22060_v20 = vld [vmem:[%s28356_s1 + $0x1a8] ss:$16 sps:$4 sm:$0xff]   ;;  %v22061_v22 = vld [vmem:[%s28356_s1 + $0x1c4] ss:$16 sps:$4 sm:$0xff]  }
  0x4f   :  { %511 = vmatprep.mubr.bf16.mxu1 %v22015_v27  ;;  %v22063_v27 = vld [vmem:[%s28356_s1 + $0x1cc] ss:$16 sps:$4 sm:$0xff]  }
  0x55   :  { %415 = vmatmul.mubr.bf16.gmra.mrb[24].mxu0 %v22017_v29  ;;  %v22065_v29 = vld [vmem:[%s28356_s1 + $0x1c0] ss:$16 sps:$4 sm:$0xff]  }
  0x56   :  { %512 = vmatmul.mubr.bf16.gmra.mrb[24].mxu1 %v22018_v31  ;;  %422 = vmatprep.mubr.bf16.mxu0 %v22019_v32  ;;  %v22066_v31 = vld [vmem:[%s28356_s1 + $0x1c8] ss:$16 sps:$4 sm:$0xff]   ;;  %v22067_v32 = vld [vmem:[%s28356_s1 + $0x1e4] ss:$16 sps:$4 sm:$0xff]  }
  0x57   :  { %519 = vmatprep.mubr.bf16.mxu1 %v22021_v33  ;;  %v22069_v33 = vld [vmem:[%s28356_s1 + $0x1ec] ss:$16 sps:$4 sm:$0xff]  }
  0x5d   :  { %423 = vmatmul.mubr.bf16.gmra.mrb[28].mxu0 %v22023_v36  ;;  %v22071_v36 = vld [vmem:[%s28356_s1 + $0x1e0] ss:$16 sps:$4 sm:$0xff]  }
  0x5e   :  { %520 = vmatmul.mubr.bf16.gmra.mrb[28].mxu1 %v22024_v41  ;;  %762 = vmatprep.mubr.bf16.mxu0 %v22027_v44  ;;  %v22072_v41 = vld [vmem:[%s28356_s1 + $0x1e8] ss:$16 sps:$4 sm:$0xff]   ;;  %v22075_v44 = vld [vmem:[%s28356_s1 + $0x204] ss:$16 sps:$4 sm:$0xff]  }
  0x5f   :  { %859 = vmatprep.mubr.bf16.mxu1 %v22030_v45  ;;  %v22073_v45 = vld [vmem:[%s28356_s1 + $0x200] ss:$16 sps:$4 sm:$0xff]  }
  0x65   :  { %763 = vmatmul.mubr.bf16.vlgmr.msra.gmra.mrb[32].mxu0 %v22025_v48  ;;  %v22076_v48 = vld [vmem:[%s28356_s1 + $0x224] ss:$16 sps:$4 sm:$0xff]  }
  0x66   :  { %860 = vmatmul.mubr.bf16.vlgmr.msra.gmra.mrb[32].mxu1 %v22028_v49  ;;  %770 = vmatprep.mubr.bf16.mxu0 %v22031_v53  ;;  %v22078_v49 = vld [vmem:[%s28356_s1 + $0x220] ss:$16 sps:$4 sm:$0xff]   ;;  %v22079_v53 = vld [vmem:[%s28356_s1 + $0x244] ss:$16 sps:$4 sm:$0xff]  }
  0x67   :  { %867 = vmatprep.mubr.bf16.mxu1 %v22033_v54  ;;  %17756 = vmatpush3.bf16.msra.mxu1 %v23121_v8  ;;  %v22081_v54 = vld [vmem:[%s28356_s1 + $0x240] ss:$16 sps:$4 sm:$0xff]  }
  0x68   :  { %17757 = vmatprep.subr.bf16.mxu1 %v23146_v16 }
  0x6b   :  { %17758 = vmatpush3.bf16.msra.mxu1 %v23160_v21 }
  0x6c   :  { %17759 = vmatprep.subr.bf16.mxu1 %v23175_v26 }
  0x6d   :  { %771 = vmatmul.mubr.bf16.gmra.mrb[36].mxu0 %v22035_v55  ;;  %v22082_v55 = vld [vmem:[%s28356_s1 + $0x264] ss:$16 sps:$4 sm:$0xff]  }
  0x6e   :  { %868 = vmatmul.mubr.bf16.gmra.mrb[36].mxu1 %v22036_v57  ;;  %778 = vmatprep.mubr.bf16.mxu0 %v22037_v58  ;;  %v22084_v57 = vld [vmem:[%s28356_s1 + $0x260] ss:$16 sps:$4 sm:$0xff]   ;;  %v22085_v58 = vld [vmem:[%s28356_s1 + $0x284] ss:$16 sps:$4 sm:$0xff]  }
  0x6f   :  { %875 = vmatprep.mubr.bf16.mxu1 %v22039_v59  ;;  %17760 = vmatpush3.bf16.msra.mxu1 %v23198_v34  ;;  %v22087_v59 = vld [vmem:[%s28356_s1 + $0x280] ss:$16 sps:$4 sm:$0xff]  }
  0x70   :  { %17761 = vmatprep.subr.bf16.mxu1 %v23213_v39 }
  0x73   :  { %17762 = vmatpush3.bf16.msra.mxu1 %v23246_v50 }
  0x74   :  { %17763 = vmatprep.subr.bf16.mxu1 %v23252_v52 }
  0x75   :  { %779 = vmatmul.mubr.bf16.gmra.mrb[40].mxu0 %v22041_v60  ;;  %v22088_v60 = vld [vmem:[%s28356_s1 + $0x2a4] ss:$16 sps:$4 sm:$0xff]  }
  0x76   :  { %876 = vmatmul.mubr.bf16.gmra.mrb[40].mxu1 %v22042_v61  ;;  %786 = vmatprep.mubr.bf16.mxu0 %v22043_v63  ;;  %v23025_v61 = vmov 65535  }
  0x77   :  { %883 = vmatprep.mubr.bf16.mxu1 %v22045_v2  ;;  %17764 = vmatpush3.bf16.msra.mxu1 %v23282_v62  ;;  %v961_v63 = vsel %vm959_vm0, 4294967295, %v23025_v61  ;;  %v15592_v2 = vld [vmem:[%s28357_s2 + $0x2] sm:$0x3] }
  0x78   :  { %17765 = vmatprep.subr.bf16.mxu1 %v23291_v1 }
  0x7b   :  { %17766 = vmatpush3.bf16.msra.mxu1 %v23324_v18 }
  0x7c   :  { %17767 = vmatprep.subr.bf16.mxu1 %v23339_v24 }
  0x7d   :  { %787 = vmatmul.mubr.bf16.gmra.mrb[44].mxu0 %v22047_v4  ;;  %v23679_v4 = vsel %vm960_vm1, %v961_v63, 0 }
  0x7e   :  { %884 = vmatmul.mubr.bf16.gmra.mrb[44].mxu1 %v22048_v5  ;;  %794 = vmatprep.mubr.bf16.mxu0 %v22049_v9  ;;  %v964_v5 = vand.u32 %v15592_v2, %v23679_v4  ;;  %v22090_v9 = vld [vmem:[%s28356_s1 + $0x2a0] ss:$16 sps:$4 sm:$0xff]  }
  0x7f   :  { %891 = vmatprep.mubr.bf16.mxu1 %v22051_v10  ;;  %17768 = vmatpush3.bf16.msra.mxu1 %v23360_v35  ;;  %v22091_v10 = vld [vmem:[%s28356_s1 + $0x2c4] ss:$16 sps:$4 sm:$0xff]  }
  0x80   :  { %17769 = vmatprep.subr.bf16.mxu1 %v23369_v40  ;;  %20201 = vmatprep.subr.bf16.mxu0 %v964_v5 }
  0x81   :  { %20202 = vmatpush3.bf16.msra.mxu0 %v964_v5 }
  0x83   :  { %17770 = vmatpush3.bf16.msra.mxu1 %v23384_v46 }
  0x84   :  { %17892 = vmatprep.subr.bf16.mxu1 %v23108_v3 }
  0x85   :  { %795 = vmatmul.mubr.bf16.gmra.mrb[48].mxu0 %v22053_v11  ;;  %v22093_v11 = vld [vmem:[%s28356_s1 + $0x2c0] ss:$16 sps:$4 sm:$0xff]  }
  0x86   :  { %892 = vmatmul.mubr.bf16.gmra.mrb[48].mxu1 %v22054_v13  ;;  %802 = vmatprep.mubr.bf16.mxu0 %v22055_v14  ;;  %v22094_v13 = vld [vmem:[%s28356_s1 + $0x2e4] ss:$16 sps:$4 sm:$0xff]   ;;  %v22096_v14 = vld [vmem:[%s28356_s1 + $0x2e0] ss:$16 sps:$4 sm:$0xff]  }
  0x87   :  { %899 = vmatprep.mubr.bf16.mxu1 %v22057_v15  ;;  %v22099_v15 = vld [vmem:[%s28356_s1 + $0x304] ss:$16 sps:$4 sm:$0xff]  }
  0x8d   :  { %803 = vmatmul.mubr.bf16.gmra.mrb[52].mxu0 %v22059_v19  ;;  %v22097_v19 = vld [vmem:[%s28356_s1 + $0x300] ss:$16 sps:$4 sm:$0xff]  }
  0x8e   :  { %900 = vmatmul.mubr.bf16.gmra.mrb[52].mxu1 %v22060_v20  ;;  %810 = vmatprep.mubr.bf16.mxu0 %v22061_v22  ;;  %v22100_v20 = vld [vmem:[%s28356_s1 + $0x324] ss:$16 sps:$4 sm:$0xff]   ;;  %v22102_v22 = vld [vmem:[%s28356_s1 + $0x320] ss:$16 sps:$4 sm:$0xff]  }
  0x8f   :  { %907 = vmatprep.mubr.bf16.mxu1 %v22063_v27  ;;  %v22103_v27 = vld [vmem:[%s28356_s1 + $0x344] ss:$16 sps:$4 sm:$0xff]  }
  0x95   :  { %811 = vmatmul.mubr.bf16.gmra.mrb[56].mxu0 %v22065_v29  ;;  %v22105_v29 = vld [vmem:[%s28356_s1 + $0x340] ss:$16 sps:$4 sm:$0xff]  }
  0x96   :  { %908 = vmatmul.mubr.bf16.gmra.mrb[56].mxu1 %v22066_v31  ;;  %818 = vmatprep.mubr.bf16.mxu0 %v22067_v32  ;;  %v22106_v31 = vld [vmem:[%s28356_s1 + $0x364] ss:$16 sps:$4 sm:$0xff]  }
  0x97   :  { %915 = vmatprep.mubr.bf16.mxu1 %v22069_v33  ;;  %v22108_v33 = vld [vmem:[%s28356_s1 + $0x360] ss:$16 sps:$4 sm:$0xff]  }
  0x9d   :  { %819 = vmatmul.mubr.bf16.gmra.mrb[60].mxu0 %v22071_v36 }
  0x9e   :  { %916 = vmatmul.mubr.bf16.gmra.mrb[60].mxu1 %v22072_v41 }
  0x9f   :  { %1412 = vmatprep.mubr.bf16.mxu1 %v22075_v44  ;;  %v22109_v44 = vld [vmem:[%s28356_s1 + $0x384] ss:$16 sps:$4 sm:$0xff]  }
  0xa6   :  { %1413 = vmatmul.mubr.bf16.vlgmr.msra.gmra.mrb[64].mxu1 %v22073_v45 }
  0xa7   :  { %1420 = vmatprep.mubr.bf16.mxu1 %v22076_v48  ;;  %17893 = vmatpush3.bf16.msra.mxu1 %v23121_v8 }
  0xa8   :  { %17894 = vmatprep.subr.bf16.mxu1 %v23146_v16 }
  0xab   :  { %17895 = vmatpush3.bf16.msra.mxu1 %v23160_v21 }
  0xac   :  { %17896 = vmatprep.subr.bf16.mxu1 %v23175_v26 }
  0xae   :  { %1421 = vmatmul.mubr.bf16.gmra.mrb[68].mxu1 %v22078_v49 }
  0xaf   :  { %1428 = vmatprep.mubr.bf16.mxu1 %v22079_v53  ;;  %17897 = vmatpush3.bf16.msra.mxu1 %v23198_v34 }
  0xb0   :  { %17898 = vmatprep.subr.bf16.mxu1 %v23213_v39 }
  0xb3   :  { %17899 = vmatpush3.bf16.msra.mxu1 %v23246_v50 }
  0xb4   :  { %17900 = vmatprep.subr.bf16.mxu1 %v23252_v52 }
  0xb6   :  { %1429 = vmatmul.mubr.bf16.gmra.mrb[72].mxu1 %v22081_v54 }
  0xb7   :  { %1436 = vmatprep.mubr.bf16.mxu1 %v22082_v55  ;;  %17901 = vmatpush3.bf16.msra.mxu1 %v23282_v62 }
  0xb8   :  { %17902 = vmatprep.subr.bf16.mxu1 %v23291_v1 }
  0xbb   :  { %17903 = vmatpush3.bf16.msra.mxu1 %v23324_v18 }
  0xbc   :  { %17904 = vmatprep.subr.bf16.mxu1 %v23339_v24 }
  0xbe   :  { %1437 = vmatmul.mubr.bf16.gmra.mrb[76].mxu1 %v22084_v57 }
  0xbf   :  { %1444 = vmatprep.mubr.bf16.mxu1 %v22085_v58  ;;  %17905 = vmatpush3.bf16.msra.mxu1 %v23360_v35 }
  0xc0   :  { %17906 = vmatprep.subr.bf16.mxu1 %v23369_v40 }
  0xc3   :  { %17907 = vmatpush3.bf16.msra.mxu1 %v23384_v46 }
  0xc4   :  { %17956 = vmatprep.subr.bf16.mxu1 %v23119_v7 }
  0xc6   :  { %1445 = vmatmul.mubr.bf16.gmra.mrb[80].mxu1 %v22087_v59  ;;  %v536_v59 = vld [vmem:[%s28357_s2] sm:$0x3] }
  0xc7   :  { %1452 = vmatprep.mubr.bf16.mxu1 %v22088_v60  ;;  %v23743_v63 = vand.u32 %v23679_v4, %v536_v59 }
  0xc9   :  { %20219 = vmatprep.subr.bf16.mxu0 %v23743_v63 }
  0xce   :  { %1453 = vmatmul.mubr.bf16.gmra.mrb[84].mxu1 %v22090_v9  ;;  %v22111_v9 = vld [vmem:[%s28356_s1 + $0x380] ss:$16 sps:$4 sm:$0xff]  }
  0xcf   :  { %1460 = vmatprep.mubr.bf16.mxu1 %v22091_v10 }
  0xd6   :  { %1461 = vmatmul.mubr.bf16.gmra.mrb[88].mxu1 %v22093_v11 }
  0xd7   :  { %1468 = vmatprep.mubr.bf16.mxu1 %v22094_v13  ;;  %v22112_v13 = vld [vmem:[%s28356_s1 + $0x3a4] ss:$16 sps:$4 sm:$0xff]  }
  0xde   :  { %1469 = vmatmul.mubr.bf16.gmra.mrb[92].mxu1 %v22096_v14 }
  0xdf   :  { %1949 = vmatprep.mubr.bf16.mxu1 %v22099_v15 }
  0xe6   :  { %1950 = vmatmul.mubr.bf16.vlgmr.msra.gmra.mrb[96].mxu1 %v22097_v19 }
  0xe7   :  { %1957 = vmatprep.mubr.bf16.mxu1 %v22100_v20  ;;  %17957 = vmatpush3.bf16.msra.mxu1 %v23133_v12 }
  0xe8   :  { %17958 = vmatprep.subr.bf16.mxu1 %v23148_v17 }
  0xeb   :  { %17959 = vmatpush3.bf16.msra.mxu1 %v23173_v25 }
  0xec   :  { %17960 = vmatprep.subr.bf16.mxu1 %v23186_v30 }
  0xee   :  { %1958 = vmatmul.mubr.bf16.gmra.mrb[100].mxu1 %v22102_v22 }
  0xef   :  { %1965 = vmatprep.mubr.bf16.mxu1 %v22103_v27  ;;  %17961 = vmatpush3.bf16.msra.mxu1 %v23211_v38 }
  0xf0   :  { %17962 = vmatprep.subr.bf16.mxu1 %v23225_v43 }
  0xf3   :  { %17963 = vmatpush3.bf16.msra.mxu1 %v23250_v51 }
  0xf4   :  { %17964 = vmatprep.subr.bf16.mxu1 %v23264_v56 }
  0xf6   :  { %1966 = vmatmul.mubr.bf16.gmra.mrb[104].mxu1 %v22105_v29 }
  0xf7   :  { %1973 = vmatprep.mubr.bf16.mxu1 %v22106_v31  ;;  %17965 = vmatpush3.bf16.msra.mxu1 %v23289_v0 }
  0xf8   :  { %v17497_v32 = vpop.f32.mrb[0].mxu0  ;;  %17966 = vmatprep.subr.bf16.mxu1 %v23303_v6 }
  0xf9   :  { %v17561_v36 = vpop.f32.mrb[0].mxu1  ;;  %v17498_v41 = vpop.f32.mrb[1].mxu0 }
  0xfa   :  { %v17499_v45 = vadd.f32 %v17498_v41, %v17497_v32  ;;  %v17562_v48 = vpop.f32.mrb[1].mxu1  ;;  %v17500_v49 = vpop.f32.mrb[2].mxu0 }
  0xfb   :  { %v17563_v53 = vadd.f32 %v17562_v48, %v17561_v36  ;;  %v17564_v54 = vpop.f32.mrb[2].mxu1  ;;  %v17501_v55 = vpop.f32.mrb[3].mxu0  ;;  %17967 = vmatpush3.bf16.msra.mxu1 %v23337_v23 }
  0xfc   :  { %v17502_v57 = vadd.f32 %v17501_v55, %v17500_v49  ;;  %v17565_v58 = vpop.f32.mrb[3].mxu1  ;;  %17968 = vmatprep.subr.bf16.mxu1 %v23345_v28 }
  0xfd   :  { %v23740_v60 = vadd.f32 %v17563_v53, %v17499_v45  ;;  %v17566_v61 = vadd.f32 %v17565_v58, %v17564_v54  ;;  %v22114_v45 = vld [vmem:[%s28356_s1 + $0x3a0] ss:$16 sps:$4 sm:$0xff]   ;;  %v22115_v54 = vld [vmem:[%s28356_s1 + $0x3c4] ss:$16 sps:$4 sm:$0xff]  }
  0xfe   :  { %1974 = vmatmul.mubr.bf16.gmra.mrb[108].mxu1 %v22108_v33 }
  0xff   :  { %v23745_v2 = vadd.f32 %v17566_v61, %v17502_v57  ;;  %1981 = vmatprep.mubr.bf16.mxu1 %v22109_v44  ;;  %17969 = vmatpush3.bf16.msra.mxu1 %v23367_v37 }
 0x100   :  { %v17503_v5 = vpop.f32.mrb[4].mxu0  ;;  %17970 = vmatprep.subr.bf16.mxu1 %v23375_v42 }
 0x101   :  { %v17567_v10 = vpop.f32.mrb[4].mxu1  ;;  %v17504_v11 = vpop.f32.mrb[5].mxu0 }
 0x102   :  { %v17505_v15 = vadd.f32 %v17504_v11, %v17503_v5  ;;  %v17568_v19 = vpop.f32.mrb[5].mxu1  ;;  %v17506_v20 = vpop.f32.mrb[6].mxu0 }
 0x103   :  { %v17569_v22 = vadd.f32 %v17568_v19, %v17567_v10  ;;  %v17570_v27 = vpop.f32.mrb[6].mxu1  ;;  %v17507_v29 = vpop.f32.mrb[7].mxu0  ;;  %17971 = vmatpush3.bf16.msra.mxu1 %v23388_v47 }
 0x104   :  { %v17508_v31 = vadd.f32 %v17507_v29, %v17506_v20  ;;  %v17571_v32 = vpop.f32.mrb[7].mxu1  ;;  %18093 = vmatprep.subr.bf16.mxu1 %v23119_v7  ;;  %v22117_v20 = vld [vmem:[%s28356_s1 + $0x3c0] ss:$16 sps:$4 sm:$0xff]   ;;  %v22118_v29 = vld [vmem:[%s28356_s1 + $0x3e4] ss:$16 sps:$4 sm:$0xff]  }
 0x105   :  { %v23760_v33 = vadd.f32 %v17569_v22, %v17505_v15  ;;  %v17572_v36 = vadd.f32 %v17571_v32, %v17570_v27 }
 0x106   :  { %1982 = vmatmul.mubr.bf16.gmra.mrb[112].mxu1 %v22111_v9 }
 0x107   :  { %v23762_v41 = vadd.f32 %v17572_v36, %v17508_v31  ;;  %1989 = vmatprep.mubr.bf16.mxu1 %v22112_v13 }
 0x108   :  { %v17509_v44 = vpop.f32.mrb[8].mxu0 }
 0x109   :  { %v17573_v49 = vpop.f32.mrb[8].mxu1  ;;  %v17510_v53 = vpop.f32.mrb[9].mxu0 }
 0x10a   :  { %v17511_v55 = vadd.f32 %v17510_v53, %v17509_v44  ;;  %v17574_v57 = vpop.f32.mrb[9].mxu1  ;;  %v17512_v58 = vpop.f32.mrb[10].mxu0 }
 0x10b   :  { %v17575_v59 = vadd.f32 %v17574_v57, %v17573_v49  ;;  %v17576_v61 = vpop.f32.mrb[10].mxu1  ;;  %v17513_v5 = vpop.f32.mrb[11].mxu0 }
 0x10c   :  { %v17514_v9 = vadd.f32 %v17513_v5, %v17512_v58  ;;  %v17577_v10 = vpop.f32.mrb[11].mxu1  ;;  %v22120_v5 = vld [vmem:[%s28356_s1 + $0x3e0] ss:$16 sps:$4 sm:$0xff]  }
 0x10d   :  { %v23772_v11 = vadd.f32 %v17575_v59, %v17511_v55  ;;  %v17578_v13 = vadd.f32 %v17577_v10, %v17576_v61 }
 0x10e   :  { %1990 = vmatmul.mubr.bf16.gmra.mrb[116].mxu1 %v22114_v45 }
 0x10f   :  { %v23774_v15 = vadd.f32 %v17578_v13, %v17514_v9  ;;  %1997 = vmatprep.mubr.bf16.mxu1 %v22115_v54  ;;  %v22123_v13 = vld [vmem:[%s28356_s1 + $0x30c] ss:$16 sps:$4 sm:$0xff]  }
 0x110   :  { %v17515_v19 = vpop.f32.mrb[12].mxu0 }
 0x111   :  { %v17579_v22 = vpop.f32.mrb[12].mxu1  ;;  %v17516_v27 = vpop.f32.mrb[13].mxu0 }
 0x112   :  { %v17517_v32 = vadd.f32 %v17516_v27, %v17515_v19  ;;  %v17580_v36 = vpop.f32.mrb[13].mxu1  ;;  %v17518_v44 = vpop.f32.mrb[14].mxu0 }
 0x113   :  { %v17581_v45 = vadd.f32 %v17580_v36, %v17579_v22  ;;  %v17582_v49 = vpop.f32.mrb[14].mxu1  ;;  %v17519_v53 = vpop.f32.mrb[15].mxu0 }
 0x114   :  { %v17520_v54 = vadd.f32 %v17519_v53, %v17518_v44  ;;  %v17583_v55 = vpop.f32.mrb[15].mxu1 }
 0x115   :  { %v23784_v57 = vadd.f32 %v17581_v45, %v17517_v32  ;;  %v17584_v58 = vadd.f32 %v17583_v55, %v17582_v49 }
 0x116   :  { %1998 = vmatmul.mubr.bf16.gmra.mrb[120].mxu1 %v22117_v20 }
 0x117   :  { %v23786_v59 = vadd.f32 %v17584_v58, %v17520_v54  ;;  %2005 = vmatprep.mubr.bf16.mxu1 %v22118_v29  ;;  %v22121_v58 = vld [vmem:[%s28356_s1 + $0x308] ss:$16 sps:$4 sm:$0xff]  }
 0x118   :  { %v17521_v61 = vpop.f32.mrb[16].mxu0 }
 0x119   :  { %v17585_v9 = vpop.f32.mrb[16].mxu1  ;;  %v17522_v10 = vpop.f32.mrb[17].mxu0 }
 0x11a   :  { %v17523_v22 = vadd.f32 %v17522_v10, %v17521_v61  ;;  %v17586_v27 = vpop.f32.mrb[17].mxu1  ;;  %v17524_v20 = vpop.f32.mrb[18].mxu0 }
 0x11b   :  { %v17587_v32 = vadd.f32 %v17586_v27, %v17585_v9  ;;  %v17588_v36 = vpop.f32.mrb[18].mxu1  ;;  %v17525_v29 = vpop.f32.mrb[19].mxu0 }
 0x11c   :  { %v17526_v44 = vadd.f32 %v17525_v29, %v17524_v20  ;;  %v17589_v45 = vpop.f32.mrb[19].mxu1 }
 0x11d   :  { %v23796_v49 = vadd.f32 %v17587_v32, %v17523_v22  ;;  %v17590_v53 = vadd.f32 %v17589_v45, %v17588_v36 }
 0x11e   :  { %2006 = vmatmul.mubr.bf16.gmra.mrb[124].mxu1 %v22120_v5  ;;  %v22124_v5 = vld [vmem:[%s28356_s1 + $0x32c] ss:$16 sps:$4 sm:$0xff]  }
 0x11f   :  { %v23798_v54 = vadd.f32 %v17590_v53, %v17526_v44  ;;  %2046 = vmatprep.mubr.bf16.mxu1 %v22123_v13 }
 0x120   :  { %v17527_v55 = vpop.f32.mrb[20].mxu0 }
 0x121   :  { %v17591_v61 = vpop.f32.mrb[20].mxu1  ;;  %v17528_v10 = vpop.f32.mrb[21].mxu0 }
 0x122   :  { %v17529_v27 = vadd.f32 %v17528_v10, %v17527_v55  ;;  %v17592_v20 = vpop.f32.mrb[21].mxu1  ;;  %v17530_v29 = vpop.f32.mrb[22].mxu0 }
 0x123   :  { %v17593_v22 = vadd.f32 %v17592_v20, %v17591_v61  ;;  %v17594_v32 = vpop.f32.mrb[22].mxu1  ;;  %v17531_v36 = vpop.f32.mrb[23].mxu0  ;;  %v22126_v61 = vld [vmem:[%s28356_s1 + $0x328] ss:$16 sps:$4 sm:$0xff]  }
 0x124   :  { %v17532_v13 = vadd.f32 %v17531_v36, %v17530_v29  ;;  %v17595_v44 = vpop.f32.mrb[23].mxu1 }
 0x125   :  { %v23808_v45 = vadd.f32 %v17593_v22, %v17529_v27  ;;  %v17596_v53 = vadd.f32 %v17595_v44, %v17594_v32 }
 0x126   :  { %2047 = vmatmul.mubr.bf16.vlgmr.msra.gmra.mrb[128].mxu1 %v22121_v58 }
 0x127   :  { %v23810_v19 = vadd.f32 %v17596_v53, %v17532_v13  ;;  %2054 = vmatprep.mubr.bf16.mxu1 %v22124_v5  ;;  %18094 = vmatpush3.bf16.msra.mxu1 %v23133_v12  ;;  %v22127_v13 = vld [vmem:[%s28356_s1 + $0x34c] ss:$16 sps:$4 sm:$0xff]  }
 0x128   :  { %v17533_v55 = vpop.f32.mrb[24].mxu0  ;;  %18095 = vmatprep.subr.bf16.mxu1 %v23148_v17 }
 0x129   :  { %v17597_v10 = vpop.f32.mrb[24].mxu1  ;;  %v17534_v20 = vpop.f32.mrb[25].mxu0 }
 0x12a   :  { %v17535_v29 = vadd.f32 %v17534_v20, %v17533_v55  ;;  %v17598_v22 = vpop.f32.mrb[25].mxu1  ;;  %v17536_v58 = vpop.f32.mrb[26].mxu0  ;;  %v22129_v20 = vld [vmem:[%s28356_s1 + $0x348] ss:$16 sps:$4 sm:$0xff]  }
 0x12b   :  { %v17599_v32 = vadd.f32 %v17598_v22, %v17597_v10  ;;  %v17600_v36 = vpop.f32.mrb[26].mxu1  ;;  %v17537_v5 = vpop.f32.mrb[27].mxu0  ;;  %18096 = vmatpush3.bf16.msra.mxu1 %v23173_v25 }
 0x12c   :  { %v17538_v44 = vadd.f32 %v17537_v5, %v17536_v58  ;;  %v17601_v53 = vpop.f32.mrb[27].mxu1  ;;  %18097 = vmatprep.subr.bf16.mxu1 %v23186_v30 }
 0x12d   :  { %v23824_v9 = vadd.f32 %v17599_v32, %v17535_v29  ;;  %v17602_v31 = vadd.f32 %v17601_v53, %v17600_v36 }
 0x12e   :  { %2055 = vmatmul.mubr.bf16.gmra.mrb[132].mxu1 %v22126_v61 }
 0x12f   :  { %v23826_v55 = vadd.f32 %v17602_v31, %v17538_v44  ;;  %2062 = vmatprep.mubr.bf16.mxu1 %v22127_v13  ;;  %18098 = vmatpush3.bf16.msra.mxu1 %v23211_v38  ;;  %v22130_v44 = vld [vmem:[%s28356_s1 + $0x36c] ss:$16 sps:$4 sm:$0xff]  }
 0x130   :  { %v17539_v10 = vpop.f32.mrb[28].mxu0  ;;  %18099 = vmatprep.subr.bf16.mxu1 %v23225_v43 }
 0x131   :  { %v17603_v22 = vpop.f32.mrb[28].mxu1  ;;  %v17540_v58 = vpop.f32.mrb[29].mxu0 }
 0x132   :  { %v17541_v32 = vadd.f32 %v17540_v58, %v17539_v10  ;;  %v17604_v36 = vpop.f32.mrb[29].mxu1  ;;  %v17542_v61 = vpop.f32.mrb[30].mxu0  ;;  %v22132_v58 = vld [vmem:[%s28356_s1 + $0x368] ss:$16 sps:$4 sm:$0xff]  }
 0x133   :  { %v17605_v31 = vadd.f32 %v17604_v36, %v17603_v22  ;;  %v17606_v5 = vpop.f32.mrb[30].mxu1  ;;  %v17543_v13 = vpop.f32.mrb[31].mxu0  ;;  %18100 = vmatpush3.bf16.msra.mxu1 %v23250_v51 }
 0x134   :  { %v17544_v53 = vadd.f32 %v17543_v13, %v17542_v61  ;;  %v17607_v27 = vpop.f32.mrb[31].mxu1  ;;  %18101 = vmatprep.subr.bf16.mxu1 %v23264_v56 }
 0x135   :  { %v23840_v48 = vadd.f32 %v17605_v31, %v17541_v32  ;;  %v17608_v14 = vadd.f32 %v17607_v27, %v17606_v5 }
 0x136   :  { %2063 = vmatmul.mubr.bf16.gmra.mrb[136].mxu1 %v22129_v20 }
 0x137   :  { %v23842_v10 = vadd.f32 %v17608_v14, %v17544_v53  ;;  %2070 = vmatprep.mubr.bf16.mxu1 %v22130_v44  ;;  %18102 = vmatpush3.bf16.msra.mxu1 %v23289_v0  ;;  %v22133_v44 = vld [vmem:[%s28356_s1 + $0x38c] ss:$16 sps:$4 sm:$0xff]  }
 0x138   :  { %v17625_v22 = vpop.f32.mrb[32].mxu0  ;;  %18103 = vmatprep.subr.bf16.mxu1 %v23303_v6 }
 0x139   :  { %v17689_v36 = vpop.f32.mrb[32].mxu1  ;;  %v17626_v61 = vpop.f32.mrb[33].mxu0 }
 0x13a   :  { %v17627_v31 = vadd.f32 %v17626_v61, %v17625_v22  ;;  %v17690_v27 = vpop.f32.mrb[33].mxu1  ;;  %v17628_v20 = vpop.f32.mrb[34].mxu0 }
 0x13b   :  { %v17691_v14 = vadd.f32 %v17690_v27, %v17689_v36  ;;  %v17692_v5 = vpop.f32.mrb[34].mxu1  ;;  %v17629_v13 = vpop.f32.mrb[35].mxu0  ;;  %18104 = vmatpush3.bf16.msra.mxu1 %v23337_v23  ;;  %v22135_v36 = vld [vmem:[%s28356_s1 + $0x388] ss:$16 sps:$4 sm:$0xff]  }
 0x13c   :  { %v17630_v53 = vadd.f32 %v17629_v13, %v17628_v20  ;;  %v17693_v29 = vpop.f32.mrb[35].mxu1  ;;  %18105 = vmatprep.subr.bf16.mxu1 %v23345_v28 }
 0x13d   :  { %v862_v46 = vadd.f32 %v17691_v14, %v17627_v31  ;;  %v17694_v40 = vadd.f32 %v17693_v29, %v17692_v5  ;;  %v22139_v14 = vld [vmem:[%s28356_s1 + $0x3ac] ss:$16 sps:$4 sm:$0xff]  }
 0x13e   :  { %2071 = vmatmul.mubr.bf16.gmra.mrb[140].mxu1 %v22132_v58 }
 0x13f   :  { %v865_v32 = vadd.f32 %v17694_v40, %v17630_v53  ;;  %2078 = vmatprep.mubr.bf16.mxu1 %v22133_v44  ;;  %18106 = vmatpush3.bf16.msra.mxu1 %v23367_v37 }
 0x140   :  { %v17631_v22 = vpop.f32.mrb[36].mxu0  ;;  %18107 = vmatprep.subr.bf16.mxu1 %v23375_v42 }
 0x141   :  { %v17695_v61 = vpop.f32.mrb[36].mxu1  ;;  %v17632_v27 = vpop.f32.mrb[37].mxu0  ;;  %v924_v20 = vpack.c.bf16 %v865_v32, %v862_v46 }
 0x142   :  { %v17633_v13 = vadd.f32 %v17632_v27, %v17631_v22  ;;  %v17696_v35 = vpop.f32.mrb[37].mxu1  ;;  %v17634_v31 = vpop.f32.mrb[38].mxu0  ;;  %v22141_v22 = vld [vmem:[%s28356_s1 + $0x3a8] ss:$16 sps:$4 sm:$0xff]  }
 0x143   :  { %v17697_v29 = vadd.f32 %v17696_v35, %v17695_v61  ;;  %v17698_v58 = vpop.f32.mrb[38].mxu1  ;;  %20203 = vmatprep.mubr.msk.bf16.mxu0 %vm934_vm2, %v924_v20  ;;  %v17635_v40 = vpop.f32.mrb[39].mxu0  ;;  %18108 = vmatpush3.bf16.msra.mxu1 %v23388_v47 }
 0x144   :  { %v17636_v5 = vadd.f32 %v17635_v40, %v17634_v31  ;;  %v17699_v44 = vpop.f32.mrb[39].mxu1  ;;  %18166 = vmatprep.subr.bf16.mxu1 %v23108_v3 }
 0x145   :  { %v870_v53 = vadd.f32 %v17697_v29, %v17633_v13  ;;  %v17700_v46 = vadd.f32 %v17699_v44, %v17698_v58 }
 0x146   :  { %2079 = vmatmul.mubr.bf16.gmra.mrb[144].mxu1 %v22135_v36  ;;  %v22145_v36 = vld [vmem:[%s28356_s1 + $0x3cc] ss:$16 sps:$4 sm:$0xff]  }
 0x147   :  { %v873_v32 = vadd.f32 %v17700_v46, %v17636_v5  ;;  %2086 = vmatprep.mubr.bf16.mxu1 %v22139_v14 }
 0x148   :  { %v17637_v35 = vpop.f32.mrb[40].mxu0 }
 0x149   :  { %v925_v61 = vpack.c.bf16 %v873_v32, %v870_v53  ;;  %v17701_v27 = vpop.f32.mrb[40].mxu1  ;;  %v17638_v20 = vpop.f32.mrb[41].mxu0  ;;  %v22147_v53 = vld [vmem:[%s28356_s1 + $0x3c8] ss:$16 sps:$4 sm:$0xff]  }
 0x14a   :  { %v17639_v24 = vadd.f32 %v17638_v20, %v17637_v35  ;;  %v17702_v18 = vpop.f32.mrb[41].mxu1  ;;  %v17640_v1 = vpop.f32.mrb[42].mxu0 }
 0x14b   :  { %v17703_v31 = vadd.f32 %v17702_v18, %v17701_v27  ;;  %v17704_v40 = vpop.f32.mrb[42].mxu1  ;;  %20204 = vmatmul.mubr.msk.bf16.vlgmr.msra.gmra.mrb[64].mxu0 %vm934_vm2, %v925_v61  ;;  %v17641_v13 = vpop.f32.mrb[43].mxu0 }
 0x14c   :  { %v17642_v29 = vadd.f32 %v17641_v13, %v17640_v1  ;;  %v17705_v58 = vpop.f32.mrb[43].mxu1  ;;  %20220 = vmatpush3.bf16.msra.mxu0 %v23743_v63 }
 0x14d   :  { %v878_v14 = vadd.f32 %v17703_v31, %v17639_v24  ;;  %v17706_v5 = vadd.f32 %v17705_v58, %v17704_v40  ;;  %17819 = vmatprep.subr.bf16.mxu0 %v23119_v7 }
 0x14e   :  { %2087 = vmatmul.mubr.bf16.gmra.mrb[148].mxu1 %v22141_v22  ;;  %v22151_v22 = vld [vmem:[%s28356_s1 + $0x3ec] ss:$16 sps:$4 sm:$0xff]  }
 0x14f   :  { %v881_v44 = vadd.f32 %v17706_v5, %v17642_v29  ;;  %2094 = vmatprep.mubr.bf16.mxu1 %v22145_v36 }
 0x150   :  { %v17643_v18 = vpop.f32.mrb[44].mxu0 }
 0x151   :  { %v17707_v46 = vpop.f32.mrb[44].mxu1  ;;  %v17644_v32 = vpop.f32.mrb[45].mxu0  ;;  %v926_v35 = vpack.c.bf16 %v881_v44, %v878_v14  ;;  %v22153_v14 = vld [vmem:[%s28356_s1 + $0x3e8] ss:$16 sps:$4 sm:$0xff]  }
 0x152   :  { %v17645_v61 = vadd.f32 %v17644_v32, %v17643_v18  ;;  %v17708_v1 = vpop.f32.mrb[45].mxu1  ;;  %v17646_v27 = vpop.f32.mrb[46].mxu0 }
 0x153   :  { %v17709_v20 = vadd.f32 %v17708_v1, %v17707_v46  ;;  %v17710_v63 = vpop.f32.mrb[46].mxu1  ;;  %20207 = vmatprep.mubr.msk.bf16.mxu0 %vm934_vm2, %v926_v35  ;;  %v17647_v24 = vpop.f32.mrb[47].mxu0 }
 0x154   :  { %v17648_v31 = vadd.f32 %v17647_v24, %v17646_v27  ;;  %v17711_v40 = vpop.f32.mrb[47].mxu1 }
 0x155   :  { %v886_v13 = vadd.f32 %v17709_v20, %v17645_v61  ;;  %v17712_v36 = vadd.f32 %v17711_v40, %v17710_v63 }
 0x156   :  { %2095 = vmatmul.mubr.bf16.gmra.mrb[152].mxu1 %v22147_v53 }
 0x157   :  { %v889_v29 = vadd.f32 %v17712_v36, %v17648_v31  ;;  %2102 = vmatprep.mubr.bf16.mxu1 %v22151_v22 }
 0x158   :  { %v17649_v58 = vpop.f32.mrb[48].mxu0 }
 0x159   :  { %v17713_v5 = vpop.f32.mrb[48].mxu1  ;;  %v17650_v44 = vpop.f32.mrb[49].mxu0  ;;  %v927_v18 = vpack.c.bf16 %v889_v29, %v886_v13 }
 0x15a   :  { %v17651_v46 = vadd.f32 %v17650_v44, %v17649_v58  ;;  %v17714_v32 = vpop.f32.mrb[49].mxu1  ;;  %v17652_v35 = vpop.f32.mrb[50].mxu0 }
 0x15b   :  { %v17715_v1 = vadd.f32 %v17714_v32, %v17713_v5  ;;  %v17716_v7 = vpop.f32.mrb[50].mxu1  ;;  %20208 = vmatmul.mubr.msk.bf16.gmra.mrb[68].mxu0 %vm934_vm2, %v927_v18  ;;  %v17653_v61 = vpop.f32.mrb[51].mxu0 }
 0x15c   :  { %v17654_v27 = vadd.f32 %v17653_v61, %v17652_v35  ;;  %v17717_v53 = vpop.f32.mrb[51].mxu1 }
 0x15d   :  { %v894_v20 = vadd.f32 %v17715_v1, %v17651_v46  ;;  %v17718_v63 = vadd.f32 %v17717_v53, %v17716_v7 }
 0x15e   :  { %2103 = vmatmul.mubr.bf16.gmra.mrb[156].mxu1 %v22153_v14 }
 0x15f   :  { %v897_v24 = vadd.f32 %v17718_v63, %v17654_v27 }
 0x160   :  { %v17655_v22 = vpop.f32.mrb[52].mxu0 }
 0x161   :  { %v17719_v31 = vpop.f32.mrb[52].mxu1  ;;  %v17656_v40 = vpop.f32.mrb[53].mxu0  ;;  %v928_v36 = vpack.c.bf16 %v897_v24, %v894_v20 }
 0x162   :  { %v17657_v3 = vadd.f32 %v17656_v40, %v17655_v22  ;;  %v17720_v13 = vpop.f32.mrb[53].mxu1  ;;  %v17658_v29 = vpop.f32.mrb[54].mxu0 }
 0x163   :  { %v17721_v58 = vadd.f32 %v17720_v13, %v17719_v31  ;;  %v17722_v44 = vpop.f32.mrb[54].mxu1  ;;  %20211 = vmatprep.mubr.msk.bf16.mxu0 %vm934_vm2, %v928_v36  ;;  %v17659_v5 = vpop.f32.mrb[55].mxu0 }
 0x164   :  { %v17660_v18 = vadd.f32 %v17659_v5, %v17658_v29  ;;  %v17723_v32 = vpop.f32.mrb[55].mxu1 }
 0x165   :  { %v902_v35 = vadd.f32 %v17721_v58, %v17657_v3  ;;  %v17724_v61 = vadd.f32 %v17723_v32, %v17722_v44 }
 0x167   :  { %v905_v46 = vadd.f32 %v17724_v61, %v17660_v18 }
 0x168   :  { %v17661_v7 = vpop.f32.mrb[56].mxu0 }
 0x169   :  { %v17725_v14 = vpop.f32.mrb[56].mxu1  ;;  %v17662_v1 = vpop.f32.mrb[57].mxu0  ;;  %v929_v27 = vpack.c.bf16 %v905_v46, %v902_v35 }
 0x16a   :  { %v17663_v53 = vadd.f32 %v17662_v1, %v17661_v7  ;;  %v17726_v63 = vpop.f32.mrb[57].mxu1  ;;  %v17664_v20 = vpop.f32.mrb[58].mxu0 }
 0x16b   :  { %v17727_v24 = vadd.f32 %v17726_v63, %v17725_v14  ;;  %v17728_v22 = vpop.f32.mrb[58].mxu1  ;;  %20212 = vmatmul.mubr.msk.bf16.gmra.mrb[72].mxu0 %vm934_vm2, %v929_v27  ;;  %v17665_v31 = vpop.f32.mrb[59].mxu0 }
 0x16c   :  { %v17666_v40 = vadd.f32 %v17665_v31, %v17664_v20  ;;  %v17729_v36 = vpop.f32.mrb[59].mxu1 }
 0x16d   :  { %v910_v13 = vadd.f32 %v17727_v24, %v17663_v53  ;;  %v17730_v29 = vadd.f32 %v17729_v36, %v17728_v22 }
 0x16f   :  { %v913_v5 = vadd.f32 %v17730_v29, %v17666_v40 }
 0x170   :  { %v17667_v3 = vpop.f32.mrb[60].mxu0 }
 0x171   :  { %v17731_v58 = vpop.f32.mrb[60].mxu1  ;;  %v17668_v44 = vpop.f32.mrb[61].mxu0  ;;  %v930_v18 = vpack.c.bf16 %v913_v5, %v910_v13  ;;  %v28475_v13 = vpack.c.bf16 %v23745_v2, %v23740_v60 }
 0x172   :  { %v17669_v32 = vadd.f32 %v17668_v44, %v17667_v3  ;;  %v17732_v61 = vpop.f32.mrb[61].mxu1  ;;  %v17670_v35 = vpop.f32.mrb[62].mxu0  ;;  %v28476_v44 = vpack.c.bf16 %v23762_v41, %v23760_v33 }
 0x173   :  { %v17733_v46 = vadd.f32 %v17732_v61, %v17731_v58  ;;  %v17734_v7 = vpop.f32.mrb[62].mxu1  ;;  %20215 = vmatprep.mubr.msk.bf16.mxu0 %vm934_vm2, %v930_v18  ;;  %v17671_v14 = vpop.f32.mrb[63].mxu0  ;;  %v28477_v61 = vpack.c.bf16 %v23774_v15, %v23772_v11 }
 0x174   :  { %v17672_v1 = vadd.f32 %v17671_v14, %v17670_v35  ;;  %v17735_v27 = vpop.f32.mrb[63].mxu1  ;;  %v28478_v35 = vpack.c.bf16 %v23786_v59, %v23784_v57 }
 0x175   :  { %v918_v63 = vadd.f32 %v17733_v46, %v17669_v32  ;;  %v17736_v20 = vadd.f32 %v17735_v27, %v17734_v7  ;;  %v28479_v46 = vpack.c.bf16 %v23798_v54, %v23796_v49  ;;  %v28481_v27 = vpack.c.bf16 %v23826_v55, %v23824_v9 }
 0x176   :  { %v28482_v9 = vpack.c.bf16 %v23842_v10, %v23840_v48  ;;  %v22142_v48 = vld [vmem:[%s28356_s1 + $0x22c] ss:$16 sps:$4 sm:$0xff]  }
 0x177   :  { %v921_v31 = vadd.f32 %v17736_v20, %v17672_v1  ;;  %v28480_v1 = vpack.c.bf16 %v23810_v19, %v23808_v45  ;;  %v22138_v19 = vld [vmem:[%s28356_s1 + $0x20c] ss:$16 sps:$4 sm:$0xff]  }
 0x179   :  { %v931_v53 = vpack.c.bf16 %v921_v31, %v918_v63  ;;  %v17771_v24 = vpop.f32.mrb[64].mxu1 }
 0x17a   :  { %v17772_v22 = vpop.f32.mrb[65].mxu1 }
 0x17b   :  { %20216 = vmatmul.mubr.msk.bf16.gmra.mrb[76].mxu0 %vm934_vm2, %v931_v53  ;;  %v23891_v40 = vadd.f32 %v17772_v22, %v17771_v24  ;;  %v17774_v36 = vpop.f32.mrb[66].mxu1  ;;  %v22136_v22 = vld [vmem:[%s28356_s1 + $0x208] ss:$16 sps:$4 sm:$0xff]  }
 0x17c   :  { %20221 = vmatprep.mubr.msk.bf16.mxu0 %vm934_vm2, %v28475_v13  ;;  %v17775_v29 = vpop.f32.mrb[67].mxu1 }
 0x17d   :  { %v23897_v5 = vadd.f32 %v17775_v29, %v17774_v36 }
 0x181   :  { %v17777_v3 = vpop.f32.mrb[68].mxu1 }
 0x182   :  { %v17778_v58 = vpop.f32.mrb[69].mxu1 }
 0x183   :  { %20222 = vmatmul.mubr.msk.bf16.vlgmr.msra.gmra.mrb[64].mxu0 %vm934_vm2, %v28476_v44  ;;  %v23903_v18 = vadd.f32 %v17778_v58, %v17777_v3  ;;  %v17780_v32 = vpop.f32.mrb[70].mxu1  ;;  %v22144_v44 = vld [vmem:[%s28356_s1 + $0x228] ss:$16 sps:$4 sm:$0xff]  }
 0x184   :  { %20225 = vmatprep.mubr.msk.bf16.mxu0 %vm934_vm2, %v28477_v61  ;;  %17820 = vmatpush3.bf16.msra.mxu0 %v23133_v12  ;;  %v17781_v60 = vpop.f32.mrb[71].mxu1  ;;  %v22148_v61 = vld [vmem:[%s28356_s1 + $0x24c] ss:$16 sps:$4 sm:$0xff]  }
 0x185   :  { %17821 = vmatprep.subr.bf16.mxu0 %v23148_v17  ;;  %v23911_v2 = vadd.f32 %v17781_v60, %v17780_v32 }
 0x188   :  { %17822 = vmatpush3.bf16.msra.mxu0 %v23173_v25 }
 0x189   :  { %17823 = vmatprep.subr.bf16.mxu0 %v23186_v30  ;;  %v17783_v33 = vpop.f32.mrb[72].mxu1 }
 0x18a   :  { %v17784_v41 = vpop.f32.mrb[73].mxu1 }
 0x18b   :  { %20226 = vmatmul.mubr.msk.bf16.gmra.mrb[68].mxu0 %vm934_vm2, %v28478_v35  ;;  %v23919_v11 = vadd.f32 %v17784_v41, %v17783_v33  ;;  %v17786_v15 = vpop.f32.mrb[74].mxu1 }
 0x18c   :  { %20229 = vmatprep.mubr.msk.bf16.mxu0 %vm934_vm2, %v28479_v46  ;;  %17824 = vmatpush3.bf16.msra.mxu0 %v23211_v38  ;;  %v17787_v7 = vpop.f32.mrb[75].mxu1  ;;  %v22150_v46 = vld [vmem:[%s28356_s1 + $0x248] ss:$16 sps:$4 sm:$0xff]  }
 0x18d   :  { %17825 = vmatprep.subr.bf16.mxu0 %v23225_v43  ;;  %v23927_v14 = vadd.f32 %v17787_v7, %v17786_v15 }
 0x190   :  { %17826 = vmatpush3.bf16.msra.mxu0 %v23250_v51 }
 0x191   :  { %17827 = vmatprep.subr.bf16.mxu0 %v23264_v56  ;;  %v17789_v57 = vpop.f32.mrb[76].mxu1 }
 0x192   :  { %v17790_v59 = vpop.f32.mrb[77].mxu1 }
 0x193   :  { %20230 = vmatmul.mubr.msk.bf16.gmra.mrb[72].mxu0 %vm934_vm2, %v28480_v1  ;;  %v23935_v49 = vadd.f32 %v17790_v59, %v17789_v57  ;;  %v17792_v54 = vpop.f32.mrb[78].mxu1  ;;  %v22154_v57 = vld [vmem:[%s28356_s1 + $0x26c] ss:$16 sps:$4 sm:$0xff]  }
 0x194   :  { %20233 = vmatprep.mubr.msk.bf16.mxu0 %vm934_vm2, %v28481_v27  ;;  %17828 = vmatpush3.bf16.msra.mxu0 %v23289_v0  ;;  %v17793_v63 = vpop.f32.mrb[79].mxu1 }
 0x195   :  { %17829 = vmatprep.subr.bf16.mxu0 %v23303_v6  ;;  %v23943_v20 = vadd.f32 %v17793_v63, %v17792_v54 }
 0x198   :  { %17830 = vmatpush3.bf16.msra.mxu0 %v23337_v23 }
 0x199   :  { %17831 = vmatprep.subr.bf16.mxu0 %v23345_v28  ;;  %v17795_v45 = vpop.f32.mrb[80].mxu1 }
 0x19a   :  { %v17796_v31 = vpop.f32.mrb[81].mxu1 }
 0x19b   :  { %20234 = vmatmul.mubr.msk.bf16.gmra.mrb[76].mxu0 %vm934_vm2, %v28482_v9  ;;  %v23954_v55 = vadd.f32 %v17796_v31, %v17795_v45  ;;  %v17798_v53 = vpop.f32.mrb[82].mxu1  ;;  %v22157_v31 = vld [vmem:[%s28356_s1 + $0x28c] ss:$16 sps:$4 sm:$0xff]  }
 0x19c   :  { %17832 = vmatpush3.bf16.msra.mxu0 %v23367_v37  ;;  %1509 = vmatprep.mubr.bf16.mxu0 %v22138_v19  ;;  %v17799_v24 = vpop.f32.mrb[83].mxu1  ;;  %v22156_v19 = vld [vmem:[%s28356_s1 + $0x268] ss:$16 sps:$4 sm:$0xff]  }
 0x19d   :  { %17833 = vmatprep.subr.bf16.mxu0 %v23375_v42  ;;  %v23961_v36 = vadd.f32 %v17799_v24, %v17798_v53 }
 0x1a0   :  { %17834 = vmatpush3.bf16.msra.mxu0 %v23388_v47 }
 0x1a1   :  { %v17801_v10 = vpop.f32.mrb[84].mxu1 }
 0x1a2   :  { %v17802_v13 = vpop.f32.mrb[85].mxu1 }
 0x1a3   :  { %1510 = vmatmul.mubr.bf16.vlgmr.msra.gmra.mrb[80].mxu0 %v22136_v22  ;;  %v23967_v29 = vadd.f32 %v17802_v13, %v17801_v10  ;;  %v17804_v3 = vpop.f32.mrb[86].mxu1 }
 0x1a4   :  { %1517 = vmatprep.mubr.bf16.mxu0 %v22142_v48  ;;  %v17805_v58 = vpop.f32.mrb[87].mxu1 }
 0x1a5   :  { %v23972_v32 = vadd.f32 %v17805_v58, %v17804_v3 }
 0x1a9   :  { %v17807_v60 = vpop.f32.mrb[88].mxu1 }
 0x1aa   :  { %v17808_v33 = vpop.f32.mrb[89].mxu1 }
 0x1ab   :  { %1518 = vmatmul.mubr.bf16.gmra.mrb[84].mxu0 %v22144_v44  ;;  %v23977_v41 = vadd.f32 %v17808_v33, %v17807_v60  ;;  %v17810_v35 = vpop.f32.mrb[90].mxu1 }
 0x1ac   :  { %1525 = vmatprep.mubr.bf16.mxu0 %v22148_v61  ;;  %v17811_v15 = vpop.f32.mrb[91].mxu1 }
 0x1ad   :  { %v23982_v7 = vadd.f32 %v17811_v15, %v17810_v35 }
 0x1b1   :  { %v17813_v59 = vpop.f32.mrb[92].mxu1 }
 0x1b2   :  { %v17814_v1 = vpop.f32.mrb[93].mxu1 }
 0x1b3   :  { %1526 = vmatmul.mubr.bf16.gmra.mrb[88].mxu0 %v22150_v46  ;;  %v23987_v54 = vadd.f32 %v17814_v1, %v17813_v59  ;;  %v17816_v27 = vpop.f32.mrb[94].mxu1 }
 0x1b4   :  { %1533 = vmatprep.mubr.bf16.mxu0 %v22154_v57  ;;  %v17817_v63 = vpop.f32.mrb[95].mxu1 }
 0x1b5   :  { %v23992_v45 = vadd.f32 %v17817_v63, %v17816_v27 }
 0x1b9   :  { %v17908_v9 = vpop.f32.mrb[96].mxu1 }
 0x1ba   :  { %v17909_v53 = vpop.f32.mrb[97].mxu1 }
 0x1bb   :  { %1534 = vmatmul.mubr.bf16.gmra.mrb[92].mxu0 %v22156_v19  ;;  %v23997_v24 = vadd.f32 %v17909_v53, %v17908_v9  ;;  %v17911_v22 = vpop.f32.mrb[98].mxu1 }
 0x1bc   :  { %1541 = vmatprep.mubr.bf16.mxu0 %v22157_v31  ;;  %v17912_v48 = vpop.f32.mrb[99].mxu1 }
 0x1bd   :  { %v23999_v10 = vadd.f32 %v17912_v48, %v17911_v22 }
 0x1be   :  { %18 = vsyncpa [#allocation3], 0  ;;  %v22159_v13 = vld [vmem:[%s28356_s1 + $0x288] ss:$16 sps:$4 sm:$0xff]   ;;  %v22160_v3 = vld [vmem:[%s28356_s1 + $0x2ac] ss:$16 sps:$4 sm:$0xff]  }
 0x1bf   :  { %v22162_v15 = vld [vmem:[%s28356_s1 + $0x2a8] ss:$16 sps:$4 sm:$0xff]   ;;  %v22163_v46 = vld [vmem:[%s28356_s1 + $0x2cc] ss:$16 sps:$4 sm:$0xff]   ;;  %vm8908_vm3 = vcmask 261120   ;;  %vm23027_vm4 = vmmov 0  }
 0x1c0   :  { %v22165_v31 = vld [vmem:[%s28356_s1 + $0x2c8] ss:$16 sps:$4 sm:$0xff]   ;;  %v22166_v9 = vld [vmem:[%s28356_s1 + $0x2ec] ss:$16 sps:$4 sm:$0xff]   ;;  %vm11196_vm5 = vcmask 523264   ;;  %vm13044_vm6 = vcmask 1043456  }
 0x1c1   :  { %v17914_v58 = vpop.f32.mrb[100].mxu1  ;;  %v28488_v51 = vld [vmem:[#allocation25_spill] sm:$0xff]  ;;  %vm13040_vm7 = vcmask 64512   ;;  %s23028_s19 = smov [#allocation2]   ;;  %vm15480_vm8 = vcmask 517120  }
 0x1c2   :  { %v17915_v44 = vpop.f32.mrb[101].mxu1  ;;  %v28489_v43 = vld [vmem:[#allocation5_spill] sm:$0xff]  ;;  %s15488_s20 = sshll.u32 %s23028_s19, 4  ;;  %s15489_s20 = int_to_ptr.vmem [resolvable:$true] %s15488_s20 }
 0x1c3   :  { %1542 = vmatmul.mubr.bf16.gmra.mrb[96].mxu0 %v22159_v13  ;;  %v24007_v61 = vadd.f32 %v17915_v44, %v17914_v58  ;;  %v17917_v60 = vpop.f32.mrb[102].mxu1  ;;  %v22168_v44 = vld [vmem:[%s28356_s1 + $0x2e8] ss:$16 sps:$4 sm:$0xff]   ;;  %s23001_s21 = scalar_lea.vmem %s15489_s20, 32  ;;  %p23006_p1 = scmp.lt.s32.totalorder %s15489_s20, %s15489_s20 }
 0x1c4   :  { %1549 = vmatprep.mubr.bf16.mxu0 %v22160_v3  ;;  %v17918_v33 = vpop.f32.mrb[103].mxu1  ;;  %p23002_p0 = scmp.ne.s32.totalorder %s15489_s20, %s23001_s21  ;;  %p23007_p2 = scmp.lt.s32.totalorder %s23001_s21, %s23001_s21 }
 0x1c5   :  { %v24009_v35 = vadd.f32 %v17918_v33, %v17917_v60 }
 0x1c6   :  { %p23008_p3 = por %p23007_p2, %p23006_p1 }
 0x1c8   :  { %p23009_p4 = pnand %p23008_p3, %p23002_p0 }
 0x1c9   :  { %v17920_v57 = vpop.f32.mrb[104].mxu1 }
 0x1ca   :  { %v17921_v59 = vpop.f32.mrb[105].mxu1 }
 0x1cb   :  { %1550 = vmatmul.mubr.bf16.gmra.mrb[100].mxu0 %v22162_v15  ;;  %v24017_v1 = vadd.f32 %v17921_v59, %v17920_v57  ;;  %v17923_v27 = vpop.f32.mrb[106].mxu1 }
 0x1cc   :  { %1557 = vmatprep.mubr.bf16.mxu0 %v22163_v46  ;;  %v17924_v63 = vpop.f32.mrb[107].mxu1 }
 0x1cd   :  { %v24019_v19 = vadd.f32 %v17924_v63, %v17923_v27 }
 0x1d1   :  { %v17926_v53 = vpop.f32.mrb[108].mxu1 }
 0x1d2   :  { %v17927_v22 = vpop.f32.mrb[109].mxu1 }
 0x1d3   :  { %1558 = vmatmul.mubr.bf16.gmra.mrb[104].mxu0 %v22165_v31  ;;  %v24027_v48 = vadd.f32 %v17927_v22, %v17926_v53  ;;  %v17929_v13 = vpop.f32.mrb[110].mxu1 }
 0x1d4   :  { %1565 = vmatprep.mubr.bf16.mxu0 %v22166_v9  ;;  %v17930_v3 = vpop.f32.mrb[111].mxu1 }
 0x1d5   :  { %v24029_v58 = vadd.f32 %v17930_v3, %v17929_v13 }
 0x1d9   :  { %v17932_v60 = vpop.f32.mrb[112].mxu1 }
 0x1da   :  { %v17933_v33 = vpop.f32.mrb[113].mxu1 }
 0x1db   :  { %1566 = vmatmul.mubr.bf16.gmra.mrb[108].mxu0 %v22168_v44  ;;  %v24034_v15 = vadd.f32 %v17933_v33, %v17932_v60  ;;  %v17935_v46 = vpop.f32.mrb[114].mxu1 }
 0x1dc   :  { %v17936_v57 = vpop.f32.mrb[115].mxu1 }
 0x1dd   :  { %v24036_v59 = vadd.f32 %v17936_v57, %v17935_v46 }
 0x1e1   :  { %v17938_v27 = vpop.f32.mrb[116].mxu1 }
 0x1e2   :  { %v17939_v63 = vpop.f32.mrb[117].mxu1 }
 0x1e3   :  { %v24038_v31 = vadd.f32 %v17939_v63, %v17938_v27  ;;  %v17941_v9 = vpop.f32.mrb[118].mxu1 }
 0x1e4   :  { %v17942_v53 = vpop.f32.mrb[119].mxu1 }
 0x1e5   :  { %v24040_v22 = vadd.f32 %v17942_v53, %v17941_v9 }
 0x1e9   :  { %v17944_v13 = vpop.f32.mrb[120].mxu1 }
 0x1ea   :  { %v17945_v3 = vpop.f32.mrb[121].mxu1 }
 0x1eb   :  { %v24042_v47 = vadd.f32 %v17945_v3, %v17944_v13  ;;  %v17947_v42 = vpop.f32.mrb[122].mxu1 }
 0x1ec   :  { %v17948_v44 = vpop.f32.mrb[123].mxu1 }
 0x1ed   :  { %v24044_v60 = vadd.f32 %v17948_v44, %v17947_v42 }
 0x1f1   :  { %v17950_v33 = vpop.f32.mrb[124].mxu1 }
 0x1f2   :  { %v17951_v37 = vpop.f32.mrb[125].mxu1 }
 0x1f3   :  { %v24046_v46 = vadd.f32 %v17951_v37, %v17950_v33  ;;  %v17953_v57 = vpop.f32.mrb[126].mxu1  ;;  %v15673_v37 = vld [vmem:[%s28357_s2 + $0x4] sm:$0x3] }
 0x1f4   :  { %v17954_v28 = vpop.f32.mrb[127].mxu1 }
 0x1f5   :  { %v24048_v27 = vadd.f32 %v17954_v28, %v17953_v57 }
 0x1f9   :  { %v17972_v63 = vpop.f32.mrb[128].mxu1 }
 0x1fa   :  { %v17973_v23 = vpop.f32.mrb[129].mxu1 }
 0x1fb   :  { %v17974_v9 = vadd.f32 %v17973_v23, %v17972_v63  ;;  %v17975_v53 = vpop.f32.mrb[130].mxu1  ;;  %v1609_v23 = vand.u32 %v15673_v37, %v23679_v4 }
 0x1fc   :  { %v17976_v6 = vpop.f32.mrb[131].mxu1 }
 0x1fd   :  { %v24051_v13 = vadd.f32 %v17974_v9, %v23997_v24  ;;  %v17977_v3 = vadd.f32 %v17976_v6, %v17975_v53  ;;  %20237 = vmatprep.subr.bf16.mxu0 %v1609_v23 }
 0x1fe   :  { %20238 = vmatpush3.bf16.msra.mxu0 %v1609_v23 }
 0x1ff   :  { %v24054_v42 = vadd.f32 %v17977_v3, %v23999_v10 }
 0x201   :  { %v17978_v44 = vpop.f32.mrb[132].mxu1 }
 0x202   :  { %v17979_v33 = vpop.f32.mrb[133].mxu1 }
 0x203   :  { %v17980_v57 = vadd.f32 %v17979_v33, %v17978_v44  ;;  %v17981_v63 = vpop.f32.mrb[134].mxu1 }
 0x204   :  { %v17982_v0 = vpop.f32.mrb[135].mxu1 }
 0x205   :  { %v24063_v6 = vadd.f32 %v17980_v57, %v24007_v61  ;;  %v17983_v24 = vadd.f32 %v17982_v0, %v17981_v63 }
 0x207   :  { %v24066_v10 = vadd.f32 %v17983_v24, %v24009_v35 }
 0x209   :  { %v17984_v53 = vpop.f32.mrb[136].mxu1 }
 0x20a   :  { %v17985_v3 = vpop.f32.mrb[137].mxu1 }
 0x20b   :  { %v17986_v28 = vadd.f32 %v17985_v3, %v17984_v53  ;;  %v17987_v56 = vpop.f32.mrb[138].mxu1 }
 0x20c   :  { %v17988_v37 = vpop.f32.mrb[139].mxu1 }
 0x20d   :  { %v24071_v44 = vadd.f32 %v17986_v28, %v24017_v1  ;;  %v17989_v33 = vadd.f32 %v17988_v37, %v17987_v56 }
 0x20f   :  { %v24074_v61 = vadd.f32 %v17989_v33, %v24019_v19 }
 0x211   :  { %v17990_v0 = vpop.f32.mrb[140].mxu1 }
 0x212   :  { %v17991_v23 = vpop.f32.mrb[141].mxu1 }
 0x213   :  { %v17992_v57 = vadd.f32 %v17991_v23, %v17990_v0  ;;  %v17993_v63 = vpop.f32.mrb[142].mxu1 }
 0x214   :  { %v17994_v24 = vpop.f32.mrb[143].mxu1 }
 0x215   :  { %v24079_v9 = vadd.f32 %v17992_v57, %v24027_v48  ;;  %v17995_v53 = vadd.f32 %v17994_v24, %v17993_v63 }
 0x217   :  { %v24082_v3 = vadd.f32 %v17995_v53, %v24029_v58 }
 0x219   :  { %v17996_v1 = vpop.f32.mrb[144].mxu1 }
 0x21a   :  { %v17997_v19 = vpop.f32.mrb[145].mxu1 }
 0x21b   :  { %v17998_v28 = vadd.f32 %v17997_v19, %v17996_v1  ;;  %v17999_v37 = vpop.f32.mrb[146].mxu1 }
 0x21c   :  { %v18000_v33 = vpop.f32.mrb[147].mxu1 }
 0x21d   :  { %v24087_v35 = vadd.f32 %v17998_v28, %v24034_v15  ;;  %v18001_v0 = vadd.f32 %v18000_v33, %v17999_v37 }
 0x21f   :  { %v24090_v23 = vadd.f32 %v18001_v0, %v24036_v59 }
 0x221   :  { %v18002_v48 = vpop.f32.mrb[148].mxu1 }
 0x222   :  { %v18003_v57 = vpop.f32.mrb[149].mxu1 }
 0x223   :  { %v18004_v63 = vadd.f32 %v18003_v57, %v18002_v48  ;;  %v18005_v24 = vpop.f32.mrb[150].mxu1 }
 0x224   :  { %v18006_v53 = vpop.f32.mrb[151].mxu1 }
 0x225   :  { %v24095_v56 = vadd.f32 %v18004_v63, %v24038_v31  ;;  %v18007_v1 = vadd.f32 %v18006_v53, %v18005_v24 }
 0x227   :  { %v24098_v19 = vadd.f32 %v18007_v1, %v24040_v22 }
 0x229   :  { %v18008_v15 = vpop.f32.mrb[152].mxu1 }
 0x22a   :  { %v18009_v28 = vpop.f32.mrb[153].mxu1 }
 0x22b   :  { %v18010_v37 = vadd.f32 %v18009_v28, %v18008_v15  ;;  %v18011_v33 = vpop.f32.mrb[154].mxu1 }
 0x22c   :  { %v18012_v0 = vpop.f32.mrb[155].mxu1 }
 0x22d   :  { %v24103_v58 = vadd.f32 %v18010_v37, %v24042_v47  ;;  %v18013_v48 = vadd.f32 %v18012_v0, %v18011_v33  ;;  %v15746_v47 = vld [vmem:[%s28357_s2 + $0x6] sm:$0x3]  ;;  %v22175_v33 = vld [vmem:[%s28356_s1 + $0x42c] ss:$16 sps:$4 sm:$0xff]   ;;  %v22177_v0 = vld [vmem:[%s28356_s1 + $0x428] ss:$16 sps:$4 sm:$0xff]  }
 0x22e   :  { %v24122_v37 = vand.u32 %v15746_v47, %v23679_v4 }
 0x22f   :  { %v24106_v57 = vadd.f32 %v18013_v48, %v24044_v60  ;;  %v22181_v48 = vld [vmem:[%s28356_s1 + $0x44c] ss:$16 sps:$4 sm:$0xff]  }
 0x230   :  { %20255 = vmatprep.subr.bf16.mxu0 %v24122_v37 }
 0x231   :  { %v18014_v31 = vpop.f32.mrb[156].mxu1 }
 0x232   :  { %v18015_v63 = vpop.f32.mrb[157].mxu1 }
 0x233   :  { %v18016_v24 = vadd.f32 %v18015_v63, %v18014_v31  ;;  %v18017_v53 = vpop.f32.mrb[158].mxu1  ;;  %v22183_v31 = vld [vmem:[%s28356_s1 + $0x448] ss:$16 sps:$4 sm:$0xff]  }
 0x234   :  { %v18018_v1 = vpop.f32.mrb[159].mxu1  ;;  %v28483_v63 = vld [vmem:[#allocation15_spill] sm:$0xff] }
 0x235   :  { %v24111_v59 = vadd.f32 %v18016_v24, %v24046_v46  ;;  %v18019_v15 = vadd.f32 %v18018_v1, %v18017_v53  ;;  %v22169_v46 = vld [vmem:[%s28356_s1 + $0x408] ss:$16 sps:$4 sm:$0xff]   ;;  %v22187_v24 = vld [vmem:[%s28356_s1 + $0x46c] ss:$16 sps:$4 sm:$0xff]  }
 0x236   :  { %v22189_v53 = vld [vmem:[%s28356_s1 + $0x468] ss:$16 sps:$4 sm:$0xff]  }
 0x237   :  { %v24114_v28 = vadd.f32 %v18019_v15, %v24048_v27  ;;  %v22171_v27 = vld [vmem:[%s28356_s1 + $0x40c] ss:$16 sps:$4 sm:$0xff]   ;;  %v28484_v1 = vld [vmem:[#allocation17_spill] sm:$0xff]  ;;  %v28485_v15 = vld [vmem:[#allocation19_spill] sm:$0xff] }
 0x238   :  { %2583 = vmatprep.mubr.bf16.mxu1 %v22171_v27 }
 0x239   :  { %2584 = vmatmul.mubr.bf16.vlgmr.msra.gmra.mrb[160].mxu1 %v22169_v46  ;;  %v28486_v46 = vld [vmem:[#allocation21_spill] sm:$0xff] }
 0x23a   :  { %18167 = vmatpush3.bf16.msra.mxu1 %v23121_v8  ;;  %2591 = vmatprep.mubr.bf16.mxu1 %v22175_v33  ;;  %v28487_v33 = vld [vmem:[#allocation23_spill] sm:$0xff] }
 0x23b   :  { %18168 = vmatprep.subr.bf16.mxu1 %v23146_v16 }
 0x23e   :  { %18169 = vmatpush3.bf16.msra.mxu1 %v23160_v21 }
 0x23f   :  { %18170 = vmatprep.subr.bf16.mxu1 %v23175_v26 }
 0x241   :  { %2592 = vmatmul.mubr.bf16.gmra.mrb[164].mxu1 %v22177_v0 }
 0x242   :  { %18171 = vmatpush3.bf16.msra.mxu1 %v23198_v34  ;;  %2599 = vmatprep.mubr.bf16.mxu1 %v22181_v48 }
 0x243   :  { %18172 = vmatprep.subr.bf16.mxu1 %v23213_v39 }
 0x246   :  { %18173 = vmatpush3.bf16.msra.mxu1 %v23246_v50 }
 0x247   :  { %18174 = vmatprep.subr.bf16.mxu1 %v23252_v52 }
 0x249   :  { %2600 = vmatmul.mubr.bf16.gmra.mrb[168].mxu1 %v22183_v31  ;;  %v22193_v31 = vld [vmem:[%s28356_s1 + $0x48c] ss:$16 sps:$4 sm:$0xff]  }
 0x24a   :  { %18175 = vmatpush3.bf16.msra.mxu1 %v23282_v62  ;;  %2607 = vmatprep.mubr.bf16.mxu1 %v22187_v24  ;;  %v22195_v24 = vld [vmem:[%s28356_s1 + $0x488] ss:$16 sps:$4 sm:$0xff]  }
 0x24b   :  { %18176 = vmatprep.subr.bf16.mxu1 %v28483_v63 }
 0x24e   :  { %18177 = vmatpush3.bf16.msra.mxu1 %v28484_v1 }
 0x24f   :  { %18178 = vmatprep.subr.bf16.mxu1 %v28485_v15 }
 0x251   :  { %2608 = vmatmul.mubr.bf16.gmra.mrb[172].mxu1 %v22189_v53 }
 0x252   :  { %18179 = vmatpush3.bf16.msra.mxu1 %v28486_v46  ;;  %2615 = vmatprep.mubr.bf16.mxu1 %v22193_v31 }
 0x253   :  { %18180 = vmatprep.subr.bf16.mxu1 %v28487_v33 }
 0x256   :  { %18181 = vmatpush3.bf16.msra.mxu1 %v28488_v51 }
 0x257   :  { %18303 = vmatprep.subr.bf16.mxu1 %v28489_v43 }
 0x259   :  { %2616 = vmatmul.mubr.bf16.gmra.mrb[176].mxu1 %v22195_v24 }
 0x276   :  { %v17835_v47 = vpop.f32.mrb[80].mxu0 }
 0x277   :  { %v17836_v27 = vpop.f32.mrb[81].mxu0 }
 0x278   :  { %v17837_v0 = vadd.f32 %v17836_v27, %v17835_v47  ;;  %v17838_v48 = vpop.f32.mrb[82].mxu0 }
 0x279   :  { %v17839_v60 = vpop.f32.mrb[83].mxu0 }
 0x27a   :  { %v1512_v22 = vadd.f32 %v17837_v0, %v23891_v40  ;;  %v17840_v53 = vadd.f32 %v17839_v60, %v17838_v48  ;;  %v22199_v40 = vld [vmem:[%s28356_s1 + $0x4ac] ss:$16 sps:$4 sm:$0xff]   ;;  %v22201_v0 = vld [vmem:[%s28356_s1 + $0x4a8] ss:$16 sps:$4 sm:$0xff]  }
 0x27b   :  { %2623 = vmatprep.mubr.bf16.mxu1 %v22199_v40 }
 0x27c   :  { %v1515_v47 = vadd.f32 %v17840_v53, %v23897_v5  ;;  %2624 = vmatmul.mubr.bf16.gmra.mrb[180].mxu1 %v22201_v0 }
 0x27e   :  { %v17841_v27 = vpop.f32.mrb[84].mxu0  ;;  %v1574_v38 = vpack.c.bf16 %v1515_v47, %v1512_v22  ;;  %v22205_v47 = vld [vmem:[%s28356_s1 + $0x4cc] ss:$16 sps:$4 sm:$0xff]  }
 0x27f   :  { %v17842_v30 = vpop.f32.mrb[85].mxu0  ;;  %2631 = vmatprep.mubr.bf16.mxu1 %v22205_v47 }
 0x280   :  { %v17843_v25 = vadd.f32 %v17842_v30, %v17841_v27  ;;  %v17844_v17 = vpop.f32.mrb[86].mxu0  ;;  %20239 = vmatprep.mubr.msk.bf16.mxu0 %vm934_vm2, %v1574_v38 }
 0x281   :  { %v17845_v60 = vpop.f32.mrb[87].mxu0 }
 0x282   :  { %v1520_v48 = vadd.f32 %v17843_v25, %v23903_v18  ;;  %v17846_v5 = vadd.f32 %v17845_v60, %v17844_v17  ;;  %v22207_v17 = vld [vmem:[%s28356_s1 + $0x4c8] ss:$16 sps:$4 sm:$0xff]  }
 0x284   :  { %v1523_v22 = vadd.f32 %v17846_v5, %v23911_v2  ;;  %2632 = vmatmul.mubr.bf16.gmra.mrb[184].mxu1 %v22207_v17 }
 0x286   :  { %v1575_v30 = vpack.c.bf16 %v1523_v22, %v1520_v48  ;;  %v17847_v31 = vpop.f32.mrb[88].mxu0 }
 0x287   :  { %v17848_v24 = vpop.f32.mrb[89].mxu0 }
 0x288   :  { %v17849_v38 = vadd.f32 %v17848_v24, %v17847_v31  ;;  %v17850_v53 = vpop.f32.mrb[90].mxu0  ;;  %20240 = vmatmul.mubr.msk.bf16.vlgmr.msra.gmra.mrb[64].mxu0 %vm934_vm2, %v1575_v30 }
 0x289   :  { %v17851_v27 = vpop.f32.mrb[91].mxu0  ;;  %20256 = vmatpush3.bf16.msra.mxu0 %v24122_v37  ;;  %v22211_v37 = vld [vmem:[%s28356_s1 + $0x4ec] ss:$16 sps:$4 sm:$0xff]  }
 0x28a   :  { %v1528_v25 = vadd.f32 %v17849_v38, %v23919_v11  ;;  %v17852_v18 = vadd.f32 %v17851_v27, %v17850_v53  ;;  %18029 = vmatprep.subr.bf16.mxu0 %v28489_v43  ;;  %v22213_v11 = vld [vmem:[%s28356_s1 + $0x4e8] ss:$16 sps:$4 sm:$0xff]   ;;  %2639 = vmatprep.mubr.bf16.mxu1 %v22211_v37 }
 0x28c   :  { %v1531_v2 = vadd.f32 %v17852_v18, %v23927_v14  ;;  %2640 = vmatmul.mubr.bf16.gmra.mrb[188].mxu1 %v22213_v11 }
 0x28e   :  { %v17853_v40 = vpop.f32.mrb[92].mxu0  ;;  %v1576_v60 = vpack.c.bf16 %v1531_v2, %v1528_v25 }
 0x28f   :  { %v17854_v0 = vpop.f32.mrb[93].mxu0 }
 0x290   :  { %v17855_v48 = vadd.f32 %v17854_v0, %v17853_v40  ;;  %v17856_v5 = vpop.f32.mrb[94].mxu0  ;;  %20243 = vmatprep.mubr.msk.bf16.mxu0 %vm934_vm2, %v1576_v60 }
 0x291   :  { %v17857_v22 = vpop.f32.mrb[95].mxu0 }
 0x292   :  { %v1536_v30 = vadd.f32 %v17855_v48, %v23935_v49  ;;  %v17858_v14 = vadd.f32 %v17857_v22, %v17856_v5 }
 0x294   :  { %v1539_v31 = vadd.f32 %v17858_v14, %v23943_v20 }
 0x296   :  { %v17859_v24 = vpop.f32.mrb[96].mxu0  ;;  %v1577_v38 = vpack.c.bf16 %v1539_v31, %v1536_v30 }
 0x297   :  { %v17860_v53 = vpop.f32.mrb[97].mxu0 }
 0x298   :  { %v17861_v47 = vadd.f32 %v17860_v53, %v17859_v24  ;;  %v17862_v27 = vpop.f32.mrb[98].mxu0  ;;  %20244 = vmatmul.mubr.msk.bf16.gmra.mrb[68].mxu0 %vm934_vm2, %v1577_v38 }
 0x299   :  { %v17863_v17 = vpop.f32.mrb[99].mxu0 }
 0x29a   :  { %v1544_v25 = vadd.f32 %v17861_v47, %v23954_v55  ;;  %v17864_v18 = vadd.f32 %v17863_v17, %v17862_v27 }
 0x29c   :  { %v1547_v2 = vadd.f32 %v17864_v18, %v23961_v36 }
 0x29e   :  { %v17865_v40 = vpop.f32.mrb[100].mxu0  ;;  %v1578_v49 = vpack.c.bf16 %v1547_v2, %v1544_v25 }
 0x29f   :  { %v17866_v60 = vpop.f32.mrb[101].mxu0 }
 0x2a0   :  { %v17867_v0 = vadd.f32 %v17866_v60, %v17865_v40  ;;  %v17868_v48 = vpop.f32.mrb[102].mxu0  ;;  %20247 = vmatprep.mubr.msk.bf16.mxu0 %vm934_vm2, %v1578_v49  ;;  %v28492_v60 = vpack.c.bf16 %v24074_v61, %v24071_v44  ;;  %v22178_v44 = vld [vmem:[%s28356_s1 + $0x424] ss:$16 sps:$4 sm:$0xff]   ;;  %v22180_v61 = vld [vmem:[%s28356_s1 + $0x420] ss:$16 sps:$4 sm:$0xff]  }
 0x2a1   :  { %v17869_v20 = vpop.f32.mrb[103].mxu0 }
 0x2a2   :  { %v1552_v5 = vadd.f32 %v17867_v0, %v23967_v29  ;;  %v17870_v37 = vadd.f32 %v17869_v20, %v17868_v48  ;;  %v22210_v0 = vld [vmem:[%s28356_s1 + $0x4c0] ss:$16 sps:$4 sm:$0xff]   ;;  %v22214_v48 = vld [vmem:[%s28356_s1 + $0x4e4] ss:$16 sps:$4 sm:$0xff]  }
 0x2a3   :  { %v22216_v20 = vld [vmem:[%s28356_s1 + $0x4e0] ss:$16 sps:$4 sm:$0xff]  }
 0x2a4   :  { %v1555_v22 = vadd.f32 %v17870_v37, %v23972_v32 }
 0x2a6   :  { %v17871_v11 = vpop.f32.mrb[104].mxu0  ;;  %v1579_v30 = vpack.c.bf16 %v1555_v22, %v1552_v5 }
 0x2a7   :  { %v17872_v14 = vpop.f32.mrb[105].mxu0 }
 0x2a8   :  { %v17873_v55 = vadd.f32 %v17872_v14, %v17871_v11  ;;  %v17874_v31 = vpop.f32.mrb[106].mxu0  ;;  %20248 = vmatmul.mubr.msk.bf16.gmra.mrb[72].mxu0 %vm934_vm2, %v1579_v30 }
 0x2a9   :  { %v17875_v36 = vpop.f32.mrb[107].mxu0 }
 0x2aa   :  { %v1560_v24 = vadd.f32 %v17873_v55, %v23977_v41  ;;  %v17876_v38 = vadd.f32 %v17875_v36, %v17874_v31  ;;  %v28490_v41 = vpack.c.bf16 %v24054_v42, %v24051_v13  ;;  %v28495_v13 = vpack.c.bf16 %v24098_v19, %v24095_v56  ;;  %v22190_v56 = vld [vmem:[%s28356_s1 + $0x464] ss:$16 sps:$4 sm:$0xff]   ;;  %v22198_v19 = vld [vmem:[%s28356_s1 + $0x480] ss:$16 sps:$4 sm:$0xff]  }
 0x2ab   :  { %v28496_v42 = vpack.c.bf16 %v24106_v57, %v24103_v58  ;;  %v22196_v58 = vld [vmem:[%s28356_s1 + $0x484] ss:$16 sps:$4 sm:$0xff]   ;;  %v22204_v57 = vld [vmem:[%s28356_s1 + $0x4a0] ss:$16 sps:$4 sm:$0xff]  }
 0x2ac   :  { %v1563_v53 = vadd.f32 %v17876_v38, %v23982_v7  ;;  %v28491_v7 = vpack.c.bf16 %v24066_v10, %v24063_v6  ;;  %v22174_v6 = vld [vmem:[%s28356_s1 + $0x404] ss:$16 sps:$4 sm:$0xff]   ;;  %v28497_v10 = vpack.c.bf16 %v24114_v28, %v24111_v59 }
 0x2ad   :  { %v22202_v59 = vld [vmem:[%s28356_s1 + $0x4a4] ss:$16 sps:$4 sm:$0xff]  }
 0x2ae   :  { %v17877_v47 = vpop.f32.mrb[108].mxu0  ;;  %v1580_v27 = vpack.c.bf16 %v1563_v53, %v1560_v24  ;;  %v22208_v28 = vld [vmem:[%s28356_s1 + $0x4c4] ss:$16 sps:$4 sm:$0xff]  }
 0x2af   :  { %v17878_v17 = vpop.f32.mrb[109].mxu0 }
 0x2b0   :  { %v17879_v29 = vadd.f32 %v17878_v17, %v17877_v47  ;;  %v17880_v25 = vpop.f32.mrb[110].mxu0  ;;  %20251 = vmatprep.mubr.msk.bf16.mxu0 %vm934_vm2, %v1580_v27  ;;  %v15819_v47 = vld [vmem:[%s28357_s2 + $0x8] sm:$0x3] }
 0x2b1   :  { %v17881_v32 = vpop.f32.mrb[111].mxu0  ;;  %v2683_v27 = vand.u32 %v15819_v47, %v23679_v4  ;;  %v22225_v47 = vld [vmem:[%s28356_s1 + $0x520] ss:$16 sps:$4 sm:$0xff]  }
 0x2b2   :  { %v1568_v18 = vadd.f32 %v17879_v29, %v23987_v54  ;;  %v17882_v2 = vadd.f32 %v17881_v32, %v17880_v25  ;;  %v28493_v54 = vpack.c.bf16 %v24082_v3, %v24079_v9  ;;  %v22172_v9 = vld [vmem:[%s28356_s1 + $0x400] ss:$16 sps:$4 sm:$0xff]  }
 0x2b3   :  { %v22186_v3 = vld [vmem:[%s28356_s1 + $0x440] ss:$16 sps:$4 sm:$0xff]  }
 0x2b4   :  { %v1571_v40 = vadd.f32 %v17882_v2, %v23992_v45  ;;  %v28494_v45 = vpack.c.bf16 %v24090_v23, %v24087_v35  ;;  %v22184_v35 = vld [vmem:[%s28356_s1 + $0x444] ss:$16 sps:$4 sm:$0xff]   ;;  %v22192_v23 = vld [vmem:[%s28356_s1 + $0x460] ss:$16 sps:$4 sm:$0xff]  }
 0x2b5   :  { %v28498_v2 = vld [vmem:[#allocation6_spill] sm:$0xff] }
 0x2b6   :  { %v1581_v49 = vpack.c.bf16 %v1571_v40, %v1568_v18 }
 0x2b8   :  { %20252 = vmatmul.mubr.msk.bf16.gmra.mrb[76].mxu0 %vm934_vm2, %v1581_v49 }
 0x2b9   :  { %20257 = vmatprep.mubr.msk.bf16.mxu0 %vm934_vm2, %v28490_v41 }
 0x2c0   :  { %20258 = vmatmul.mubr.msk.bf16.vlgmr.msra.gmra.mrb[64].mxu0 %vm934_vm2, %v28491_v7 }
 0x2c1   :  { %20261 = vmatprep.mubr.msk.bf16.mxu0 %vm934_vm2, %v28492_v60  ;;  %18030 = vmatpush3.bf16.msra.mxu0 %v23121_v8 }
 0x2c2   :  { %18031 = vmatprep.subr.bf16.mxu0 %v23146_v16 }
 0x2c5   :  { %18032 = vmatpush3.bf16.msra.mxu0 %v23160_v21 }
 0x2c6   :  { %18033 = vmatprep.subr.bf16.mxu0 %v23175_v26 }
 0x2c8   :  { %20262 = vmatmul.mubr.msk.bf16.gmra.mrb[68].mxu0 %vm934_vm2, %v28493_v54 }
 0x2c9   :  { %20265 = vmatprep.mubr.msk.bf16.mxu0 %vm934_vm2, %v28494_v45  ;;  %18034 = vmatpush3.bf16.msra.mxu0 %v23198_v34 }
 0x2ca   :  { %18035 = vmatprep.subr.bf16.mxu0 %v23213_v39 }
 0x2cd   :  { %18036 = vmatpush3.bf16.msra.mxu0 %v23246_v50 }
 0x2ce   :  { %18037 = vmatprep.subr.bf16.mxu0 %v23252_v52 }
 0x2d0   :  { %20266 = vmatmul.mubr.msk.bf16.gmra.mrb[72].mxu0 %vm934_vm2, %v28495_v13 }
 0x2d1   :  { %20269 = vmatprep.mubr.msk.bf16.mxu0 %vm934_vm2, %v28496_v42  ;;  %18038 = vmatpush3.bf16.msra.mxu0 %v23282_v62 }
 0x2d2   :  { %18039 = vmatprep.subr.bf16.mxu0 %v28483_v63 }
 0x2d5   :  { %18040 = vmatpush3.bf16.msra.mxu0 %v28484_v1 }
 0x2d6   :  { %18041 = vmatprep.subr.bf16.mxu0 %v28485_v15 }
 0x2d8   :  { %20270 = vmatmul.mubr.msk.bf16.gmra.mrb[76].mxu0 %vm934_vm2, %v28497_v10 }
 0x2d9   :  { %18042 = vmatpush3.bf16.msra.mxu0 %v28486_v46  ;;  %2486 = vmatprep.mubr.bf16.mxu0 %v22174_v6 }
 0x2da   :  { %18043 = vmatprep.subr.bf16.mxu0 %v28487_v33 }
 0x2dd   :  { %18044 = vmatpush3.bf16.msra.mxu0 %v28488_v51 }
 0x2de   :  { %20273 = vmatprep.subr.bf16.mxu0 %v2683_v27 }
 0x2e0   :  { %2487 = vmatmul.mubr.bf16.vlgmr.msra.gmra.mrb[112].mxu0 %v22172_v9 }
 0x2e1   :  { %2494 = vmatprep.mubr.bf16.mxu0 %v22178_v44  ;;  %20274 = vmatpush3.bf16.msra.mxu0 %v2683_v27  ;;  %v22229_v27 = vld [vmem:[%s28356_s1 + $0x544] ss:$16 sps:$4 sm:$0xff]  }
 0x2e2   :  { %18230 = vmatprep.subr.bf16.mxu0 %v28498_v2 }
 0x2e8   :  { %2495 = vmatmul.mubr.bf16.gmra.mrb[116].mxu0 %v22180_v61 }
 0x2e9   :  { %2502 = vmatprep.mubr.bf16.mxu0 %v22184_v35 }
 0x2f0   :  { %2503 = vmatmul.mubr.bf16.gmra.mrb[120].mxu0 %v22186_v3 }
 0x2f1   :  { %2510 = vmatprep.mubr.bf16.mxu0 %v22190_v56 }
 0x2f8   :  { %2511 = vmatmul.mubr.bf16.gmra.mrb[124].mxu0 %v22192_v23 }
 0x2f9   :  { %2518 = vmatprep.mubr.bf16.mxu0 %v22196_v58 }
 0x300   :  { %2519 = vmatmul.mubr.bf16.gmra.mrb[128].mxu0 %v22198_v19 }
 0x301   :  { %2526 = vmatprep.mubr.bf16.mxu0 %v22202_v59 }
 0x308   :  { %2527 = vmatmul.mubr.bf16.gmra.mrb[132].mxu0 %v22204_v57 }
 0x309   :  { %2534 = vmatprep.mubr.bf16.mxu0 %v22208_v28 }
 0x30c   :  { %v18109_v5 = vpop.f32.mrb[160].mxu1 }
 0x30d   :  { %v18110_v37 = vpop.f32.mrb[161].mxu1 }
 0x30e   :  { %v24310_v22 = vadd.f32 %v18110_v37, %v18109_v5  ;;  %v18112_v11 = vpop.f32.mrb[162].mxu1 }
 0x30f   :  { %v18113_v30 = vpop.f32.mrb[163].mxu1 }
 0x310   :  { %2535 = vmatmul.mubr.bf16.gmra.mrb[136].mxu0 %v22210_v0  ;;  %v24312_v14 = vadd.f32 %v18113_v30, %v18112_v11 }
 0x311   :  { %2542 = vmatprep.mubr.bf16.mxu0 %v22214_v48 }
 0x314   :  { %v18115_v55 = vpop.f32.mrb[164].mxu1 }
 0x315   :  { %v18116_v31 = vpop.f32.mrb[165].mxu1 }
 0x316   :  { %v24314_v36 = vadd.f32 %v18116_v31, %v18115_v55  ;;  %v18118_v24 = vpop.f32.mrb[166].mxu1  ;;  %v22217_v31 = vld [vmem:[%s28356_s1 + $0x500] ss:$16 sps:$4 sm:$0xff]  }
 0x317   :  { %v18119_v38 = vpop.f32.mrb[167].mxu1 }
 0x318   :  { %2543 = vmatmul.mubr.bf16.gmra.mrb[140].mxu0 %v22216_v20  ;;  %v24316_v53 = vadd.f32 %v18119_v38, %v18118_v24  ;;  %v22219_v24 = vld [vmem:[%s28356_s1 + $0x504] ss:$16 sps:$4 sm:$0xff]  }
 0x319   :  { %3023 = vmatprep.mubr.bf16.mxu1 %v22219_v24  ;;  %v22223_v38 = vld [vmem:[%s28356_s1 + $0x524] ss:$16 sps:$4 sm:$0xff]   ;;  %v22270_v24 = vld [vmem:[%s28356_s1 + $0x620] ss:$16 sps:$4 sm:$0xff]  }
 0x31a   :  { %3024 = vmatmul.mubr.bf16.vlgmr.msra.gmra.mrb[192].mxu1 %v22217_v31 }
 0x31b   :  { %18304 = vmatpush3.bf16.msra.mxu1 %v23121_v8  ;;  %3031 = vmatprep.mubr.bf16.mxu1 %v22223_v38 }
 0x31c   :  { %v18121_v17 = vpop.f32.mrb[168].mxu1  ;;  %18305 = vmatprep.subr.bf16.mxu1 %v23146_v16 }
 0x31d   :  { %v18122_v29 = vpop.f32.mrb[169].mxu1 }
 0x31e   :  { %v18124_v25 = vpop.f32.mrb[170].mxu1  ;;  %v24322_v32 = vadd.f32 %v18122_v29, %v18121_v17  ;;  %v22231_v17 = vld [vmem:[%s28356_s1 + $0x540] ss:$16 sps:$4 sm:$0xff]   ;;  %v22235_v29 = vld [vmem:[%s28356_s1 + $0x564] ss:$16 sps:$4 sm:$0xff]  }
 0x31f   :  { %v18125_v18 = vpop.f32.mrb[171].mxu1  ;;  %18306 = vmatpush3.bf16.msra.mxu1 %v23160_v21 }
 0x320   :  { %v24325_v40 = vadd.f32 %v18125_v18, %v18124_v25  ;;  %18307 = vmatprep.subr.bf16.mxu1 %v23175_v26  ;;  %v22237_v25 = vld [vmem:[%s28356_s1 + $0x560] ss:$16 sps:$4 sm:$0xff]   ;;  %v22241_v18 = vld [vmem:[%s28356_s1 + $0x584] ss:$16 sps:$4 sm:$0xff]  }
 0x322   :  { %3032 = vmatmul.mubr.bf16.gmra.mrb[196].mxu1 %v22225_v47 }
 0x323   :  { %18308 = vmatpush3.bf16.msra.mxu1 %v23198_v34  ;;  %3039 = vmatprep.mubr.bf16.mxu1 %v22229_v27 }
 0x324   :  { %v18127_v49 = vpop.f32.mrb[172].mxu1  ;;  %18309 = vmatprep.subr.bf16.mxu1 %v23213_v39 }
 0x325   :  { %v18128_v41 = vpop.f32.mrb[173].mxu1 }
 0x326   :  { %v24327_v7 = vadd.f32 %v18128_v41, %v18127_v49  ;;  %v18130_v60 = vpop.f32.mrb[174].mxu1  ;;  %v22243_v49 = vld [vmem:[%s28356_s1 + $0x580] ss:$16 sps:$4 sm:$0xff]   ;;  %v22247_v41 = vld [vmem:[%s28356_s1 + $0x5a4] ss:$16 sps:$4 sm:$0xff]  }
 0x327   :  { %v18131_v54 = vpop.f32.mrb[175].mxu1  ;;  %18310 = vmatpush3.bf16.msra.mxu1 %v23246_v50 }
 0x328   :  { %v24329_v45 = vadd.f32 %v18131_v54, %v18130_v60  ;;  %18311 = vmatprep.subr.bf16.mxu1 %v23252_v52  ;;  %v22249_v60 = vld [vmem:[%s28356_s1 + $0x5a0] ss:$16 sps:$4 sm:$0xff]   ;;  %v22253_v54 = vld [vmem:[%s28356_s1 + $0x5c4] ss:$16 sps:$4 sm:$0xff]  }
 0x32a   :  { %3040 = vmatmul.mubr.bf16.gmra.mrb[200].mxu1 %v22231_v17 }
 0x32b   :  { %18312 = vmatpush3.bf16.msra.mxu1 %v23282_v62  ;;  %3047 = vmatprep.mubr.bf16.mxu1 %v22235_v29 }
 0x32c   :  { %v18133_v13 = vpop.f32.mrb[176].mxu1  ;;  %18313 = vmatprep.subr.bf16.mxu1 %v28483_v63 }
 0x32d   :  { %v18134_v42 = vpop.f32.mrb[177].mxu1 }
 0x32e   :  { %v24331_v6 = vadd.f32 %v18134_v42, %v18133_v13  ;;  %v18136_v10 = vpop.f32.mrb[178].mxu1  ;;  %v22255_v13 = vld [vmem:[%s28356_s1 + $0x5c0] ss:$16 sps:$4 sm:$0xff]   ;;  %v22259_v42 = vld [vmem:[%s28356_s1 + $0x5e4] ss:$16 sps:$4 sm:$0xff]  }
 0x32f   :  { %v18137_v9 = vpop.f32.mrb[179].mxu1  ;;  %18314 = vmatpush3.bf16.msra.mxu1 %v28484_v1 }
 0x330   :  { %v24333_v44 = vadd.f32 %v18137_v9, %v18136_v10  ;;  %18315 = vmatprep.subr.bf16.mxu1 %v28485_v15  ;;  %v22261_v10 = vld [vmem:[%s28356_s1 + $0x5e0] ss:$16 sps:$4 sm:$0xff]  }
 0x332   :  { %3048 = vmatmul.mubr.bf16.gmra.mrb[204].mxu1 %v22237_v25 }
 0x333   :  { %18316 = vmatpush3.bf16.msra.mxu1 %v28486_v46  ;;  %3055 = vmatprep.mubr.bf16.mxu1 %v22241_v18 }
 0x334   :  { %18317 = vmatprep.subr.bf16.mxu1 %v28487_v33 }
 0x337   :  { %18318 = vmatpush3.bf16.msra.mxu1 %v28488_v51 }
 0x338   :  { %18440 = vmatprep.subr.bf16.mxu1 %v28489_v43 }
 0x33a   :  { %3056 = vmatmul.mubr.bf16.gmra.mrb[208].mxu1 %v22243_v49 }
 0x33b   :  { %3063 = vmatprep.mubr.bf16.mxu1 %v22247_v41  ;;  %v22273_v41 = vld [vmem:[%s28356_s1 + $0x640] ss:$16 sps:$4 sm:$0xff]  }
 0x342   :  { %3064 = vmatmul.mubr.bf16.gmra.mrb[212].mxu1 %v22249_v60 }
 0x343   :  { %3071 = vmatprep.mubr.bf16.mxu1 %v22253_v54 }
 0x34a   :  { %3072 = vmatmul.mubr.bf16.gmra.mrb[216].mxu1 %v22255_v13 }
 0x34b   :  { %3079 = vmatprep.mubr.bf16.mxu1 %v22259_v42 }
 0x34f   :  { %v18139_v61 = vpop.f32.mrb[180].mxu1 }
 0x350   :  { %v18140_v35 = vpop.f32.mrb[181].mxu1 }
 0x351   :  { %v24335_v3 = vadd.f32 %v18140_v35, %v18139_v61  ;;  %v18142_v56 = vpop.f32.mrb[182].mxu1 }
 0x352   :  { %v18143_v23 = vpop.f32.mrb[183].mxu1  ;;  %3080 = vmatmul.mubr.bf16.gmra.mrb[220].mxu1 %v22261_v10  ;;  %v28499_v10 = vld [vmem:[#allocation7_spill] sm:$0xff] }
 0x353   :  { %v24337_v58 = vadd.f32 %v18143_v23, %v18142_v56  ;;  %v22265_v23 = vld [vmem:[%s28356_s1 + $0x600] ss:$16 sps:$4 sm:$0xff]  }
 0x357   :  { %v18145_v19 = vpop.f32.mrb[184].mxu1 }
 0x358   :  { %v18146_v59 = vpop.f32.mrb[185].mxu1 }
 0x359   :  { %v24339_v57 = vadd.f32 %v18146_v59, %v18145_v19  ;;  %v18148_v28 = vpop.f32.mrb[186].mxu1  ;;  %v22267_v19 = vld [vmem:[%s28356_s1 + $0x604] ss:$16 sps:$4 sm:$0xff]  }
 0x35a   :  { %v18149_v0 = vpop.f32.mrb[187].mxu1  ;;  %3560 = vmatprep.mubr.bf16.mxu1 %v22267_v19 }
 0x35b   :  { %v24341_v48 = vadd.f32 %v18149_v0, %v18148_v28  ;;  %v22268_v28 = vld [vmem:[%s28356_s1 + $0x624] ss:$16 sps:$4 sm:$0xff]   ;;  %3561 = vmatmul.mubr.bf16.vlgmr.msra.gmra.mrb[224].mxu1 %v22265_v23 }
 0x35c   :  { %3568 = vmatprep.mubr.bf16.mxu1 %v22268_v28  ;;  %18441 = vmatpush3.bf16.msra.mxu1 %v23121_v8  ;;  %v28501_v23 = vld [vmem:[#allocation9_spill] sm:$0xff] }
 0x35d   :  { %18442 = vmatprep.subr.bf16.mxu1 %v23146_v16 }
 0x35f   :  { %v18151_v20 = vpop.f32.mrb[188].mxu1 }
 0x360   :  { %v18152_v5 = vpop.f32.mrb[189].mxu1  ;;  %18443 = vmatpush3.bf16.msra.mxu1 %v23160_v21 }
 0x361   :  { %v24343_v37 = vadd.f32 %v18152_v5, %v18151_v20  ;;  %v18154_v11 = vpop.f32.mrb[190].mxu1  ;;  %18444 = vmatprep.subr.bf16.mxu1 %v23175_v26 }
 0x362   :  { %v18155_v30 = vpop.f32.mrb[191].mxu1 }
 0x363   :  { %v24345_v55 = vadd.f32 %v18155_v30, %v18154_v11  ;;  %3569 = vmatmul.mubr.bf16.gmra.mrb[228].mxu1 %v22270_v24  ;;  %v28504_v24 = vld [vmem:[#allocation12_spill] sm:$0xff] }
 0x364   :  { %18445 = vmatpush3.bf16.msra.mxu1 %v23198_v34 }
 0x365   :  { %18446 = vmatprep.subr.bf16.mxu1 %v23213_v39 }
 0x368   :  { %18447 = vmatpush3.bf16.msra.mxu1 %v23246_v50 }
 0x369   :  { %18448 = vmatprep.subr.bf16.mxu1 %v23252_v52 }
 0x36c   :  { %18449 = vmatpush3.bf16.msra.mxu1 %v23282_v62 }
 0x36d   :  { %18450 = vmatprep.subr.bf16.mxu1 %v28483_v63 }
 0x370   :  { %18451 = vmatpush3.bf16.msra.mxu1 %v28484_v1 }
 0x371   :  { %18452 = vmatprep.subr.bf16.mxu1 %v28485_v15 }
 0x374   :  { %18453 = vmatpush3.bf16.msra.mxu1 %v28486_v46 }
 0x375   :  { %18454 = vmatprep.subr.bf16.mxu1 %v28487_v33 }
 0x378   :  { %18455 = vmatpush3.bf16.msra.mxu1 %v28488_v51 }
 0x379   :  { %18504 = vmatprep.subr.bf16.mxu1 %v28498_v2 }
 0x3b3   :  { %v18045_v9 = vpop.f32.mrb[112].mxu0 }
 0x3b4   :  { %v18046_v61 = vpop.f32.mrb[113].mxu0 }
 0x3b5   :  { %v18047_v35 = vadd.f32 %v18046_v61, %v18045_v9  ;;  %v18048_v56 = vpop.f32.mrb[114].mxu0  ;;  %v28500_v61 = vld [vmem:[#allocation8_spill] sm:$0xff] }
 0x3b6   :  { %v18049_v59 = vpop.f32.mrb[115].mxu0 }
 0x3b7   :  { %v2586_v0 = vadd.f32 %v24310_v22, %v18047_v35  ;;  %v18050_v20 = vadd.f32 %v18049_v59, %v18048_v56  ;;  %v22271_v22 = vld [vmem:[%s28356_s1 + $0x644] ss:$16 sps:$4 sm:$0xff]  }
 0x3b8   :  { %3576 = vmatprep.mubr.bf16.mxu1 %v22271_v22  ;;  %v28505_v22 = vld [vmem:[#allocation13_spill] sm:$0xff] }
 0x3b9   :  { %v2589_v5 = vadd.f32 %v24312_v14, %v18050_v20  ;;  %3577 = vmatmul.mubr.bf16.gmra.mrb[232].mxu1 %v22273_v41  ;;  %v28502_v20 = vld [vmem:[#allocation10_spill] sm:$0xff]  ;;  %v28507_v41 = vld [vmem:[#allocation16_spill] sm:$0xff] }
 0x3bb   :  { %v18051_v11 = vpop.f32.mrb[116].mxu0  ;;  %v2648_v30 = vpack.c.bf16 %v2589_v5, %v2586_v0 }
 0x3bc   :  { %v18052_v31 = vpop.f32.mrb[117].mxu0 }
 0x3bd   :  { %v18053_v38 = vadd.f32 %v18052_v31, %v18051_v11  ;;  %v18054_v47 = vpop.f32.mrb[118].mxu0  ;;  %20275 = vmatprep.mubr.msk.bf16.mxu0 %vm934_vm2, %v2648_v30  ;;  %v28503_v30 = vld [vmem:[#allocation11_spill] sm:$0xff] }
 0x3be   :  { %v18055_v14 = vpop.f32.mrb[119].mxu0 }
 0x3bf   :  { %v2594_v27 = vadd.f32 %v24314_v36, %v18053_v38  ;;  %v18056_v17 = vadd.f32 %v18055_v14, %v18054_v47  ;;  %v22274_v36 = vld [vmem:[%s28356_s1 + $0x664] ss:$16 sps:$4 sm:$0xff]  }
 0x3c0   :  { %3584 = vmatprep.mubr.bf16.mxu1 %v22274_v36 }
 0x3c1   :  { %v2597_v29 = vadd.f32 %v24316_v53, %v18056_v17 }
 0x3c3   :  { %v2649_v25 = vpack.c.bf16 %v2597_v29, %v2594_v27  ;;  %v18057_v18 = vpop.f32.mrb[120].mxu0 }
 0x3c4   :  { %v18058_v49 = vpop.f32.mrb[121].mxu0 }
 0x3c5   :  { %v18059_v60 = vadd.f32 %v18058_v49, %v18057_v18  ;;  %v18060_v54 = vpop.f32.mrb[122].mxu0  ;;  %20276 = vmatmul.mubr.msk.bf16.vlgmr.msra.gmra.mrb[64].mxu0 %vm934_vm2, %v2649_v25  ;;  %v28506_v25 = vld [vmem:[#allocation14_spill] sm:$0xff] }
 0x3c6   :  { %v18061_v53 = vpop.f32.mrb[123].mxu0  ;;  %18231 = vmatpush3.bf16.msra.mxu0 %v23133_v12 }
 0x3c7   :  { %v2602_v13 = vadd.f32 %v24322_v32, %v18059_v60  ;;  %v18062_v42 = vadd.f32 %v18061_v53, %v18060_v54  ;;  %18232 = vmatprep.subr.bf16.mxu0 %v28499_v10  ;;  %v22276_v32 = vld [vmem:[%s28356_s1 + $0x660] ss:$16 sps:$4 sm:$0xff]  }
 0x3c8   :  { %3585 = vmatmul.mubr.bf16.gmra.mrb[236].mxu1 %v22276_v32  ;;  %v28508_v54 = vld [vmem:[#allocation18_spill] sm:$0xff] }
 0x3c9   :  { %v2605_v9 = vadd.f32 %v24325_v40, %v18062_v42  ;;  %v22277_v40 = vld [vmem:[%s28356_s1 + $0x684] ss:$16 sps:$4 sm:$0xff]  }
 0x3ca   :  { %18233 = vmatpush3.bf16.msra.mxu0 %v28500_v61  ;;  %3592 = vmatprep.mubr.bf16.mxu1 %v22277_v40 }
 0x3cb   :  { %v18063_v35 = vpop.f32.mrb[124].mxu0  ;;  %v2650_v56 = vpack.c.bf16 %v2605_v9, %v2602_v13  ;;  %18234 = vmatprep.subr.bf16.mxu0 %v28501_v23  ;;  %v28509_v13 = vld [vmem:[#allocation20_spill] sm:$0xff] }
 0x3cc   :  { %v18064_v19 = vpop.f32.mrb[125].mxu0  ;;  %v22282_v9 = vld [vmem:[%s28356_s1 + $0x6a0] ss:$16 sps:$4 sm:$0xff]  }
 0x3cd   :  { %v18065_v59 = vadd.f32 %v18064_v19, %v18063_v35  ;;  %v18066_v28 = vpop.f32.mrb[126].mxu0  ;;  %20279 = vmatprep.mubr.msk.bf16.mxu0 %vm934_vm2, %v2650_v56  ;;  %v28510_v19 = vld [vmem:[#allocation22_spill] sm:$0xff] }
 0x3ce   :  { %v18067_v0 = vpop.f32.mrb[127].mxu0  ;;  %18235 = vmatpush3.bf16.msra.mxu0 %v28502_v20 }
 0x3cf   :  { %v2610_v5 = vadd.f32 %v24327_v7, %v18065_v59  ;;  %v18068_v11 = vadd.f32 %v18067_v0, %v18066_v28  ;;  %18236 = vmatprep.subr.bf16.mxu0 %v28503_v30  ;;  %v22279_v7 = vld [vmem:[%s28356_s1 + $0x680] ss:$16 sps:$4 sm:$0xff]  }
 0x3d0   :  { %3593 = vmatmul.mubr.bf16.gmra.mrb[240].mxu1 %v22279_v7  ;;  %v28511_v28 = vld [vmem:[#allocation24_spill] sm:$0xff]  ;;  %v28512_v0 = vld [vmem:[#allocation26_spill] sm:$0xff] }
 0x3d1   :  { %v2613_v31 = vadd.f32 %v24329_v45, %v18068_v11  ;;  %v22280_v45 = vld [vmem:[%s28356_s1 + $0x6a4] ss:$16 sps:$4 sm:$0xff]  }
 0x3d2   :  { %18237 = vmatpush3.bf16.msra.mxu0 %v28504_v24  ;;  %3600 = vmatprep.mubr.bf16.mxu1 %v22280_v45 }
 0x3d3   :  { %v18069_v38 = vpop.f32.mrb[128].mxu0  ;;  %v2651_v47 = vpack.c.bf16 %v2613_v31, %v2610_v5  ;;  %18238 = vmatprep.subr.bf16.mxu0 %v28505_v22 }
 0x3d4   :  { %v18070_v14 = vpop.f32.mrb[129].mxu0 }
 0x3d5   :  { %v18071_v27 = vadd.f32 %v18070_v14, %v18069_v38  ;;  %v18072_v17 = vpop.f32.mrb[130].mxu0  ;;  %20280 = vmatmul.mubr.msk.bf16.gmra.mrb[68].mxu0 %vm934_vm2, %v2651_v47  ;;  %v22285_v38 = vld [vmem:[%s28356_s1 + $0x6c0] ss:$16 sps:$4 sm:$0xff]  }
 0x3d6   :  { %v18073_v29 = vpop.f32.mrb[131].mxu0  ;;  %18239 = vmatpush3.bf16.msra.mxu0 %v28506_v25 }
 0x3d7   :  { %v2618_v18 = vadd.f32 %v24331_v6, %v18071_v27  ;;  %v18074_v49 = vadd.f32 %v18073_v29, %v18072_v17  ;;  %18240 = vmatprep.subr.bf16.mxu0 %v28507_v41 }
 0x3d8   :  { %3601 = vmatmul.mubr.bf16.gmra.mrb[244].mxu1 %v22282_v9 }
 0x3d9   :  { %v2621_v60 = vadd.f32 %v24333_v44, %v18074_v49  ;;  %v22283_v44 = vld [vmem:[%s28356_s1 + $0x6c4] ss:$16 sps:$4 sm:$0xff]   ;;  %v22288_v49 = vld [vmem:[%s28356_s1 + $0x6e0] ss:$16 sps:$4 sm:$0xff]  }
 0x3da   :  { %18241 = vmatpush3.bf16.msra.mxu0 %v28508_v54  ;;  %3608 = vmatprep.mubr.bf16.mxu1 %v22283_v44  ;;  %v22289_v44 = vld [vmem:[%s28356_s1 + $0x700] ss:$16 sps:$4 sm:$0xff]  }
 0x3db   :  { %v18075_v36 = vpop.f32.mrb[132].mxu0  ;;  %v2652_v53 = vpack.c.bf16 %v2621_v60, %v2618_v18  ;;  %18242 = vmatprep.subr.bf16.mxu0 %v28509_v13 }
 0x3dc   :  { %v18076_v42 = vpop.f32.mrb[133].mxu0 }
 0x3dd   :  { %v18077_v35 = vadd.f32 %v18076_v42, %v18075_v36  ;;  %v18078_v6 = vpop.f32.mrb[134].mxu0  ;;  %20283 = vmatprep.mubr.msk.bf16.mxu0 %vm934_vm2, %v2652_v53 }
 0x3de   :  { %v18079_v56 = vpop.f32.mrb[135].mxu0  ;;  %18243 = vmatpush3.bf16.msra.mxu0 %v28510_v19 }
 0x3df   :  { %v2626_v32 = vadd.f32 %v24335_v3, %v18077_v35  ;;  %v18080_v59 = vadd.f32 %v18079_v56, %v18078_v6  ;;  %18244 = vmatprep.subr.bf16.mxu0 %v28511_v28  ;;  %v22286_v3 = vld [vmem:[%s28356_s1 + $0x6e4] ss:$16 sps:$4 sm:$0xff]   ;;  %v22222_v35 = vld [vmem:[%s28356_s1 + $0x50c] ss:$16 sps:$4 sm:$0xff]  }
 0x3e0   :  { %3609 = vmatmul.mubr.bf16.gmra.mrb[248].mxu1 %v22285_v38  ;;  %v22226_v56 = vld [vmem:[%s28356_s1 + $0x52c] ss:$16 sps:$4 sm:$0xff]   ;;  %v22234_v38 = vld [vmem:[%s28356_s1 + $0x548] ss:$16 sps:$4 sm:$0xff]  }
 0x3e1   :  { %v2629_v40 = vadd.f32 %v24337_v58, %v18080_v59  ;;  %3616 = vmatprep.mubr.bf16.mxu1 %v22286_v3  ;;  %v22297_v59 = vld [vmem:[%s28356_s1 + $0x744] ss:$16 sps:$4 sm:$0xff]   ;;  %v22240_v3 = vld [vmem:[%s28356_s1 + $0x568] ss:$16 sps:$4 sm:$0xff]  }
 0x3e2   :  { %18245 = vmatpush3.bf16.msra.mxu0 %v28512_v0 }
 0x3e3   :  { %v18081_v5 = vpop.f32.mrb[136].mxu0  ;;  %v2653_v11 = vpack.c.bf16 %v2629_v40, %v2626_v32  ;;  %v22292_v32 = vld [vmem:[%s28356_s1 + $0x720] ss:$16 sps:$4 sm:$0xff]   ;;  %v22228_v40 = vld [vmem:[%s28356_s1 + $0x528] ss:$16 sps:$4 sm:$0xff]  }
 0x3e4   :  { %v18082_v31 = vpop.f32.mrb[137].mxu0 }
 0x3e5   :  { %v18083_v47 = vadd.f32 %v18082_v31, %v18081_v5  ;;  %v18084_v14 = vpop.f32.mrb[138].mxu0  ;;  %20284 = vmatmul.mubr.msk.bf16.gmra.mrb[72].mxu0 %vm934_vm2, %v2653_v11  ;;  %v22232_v5 = vld [vmem:[%s28356_s1 + $0x54c] ss:$16 sps:$4 sm:$0xff]   ;;  %v22295_v11 = vld [vmem:[%s28356_s1 + $0x740] ss:$16 sps:$4 sm:$0xff]  }
 0x3e6   :  { %v18085_v7 = vpop.f32.mrb[139].mxu0  ;;  %v22300_v31 = vld [vmem:[%s28356_s1 + $0x764] ss:$16 sps:$4 sm:$0xff]  }
 0x3e7   :  { %v2634_v58 = vadd.f32 %v24339_v57, %v18083_v47  ;;  %v18086_v27 = vadd.f32 %v18085_v7, %v18084_v14  ;;  %v22291_v57 = vld [vmem:[%s28356_s1 + $0x704] ss:$16 sps:$4 sm:$0xff]   ;;  %v22238_v47 = vld [vmem:[%s28356_s1 + $0x56c] ss:$16 sps:$4 sm:$0xff]   ;;  %v22298_v14 = vld [vmem:[%s28356_s1 + $0x760] ss:$16 sps:$4 sm:$0xff]  }
 0x3e8   :  { %3617 = vmatmul.mubr.bf16.gmra.mrb[252].mxu1 %v22288_v49  ;;  %v22244_v7 = vld [vmem:[%s28356_s1 + $0x58c] ss:$16 sps:$4 sm:$0xff]   ;;  %v22264_v49 = vld [vmem:[%s28356_s1 + $0x5e8] ss:$16 sps:$4 sm:$0xff]  }
 0x3e9   :  { %v2637_v17 = vadd.f32 %v24341_v48, %v18086_v27  ;;  %4097 = vmatprep.mubr.bf16.mxu1 %v22291_v57  ;;  %v22250_v27 = vld [vmem:[%s28356_s1 + $0x5ac] ss:$16 sps:$4 sm:$0xff]  }
 0x3eb   :  { %v18087_v45 = vpop.f32.mrb[140].mxu0  ;;  %v2654_v29 = vpack.c.bf16 %v2637_v17, %v2634_v58  ;;  %v22246_v58 = vld [vmem:[%s28356_s1 + $0x588] ss:$16 sps:$4 sm:$0xff]  }
 0x3ec   :  { %v18088_v18 = vpop.f32.mrb[141].mxu0  ;;  %v22252_v17 = vld [vmem:[%s28356_s1 + $0x5a8] ss:$16 sps:$4 sm:$0xff]  }
 0x3ed   :  { %v18089_v60 = vadd.f32 %v18088_v18, %v18087_v45  ;;  %v18090_v36 = vpop.f32.mrb[142].mxu0  ;;  %20287 = vmatprep.mubr.msk.bf16.mxu0 %vm934_vm2, %v2654_v29  ;;  %v22256_v45 = vld [vmem:[%s28356_s1 + $0x5cc] ss:$16 sps:$4 sm:$0xff]   ;;  %v22258_v29 = vld [vmem:[%s28356_s1 + $0x5c8] ss:$16 sps:$4 sm:$0xff]  }
 0x3ee   :  { %v18091_v53 = vpop.f32.mrb[143].mxu0  ;;  %v22262_v18 = vld [vmem:[%s28356_s1 + $0x5ec] ss:$16 sps:$4 sm:$0xff]  }
 0x3ef   :  { %v2642_v42 = vadd.f32 %v24343_v37, %v18089_v60  ;;  %v18092_v48 = vadd.f32 %v18091_v53, %v18090_v36  ;;  %v22294_v37 = vld [vmem:[%s28356_s1 + $0x724] ss:$16 sps:$4 sm:$0xff]   ;;  %v18182_v60 = vpop.f32.mrb[192].mxu1 }
 0x3f0   :  { %4098 = vmatmul.mubr.bf16.vlgmr.msra.gmra.mrb[0].mxu1 %v22289_v44  ;;  %v18183_v36 = vpop.f32.mrb[193].mxu1 }
 0x3f1   :  { %v2645_v9 = vadd.f32 %v24345_v55, %v18092_v48  ;;  %v22220_v55 = vld [vmem:[%s28356_s1 + $0x508] ss:$16 sps:$4 sm:$0xff]   ;;  %4105 = vmatprep.mubr.bf16.mxu1 %v22294_v37  ;;  %18505 = vmatpush3.bf16.msra.mxu1 %v23133_v12  ;;  %v24602_v57 = vadd.f32 %v18183_v36, %v18182_v60  ;;  %v18185_v53 = vpop.f32.mrb[194].mxu1  ;;  %v22312_v36 = vld [vmem:[%s28356_s1 + $0x7e4] ss:$16 sps:$4 sm:$0xff]  }
 0x3f2   :  { %18506 = vmatprep.subr.bf16.mxu1 %v28499_v10 }
 0x3f3   :  { %v2655_v6 = vpack.c.bf16 %v2645_v9, %v2642_v42  ;;  %v18186_v42 = vpop.f32.mrb[195].mxu1  ;;  %v22303_v9 = vld [vmem:[%s28356_s1 + $0x784] ss:$16 sps:$4 sm:$0xff]  }
 0x3f4   :  { %v24604_v48 = vadd.f32 %v18186_v42, %v18185_v53  ;;  %v22310_v42 = vld [vmem:[%s28356_s1 + $0x7e0] ss:$16 sps:$4 sm:$0xff]  }
 0x3f5   :  { %20288 = vmatmul.mubr.msk.bf16.gmra.mrb[76].mxu0 %vm934_vm2, %v2655_v6  ;;  %18507 = vmatpush3.bf16.msra.mxu1 %v28500_v61  ;;  %v22301_v6 = vld [vmem:[%s28356_s1 + $0x780] ss:$16 sps:$4 sm:$0xff]  }
 0x3f6   :  { %3120 = vmatprep.mubr.bf16.mxu0 %v22222_v35  ;;  %18508 = vmatprep.subr.bf16.mxu1 %v28501_v23  ;;  %v18188_v35 = vpop.f32.mrb[196].mxu1 }
 0x3f7   :  { %v18189_v44 = vpop.f32.mrb[197].mxu1 }
 0x3f8   :  { %4106 = vmatmul.mubr.bf16.gmra.mrb[4].mxu1 %v22292_v32  ;;  %v24612_v37 = vadd.f32 %v18189_v44, %v18188_v35 }
 0x3f9   :  { %4113 = vmatprep.mubr.bf16.mxu1 %v22297_v59  ;;  %18509 = vmatpush3.bf16.msra.mxu1 %v28502_v20  ;;  %v15892_v59 = vld [vmem:[%s28357_s2 + $0xa] sm:$0x3] }
 0x3fa   :  { %18510 = vmatprep.subr.bf16.mxu1 %v28503_v30 }
 0x3fd   :  { %3121 = vmatmul.mubr.bf16.vlgmr.msra.gmra.mrb[144].mxu0 %v22220_v55  ;;  %18511 = vmatpush3.bf16.msra.mxu1 %v28504_v24  ;;  %v18191_v55 = vpop.f32.mrb[198].mxu1 }
 0x3fe   :  { %3128 = vmatprep.mubr.bf16.mxu0 %v22226_v56  ;;  %18512 = vmatprep.subr.bf16.mxu1 %v28505_v22  ;;  %v18192_v56 = vpop.f32.mrb[199].mxu1 }
 0x3ff   :  { %v24614_v32 = vadd.f32 %v18192_v56, %v18191_v55  ;;  %v22315_v56 = vld [vmem:[%s28356_s1 + $0x70c] ss:$16 sps:$4 sm:$0xff]  }
 0x400   :  { %4114 = vmatmul.mubr.bf16.gmra.mrb[8].mxu1 %v22295_v11  ;;  %v18194_v11 = vpop.f32.mrb[200].mxu1 }
 0x401   :  { %4121 = vmatprep.mubr.bf16.mxu1 %v22300_v31  ;;  %18513 = vmatpush3.bf16.msra.mxu1 %v28506_v25  ;;  %v22304_v31 = vld [vmem:[%s28356_s1 + $0x7a0] ss:$16 sps:$4 sm:$0xff]  }
 0x402   :  { %18514 = vmatprep.subr.bf16.mxu1 %v28507_v41 }
 0x405   :  { %3129 = vmatmul.mubr.bf16.gmra.mrb[148].mxu0 %v22228_v40  ;;  %18515 = vmatpush3.bf16.msra.mxu1 %v28508_v54  ;;  %v3220_v40 = vand.u32 %v15892_v59, %v23679_v4 }
 0x406   :  { %3136 = vmatprep.mubr.bf16.mxu0 %v22232_v5  ;;  %18516 = vmatprep.subr.bf16.mxu1 %v28509_v13  ;;  %v22306_v5 = vld [vmem:[%s28356_s1 + $0x7a4] ss:$16 sps:$4 sm:$0xff]  }
 0x407   :  { %20291 = vmatprep.subr.bf16.mxu0 %v3220_v40 }
 0x408   :  { %4122 = vmatmul.mubr.bf16.gmra.mrb[12].mxu1 %v22298_v14  ;;  %20292 = vmatpush3.bf16.msra.mxu0 %v3220_v40  ;;  %v22313_v40 = vld [vmem:[%s28356_s1 + $0x708] ss:$16 sps:$4 sm:$0xff]  }
 0x409   :  { %18517 = vmatpush3.bf16.msra.mxu1 %v28510_v19  ;;  %4129 = vmatprep.mubr.bf16.mxu1 %v22303_v9 }
 0x40a   :  { %18518 = vmatprep.subr.bf16.mxu1 %v28511_v28  ;;  %18367 = vmatprep.subr.bf16.mxu0 %v28498_v2 }
 0x40d   :  { %3137 = vmatmul.mubr.bf16.gmra.mrb[152].mxu0 %v22234_v38  ;;  %18519 = vmatpush3.bf16.msra.mxu1 %v28512_v0  ;;  %v18195_v38 = vpop.f32.mrb[201].mxu1 }
 0x40e   :  { %3144 = vmatprep.mubr.bf16.mxu0 %v22238_v47  ;;  %18641 = vmatprep.subr.bf16.mxu1 %v28498_v2  ;;  %v18197_v47 = vpop.f32.mrb[202].mxu1  ;;  %v24626_v14 = vadd.f32 %v18195_v38, %v18194_v11 }
 0x410   :  { %4130 = vmatmul.mubr.bf16.gmra.mrb[16].mxu1 %v22301_v6 }
 0x411   :  { %4137 = vmatprep.mubr.bf16.mxu1 %v22306_v5 }
 0x415   :  { %3145 = vmatmul.mubr.bf16.gmra.mrb[156].mxu0 %v22240_v3  ;;  %v18198_v3 = vpop.f32.mrb[203].mxu1 }
 0x416   :  { %3152 = vmatprep.mubr.bf16.mxu0 %v22244_v7  ;;  %v24629_v7 = vadd.f32 %v18198_v3, %v18197_v47 }
 0x418   :  { %4138 = vmatmul.mubr.bf16.gmra.mrb[20].mxu1 %v22304_v31 }
 0x41d   :  { %3153 = vmatmul.mubr.bf16.gmra.mrb[160].mxu0 %v22246_v58  ;;  %v22309_v58 = vld [vmem:[%s28356_s1 + $0x7c4] ss:$16 sps:$4 sm:$0xff]  }
 0x41e   :  { %3160 = vmatprep.mubr.bf16.mxu0 %v22250_v27  ;;  %v18200_v27 = vpop.f32.mrb[204].mxu1  ;;  %4145 = vmatprep.mubr.bf16.mxu1 %v22309_v58  ;;  %v22316_v58 = vld [vmem:[%s28356_s1 + $0x728] ss:$16 sps:$4 sm:$0xff]  }
 0x425   :  { %3161 = vmatmul.mubr.bf16.gmra.mrb[164].mxu0 %v22252_v17  ;;  %v22307_v17 = vld [vmem:[%s28356_s1 + $0x7c0] ss:$16 sps:$4 sm:$0xff]  }
 0x426   :  { %3168 = vmatprep.mubr.bf16.mxu0 %v22256_v45  ;;  %v18201_v45 = vpop.f32.mrb[205].mxu1  ;;  %4146 = vmatmul.mubr.bf16.gmra.mrb[24].mxu1 %v22307_v17 }
 0x427   :  { %4153 = vmatprep.mubr.bf16.mxu1 %v22312_v36 }
 0x42d   :  { %3169 = vmatmul.mubr.bf16.gmra.mrb[168].mxu0 %v22258_v29  ;;  %v24637_v29 = vadd.f32 %v18201_v45, %v18200_v27  ;;  %v22318_v27 = vld [vmem:[%s28356_s1 + $0x72c] ss:$16 sps:$4 sm:$0xff]  }
 0x42e   :  { %3176 = vmatprep.mubr.bf16.mxu0 %v22262_v18  ;;  %v18203_v18 = vpop.f32.mrb[206].mxu1  ;;  %4154 = vmatmul.mubr.bf16.gmra.mrb[28].mxu1 %v22310_v42 }
 0x42f   :  { %4194 = vmatprep.mubr.bf16.mxu1 %v22315_v56 }
 0x435   :  { %3177 = vmatmul.mubr.bf16.gmra.mrb[172].mxu0 %v22264_v49  ;;  %v18204_v49 = vpop.f32.mrb[207].mxu1 }
 0x436   :  { %v24639_v60 = vadd.f32 %v18204_v49, %v18203_v18  ;;  %v18206_v53 = vpop.f32.mrb[208].mxu1  ;;  %4195 = vmatmul.mubr.bf16.vlgmr.msra.gmra.mrb[32].mxu1 %v22313_v40 }
 0x437   :  { %v18207_v9 = vpop.f32.mrb[209].mxu1  ;;  %18642 = vmatpush3.bf16.msra.mxu1 %v23133_v12  ;;  %4202 = vmatprep.mubr.bf16.mxu1 %v22318_v27  ;;  %v22331_v27 = vld [vmem:[%s28356_s1 + $0x7a8] ss:$16 sps:$4 sm:$0xff]  }
 0x438   :  { %v24647_v35 = vadd.f32 %v18207_v9, %v18206_v53  ;;  %v18209_v6 = vpop.f32.mrb[210].mxu1  ;;  %18643 = vmatprep.subr.bf16.mxu1 %v28499_v10  ;;  %v22321_v53 = vld [vmem:[%s28356_s1 + $0x74c] ss:$16 sps:$4 sm:$0xff]   ;;  %v22319_v9 = vld [vmem:[%s28356_s1 + $0x748] ss:$16 sps:$4 sm:$0xff]  }
 0x439   :  { %v18210_v44 = vpop.f32.mrb[211].mxu1 }
 0x43a   :  { %v24649_v55 = vadd.f32 %v18210_v44, %v18209_v6  ;;  %v18212_v59 = vpop.f32.mrb[212].mxu1 }
 0x43b   :  { %v18213_v5 = vpop.f32.mrb[213].mxu1  ;;  %18644 = vmatpush3.bf16.msra.mxu1 %v28500_v61 }
 0x43c   :  { %v24657_v11 = vadd.f32 %v18213_v5, %v18212_v59  ;;  %v18215_v31 = vpop.f32.mrb[214].mxu1  ;;  %18645 = vmatprep.subr.bf16.mxu1 %v28501_v23  ;;  %v22324_v5 = vld [vmem:[%s28356_s1 + $0x76c] ss:$16 sps:$4 sm:$0xff]  }
 0x43d   :  { %v18216_v38 = vpop.f32.mrb[215].mxu1 }
 0x43e   :  { %v24660_v47 = vadd.f32 %v18216_v38, %v18215_v31  ;;  %v18218_v3 = vpop.f32.mrb[216].mxu1  ;;  %4203 = vmatmul.mubr.bf16.gmra.mrb[36].mxu1 %v22316_v58  ;;  %v22322_v31 = vld [vmem:[%s28356_s1 + $0x768] ss:$16 sps:$4 sm:$0xff]   ;;  %v22327_v38 = vld [vmem:[%s28356_s1 + $0x78c] ss:$16 sps:$4 sm:$0xff]  }
 0x43f   :  { %v18219_v17 = vpop.f32.mrb[217].mxu1  ;;  %18646 = vmatpush3.bf16.msra.mxu1 %v28502_v20  ;;  %4210 = vmatprep.mubr.bf16.mxu1 %v22321_v53  ;;  %v22333_v58 = vld [vmem:[%s28356_s1 + $0x7ac] ss:$16 sps:$4 sm:$0xff]   ;;  %v22343_v53 = vld [vmem:[%s28356_s1 + $0x7e8] ss:$16 sps:$4 sm:$0xff]  }
 0x440   :  { %v24670_v45 = vadd.f32 %v18219_v17, %v18218_v3  ;;  %v18221_v18 = vpop.f32.mrb[218].mxu1  ;;  %18647 = vmatprep.subr.bf16.mxu1 %v28503_v30  ;;  %v22325_v3 = vld [vmem:[%s28356_s1 + $0x788] ss:$16 sps:$4 sm:$0xff]   ;;  %v22339_v17 = vld [vmem:[%s28356_s1 + $0x7cc] ss:$16 sps:$4 sm:$0xff]  }
 0x441   :  { %v18222_v49 = vpop.f32.mrb[219].mxu1 }
 0x442   :  { %v24673_v36 = vadd.f32 %v18222_v49, %v18221_v18  ;;  %v18224_v42 = vpop.f32.mrb[220].mxu1  ;;  %v22337_v18 = vld [vmem:[%s28356_s1 + $0x7c8] ss:$16 sps:$4 sm:$0xff]   ;;  %v22345_v49 = vld [vmem:[%s28356_s1 + $0x7ec] ss:$16 sps:$4 sm:$0xff]  }
 0x443   :  { %18648 = vmatpush3.bf16.msra.mxu1 %v28504_v24  ;;  %v18225_v6 = vpop.f32.mrb[221].mxu1 }
 0x444   :  { %18649 = vmatprep.subr.bf16.mxu1 %v28505_v22  ;;  %v24685_v44 = vadd.f32 %v18225_v6, %v18224_v42  ;;  %v18227_v56 = vpop.f32.mrb[222].mxu1 }
 0x445   :  { %v18228_v59 = vpop.f32.mrb[223].mxu1 }
 0x446   :  { %4211 = vmatmul.mubr.bf16.gmra.mrb[40].mxu1 %v22319_v9  ;;  %v24688_v40 = vadd.f32 %v18228_v59, %v18227_v56  ;;  %v18319_v59 = vpop.f32.mrb[224].mxu1 }
 0x447   :  { %18650 = vmatpush3.bf16.msra.mxu1 %v28506_v25  ;;  %4218 = vmatprep.mubr.bf16.mxu1 %v22324_v5 }
 0x448   :  { %18651 = vmatprep.subr.bf16.mxu1 %v28507_v41 }
 0x44b   :  { %18652 = vmatpush3.bf16.msra.mxu1 %v28508_v54 }
 0x44c   :  { %18653 = vmatprep.subr.bf16.mxu1 %v28509_v13 }
 0x44e   :  { %4219 = vmatmul.mubr.bf16.gmra.mrb[44].mxu1 %v22322_v31  ;;  %v18320_v31 = vpop.f32.mrb[225].mxu1 }
 0x44f   :  { %18654 = vmatpush3.bf16.msra.mxu1 %v28510_v19  ;;  %4226 = vmatprep.mubr.bf16.mxu1 %v22327_v38 }
 0x450   :  { %18655 = vmatprep.subr.bf16.mxu1 %v28511_v28 }
 0x453   :  { %18656 = vmatpush3.bf16.msra.mxu1 %v28512_v0 }
 0x454   :  { %18714 = vmatprep.subr.bf16.mxu1 %v28489_v43 }
 0x456   :  { %4227 = vmatmul.mubr.bf16.gmra.mrb[48].mxu1 %v22325_v3 }
 0x457   :  { %4234 = vmatprep.mubr.bf16.mxu1 %v22333_v58  ;;  %v24728_v58 = vadd.f32 %v18320_v31, %v18319_v59 }
 0x45e   :  { %4235 = vmatmul.mubr.bf16.gmra.mrb[52].mxu1 %v22331_v27  ;;  %v18322_v27 = vpop.f32.mrb[226].mxu1 }
 0x45f   :  { %4242 = vmatprep.mubr.bf16.mxu1 %v22339_v17  ;;  %v18323_v17 = vpop.f32.mrb[227].mxu1 }
 0x460   :  { %v24731_v2 = vadd.f32 %v18323_v17, %v18322_v27 }
 0x466   :  { %4243 = vmatmul.mubr.bf16.gmra.mrb[56].mxu1 %v22337_v18 }
 0x467   :  { %4250 = vmatprep.mubr.bf16.mxu1 %v22345_v49  ;;  %v18325_v49 = vpop.f32.mrb[228].mxu1 }
 0x46e   :  { %4251 = vmatmul.mubr.bf16.gmra.mrb[60].mxu1 %v22343_v53  ;;  %v18326_v53 = vpop.f32.mrb[229].mxu1 }
 0x4d0   :  { %v18246_v42 = vpop.f32.mrb[144].mxu0 }
 0x4d1   :  { %v18247_v9 = vpop.f32.mrb[145].mxu0 }
 0x4d2   :  { %v18248_v6 = vadd.f32 %v18247_v9, %v18246_v42  ;;  %v18249_v56 = vpop.f32.mrb[146].mxu0  ;;  %v24733_v42 = vadd.f32 %v18326_v53, %v18325_v49  ;;  %v18328_v9 = vpop.f32.mrb[230].mxu1 }
 0x4d3   :  { %v18250_v5 = vpop.f32.mrb[147].mxu0  ;;  %v18329_v46 = vpop.f32.mrb[231].mxu1 }
 0x4d4   :  { %v3123_v38 = vadd.f32 %v18248_v6, %v24602_v57  ;;  %v18251_v3 = vadd.f32 %v18250_v5, %v18249_v56  ;;  %28513 = vst [vmem:[#allocation15_spill] sm:$0xff] %v24733_v42  ;;  %v24736_v6 = vadd.f32 %v18329_v46, %v18328_v9  ;;  %v18331_v56 = vpop.f32.mrb[232].mxu1 }
 0x4d6   :  { %v3126_v18 = vadd.f32 %v18251_v3, %v24604_v48  ;;  %28514 = vst [vmem:[#allocation17_spill] sm:$0xff] %v24736_v6  ;;  %v18332_v48 = vpop.f32.mrb[233].mxu1 }
 0x4d7   :  { %v24739_v3 = vadd.f32 %v18332_v48, %v18331_v56 }
 0x4d8   :  { %v18252_v43 = vpop.f32.mrb[148].mxu0  ;;  %v3185_v51 = vpack.c.bf16 %v3126_v18, %v3123_v38  ;;  %v18334_v38 = vpop.f32.mrb[234].mxu1 }
 0x4d9   :  { %v18253_v33 = vpop.f32.mrb[149].mxu0  ;;  %v18335_v27 = vpop.f32.mrb[235].mxu1 }
 0x4da   :  { %v18254_v15 = vadd.f32 %v18253_v33, %v18252_v43  ;;  %v18255_v57 = vpop.f32.mrb[150].mxu0  ;;  %20293 = vmatprep.mubr.msk.bf16.mxu0 %vm934_vm2, %v3185_v51  ;;  %v24742_v18 = vadd.f32 %v18335_v27, %v18334_v38  ;;  %v18337_v43 = vpop.f32.mrb[236].mxu1 }
 0x4db   :  { %v18256_v59 = vpop.f32.mrb[151].mxu0  ;;  %v18338_v33 = vpop.f32.mrb[237].mxu1 }
 0x4dc   :  { %v3131_v5 = vadd.f32 %v18254_v15, %v24612_v37  ;;  %v18257_v31 = vadd.f32 %v18256_v59, %v18255_v57  ;;  %v24744_v46 = vadd.f32 %v18338_v33, %v18337_v43  ;;  %v18340_v53 = vpop.f32.mrb[238].mxu1 }
 0x4dd   :  { %v18341_v6 = vpop.f32.mrb[239].mxu1 }
 0x4de   :  { %v3134_v17 = vadd.f32 %v18257_v31, %v24614_v32  ;;  %v24747_v37 = vadd.f32 %v18341_v6, %v18340_v53  ;;  %v18343_v57 = vpop.f32.mrb[240].mxu1 }
 0x4df   :  { %v18344_v32 = vpop.f32.mrb[241].mxu1 }
 0x4e0   :  { %v3186_v49 = vpack.c.bf16 %v3134_v17, %v3131_v5  ;;  %v18258_v51 = vpop.f32.mrb[152].mxu0  ;;  %v24752_v5 = vadd.f32 %v18344_v32, %v18343_v57  ;;  %v18346_v31 = vpop.f32.mrb[242].mxu1 }
 0x4e1   :  { %v18259_v9 = vpop.f32.mrb[153].mxu0  ;;  %v18347_v38 = vpop.f32.mrb[243].mxu1 }
 0x4e2   :  { %v18260_v42 = vadd.f32 %v18259_v9, %v18258_v51  ;;  %v18261_v15 = vpop.f32.mrb[154].mxu0  ;;  %20294 = vmatmul.mubr.msk.bf16.vlgmr.msra.gmra.mrb[64].mxu0 %vm934_vm2, %v3186_v49  ;;  %v24755_v17 = vadd.f32 %v18347_v38, %v18346_v31  ;;  %v18349_v6 = vpop.f32.mrb[244].mxu1 }
 0x4e3   :  { %v18262_v56 = vpop.f32.mrb[155].mxu0  ;;  %18368 = vmatpush3.bf16.msra.mxu0 %v23133_v12  ;;  %v18350_v43 = vpop.f32.mrb[245].mxu1 }
 0x4e4   :  { %v3139_v59 = vadd.f32 %v18260_v42, %v24626_v14  ;;  %v18263_v48 = vadd.f32 %v18262_v56, %v18261_v15  ;;  %18369 = vmatprep.subr.bf16.mxu0 %v28499_v10  ;;  %v24759_v14 = vadd.f32 %v18350_v43, %v18349_v6  ;;  %v18352_v42 = vpop.f32.mrb[246].mxu1 }
 0x4e5   :  { %v18353_v53 = vpop.f32.mrb[247].mxu1 }
 0x4e6   :  { %v3142_v27 = vadd.f32 %v18263_v48, %v24629_v7  ;;  %v24762_v7 = vadd.f32 %v18353_v53, %v18352_v42  ;;  %v18355_v57 = vpop.f32.mrb[248].mxu1 }
 0x4e7   :  { %18370 = vmatpush3.bf16.msra.mxu0 %v28500_v61  ;;  %v18356_v32 = vpop.f32.mrb[249].mxu1  ;;  %v22399_v61 = vld [vmem:[%s28356_s1 + $0x8cc] ss:$16 sps:$4 sm:$0xff]  }
 0x4e8   :  { %v18264_v33 = vpop.f32.mrb[156].mxu0  ;;  %v3187_v49 = vpack.c.bf16 %v3142_v27, %v3139_v59  ;;  %18371 = vmatprep.subr.bf16.mxu0 %v28501_v23  ;;  %v24767_v31 = vadd.f32 %v18356_v32, %v18355_v57  ;;  %v18358_v38 = vpop.f32.mrb[250].mxu1 }
 0x4e9   :  { %v18265_v51 = vpop.f32.mrb[157].mxu0  ;;  %v18359_v27 = vpop.f32.mrb[251].mxu1 }
 0x4ea   :  { %v18266_v9 = vadd.f32 %v18265_v51, %v18264_v33  ;;  %v18267_v15 = vpop.f32.mrb[158].mxu0  ;;  %20297 = vmatprep.mubr.msk.bf16.mxu0 %vm934_vm2, %v3187_v49  ;;  %v24770_v43 = vadd.f32 %v18359_v27, %v18358_v38  ;;  %v18361_v33 = vpop.f32.mrb[252].mxu1 }
 0x4eb   :  { %v18268_v56 = vpop.f32.mrb[159].mxu0  ;;  %18372 = vmatpush3.bf16.msra.mxu0 %v28502_v20  ;;  %v18362_v49 = vpop.f32.mrb[253].mxu1 }
 0x4ec   :  { %v3147_v59 = vadd.f32 %v18266_v9, %v24637_v29  ;;  %v18269_v48 = vadd.f32 %v18268_v56, %v18267_v15  ;;  %18373 = vmatprep.subr.bf16.mxu0 %v28503_v30  ;;  %v24774_v29 = vadd.f32 %v18362_v49, %v18361_v33  ;;  %v18364_v53 = vpop.f32.mrb[254].mxu1 }
 0x4ed   :  { %v18365_v15 = vpop.f32.mrb[255].mxu1 }
 0x4ee   :  { %v3150_v6 = vadd.f32 %v18269_v48, %v24639_v60  ;;  %v24777_v60 = vadd.f32 %v18365_v15, %v18364_v53  ;;  %v18456_v32 = vpop.f32.mrb[0].mxu1 }
 0x4ef   :  { %18374 = vmatpush3.bf16.msra.mxu0 %v28504_v24  ;;  %v18457_v38 = vpop.f32.mrb[1].mxu1 }
 0x4f0   :  { %v18270_v42 = vpop.f32.mrb[160].mxu0  ;;  %v3188_v51 = vpack.c.bf16 %v3150_v6, %v3147_v59  ;;  %18375 = vmatprep.subr.bf16.mxu0 %v28505_v22  ;;  %v24782_v6 = vadd.f32 %v18457_v38, %v18456_v32  ;;  %v18459_v33 = vpop.f32.mrb[2].mxu1 }
 0x4f1   :  { %v18271_v9 = vpop.f32.mrb[161].mxu0  ;;  %v18460_v49 = vpop.f32.mrb[3].mxu1 }
 0x4f2   :  { %v18272_v57 = vadd.f32 %v18271_v9, %v18270_v42  ;;  %v18273_v56 = vpop.f32.mrb[162].mxu0  ;;  %20298 = vmatmul.mubr.msk.bf16.gmra.mrb[68].mxu0 %vm934_vm2, %v3188_v51  ;;  %v24785_v9 = vadd.f32 %v18460_v49, %v18459_v33  ;;  %v18462_v51 = vpop.f32.mrb[4].mxu1 }
 0x4f3   :  { %v18274_v48 = vpop.f32.mrb[163].mxu0  ;;  %18376 = vmatpush3.bf16.msra.mxu0 %v28506_v25  ;;  %v18463_v53 = vpop.f32.mrb[5].mxu1 }
 0x4f4   :  { %v3155_v59 = vadd.f32 %v18272_v57, %v24647_v35  ;;  %v18275_v27 = vadd.f32 %v18274_v48, %v18273_v56  ;;  %18377 = vmatprep.subr.bf16.mxu0 %v28507_v41  ;;  %v24789_v35 = vadd.f32 %v18463_v53, %v18462_v51  ;;  %v18465_v57 = vpop.f32.mrb[6].mxu1 }
 0x4f5   :  { %v18466_v32 = vpop.f32.mrb[7].mxu1 }
 0x4f6   :  { %v3158_v42 = vadd.f32 %v18275_v27, %v24649_v55  ;;  %v24792_v55 = vadd.f32 %v18466_v32, %v18465_v57  ;;  %v18468_v27 = vpop.f32.mrb[8].mxu1 }
 0x4f7   :  { %18378 = vmatpush3.bf16.msra.mxu0 %v28508_v54  ;;  %v18469_v49 = vpop.f32.mrb[9].mxu1 }
 0x4f8   :  { %v18276_v15 = vpop.f32.mrb[164].mxu0  ;;  %v3189_v25 = vpack.c.bf16 %v3158_v42, %v3155_v59  ;;  %18379 = vmatprep.subr.bf16.mxu0 %v28509_v13  ;;  %v24797_v51 = vadd.f32 %v18469_v49, %v18468_v27  ;;  %v18471_v53 = vpop.f32.mrb[10].mxu1 }
 0x4f9   :  { %v18277_v56 = vpop.f32.mrb[165].mxu0  ;;  %v18472_v13 = vpop.f32.mrb[11].mxu1 }
 0x4fa   :  { %v18279_v48 = vpop.f32.mrb[166].mxu0  ;;  %20301 = vmatprep.mubr.msk.bf16.mxu0 %vm934_vm2, %v3189_v25  ;;  %v18278_v38 = vadd.f32 %v18277_v56, %v18276_v15  ;;  %v24800_v25 = vadd.f32 %v18472_v13, %v18471_v53  ;;  %v18474_v15 = vpop.f32.mrb[12].mxu1 }
 0x4fb   :  { %v18280_v33 = vpop.f32.mrb[167].mxu0  ;;  %18380 = vmatpush3.bf16.msra.mxu0 %v28510_v19  ;;  %v18475_v57 = vpop.f32.mrb[13].mxu1 }
 0x4fc   :  { %v3163_v59 = vadd.f32 %v18278_v38, %v24657_v11  ;;  %v18281_v42 = vadd.f32 %v18280_v33, %v18279_v48  ;;  %18381 = vmatprep.subr.bf16.mxu0 %v28511_v28  ;;  %v24803_v19 = vadd.f32 %v18475_v57, %v18474_v15  ;;  %v18477_v11 = vpop.f32.mrb[14].mxu1 }
 0x4fd   :  { %v18478_v38 = vpop.f32.mrb[15].mxu1 }
 0x4fe   :  { %v3166_v54 = vadd.f32 %v18281_v42, %v24660_v47  ;;  %v24806_v49 = vadd.f32 %v18478_v38, %v18477_v11  ;;  %v22346_v38 = vld [vmem:[%s28356_s1 + $0x66c] ss:$16 sps:$4 sm:$0xff]  }
 0x4ff   :  { %18382 = vmatpush3.bf16.msra.mxu0 %v28512_v0 }
 0x500   :  { %v18282_v56 = vpop.f32.mrb[168].mxu0  ;;  %v3190_v32 = vpack.c.bf16 %v3166_v54, %v3163_v59 }
 0x501   :  { %v18283_v48 = vpop.f32.mrb[169].mxu0 }
 0x502   :  { %v18284_v33 = vadd.f32 %v18283_v48, %v18282_v56  ;;  %v18285_v27 = vpop.f32.mrb[170].mxu0  ;;  %20302 = vmatmul.mubr.msk.bf16.gmra.mrb[72].mxu0 %vm934_vm2, %v3190_v32 }
 0x503   :  { %v18286_v47 = vpop.f32.mrb[171].mxu0 }
 0x504   :  { %v3171_v13 = vadd.f32 %v18284_v33, %v24670_v45  ;;  %v18287_v42 = vadd.f32 %v18286_v47, %v18285_v27  ;;  %v22330_v45 = vld [vmem:[%s28356_s1 + $0x60c] ss:$16 sps:$4 sm:$0xff]   ;;  %v18480_v33 = vpop.f32.mrb[16].mxu1 }
 0x505   :  { %v18481_v27 = vpop.f32.mrb[17].mxu1 }
 0x506   :  { %v3174_v53 = vadd.f32 %v18287_v42, %v24673_v36  ;;  %v22336_v36 = vld [vmem:[%s28356_s1 + $0x628] ss:$16 sps:$4 sm:$0xff]   ;;  %v24835_v47 = vadd.f32 %v18481_v27, %v18480_v33 }
 0x507   :  { %v22354_v33 = vld [vmem:[%s28356_s1 + $0x6a8] ss:$16 sps:$4 sm:$0xff]  }
 0x508   :  { %v18288_v0 = vpop.f32.mrb[172].mxu0  ;;  %v3191_v28 = vpack.c.bf16 %v3174_v53, %v3171_v13  ;;  %v18483_v13 = vpop.f32.mrb[18].mxu1  ;;  %v22348_v53 = vld [vmem:[%s28356_s1 + $0x668] ss:$16 sps:$4 sm:$0xff]  }
 0x509   :  { %v18289_v54 = vpop.f32.mrb[173].mxu0  ;;  %v18484_v42 = vpop.f32.mrb[19].mxu1 }
 0x50a   :  { %v18290_v59 = vadd.f32 %v18289_v54, %v18288_v0  ;;  %v18291_v15 = vpop.f32.mrb[174].mxu0  ;;  %20305 = vmatprep.mubr.msk.bf16.mxu0 %vm934_vm2, %v3191_v28  ;;  %v22328_v0 = vld [vmem:[%s28356_s1 + $0x608] ss:$16 sps:$4 sm:$0xff]   ;;  %v22334_v28 = vld [vmem:[%s28356_s1 + $0x62c] ss:$16 sps:$4 sm:$0xff]   ;;  %v24840_v54 = vadd.f32 %v18484_v42, %v18483_v13 }
 0x50b   :  { %v18292_v57 = vpop.f32.mrb[175].mxu0  ;;  %v22355_v13 = vld [vmem:[%s28356_s1 + $0x6cc] ss:$16 sps:$4 sm:$0xff]  }
 0x50c   :  { %v3179_v56 = vadd.f32 %v18290_v59, %v24685_v44  ;;  %v18293_v48 = vadd.f32 %v18292_v57, %v18291_v15  ;;  %v22340_v44 = vld [vmem:[%s28356_s1 + $0x64c] ss:$16 sps:$4 sm:$0xff]   ;;  %v18486_v15 = vpop.f32.mrb[20].mxu1 }
 0x50d   :  { %v22349_v59 = vld [vmem:[%s28356_s1 + $0x68c] ss:$16 sps:$4 sm:$0xff]   ;;  %v18487_v57 = vpop.f32.mrb[21].mxu1 }
 0x50e   :  { %v3182_v32 = vadd.f32 %v18293_v48, %v24688_v40  ;;  %v22342_v40 = vld [vmem:[%s28356_s1 + $0x648] ss:$16 sps:$4 sm:$0xff]   ;;  %v18489_v48 = vpop.f32.mrb[22].mxu1 }
 0x510   :  { %v3192_v11 = vpack.c.bf16 %v3182_v32, %v3179_v56  ;;  %v24845_v56 = vadd.f32 %v18487_v57, %v18486_v15  ;;  %v18490_v32 = vpop.f32.mrb[23].mxu1 }
 0x512   :  { %20306 = vmatmul.mubr.msk.bf16.gmra.mrb[76].mxu0 %vm934_vm2, %v3192_v11  ;;  %v24850_v11 = vadd.f32 %v18490_v32, %v18489_v48  ;;  %v22357_v48 = vld [vmem:[%s28356_s1 + $0x6c8] ss:$16 sps:$4 sm:$0xff]  }
 0x513   :  { %3657 = vmatprep.mubr.bf16.mxu0 %v22330_v45  ;;  %v22351_v45 = vld [vmem:[%s28356_s1 + $0x688] ss:$16 sps:$4 sm:$0xff]  }
 0x51a   :  { %3658 = vmatmul.mubr.bf16.vlgmr.msra.gmra.mrb[176].mxu0 %v22328_v0  ;;  %v22352_v0 = vld [vmem:[%s28356_s1 + $0x6ac] ss:$16 sps:$4 sm:$0xff]  }
 0x51b   :  { %3665 = vmatprep.mubr.bf16.mxu0 %v22334_v28  ;;  %v18492_v28 = vpop.f32.mrb[24].mxu1 }
 0x522   :  { %3666 = vmatmul.mubr.bf16.gmra.mrb[180].mxu0 %v22336_v36  ;;  %v18493_v36 = vpop.f32.mrb[25].mxu1 }
 0x523   :  { %3673 = vmatprep.mubr.bf16.mxu0 %v22340_v44  ;;  %v24855_v44 = vadd.f32 %v18493_v36, %v18492_v28 }
 0x52a   :  { %3674 = vmatmul.mubr.bf16.gmra.mrb[184].mxu0 %v22342_v40  ;;  %v18495_v40 = vpop.f32.mrb[26].mxu1 }
 0x52b   :  { %3681 = vmatprep.mubr.bf16.mxu0 %v22346_v38  ;;  %v18496_v38 = vpop.f32.mrb[27].mxu1 }
 0x52c   :  { %v24860_v27 = vadd.f32 %v18496_v38, %v18495_v40  ;;  %v18498_v42 = vpop.f32.mrb[28].mxu1 }
 0x532   :  { %3682 = vmatmul.mubr.bf16.gmra.mrb[188].mxu0 %v22348_v53  ;;  %v18499_v53 = vpop.f32.mrb[29].mxu1 }
 0x533   :  { %3689 = vmatprep.mubr.bf16.mxu0 %v22349_v59  ;;  %v24865_v59 = vadd.f32 %v18499_v53, %v18498_v42  ;;  %v18501_v15 = vpop.f32.mrb[30].mxu1 }
 0x534   :  { %v18502_v57 = vpop.f32.mrb[31].mxu1 }
 0x535   :  { %v24870_v32 = vadd.f32 %v18502_v57, %v18501_v15 }
 0x53a   :  { %3690 = vmatmul.mubr.bf16.gmra.mrb[192].mxu0 %v22351_v45  ;;  %v22358_v45 = vld [vmem:[%s28356_s1 + $0x6ec] ss:$16 sps:$4 sm:$0xff]  }
 0x53b   :  { %3697 = vmatprep.mubr.bf16.mxu0 %v22352_v0  ;;  %v18520_v0 = vpop.f32.mrb[32].mxu1 }
 0x53c   :  { %v18521_v28 = vpop.f32.mrb[33].mxu1 }
 0x53d   :  { %v18522_v36 = vadd.f32 %v18521_v28, %v18520_v0  ;;  %v18523_v40 = vpop.f32.mrb[34].mxu1 }
 0x53e   :  { %v18524_v38 = vpop.f32.mrb[35].mxu1 }
 0x53f   :  { %v18525_v42 = vadd.f32 %v18524_v38, %v18523_v40  ;;  %v18526_v15 = vpop.f32.mrb[36].mxu1 }
 0x541   :  { %v24882_v53 = vadd.f32 %v18525_v42, %v24785_v9 }
 0x542   :  { %3698 = vmatmul.mubr.bf16.gmra.mrb[196].mxu0 %v22354_v33  ;;  %v22360_v33 = vld [vmem:[%s28356_s1 + $0x6e8] ss:$16 sps:$4 sm:$0xff]  }
 0x543   :  { %3705 = vmatprep.mubr.bf16.mxu0 %v22355_v13  ;;  %v24879_v13 = vadd.f32 %v18522_v36, %v24782_v6 }
 0x54a   :  { %3706 = vmatmul.mubr.bf16.gmra.mrb[200].mxu0 %v22357_v48  ;;  %v18527_v48 = vpop.f32.mrb[37].mxu1 }
 0x54b   :  { %3713 = vmatprep.mubr.bf16.mxu0 %v22358_v45  ;;  %v18528_v45 = vadd.f32 %v18527_v48, %v18526_v15  ;;  %v18529_v0 = vpop.f32.mrb[38].mxu1 }
 0x54c   :  { %v18530_v28 = vpop.f32.mrb[39].mxu1 }
 0x54d   :  { %v24887_v41 = vadd.f32 %v18528_v45, %v24789_v35  ;;  %v18531_v22 = vadd.f32 %v18530_v28, %v18529_v0  ;;  %v18532_v36 = vpop.f32.mrb[40].mxu1 }
 0x54e   :  { %v18533_v40 = vpop.f32.mrb[41].mxu1 }
 0x54f   :  { %v24890_v6 = vadd.f32 %v18531_v22, %v24792_v55  ;;  %v18534_v38 = vadd.f32 %v18533_v40, %v18532_v36 }
 0x551   :  { %v24895_v57 = vadd.f32 %v18534_v38, %v24797_v51 }
 0x552   :  { %3714 = vmatmul.mubr.bf16.gmra.mrb[204].mxu0 %v22360_v33  ;;  %v18535_v33 = vpop.f32.mrb[42].mxu1 }
 0x553   :  { %v18536_v42 = vpop.f32.mrb[43].mxu1 }
 0x554   :  { %v18537_v15 = vadd.f32 %v18536_v42, %v18535_v33  ;;  %v18538_v35 = vpop.f32.mrb[44].mxu1 }
 0x555   :  { %v18539_v55 = vpop.f32.mrb[45].mxu1 }
 0x556   :  { %v24898_v48 = vadd.f32 %v18537_v15, %v24800_v25  ;;  %v18540_v45 = vadd.f32 %v18539_v55, %v18538_v35  ;;  %v18541_v0 = vpop.f32.mrb[46].mxu1 }
 0x557   :  { %v18542_v28 = vpop.f32.mrb[47].mxu1 }
 0x558   :  { %v24903_v9 = vadd.f32 %v18540_v45, %v24803_v19  ;;  %v18543_v36 = vadd.f32 %v18542_v28, %v18541_v0  ;;  %v18544_v51 = vpop.f32.mrb[48].mxu1 }
 0x559   :  { %v18545_v38 = vpop.f32.mrb[49].mxu1 }
 0x55a   :  { %v24906_v40 = vadd.f32 %v18543_v36, %v24806_v49  ;;  %v18546_v33 = vadd.f32 %v18545_v38, %v18544_v51  ;;  %v18547_v42 = vpop.f32.mrb[50].mxu1 }
 0x55b   :  { %v18548_v15 = vpop.f32.mrb[51].mxu1 }
 0x55c   :  { %v24911_v22 = vadd.f32 %v18546_v33, %v24835_v47  ;;  %v18549_v35 = vadd.f32 %v18548_v15, %v18547_v42  ;;  %v18550_v19 = vpop.f32.mrb[52].mxu1  ;;  %v15965_v47 = vld [vmem:[%s28357_s2 + $0xc] sm:$0x3] }
 0x55d   :  { %v18551_v45 = vpop.f32.mrb[53].mxu1 }
 0x55e   :  { %v24914_v55 = vadd.f32 %v18549_v35, %v24840_v54  ;;  %v18552_v0 = vadd.f32 %v18551_v45, %v18550_v19  ;;  %v18553_v28 = vpop.f32.mrb[54].mxu1  ;;  %v3757_v54 = vand.u32 %v15965_v47, %v23679_v4 }
 0x55f   :  { %v18554_v36 = vpop.f32.mrb[55].mxu1 }
 0x560   :  { %v24919_v25 = vadd.f32 %v18552_v0, %v24845_v56  ;;  %v18555_v51 = vadd.f32 %v18554_v36, %v18553_v28  ;;  %v18556_v33 = vpop.f32.mrb[56].mxu1  ;;  %20309 = vmatprep.subr.bf16.mxu0 %v3757_v54  ;;  %v28519_v36 = vld [vmem:[#allocation5_spill] sm:$0xff] }
 0x561   :  { %v18557_v15 = vpop.f32.mrb[57].mxu1  ;;  %20310 = vmatpush3.bf16.msra.mxu0 %v3757_v54 }
 0x562   :  { %v24922_v38 = vadd.f32 %v18555_v51, %v24850_v11  ;;  %v18559_v35 = vpop.f32.mrb[58].mxu1  ;;  %v18558_v56 = vadd.f32 %v18557_v15, %v18556_v33 }
 0x563   :  { %v18560_v19 = vpop.f32.mrb[59].mxu1 }
 0x564   :  { %v18561_v45 = vadd.f32 %v18560_v19, %v18559_v35  ;;  %v24931_v11 = vadd.f32 %v18558_v56, %v24855_v44  ;;  %v18562_v28 = vpop.f32.mrb[60].mxu1  ;;  %v22375_v56 = vld [vmem:[%s28356_s1 + $0x84c] ss:$16 sps:$4 sm:$0xff]   ;;  %v22373_v19 = vld [vmem:[%s28356_s1 + $0x848] ss:$16 sps:$4 sm:$0xff]  }
 0x565   :  { %v18563_v51 = vpop.f32.mrb[61].mxu1  ;;  %v28518_v44 = vld [vmem:[#allocation25_spill] sm:$0xff] }
 0x566   :  { %v24934_v0 = vadd.f32 %v18561_v45, %v24860_v27  ;;  %v18564_v47 = vadd.f32 %v18563_v51, %v18562_v28  ;;  %v18565_v42 = vpop.f32.mrb[62].mxu1  ;;  %v16038_v27 = vld [vmem:[%s28357_s2 + $0xe] sm:$0x3]  ;;  %v22379_v28 = vld [vmem:[%s28356_s1 + $0x868] ss:$16 sps:$4 sm:$0xff]  }
 0x567   :  { %v18566_v49 = vpop.f32.mrb[63].mxu1  ;;  %v24950_v35 = vand.u32 %v16038_v27, %v23679_v4  ;;  %v22381_v45 = vld [vmem:[%s28356_s1 + $0x86c] ss:$16 sps:$4 sm:$0xff]   ;;  %v28515_v51 = vld [vmem:[#allocation19_spill] sm:$0xff] }
 0x568   :  { %v24939_v54 = vadd.f32 %v18564_v47, %v24865_v59  ;;  %v18567_v33 = vadd.f32 %v18566_v49, %v18565_v42  ;;  %v22361_v59 = vld [vmem:[%s28356_s1 + $0x808] ss:$16 sps:$4 sm:$0xff]   ;;  %v22369_v49 = vld [vmem:[%s28356_s1 + $0x82c] ss:$16 sps:$4 sm:$0xff]  }
 0x569   :  { %20327 = vmatprep.subr.bf16.mxu0 %v24950_v35  ;;  %v22367_v42 = vld [vmem:[%s28356_s1 + $0x828] ss:$16 sps:$4 sm:$0xff]  }
 0x56a   :  { %v24942_v15 = vadd.f32 %v18567_v33, %v24870_v32  ;;  %v22363_v32 = vld [vmem:[%s28356_s1 + $0x80c] ss:$16 sps:$4 sm:$0xff]   ;;  %v28516_v33 = vld [vmem:[#allocation21_spill] sm:$0xff] }
 0x56b   :  { %4731 = vmatprep.mubr.bf16.mxu1 %v22363_v32 }
 0x56c   :  { %4732 = vmatmul.mubr.bf16.vlgmr.msra.gmra.mrb[64].mxu1 %v22361_v59  ;;  %v28517_v59 = vld [vmem:[#allocation23_spill] sm:$0xff] }
 0x56d   :  { %18715 = vmatpush3.bf16.msra.mxu1 %v23121_v8  ;;  %4739 = vmatprep.mubr.bf16.mxu1 %v22369_v49 }
 0x56e   :  { %18716 = vmatprep.subr.bf16.mxu1 %v23146_v16 }
 0x571   :  { %18717 = vmatpush3.bf16.msra.mxu1 %v23160_v21 }
 0x572   :  { %18718 = vmatprep.subr.bf16.mxu1 %v23175_v26 }
 0x574   :  { %4740 = vmatmul.mubr.bf16.gmra.mrb[68].mxu1 %v22367_v42  ;;  %v22387_v42 = vld [vmem:[%s28356_s1 + $0x88c] ss:$16 sps:$4 sm:$0xff]  }
 0x575   :  { %18719 = vmatpush3.bf16.msra.mxu1 %v23198_v34  ;;  %4747 = vmatprep.mubr.bf16.mxu1 %v22375_v56 }
 0x576   :  { %18720 = vmatprep.subr.bf16.mxu1 %v23213_v39 }
 0x579   :  { %18721 = vmatpush3.bf16.msra.mxu1 %v23246_v50 }
 0x57a   :  { %18722 = vmatprep.subr.bf16.mxu1 %v23252_v52 }
 0x57c   :  { %4748 = vmatmul.mubr.bf16.gmra.mrb[72].mxu1 %v22373_v19  ;;  %v22385_v19 = vld [vmem:[%s28356_s1 + $0x888] ss:$16 sps:$4 sm:$0xff]  }
 0x57d   :  { %18723 = vmatpush3.bf16.msra.mxu1 %v23282_v62  ;;  %4755 = vmatprep.mubr.bf16.mxu1 %v22381_v45 }
 0x57e   :  { %18724 = vmatprep.subr.bf16.mxu1 %v28483_v63 }
 0x581   :  { %18725 = vmatpush3.bf16.msra.mxu1 %v28484_v1 }
 0x582   :  { %18726 = vmatprep.subr.bf16.mxu1 %v28515_v51 }
 0x584   :  { %4756 = vmatmul.mubr.bf16.gmra.mrb[76].mxu1 %v22379_v28 }
 0x585   :  { %18727 = vmatpush3.bf16.msra.mxu1 %v28516_v33  ;;  %4763 = vmatprep.mubr.bf16.mxu1 %v22387_v42  ;;  %v28520_v42 = vld [vmem:[#allocation15_spill] sm:$0xff] }
 0x586   :  { %18728 = vmatprep.subr.bf16.mxu1 %v28517_v59 }
 0x589   :  { %18729 = vmatpush3.bf16.msra.mxu1 %v28518_v44 }
 0x58a   :  { %18851 = vmatprep.subr.bf16.mxu1 %v28519_v36 }
 0x58c   :  { %4764 = vmatmul.mubr.bf16.gmra.mrb[80].mxu1 %v22385_v19  ;;  %v28521_v19 = vld [vmem:[#allocation17_spill] sm:$0xff] }
 0x5ed   :  { %v18383_v47 = vpop.f32.mrb[176].mxu0 }
 0x5ee   :  { %v18384_v27 = vpop.f32.mrb[177].mxu0 }
 0x5ef   :  { %v18385_v32 = vadd.f32 %v18384_v27, %v18383_v47  ;;  %v18386_v49 = vpop.f32.mrb[178].mxu0 }
 0x5f0   :  { %v18387_v56 = vpop.f32.mrb[179].mxu0 }
 0x5f1   :  { %v3660_v45 = vadd.f32 %v18385_v32, %v24728_v58  ;;  %v18388_v28 = vadd.f32 %v18387_v56, %v18386_v49  ;;  %v22393_v58 = vld [vmem:[%s28356_s1 + $0x8ac] ss:$16 sps:$4 sm:$0xff]   ;;  %v22391_v49 = vld [vmem:[%s28356_s1 + $0x8a8] ss:$16 sps:$4 sm:$0xff]  }
 0x5f2   :  { %4771 = vmatprep.mubr.bf16.mxu1 %v22393_v58 }
 0x5f3   :  { %v3663_v47 = vadd.f32 %v18388_v28, %v24731_v2  ;;  %4772 = vmatmul.mubr.bf16.gmra.mrb[84].mxu1 %v22391_v49 }
 0x5f4   :  { %4779 = vmatprep.mubr.bf16.mxu1 %v22399_v61 }
 0x5f5   :  { %v18389_v27 = vpop.f32.mrb[180].mxu0  ;;  %v3722_v24 = vpack.c.bf16 %v3663_v47, %v3660_v45 }
 0x5f6   :  { %v18390_v30 = vpop.f32.mrb[181].mxu0 }
 0x5f7   :  { %v18391_v20 = vadd.f32 %v18390_v30, %v18389_v27  ;;  %v18392_v23 = vpop.f32.mrb[182].mxu0  ;;  %20311 = vmatprep.mubr.msk.bf16.mxu0 %vm934_vm2, %v3722_v24 }
 0x5f8   :  { %v18393_v32 = vpop.f32.mrb[183].mxu0 }
 0x5f9   :  { %v3668_v56 = vadd.f32 %v18391_v20, %v28520_v42  ;;  %v18394_v2 = vadd.f32 %v18393_v32, %v18392_v23  ;;  %v22397_v23 = vld [vmem:[%s28356_s1 + $0x8c8] ss:$16 sps:$4 sm:$0xff]  }
 0x5fb   :  { %v3671_v45 = vadd.f32 %v18394_v2, %v28521_v19  ;;  %4780 = vmatmul.mubr.bf16.gmra.mrb[88].mxu1 %v22397_v23 }
 0x5fd   :  { %v3723_v30 = vpack.c.bf16 %v3671_v45, %v3668_v56  ;;  %v18395_v28 = vpop.f32.mrb[184].mxu0 }
 0x5fe   :  { %v18396_v47 = vpop.f32.mrb[185].mxu0 }
 0x5ff   :  { %v18397_v24 = vadd.f32 %v18396_v47, %v18395_v28  ;;  %v18398_v27 = vpop.f32.mrb[186].mxu0  ;;  %20312 = vmatmul.mubr.msk.bf16.vlgmr.msra.gmra.mrb[64].mxu0 %vm934_vm2, %v3723_v30 }
 0x600   :  { %v18399_v10 = vpop.f32.mrb[187].mxu0  ;;  %20328 = vmatpush3.bf16.msra.mxu0 %v24950_v35  ;;  %v22405_v35 = vld [vmem:[%s28356_s1 + $0x8ec] ss:$16 sps:$4 sm:$0xff]  }
 0x601   :  { %v3676_v20 = vadd.f32 %v18397_v24, %v24739_v3  ;;  %v18400_v58 = vadd.f32 %v18399_v10, %v18398_v27  ;;  %18577 = vmatprep.subr.bf16.mxu0 %v28519_v36  ;;  %v22403_v10 = vld [vmem:[%s28356_s1 + $0x8e8] ss:$16 sps:$4 sm:$0xff]   ;;  %4787 = vmatprep.mubr.bf16.mxu1 %v22405_v35 }
 0x603   :  { %v3679_v32 = vadd.f32 %v18400_v58, %v24742_v18  ;;  %4788 = vmatmul.mubr.bf16.gmra.mrb[92].mxu1 %v22403_v10 }
 0x605   :  { %v18401_v49 = vpop.f32.mrb[188].mxu0  ;;  %v3724_v42 = vpack.c.bf16 %v3679_v32, %v3676_v20 }
 0x606   :  { %v18402_v56 = vpop.f32.mrb[189].mxu0 }
 0x607   :  { %v18403_v2 = vadd.f32 %v18402_v56, %v18401_v49  ;;  %v18404_v19 = vpop.f32.mrb[190].mxu0  ;;  %20315 = vmatprep.mubr.msk.bf16.mxu0 %vm934_vm2, %v3724_v42 }
 0x608   :  { %v18405_v45 = vpop.f32.mrb[191].mxu0 }
 0x609   :  { %v3684_v61 = vadd.f32 %v18403_v2, %v24744_v46  ;;  %v18406_v3 = vadd.f32 %v18405_v45, %v18404_v19 }
 0x60b   :  { %v3687_v18 = vadd.f32 %v18406_v3, %v24747_v37 }
 0x60d   :  { %v18407_v30 = vpop.f32.mrb[192].mxu0  ;;  %v3725_v28 = vpack.c.bf16 %v3687_v18, %v3684_v61 }
 0x60e   :  { %v18408_v47 = vpop.f32.mrb[193].mxu0 }
 0x60f   :  { %v18409_v24 = vadd.f32 %v18408_v47, %v18407_v30  ;;  %v18410_v27 = vpop.f32.mrb[194].mxu0  ;;  %20316 = vmatmul.mubr.msk.bf16.gmra.mrb[68].mxu0 %vm934_vm2, %v3725_v28 }
 0x610   :  { %v18411_v23 = vpop.f32.mrb[195].mxu0 }
 0x611   :  { %v3692_v20 = vadd.f32 %v18409_v24, %v24752_v5  ;;  %v18412_v58 = vadd.f32 %v18411_v23, %v18410_v27 }
 0x613   :  { %v3695_v32 = vadd.f32 %v18412_v58, %v24755_v17 }
 0x615   :  { %v18413_v49 = vpop.f32.mrb[196].mxu0  ;;  %v3726_v46 = vpack.c.bf16 %v3695_v32, %v3692_v20 }
 0x616   :  { %v18414_v42 = vpop.f32.mrb[197].mxu0 }
 0x617   :  { %v18415_v56 = vadd.f32 %v18414_v42, %v18413_v49  ;;  %v18416_v2 = vpop.f32.mrb[198].mxu0  ;;  %20319 = vmatprep.mubr.msk.bf16.mxu0 %vm934_vm2, %v3726_v46  ;;  %v28524_v42 = vpack.c.bf16 %v24898_v48, %v24895_v57  ;;  %v28529_v57 = vpack.c.bf16 %v24942_v15, %v24939_v54  ;;  %v22372_v48 = vld [vmem:[%s28356_s1 + $0x820] ss:$16 sps:$4 sm:$0xff]   ;;  %v22400_v15 = vld [vmem:[%s28356_s1 + $0x8c4] ss:$16 sps:$4 sm:$0xff]  }
 0x618   :  { %v18417_v37 = vpop.f32.mrb[199].mxu0  ;;  %v22396_v54 = vld [vmem:[%s28356_s1 + $0x8a0] ss:$16 sps:$4 sm:$0xff]  }
 0x619   :  { %v3700_v19 = vadd.f32 %v18415_v56, %v24759_v14  ;;  %v18418_v35 = vadd.f32 %v18417_v37, %v18416_v2  ;;  %v22402_v56 = vld [vmem:[%s28356_s1 + $0x8c0] ss:$16 sps:$4 sm:$0xff]   ;;  %v22406_v2 = vld [vmem:[%s28356_s1 + $0x8e4] ss:$16 sps:$4 sm:$0xff]  }
 0x61a   :  { %v22408_v37 = vld [vmem:[%s28356_s1 + $0x8e0] ss:$16 sps:$4 sm:$0xff]  }
 0x61b   :  { %v3703_v45 = vadd.f32 %v18418_v35, %v24762_v7 }
 0x61d   :  { %v18419_v10 = vpop.f32.mrb[200].mxu0  ;;  %v3727_v61 = vpack.c.bf16 %v3703_v45, %v3700_v19 }
 0x61e   :  { %v18420_v3 = vpop.f32.mrb[201].mxu0 }
 0x61f   :  { %v18421_v5 = vadd.f32 %v18420_v3, %v18419_v10  ;;  %v18422_v18 = vpop.f32.mrb[202].mxu0  ;;  %20320 = vmatmul.mubr.msk.bf16.gmra.mrb[72].mxu0 %vm934_vm2, %v3727_v61 }
 0x620   :  { %v18423_v17 = vpop.f32.mrb[203].mxu0 }
 0x621   :  { %v3708_v30 = vadd.f32 %v18421_v5, %v24767_v31  ;;  %v18424_v28 = vadd.f32 %v18423_v17, %v18422_v18  ;;  %v28522_v31 = vpack.c.bf16 %v24882_v53, %v24879_v13  ;;  %v28528_v13 = vpack.c.bf16 %v24934_v0, %v24931_v11  ;;  %v22366_v53 = vld [vmem:[%s28356_s1 + $0x804] ss:$16 sps:$4 sm:$0xff]   ;;  %v22390_v11 = vld [vmem:[%s28356_s1 + $0x880] ss:$16 sps:$4 sm:$0xff]  }
 0x622   :  { %v22394_v0 = vld [vmem:[%s28356_s1 + $0x8a4] ss:$16 sps:$4 sm:$0xff]  }
 0x623   :  { %v3711_v47 = vadd.f32 %v18424_v28, %v24770_v43  ;;  %v28523_v43 = vpack.c.bf16 %v24890_v6, %v24887_v41  ;;  %v28526_v41 = vpack.c.bf16 %v24914_v55, %v24911_v22  ;;  %v22364_v6 = vld [vmem:[%s28356_s1 + $0x800] ss:$16 sps:$4 sm:$0xff]   ;;  %v22376_v22 = vld [vmem:[%s28356_s1 + $0x844] ss:$16 sps:$4 sm:$0xff]  }
 0x624   :  { %v22384_v55 = vld [vmem:[%s28356_s1 + $0x860] ss:$16 sps:$4 sm:$0xff]  }
 0x625   :  { %v18425_v24 = vpop.f32.mrb[204].mxu0  ;;  %v3728_v27 = vpack.c.bf16 %v3711_v47, %v3708_v30 }
 0x626   :  { %v18426_v23 = vpop.f32.mrb[205].mxu0 }
 0x627   :  { %v18427_v14 = vadd.f32 %v18426_v23, %v18425_v24  ;;  %v18428_v20 = vpop.f32.mrb[206].mxu0  ;;  %20323 = vmatprep.mubr.msk.bf16.mxu0 %vm934_vm2, %v3728_v27  ;;  %v16111_v24 = vld [vmem:[%s28357_s2 + $0x10] sm:$0x3] }
 0x628   :  { %v18429_v7 = vpop.f32.mrb[207].mxu0  ;;  %v4831_v27 = vand.u32 %v16111_v24, %v23679_v4  ;;  %v22417_v24 = vld [vmem:[%s28356_s1 + $0x924] ss:$16 sps:$4 sm:$0xff]  }
 0x629   :  { %v3716_v58 = vadd.f32 %v18427_v14, %v24774_v29  ;;  %v18430_v32 = vadd.f32 %v18429_v7, %v18428_v20  ;;  %v28525_v29 = vpack.c.bf16 %v24906_v40, %v24903_v9  ;;  %v22370_v9 = vld [vmem:[%s28356_s1 + $0x824] ss:$16 sps:$4 sm:$0xff]   ;;  %v22378_v40 = vld [vmem:[%s28356_s1 + $0x840] ss:$16 sps:$4 sm:$0xff]  }
 0x62b   :  { %v3719_v49 = vadd.f32 %v18430_v32, %v24777_v60  ;;  %v28527_v60 = vpack.c.bf16 %v24922_v38, %v24919_v25  ;;  %v22382_v25 = vld [vmem:[%s28356_s1 + $0x864] ss:$16 sps:$4 sm:$0xff]   ;;  %v28530_v32 = vld [vmem:[#allocation6_spill] sm:$0xff] }
 0x62c   :  { %v22388_v38 = vld [vmem:[%s28356_s1 + $0x884] ss:$16 sps:$4 sm:$0xff]  }
 0x62d   :  { %v3729_v46 = vpack.c.bf16 %v3719_v49, %v3716_v58 }
 0x62f   :  { %20324 = vmatmul.mubr.msk.bf16.gmra.mrb[76].mxu0 %vm934_vm2, %v3729_v46 }
 0x630   :  { %20329 = vmatprep.mubr.msk.bf16.mxu0 %vm934_vm2, %v28522_v31 }
 0x637   :  { %20330 = vmatmul.mubr.msk.bf16.vlgmr.msra.gmra.mrb[64].mxu0 %vm934_vm2, %v28523_v43 }
 0x638   :  { %20333 = vmatprep.mubr.msk.bf16.mxu0 %vm934_vm2, %v28524_v42  ;;  %18578 = vmatpush3.bf16.msra.mxu0 %v23121_v8 }
 0x639   :  { %18579 = vmatprep.subr.bf16.mxu0 %v23146_v16 }
 0x63c   :  { %18580 = vmatpush3.bf16.msra.mxu0 %v23160_v21 }
 0x63d   :  { %18581 = vmatprep.subr.bf16.mxu0 %v23175_v26 }
 0x63f   :  { %20334 = vmatmul.mubr.msk.bf16.gmra.mrb[68].mxu0 %vm934_vm2, %v28525_v29  ;;  %v18657_v19 = vpop.f32.mrb[64].mxu1 }
 0x640   :  { %20337 = vmatprep.mubr.msk.bf16.mxu0 %vm934_vm2, %v28526_v41  ;;  %18582 = vmatpush3.bf16.msra.mxu0 %v23198_v34  ;;  %v18658_v35 = vpop.f32.mrb[65].mxu1 }
 0x641   :  { %18583 = vmatprep.subr.bf16.mxu0 %v23213_v39  ;;  %v25138_v45 = vadd.f32 %v18658_v35, %v18657_v19  ;;  %v18660_v10 = vpop.f32.mrb[66].mxu1 }
 0x642   :  { %v18661_v61 = vpop.f32.mrb[67].mxu1 }
 0x643   :  { %v25140_v3 = vadd.f32 %v18661_v61, %v18660_v10 }
 0x644   :  { %18584 = vmatpush3.bf16.msra.mxu0 %v23246_v50 }
 0x645   :  { %18585 = vmatprep.subr.bf16.mxu0 %v23252_v52 }
 0x647   :  { %20338 = vmatmul.mubr.msk.bf16.gmra.mrb[72].mxu0 %vm934_vm2, %v28527_v60  ;;  %v18663_v5 = vpop.f32.mrb[68].mxu1 }
 0x648   :  { %20341 = vmatprep.mubr.msk.bf16.mxu0 %vm934_vm2, %v28528_v13  ;;  %18586 = vmatpush3.bf16.msra.mxu0 %v23282_v62  ;;  %v18664_v18 = vpop.f32.mrb[69].mxu1 }
 0x649   :  { %18587 = vmatprep.subr.bf16.mxu0 %v28483_v63  ;;  %v25142_v17 = vadd.f32 %v18664_v18, %v18663_v5  ;;  %v18666_v30 = vpop.f32.mrb[70].mxu1  ;;  %v22409_v18 = vld [vmem:[%s28356_s1 + $0x900] ss:$16 sps:$4 sm:$0xff]  }
 0x64a   :  { %v18667_v28 = vpop.f32.mrb[71].mxu1 }
 0x64b   :  { %v25144_v47 = vadd.f32 %v18667_v28, %v18666_v30  ;;  %v22411_v30 = vld [vmem:[%s28356_s1 + $0x904] ss:$16 sps:$4 sm:$0xff]   ;;  %v22415_v28 = vld [vmem:[%s28356_s1 + $0x920] ss:$16 sps:$4 sm:$0xff]  }
 0x64c   :  { %18588 = vmatpush3.bf16.msra.mxu0 %v28484_v1  ;;  %5171 = vmatprep.mubr.bf16.mxu1 %v22411_v30  ;;  %v22460_v30 = vld [vmem:[%s28356_s1 + $0xa20] ss:$16 sps:$4 sm:$0xff]  }
 0x64d   :  { %18589 = vmatprep.subr.bf16.mxu0 %v28515_v51  ;;  %5172 = vmatmul.mubr.bf16.vlgmr.msra.gmra.mrb[96].mxu1 %v22409_v18 }
 0x64e   :  { %18852 = vmatpush3.bf16.msra.mxu1 %v23121_v8  ;;  %5179 = vmatprep.mubr.bf16.mxu1 %v22417_v24 }
 0x64f   :  { %20342 = vmatmul.mubr.msk.bf16.gmra.mrb[76].mxu0 %vm934_vm2, %v28529_v57  ;;  %v18669_v23 = vpop.f32.mrb[72].mxu1  ;;  %18853 = vmatprep.subr.bf16.mxu1 %v23146_v16 }
 0x650   :  { %18590 = vmatpush3.bf16.msra.mxu0 %v28516_v33  ;;  %4634 = vmatprep.mubr.bf16.mxu0 %v22366_v53  ;;  %v18670_v14 = vpop.f32.mrb[73].mxu1 }
 0x651   :  { %18591 = vmatprep.subr.bf16.mxu0 %v28517_v59  ;;  %v18672_v20 = vpop.f32.mrb[74].mxu1  ;;  %v25150_v7 = vadd.f32 %v18670_v14, %v18669_v23  ;;  %v22423_v23 = vld [vmem:[%s28356_s1 + $0x944] ss:$16 sps:$4 sm:$0xff]   ;;  %v22427_v14 = vld [vmem:[%s28356_s1 + $0x960] ss:$16 sps:$4 sm:$0xff]  }
 0x652   :  { %v18673_v58 = vpop.f32.mrb[75].mxu1  ;;  %18854 = vmatpush3.bf16.msra.mxu1 %v23160_v21 }
 0x653   :  { %v25153_v49 = vadd.f32 %v18673_v58, %v18672_v20  ;;  %18855 = vmatprep.subr.bf16.mxu1 %v23175_v26  ;;  %v22429_v20 = vld [vmem:[%s28356_s1 + $0x964] ss:$16 sps:$4 sm:$0xff]   ;;  %v22433_v58 = vld [vmem:[%s28356_s1 + $0x980] ss:$16 sps:$4 sm:$0xff]  }
 0x654   :  { %18592 = vmatpush3.bf16.msra.mxu0 %v28518_v44 }
 0x655   :  { %20345 = vmatprep.subr.bf16.mxu0 %v4831_v27  ;;  %5180 = vmatmul.mubr.bf16.gmra.mrb[100].mxu1 %v22415_v28 }
 0x656   :  { %18856 = vmatpush3.bf16.msra.mxu1 %v23198_v34  ;;  %5187 = vmatprep.mubr.bf16.mxu1 %v22423_v23 }
 0x657   :  { %4635 = vmatmul.mubr.bf16.vlgmr.msra.gmra.mrb[208].mxu0 %v22364_v6  ;;  %v18675_v46 = vpop.f32.mrb[76].mxu1  ;;  %18857 = vmatprep.subr.bf16.mxu1 %v23213_v39 }
 0x658   :  { %4642 = vmatprep.mubr.bf16.mxu0 %v22370_v9  ;;  %20346 = vmatpush3.bf16.msra.mxu0 %v4831_v27  ;;  %v18676_v31 = vpop.f32.mrb[77].mxu1  ;;  %v22421_v27 = vld [vmem:[%s28356_s1 + $0x940] ss:$16 sps:$4 sm:$0xff]  }
 0x659   :  { %18778 = vmatprep.subr.bf16.mxu0 %v28530_v32  ;;  %v25155_v43 = vadd.f32 %v18676_v31, %v18675_v46  ;;  %v18678_v42 = vpop.f32.mrb[78].mxu1  ;;  %v22435_v46 = vld [vmem:[%s28356_s1 + $0x984] ss:$16 sps:$4 sm:$0xff]   ;;  %v22439_v31 = vld [vmem:[%s28356_s1 + $0x9a0] ss:$16 sps:$4 sm:$0xff]  }
 0x65a   :  { %v18679_v29 = vpop.f32.mrb[79].mxu1  ;;  %18858 = vmatpush3.bf16.msra.mxu1 %v23246_v50 }
 0x65b   :  { %v25157_v41 = vadd.f32 %v18679_v29, %v18678_v42  ;;  %18859 = vmatprep.subr.bf16.mxu1 %v23252_v52  ;;  %v22441_v42 = vld [vmem:[%s28356_s1 + $0x9a4] ss:$16 sps:$4 sm:$0xff]   ;;  %v22445_v29 = vld [vmem:[%s28356_s1 + $0x9c0] ss:$16 sps:$4 sm:$0xff]  }
 0x65d   :  { %5188 = vmatmul.mubr.bf16.gmra.mrb[104].mxu1 %v22421_v27 }
 0x65e   :  { %18860 = vmatpush3.bf16.msra.mxu1 %v23282_v62  ;;  %5195 = vmatprep.mubr.bf16.mxu1 %v22429_v20 }
 0x65f   :  { %4643 = vmatmul.mubr.bf16.gmra.mrb[212].mxu0 %v22372_v48  ;;  %v18681_v60 = vpop.f32.mrb[80].mxu1  ;;  %18861 = vmatprep.subr.bf16.mxu1 %v28483_v63 }
 0x660   :  { %4650 = vmatprep.mubr.bf16.mxu0 %v22376_v22  ;;  %v18682_v13 = vpop.f32.mrb[81].mxu1 }
 0x661   :  { %v25159_v53 = vadd.f32 %v18682_v13, %v18681_v60  ;;  %v18684_v57 = vpop.f32.mrb[82].mxu1  ;;  %v22447_v60 = vld [vmem:[%s28356_s1 + $0x9c4] ss:$16 sps:$4 sm:$0xff]   ;;  %v22451_v13 = vld [vmem:[%s28356_s1 + $0x9e0] ss:$16 sps:$4 sm:$0xff]  }
 0x662   :  { %v18685_v6 = vpop.f32.mrb[83].mxu1  ;;  %18862 = vmatpush3.bf16.msra.mxu1 %v28484_v1 }
 0x663   :  { %v25161_v9 = vadd.f32 %v18685_v6, %v18684_v57  ;;  %18863 = vmatprep.subr.bf16.mxu1 %v28515_v51  ;;  %v22453_v57 = vld [vmem:[%s28356_s1 + $0x9e4] ss:$16 sps:$4 sm:$0xff]  }
 0x665   :  { %5196 = vmatmul.mubr.bf16.gmra.mrb[108].mxu1 %v22427_v14 }
 0x666   :  { %18864 = vmatpush3.bf16.msra.mxu1 %v28516_v33  ;;  %5203 = vmatprep.mubr.bf16.mxu1 %v22435_v46 }
 0x667   :  { %4651 = vmatmul.mubr.bf16.gmra.mrb[216].mxu0 %v22378_v40  ;;  %18865 = vmatprep.subr.bf16.mxu1 %v28517_v59 }
 0x668   :  { %4658 = vmatprep.mubr.bf16.mxu0 %v22382_v25 }
 0x66a   :  { %18866 = vmatpush3.bf16.msra.mxu1 %v28518_v44 }
 0x66b   :  { %18988 = vmatprep.subr.bf16.mxu1 %v28519_v36 }
 0x66d   :  { %5204 = vmatmul.mubr.bf16.gmra.mrb[112].mxu1 %v22433_v58 }
 0x66e   :  { %5211 = vmatprep.mubr.bf16.mxu1 %v22441_v42 }
 0x66f   :  { %4659 = vmatmul.mubr.bf16.gmra.mrb[220].mxu0 %v22384_v55 }
 0x670   :  { %4666 = vmatprep.mubr.bf16.mxu0 %v22388_v38 }
 0x675   :  { %5212 = vmatmul.mubr.bf16.gmra.mrb[116].mxu1 %v22439_v31  ;;  %v22463_v31 = vld [vmem:[%s28356_s1 + $0xa40] ss:$16 sps:$4 sm:$0xff]  }
 0x676   :  { %5219 = vmatprep.mubr.bf16.mxu1 %v22447_v60 }
 0x677   :  { %4667 = vmatmul.mubr.bf16.gmra.mrb[224].mxu0 %v22390_v11 }
 0x678   :  { %4674 = vmatprep.mubr.bf16.mxu0 %v22394_v0 }
 0x67d   :  { %5220 = vmatmul.mubr.bf16.gmra.mrb[120].mxu1 %v22445_v29 }
 0x67e   :  { %5227 = vmatprep.mubr.bf16.mxu1 %v22453_v57  ;;  %v28531_v57 = vld [vmem:[#allocation7_spill] sm:$0xff] }
 0x67f   :  { %4675 = vmatmul.mubr.bf16.gmra.mrb[228].mxu0 %v22396_v54 }
 0x680   :  { %4682 = vmatprep.mubr.bf16.mxu0 %v22400_v15 }
 0x685   :  { %5228 = vmatmul.mubr.bf16.gmra.mrb[124].mxu1 %v22451_v13 }
 0x687   :  { %4683 = vmatmul.mubr.bf16.gmra.mrb[232].mxu0 %v22402_v56 }
 0x688   :  { %4690 = vmatprep.mubr.bf16.mxu0 %v22406_v2 }
 0x68f   :  { %4691 = vmatmul.mubr.bf16.gmra.mrb[236].mxu0 %v22408_v37 }
 0x6c6   :  { %v18687_v48 = vpop.f32.mrb[84].mxu1 }
 0x6c7   :  { %v18688_v22 = vpop.f32.mrb[85].mxu1 }
 0x6c8   :  { %v25163_v40 = vadd.f32 %v18688_v22, %v18687_v48  ;;  %v18690_v25 = vpop.f32.mrb[86].mxu1 }
 0x6c9   :  { %v18691_v55 = vpop.f32.mrb[87].mxu1 }
 0x6ca   :  { %v25165_v38 = vadd.f32 %v18691_v55, %v18690_v25  ;;  %v22457_v55 = vld [vmem:[%s28356_s1 + $0xa00] ss:$16 sps:$4 sm:$0xff]  }
 0x6ce   :  { %v18693_v11 = vpop.f32.mrb[88].mxu1 }
 0x6cf   :  { %v18694_v0 = vpop.f32.mrb[89].mxu1 }
 0x6d0   :  { %v25167_v54 = vadd.f32 %v18694_v0, %v18693_v11  ;;  %v18696_v15 = vpop.f32.mrb[90].mxu1  ;;  %v22459_v11 = vld [vmem:[%s28356_s1 + $0xa04] ss:$16 sps:$4 sm:$0xff]  }
 0x6d1   :  { %v18697_v56 = vpop.f32.mrb[91].mxu1  ;;  %5708 = vmatprep.mubr.bf16.mxu1 %v22459_v11 }
 0x6d2   :  { %v25169_v2 = vadd.f32 %v18697_v56, %v18696_v15  ;;  %v22462_v15 = vld [vmem:[%s28356_s1 + $0xa24] ss:$16 sps:$4 sm:$0xff]   ;;  %5709 = vmatmul.mubr.bf16.vlgmr.msra.gmra.mrb[128].mxu1 %v22457_v55 }
 0x6d3   :  { %5716 = vmatprep.mubr.bf16.mxu1 %v22462_v15  ;;  %18989 = vmatpush3.bf16.msra.mxu1 %v23121_v8  ;;  %v28533_v55 = vld [vmem:[#allocation9_spill] sm:$0xff] }
 0x6d4   :  { %18990 = vmatprep.subr.bf16.mxu1 %v23146_v16 }
 0x6d6   :  { %v18699_v37 = vpop.f32.mrb[92].mxu1 }
 0x6d7   :  { %v18700_v19 = vpop.f32.mrb[93].mxu1  ;;  %18991 = vmatpush3.bf16.msra.mxu1 %v23160_v21 }
 0x6d8   :  { %v25171_v35 = vadd.f32 %v18700_v19, %v18699_v37  ;;  %v18702_v10 = vpop.f32.mrb[94].mxu1  ;;  %18992 = vmatprep.subr.bf16.mxu1 %v23175_v26 }
 0x6d9   :  { %v18703_v61 = vpop.f32.mrb[95].mxu1 }
 0x6da   :  { %v25173_v5 = vadd.f32 %v18703_v61, %v18702_v10  ;;  %5717 = vmatmul.mubr.bf16.gmra.mrb[132].mxu1 %v22460_v30  ;;  %v28536_v30 = vld [vmem:[#allocation12_spill] sm:$0xff] }
 0x6db   :  { %18993 = vmatpush3.bf16.msra.mxu1 %v23198_v34 }
 0x6dc   :  { %18994 = vmatprep.subr.bf16.mxu1 %v23213_v39 }
 0x6df   :  { %18995 = vmatpush3.bf16.msra.mxu1 %v23246_v50 }
 0x6e0   :  { %18996 = vmatprep.subr.bf16.mxu1 %v23252_v52 }
 0x6e3   :  { %18997 = vmatpush3.bf16.msra.mxu1 %v23282_v62 }
 0x6e4   :  { %18998 = vmatprep.subr.bf16.mxu1 %v28483_v63 }
 0x6e7   :  { %18999 = vmatpush3.bf16.msra.mxu1 %v28484_v1 }
 0x6e8   :  { %19000 = vmatprep.subr.bf16.mxu1 %v28515_v51 }
 0x6eb   :  { %19001 = vmatpush3.bf16.msra.mxu1 %v28516_v33 }
 0x6ec   :  { %19002 = vmatprep.subr.bf16.mxu1 %v28517_v59 }
 0x6ef   :  { %19003 = vmatpush3.bf16.msra.mxu1 %v28518_v44 }
 0x6f0   :  { %19052 = vmatprep.subr.bf16.mxu1 %v28530_v32 }
 0x72a   :  { %v18593_v6 = vpop.f32.mrb[208].mxu0 }
 0x72b   :  { %v18594_v48 = vpop.f32.mrb[209].mxu0 }
 0x72c   :  { %v18595_v22 = vadd.f32 %v18594_v48, %v18593_v6  ;;  %v18596_v25 = vpop.f32.mrb[210].mxu0  ;;  %v28532_v48 = vld [vmem:[#allocation8_spill] sm:$0xff] }
 0x72d   :  { %v18597_v0 = vpop.f32.mrb[211].mxu0 }
 0x72e   :  { %v4734_v56 = vadd.f32 %v25138_v45, %v18595_v22  ;;  %v18598_v37 = vadd.f32 %v18597_v0, %v18596_v25  ;;  %v22465_v45 = vld [vmem:[%s28356_s1 + $0xa44] ss:$16 sps:$4 sm:$0xff]  }
 0x72f   :  { %5724 = vmatprep.mubr.bf16.mxu1 %v22465_v45  ;;  %v28537_v45 = vld [vmem:[#allocation13_spill] sm:$0xff] }
 0x730   :  { %v4737_v19 = vadd.f32 %v25140_v3, %v18598_v37  ;;  %5725 = vmatmul.mubr.bf16.gmra.mrb[136].mxu1 %v22463_v31  ;;  %v28534_v37 = vld [vmem:[#allocation10_spill] sm:$0xff]  ;;  %v28539_v31 = vld [vmem:[#allocation16_spill] sm:$0xff] }
 0x732   :  { %v18599_v10 = vpop.f32.mrb[212].mxu0  ;;  %v4796_v61 = vpack.c.bf16 %v4737_v19, %v4734_v56 }
 0x733   :  { %v18600_v18 = vpop.f32.mrb[213].mxu0 }
 0x734   :  { %v18601_v28 = vadd.f32 %v18600_v18, %v18599_v10  ;;  %v18602_v24 = vpop.f32.mrb[214].mxu0  ;;  %20347 = vmatprep.mubr.msk.bf16.mxu0 %vm934_vm2, %v4796_v61  ;;  %v28535_v61 = vld [vmem:[#allocation11_spill] sm:$0xff] }
 0x735   :  { %v18603_v3 = vpop.f32.mrb[215].mxu0 }
 0x736   :  { %v4742_v27 = vadd.f32 %v25142_v17, %v18601_v28  ;;  %v18604_v23 = vadd.f32 %v18603_v3, %v18602_v24  ;;  %v22468_v17 = vld [vmem:[%s28356_s1 + $0xa64] ss:$16 sps:$4 sm:$0xff]  }
 0x737   :  { %5732 = vmatprep.mubr.bf16.mxu1 %v22468_v17 }
 0x738   :  { %v4745_v14 = vadd.f32 %v25144_v47, %v18604_v23 }
 0x73a   :  { %v4797_v20 = vpack.c.bf16 %v4745_v14, %v4742_v27  ;;  %v18605_v58 = vpop.f32.mrb[216].mxu0 }
 0x73b   :  { %v18606_v46 = vpop.f32.mrb[217].mxu0 }
 0x73c   :  { %v18607_v42 = vadd.f32 %v18606_v46, %v18605_v58  ;;  %v18608_v29 = vpop.f32.mrb[218].mxu0  ;;  %20348 = vmatmul.mubr.msk.bf16.vlgmr.msra.gmra.mrb[64].mxu0 %vm934_vm2, %v4797_v20  ;;  %v28538_v20 = vld [vmem:[#allocation14_spill] sm:$0xff] }
 0x73d   :  { %v18609_v47 = vpop.f32.mrb[219].mxu0  ;;  %18779 = vmatpush3.bf16.msra.mxu0 %v23133_v12 }
 0x73e   :  { %v4750_v60 = vadd.f32 %v25150_v7, %v18607_v42  ;;  %v18610_v13 = vadd.f32 %v18609_v47, %v18608_v29  ;;  %18780 = vmatprep.subr.bf16.mxu0 %v28531_v57  ;;  %v22466_v7 = vld [vmem:[%s28356_s1 + $0xa60] ss:$16 sps:$4 sm:$0xff]  }
 0x73f   :  { %5733 = vmatmul.mubr.bf16.gmra.mrb[140].mxu1 %v22466_v7  ;;  %v28540_v29 = vld [vmem:[#allocation18_spill] sm:$0xff] }
 0x740   :  { %v4753_v6 = vadd.f32 %v25153_v49, %v18610_v13  ;;  %v22471_v49 = vld [vmem:[%s28356_s1 + $0xa84] ss:$16 sps:$4 sm:$0xff]  }
 0x741   :  { %18781 = vmatpush3.bf16.msra.mxu0 %v28532_v48  ;;  %5740 = vmatprep.mubr.bf16.mxu1 %v22471_v49 }
 0x742   :  { %v18611_v22 = vpop.f32.mrb[220].mxu0  ;;  %v4798_v25 = vpack.c.bf16 %v4753_v6, %v4750_v60  ;;  %18782 = vmatprep.subr.bf16.mxu0 %v28533_v55  ;;  %v28541_v60 = vld [vmem:[#allocation20_spill] sm:$0xff] }
 0x743   :  { %v18612_v11 = vpop.f32.mrb[221].mxu0  ;;  %v22472_v6 = vld [vmem:[%s28356_s1 + $0xaa0] ss:$16 sps:$4 sm:$0xff]  }
 0x744   :  { %v18613_v0 = vadd.f32 %v18612_v11, %v18611_v22  ;;  %v18614_v15 = vpop.f32.mrb[222].mxu0  ;;  %20351 = vmatprep.mubr.msk.bf16.mxu0 %vm934_vm2, %v4798_v25  ;;  %v28542_v11 = vld [vmem:[#allocation22_spill] sm:$0xff] }
 0x745   :  { %v18615_v56 = vpop.f32.mrb[223].mxu0  ;;  %18783 = vmatpush3.bf16.msra.mxu0 %v28534_v37 }
 0x746   :  { %v4758_v19 = vadd.f32 %v25155_v43, %v18613_v0  ;;  %v18616_v10 = vadd.f32 %v18615_v56, %v18614_v15  ;;  %18784 = vmatprep.subr.bf16.mxu0 %v28535_v61  ;;  %v22469_v43 = vld [vmem:[%s28356_s1 + $0xa80] ss:$16 sps:$4 sm:$0xff]  }
 0x747   :  { %5741 = vmatmul.mubr.bf16.gmra.mrb[144].mxu1 %v22469_v43  ;;  %v28543_v15 = vld [vmem:[#allocation24_spill] sm:$0xff]  ;;  %v28544_v56 = vld [vmem:[#allocation26_spill] sm:$0xff] }
 0x748   :  { %v4761_v18 = vadd.f32 %v25157_v41, %v18616_v10  ;;  %v22474_v41 = vld [vmem:[%s28356_s1 + $0xaa4] ss:$16 sps:$4 sm:$0xff]  }
 0x749   :  { %18785 = vmatpush3.bf16.msra.mxu0 %v28536_v30  ;;  %5748 = vmatprep.mubr.bf16.mxu1 %v22474_v41 }
 0x74a   :  { %v18617_v28 = vpop.f32.mrb[224].mxu0  ;;  %v4799_v24 = vpack.c.bf16 %v4761_v18, %v4758_v19  ;;  %18786 = vmatprep.subr.bf16.mxu0 %v28537_v45 }
 0x74b   :  { %v18618_v3 = vpop.f32.mrb[225].mxu0 }
 0x74c   :  { %v18619_v27 = vadd.f32 %v18618_v3, %v18617_v28  ;;  %v18620_v23 = vpop.f32.mrb[226].mxu0  ;;  %20352 = vmatmul.mubr.msk.bf16.gmra.mrb[68].mxu0 %vm934_vm2, %v4799_v24  ;;  %v22475_v28 = vld [vmem:[%s28356_s1 + $0xac0] ss:$16 sps:$4 sm:$0xff]  }
 0x74d   :  { %v18621_v14 = vpop.f32.mrb[227].mxu0  ;;  %18787 = vmatpush3.bf16.msra.mxu0 %v28538_v20 }
 0x74e   :  { %v4766_v58 = vadd.f32 %v25159_v53, %v18619_v27  ;;  %v18622_v46 = vadd.f32 %v18621_v14, %v18620_v23  ;;  %18788 = vmatprep.subr.bf16.mxu0 %v28539_v31 }
 0x74f   :  { %5749 = vmatmul.mubr.bf16.gmra.mrb[148].mxu1 %v22472_v6 }
 0x750   :  { %v4769_v42 = vadd.f32 %v25161_v9, %v18622_v46  ;;  %v22477_v9 = vld [vmem:[%s28356_s1 + $0xac4] ss:$16 sps:$4 sm:$0xff]   ;;  %v22478_v46 = vld [vmem:[%s28356_s1 + $0xae0] ss:$16 sps:$4 sm:$0xff]  }
 0x751   :  { %18789 = vmatpush3.bf16.msra.mxu0 %v28540_v29  ;;  %5756 = vmatprep.mubr.bf16.mxu1 %v22477_v9  ;;  %v22481_v9 = vld [vmem:[%s28356_s1 + $0xb00] ss:$16 sps:$4 sm:$0xff]  }
 0x752   :  { %v18623_v17 = vpop.f32.mrb[228].mxu0  ;;  %v4800_v47 = vpack.c.bf16 %v4769_v42, %v4766_v58  ;;  %18790 = vmatprep.subr.bf16.mxu0 %v28541_v60 }
 0x753   :  { %v18624_v13 = vpop.f32.mrb[229].mxu0 }
 0x754   :  { %v18625_v22 = vadd.f32 %v18624_v13, %v18623_v17  ;;  %v18626_v53 = vpop.f32.mrb[230].mxu0  ;;  %20355 = vmatprep.mubr.msk.bf16.mxu0 %vm934_vm2, %v4800_v47 }
 0x755   :  { %v18627_v25 = vpop.f32.mrb[231].mxu0  ;;  %18791 = vmatpush3.bf16.msra.mxu0 %v28542_v11 }
 0x756   :  { %v4774_v7 = vadd.f32 %v25163_v40, %v18625_v22  ;;  %v18628_v0 = vadd.f32 %v18627_v25, %v18626_v53  ;;  %18792 = vmatprep.subr.bf16.mxu0 %v28543_v15  ;;  %v22480_v40 = vld [vmem:[%s28356_s1 + $0xae4] ss:$16 sps:$4 sm:$0xff]   ;;  %v22414_v22 = vld [vmem:[%s28356_s1 + $0x90c] ss:$16 sps:$4 sm:$0xff]  }
 0x757   :  { %5757 = vmatmul.mubr.bf16.gmra.mrb[152].mxu1 %v22475_v28  ;;  %v22418_v25 = vld [vmem:[%s28356_s1 + $0x92c] ss:$16 sps:$4 sm:$0xff]   ;;  %v22426_v28 = vld [vmem:[%s28356_s1 + $0x948] ss:$16 sps:$4 sm:$0xff]  }
 0x758   :  { %v4777_v49 = vadd.f32 %v25165_v38, %v18628_v0  ;;  %5764 = vmatprep.mubr.bf16.mxu1 %v22480_v40  ;;  %v22489_v0 = vld [vmem:[%s28356_s1 + $0xb44] ss:$16 sps:$4 sm:$0xff]   ;;  %v22432_v40 = vld [vmem:[%s28356_s1 + $0x968] ss:$16 sps:$4 sm:$0xff]  }
 0x759   :  { %18793 = vmatpush3.bf16.msra.mxu0 %v28544_v56 }
 0x75a   :  { %v18629_v19 = vpop.f32.mrb[232].mxu0  ;;  %v4801_v10 = vpack.c.bf16 %v4777_v49, %v4774_v7  ;;  %v22484_v7 = vld [vmem:[%s28356_s1 + $0xb20] ss:$16 sps:$4 sm:$0xff]   ;;  %v22420_v49 = vld [vmem:[%s28356_s1 + $0x928] ss:$16 sps:$4 sm:$0xff]  }
 0x75b   :  { %v18630_v18 = vpop.f32.mrb[233].mxu0 }
 0x75c   :  { %v18631_v24 = vadd.f32 %v18630_v18, %v18629_v19  ;;  %v18632_v3 = vpop.f32.mrb[234].mxu0  ;;  %20356 = vmatmul.mubr.msk.bf16.gmra.mrb[72].mxu0 %vm934_vm2, %v4801_v10  ;;  %v22424_v19 = vld [vmem:[%s28356_s1 + $0x94c] ss:$16 sps:$4 sm:$0xff]   ;;  %v22487_v10 = vld [vmem:[%s28356_s1 + $0xb40] ss:$16 sps:$4 sm:$0xff]  }
 0x75d   :  { %v18633_v43 = vpop.f32.mrb[235].mxu0  ;;  %v22492_v18 = vld [vmem:[%s28356_s1 + $0xb64] ss:$16 sps:$4 sm:$0xff]  }
 0x75e   :  { %v4782_v38 = vadd.f32 %v25167_v54, %v18631_v24  ;;  %v18634_v27 = vadd.f32 %v18633_v43, %v18632_v3  ;;  %v22483_v54 = vld [vmem:[%s28356_s1 + $0xb04] ss:$16 sps:$4 sm:$0xff]   ;;  %v22430_v24 = vld [vmem:[%s28356_s1 + $0x96c] ss:$16 sps:$4 sm:$0xff]   ;;  %v22490_v3 = vld [vmem:[%s28356_s1 + $0xb60] ss:$16 sps:$4 sm:$0xff]  }
 0x75f   :  { %5765 = vmatmul.mubr.bf16.gmra.mrb[156].mxu1 %v22478_v46  ;;  %v22438_v43 = vld [vmem:[%s28356_s1 + $0x98c] ss:$16 sps:$4 sm:$0xff]   ;;  %v22454_v46 = vld [vmem:[%s28356_s1 + $0x9e8] ss:$16 sps:$4 sm:$0xff]  }
 0x760   :  { %v4785_v23 = vadd.f32 %v25169_v2, %v18634_v27  ;;  %6245 = vmatprep.mubr.bf16.mxu1 %v22483_v54  ;;  %v22444_v27 = vld [vmem:[%s28356_s1 + $0x9ac] ss:$16 sps:$4 sm:$0xff]  }
 0x762   :  { %v18635_v41 = vpop.f32.mrb[236].mxu0  ;;  %v4802_v14 = vpack.c.bf16 %v4785_v23, %v4782_v38  ;;  %v22436_v38 = vld [vmem:[%s28356_s1 + $0x988] ss:$16 sps:$4 sm:$0xff]  }
 0x763   :  { %v18636_v58 = vpop.f32.mrb[237].mxu0  ;;  %v22442_v23 = vld [vmem:[%s28356_s1 + $0x9a8] ss:$16 sps:$4 sm:$0xff]  }
 0x764   :  { %v18637_v42 = vadd.f32 %v18636_v58, %v18635_v41  ;;  %v18638_v17 = vpop.f32.mrb[238].mxu0  ;;  %20359 = vmatprep.mubr.msk.bf16.mxu0 %vm934_vm2, %v4802_v14  ;;  %v22450_v41 = vld [vmem:[%s28356_s1 + $0x9cc] ss:$16 sps:$4 sm:$0xff]   ;;  %v22448_v14 = vld [vmem:[%s28356_s1 + $0x9c8] ss:$16 sps:$4 sm:$0xff]  }
 0x765   :  { %v18639_v47 = vpop.f32.mrb[239].mxu0  ;;  %v22456_v58 = vld [vmem:[%s28356_s1 + $0x9ec] ss:$16 sps:$4 sm:$0xff]  }
 0x766   :  { %v4790_v13 = vadd.f32 %v25171_v35, %v18637_v42  ;;  %v18640_v2 = vadd.f32 %v18639_v47, %v18638_v17  ;;  %v22486_v35 = vld [vmem:[%s28356_s1 + $0xb24] ss:$16 sps:$4 sm:$0xff]   ;;  %v18730_v42 = vpop.f32.mrb[96].mxu1 }
 0x767   :  { %6246 = vmatmul.mubr.bf16.vlgmr.msra.gmra.mrb[160].mxu1 %v22481_v9  ;;  %v18731_v17 = vpop.f32.mrb[97].mxu1 }
 0x768   :  { %v4793_v6 = vadd.f32 %v25173_v5, %v18640_v2  ;;  %v22412_v5 = vld [vmem:[%s28356_s1 + $0x908] ss:$16 sps:$4 sm:$0xff]   ;;  %6253 = vmatprep.mubr.bf16.mxu1 %v22486_v35  ;;  %19053 = vmatpush3.bf16.msra.mxu1 %v23133_v12  ;;  %v25430_v54 = vadd.f32 %v18731_v17, %v18730_v42  ;;  %v18733_v47 = vpop.f32.mrb[98].mxu1  ;;  %v22504_v17 = vld [vmem:[%s28356_s1 + $0xbe4] ss:$16 sps:$4 sm:$0xff]  }
 0x769   :  { %19054 = vmatprep.subr.bf16.mxu1 %v28531_v57 }
 0x76a   :  { %v4803_v53 = vpack.c.bf16 %v4793_v6, %v4790_v13  ;;  %v18734_v13 = vpop.f32.mrb[99].mxu1  ;;  %v22495_v6 = vld [vmem:[%s28356_s1 + $0xb84] ss:$16 sps:$4 sm:$0xff]  }
 0x76b   :  { %v25432_v2 = vadd.f32 %v18734_v13, %v18733_v47  ;;  %v22502_v13 = vld [vmem:[%s28356_s1 + $0xbe0] ss:$16 sps:$4 sm:$0xff]  }
 0x76c   :  { %20360 = vmatmul.mubr.msk.bf16.gmra.mrb[76].mxu0 %vm934_vm2, %v4803_v53  ;;  %19055 = vmatpush3.bf16.msra.mxu1 %v28532_v48  ;;  %v22493_v53 = vld [vmem:[%s28356_s1 + $0xb80] ss:$16 sps:$4 sm:$0xff]  }
 0x76d   :  { %5268 = vmatprep.mubr.bf16.mxu0 %v22414_v22  ;;  %19056 = vmatprep.subr.bf16.mxu1 %v28533_v55  ;;  %v18736_v22 = vpop.f32.mrb[100].mxu1 }
 0x76e   :  { %v18737_v9 = vpop.f32.mrb[101].mxu1 }
 0x76f   :  { %6254 = vmatmul.mubr.bf16.gmra.mrb[164].mxu1 %v22484_v7  ;;  %v25440_v35 = vadd.f32 %v18737_v9, %v18736_v22 }
 0x770   :  { %6261 = vmatprep.mubr.bf16.mxu1 %v22489_v0  ;;  %19057 = vmatpush3.bf16.msra.mxu1 %v28534_v37  ;;  %v16184_v0 = vld [vmem:[%s28357_s2 + $0x12] sm:$0x3] }
 0x771   :  { %19058 = vmatprep.subr.bf16.mxu1 %v28535_v61 }
 0x774   :  { %5269 = vmatmul.mubr.bf16.vlgmr.msra.gmra.mrb[240].mxu0 %v22412_v5  ;;  %19059 = vmatpush3.bf16.msra.mxu1 %v28536_v30  ;;  %v18739_v5 = vpop.f32.mrb[102].mxu1 }
 0x775   :  { %5276 = vmatprep.mubr.bf16.mxu0 %v22418_v25  ;;  %19060 = vmatprep.subr.bf16.mxu1 %v28537_v45  ;;  %v18740_v25 = vpop.f32.mrb[103].mxu1 }
 0x776   :  { %v25442_v7 = vadd.f32 %v18740_v25, %v18739_v5  ;;  %v22507_v25 = vld [vmem:[%s28356_s1 + $0xb0c] ss:$16 sps:$4 sm:$0xff]  }
 0x777   :  { %6262 = vmatmul.mubr.bf16.gmra.mrb[168].mxu1 %v22487_v10  ;;  %v18742_v10 = vpop.f32.mrb[104].mxu1 }
 0x778   :  { %6269 = vmatprep.mubr.bf16.mxu1 %v22492_v18  ;;  %19061 = vmatpush3.bf16.msra.mxu1 %v28538_v20  ;;  %v22496_v18 = vld [vmem:[%s28356_s1 + $0xba0] ss:$16 sps:$4 sm:$0xff]  }
 0x779   :  { %19062 = vmatprep.subr.bf16.mxu1 %v28539_v31 }
 0x77c   :  { %5277 = vmatmul.mubr.bf16.gmra.mrb[244].mxu0 %v22420_v49  ;;  %19063 = vmatpush3.bf16.msra.mxu1 %v28540_v29  ;;  %v5368_v49 = vand.u32 %v16184_v0, %v23679_v4 }
 0x77d   :  { %5284 = vmatprep.mubr.bf16.mxu0 %v22424_v19  ;;  %19064 = vmatprep.subr.bf16.mxu1 %v28541_v60  ;;  %v22498_v19 = vld [vmem:[%s28356_s1 + $0xba4] ss:$16 sps:$4 sm:$0xff]  }
 0x77e   :  { %20363 = vmatprep.subr.bf16.mxu0 %v5368_v49 }
 0x77f   :  { %6270 = vmatmul.mubr.bf16.gmra.mrb[172].mxu1 %v22490_v3  ;;  %20364 = vmatpush3.bf16.msra.mxu0 %v5368_v49  ;;  %v22505_v49 = vld [vmem:[%s28356_s1 + $0xb08] ss:$16 sps:$4 sm:$0xff]  }
 0x780   :  { %19065 = vmatpush3.bf16.msra.mxu1 %v28542_v11  ;;  %6277 = vmatprep.mubr.bf16.mxu1 %v22495_v6 }
 0x781   :  { %19066 = vmatprep.subr.bf16.mxu1 %v28543_v15  ;;  %18915 = vmatprep.subr.bf16.mxu0 %v28530_v32 }
 0x784   :  { %5285 = vmatmul.mubr.bf16.gmra.mrb[248].mxu0 %v22426_v28  ;;  %19067 = vmatpush3.bf16.msra.mxu1 %v28544_v56  ;;  %v18743_v28 = vpop.f32.mrb[105].mxu1 }
 0x785   :  { %5292 = vmatprep.mubr.bf16.mxu0 %v22430_v24  ;;  %19189 = vmatprep.subr.bf16.mxu1 %v28530_v32  ;;  %v18745_v24 = vpop.f32.mrb[106].mxu1  ;;  %v25454_v3 = vadd.f32 %v18743_v28, %v18742_v10 }
 0x787   :  { %6278 = vmatmul.mubr.bf16.gmra.mrb[176].mxu1 %v22493_v53 }
 0x788   :  { %6285 = vmatprep.mubr.bf16.mxu1 %v22498_v19 }
 0x78c   :  { %5293 = vmatmul.mubr.bf16.gmra.mrb[252].mxu0 %v22432_v40  ;;  %v18746_v40 = vpop.f32.mrb[107].mxu1 }
 0x78d   :  { %5300 = vmatprep.mubr.bf16.mxu0 %v22438_v43  ;;  %v25457_v43 = vadd.f32 %v18746_v40, %v18745_v24  ;;  %v22510_v40 = vld [vmem:[%s28356_s1 + $0xb2c] ss:$16 sps:$4 sm:$0xff]  }
 0x78f   :  { %6286 = vmatmul.mubr.bf16.gmra.mrb[180].mxu1 %v22496_v18 }
 0x794   :  { %5301 = vmatmul.mubr.bf16.gmra.mrb[0].mxu0 %v22436_v38  ;;  %v22501_v38 = vld [vmem:[%s28356_s1 + $0xbc4] ss:$16 sps:$4 sm:$0xff]  }
 0x795   :  { %5308 = vmatprep.mubr.bf16.mxu0 %v22444_v27  ;;  %v18748_v27 = vpop.f32.mrb[108].mxu1  ;;  %6293 = vmatprep.mubr.bf16.mxu1 %v22501_v38 }
 0x79c   :  { %5309 = vmatmul.mubr.bf16.gmra.mrb[4].mxu0 %v22442_v23  ;;  %v22499_v23 = vld [vmem:[%s28356_s1 + $0xbc0] ss:$16 sps:$4 sm:$0xff]  }
 0x79d   :  { %5316 = vmatprep.mubr.bf16.mxu0 %v22450_v41  ;;  %v18749_v41 = vpop.f32.mrb[109].mxu1  ;;  %6294 = vmatmul.mubr.bf16.gmra.mrb[184].mxu1 %v22499_v23 }
 0x79e   :  { %6301 = vmatprep.mubr.bf16.mxu1 %v22504_v17 }
 0x7a4   :  { %5317 = vmatmul.mubr.bf16.gmra.mrb[8].mxu0 %v22448_v14  ;;  %v25465_v14 = vadd.f32 %v18749_v41, %v18748_v27  ;;  %v22508_v27 = vld [vmem:[%s28356_s1 + $0xb28] ss:$16 sps:$4 sm:$0xff]  }
 0x7a5   :  { %5324 = vmatprep.mubr.bf16.mxu0 %v22456_v58  ;;  %v18751_v58 = vpop.f32.mrb[110].mxu1  ;;  %6302 = vmatmul.mubr.bf16.gmra.mrb[188].mxu1 %v22502_v13 }
 0x7a6   :  { %6342 = vmatprep.mubr.bf16.mxu1 %v22507_v25 }
 0x7ac   :  { %5325 = vmatmul.mubr.bf16.gmra.mrb[12].mxu0 %v22454_v46  ;;  %v18752_v46 = vpop.f32.mrb[111].mxu1 }
 0x7ad   :  { %v25467_v42 = vadd.f32 %v18752_v46, %v18751_v58  ;;  %v18754_v47 = vpop.f32.mrb[112].mxu1  ;;  %6343 = vmatmul.mubr.bf16.vlgmr.msra.gmra.mrb[192].mxu1 %v22505_v49 }
 0x7ae   :  { %v18755_v6 = vpop.f32.mrb[113].mxu1  ;;  %19190 = vmatpush3.bf16.msra.mxu1 %v23133_v12  ;;  %6350 = vmatprep.mubr.bf16.mxu1 %v22510_v40  ;;  %v22517_v40 = vld [vmem:[%s28356_s1 + $0xb88] ss:$16 sps:$4 sm:$0xff]  }
 0x7af   :  { %v25475_v22 = vadd.f32 %v18755_v6, %v18754_v47  ;;  %v18757_v53 = vpop.f32.mrb[114].mxu1  ;;  %19191 = vmatprep.subr.bf16.mxu1 %v28531_v57  ;;  %v22513_v47 = vld [vmem:[%s28356_s1 + $0xb4c] ss:$16 sps:$4 sm:$0xff]   ;;  %v22511_v6 = vld [vmem:[%s28356_s1 + $0xb48] ss:$16 sps:$4 sm:$0xff]  }
 0x7b0   :  { %v18758_v9 = vpop.f32.mrb[115].mxu1 }
 0x7b1   :  { %v25477_v5 = vadd.f32 %v18758_v9, %v18757_v53  ;;  %v18760_v0 = vpop.f32.mrb[116].mxu1 }
 0x7b2   :  { %v18761_v19 = vpop.f32.mrb[117].mxu1  ;;  %19192 = vmatpush3.bf16.msra.mxu1 %v28532_v48 }
 0x7b3   :  { %v25485_v10 = vadd.f32 %v18761_v19, %v18760_v0  ;;  %v18763_v18 = vpop.f32.mrb[118].mxu1  ;;  %19193 = vmatprep.subr.bf16.mxu1 %v28533_v55  ;;  %v22516_v19 = vld [vmem:[%s28356_s1 + $0xb6c] ss:$16 sps:$4 sm:$0xff]  }
 0x7b4   :  { %v18764_v28 = vpop.f32.mrb[119].mxu1 }
 0x7b5   :  { %v25488_v24 = vadd.f32 %v18764_v28, %v18763_v18  ;;  %v18766_v38 = vpop.f32.mrb[120].mxu1  ;;  %6351 = vmatmul.mubr.bf16.gmra.mrb[196].mxu1 %v22508_v27  ;;  %v22514_v18 = vld [vmem:[%s28356_s1 + $0xb68] ss:$16 sps:$4 sm:$0xff]   ;;  %v22519_v28 = vld [vmem:[%s28356_s1 + $0xb8c] ss:$16 sps:$4 sm:$0xff]  }
 0x7b6   :  { %v18767_v23 = vpop.f32.mrb[121].mxu1  ;;  %19194 = vmatpush3.bf16.msra.mxu1 %v28534_v37  ;;  %6358 = vmatprep.mubr.bf16.mxu1 %v22513_v47  ;;  %v22523_v27 = vld [vmem:[%s28356_s1 + $0xba8] ss:$16 sps:$4 sm:$0xff]  }
 0x7b7   :  { %v25499_v41 = vadd.f32 %v18767_v23, %v18766_v38  ;;  %v18769_v58 = vpop.f32.mrb[122].mxu1  ;;  %19195 = vmatprep.subr.bf16.mxu1 %v28535_v61  ;;  %v22525_v38 = vld [vmem:[%s28356_s1 + $0xbac] ss:$16 sps:$4 sm:$0xff]   ;;  %v22535_v47 = vld [vmem:[%s28356_s1 + $0xbe8] ss:$16 sps:$4 sm:$0xff]  }
 0x7b8   :  { %v18770_v46 = vpop.f32.mrb[123].mxu1  ;;  %v22531_v23 = vld [vmem:[%s28356_s1 + $0xbcc] ss:$16 sps:$4 sm:$0xff]  }
 0x7b9   :  { %v25502_v17 = vadd.f32 %v18770_v46, %v18769_v58  ;;  %v18772_v13 = vpop.f32.mrb[124].mxu1  ;;  %v22529_v58 = vld [vmem:[%s28356_s1 + $0xbc8] ss:$16 sps:$4 sm:$0xff]   ;;  %v22537_v46 = vld [vmem:[%s28356_s1 + $0xbec] ss:$16 sps:$4 sm:$0xff]  }
 0x7ba   :  { %19196 = vmatpush3.bf16.msra.mxu1 %v28536_v30  ;;  %v18773_v53 = vpop.f32.mrb[125].mxu1 }
 0x7bb   :  { %19197 = vmatprep.subr.bf16.mxu1 %v28537_v45  ;;  %v25513_v9 = vadd.f32 %v18773_v53, %v18772_v13  ;;  %v18775_v25 = vpop.f32.mrb[126].mxu1 }
 0x7bc   :  { %v18776_v0 = vpop.f32.mrb[127].mxu1 }
 0x7bd   :  { %6359 = vmatmul.mubr.bf16.gmra.mrb[200].mxu1 %v22511_v6  ;;  %v25516_v49 = vadd.f32 %v18776_v0, %v18775_v25  ;;  %v18867_v0 = vpop.f32.mrb[128].mxu1 }
 0x7be   :  { %19198 = vmatpush3.bf16.msra.mxu1 %v28538_v20  ;;  %6366 = vmatprep.mubr.bf16.mxu1 %v22516_v19 }
 0x7bf   :  { %19199 = vmatprep.subr.bf16.mxu1 %v28539_v31 }
 0x7c2   :  { %19200 = vmatpush3.bf16.msra.mxu1 %v28540_v29 }
 0x7c3   :  { %19201 = vmatprep.subr.bf16.mxu1 %v28541_v60 }
 0x7c5   :  { %6367 = vmatmul.mubr.bf16.gmra.mrb[204].mxu1 %v22514_v18  ;;  %v18868_v18 = vpop.f32.mrb[129].mxu1 }
 0x7c6   :  { %19202 = vmatpush3.bf16.msra.mxu1 %v28542_v11  ;;  %6374 = vmatprep.mubr.bf16.mxu1 %v22519_v28 }
 0x7c7   :  { %19203 = vmatprep.subr.bf16.mxu1 %v28543_v15 }
 0x7ca   :  { %19204 = vmatpush3.bf16.msra.mxu1 %v28544_v56 }
 0x7cb   :  { %19262 = vmatprep.subr.bf16.mxu1 %v28519_v36 }
 0x7cd   :  { %6375 = vmatmul.mubr.bf16.gmra.mrb[208].mxu1 %v22517_v40 }
 0x7ce   :  { %6382 = vmatprep.mubr.bf16.mxu1 %v22525_v38  ;;  %v25556_v38 = vadd.f32 %v18868_v18, %v18867_v0 }
 0x7d5   :  { %6383 = vmatmul.mubr.bf16.gmra.mrb[212].mxu1 %v22523_v27  ;;  %v18870_v27 = vpop.f32.mrb[130].mxu1 }
 0x7d6   :  { %6390 = vmatprep.mubr.bf16.mxu1 %v22531_v23  ;;  %v18871_v23 = vpop.f32.mrb[131].mxu1 }
 0x7d7   :  { %v25559_v32 = vadd.f32 %v18871_v23, %v18870_v27 }
 0x7dd   :  { %6391 = vmatmul.mubr.bf16.gmra.mrb[216].mxu1 %v22529_v58 }
 0x7de   :  { %6398 = vmatprep.mubr.bf16.mxu1 %v22537_v46  ;;  %v18873_v46 = vpop.f32.mrb[132].mxu1 }
 0x7e5   :  { %6399 = vmatmul.mubr.bf16.gmra.mrb[220].mxu1 %v22535_v47  ;;  %v18874_v47 = vpop.f32.mrb[133].mxu1 }
 0x847   :  { %v18794_v13 = vpop.f32.mrb[240].mxu0 }
 0x848   :  { %v18795_v6 = vpop.f32.mrb[241].mxu0 }
 0x849   :  { %v18796_v53 = vadd.f32 %v18795_v6, %v18794_v13  ;;  %v18797_v25 = vpop.f32.mrb[242].mxu0  ;;  %v25561_v13 = vadd.f32 %v18874_v47, %v18873_v46  ;;  %v18876_v6 = vpop.f32.mrb[134].mxu1 }
 0x84a   :  { %v18798_v19 = vpop.f32.mrb[243].mxu0  ;;  %v18877_v33 = vpop.f32.mrb[135].mxu1 }
 0x84b   :  { %v5271_v28 = vadd.f32 %v18796_v53, %v25430_v54  ;;  %v18799_v40 = vadd.f32 %v18798_v19, %v18797_v25  ;;  %28545 = vst [vmem:[#allocation15_spill] sm:$0xff] %v25561_v13  ;;  %v25564_v53 = vadd.f32 %v18877_v33, %v18876_v6  ;;  %v18879_v25 = vpop.f32.mrb[136].mxu1 }
 0x84d   :  { %v5274_v58 = vadd.f32 %v18799_v40, %v25432_v2  ;;  %28546 = vst [vmem:[#allocation17_spill] sm:$0xff] %v25564_v53  ;;  %v18880_v2 = vpop.f32.mrb[137].mxu1 }
 0x84e   :  { %v25567_v40 = vadd.f32 %v18880_v2, %v18879_v25 }
 0x84f   :  { %v18800_v36 = vpop.f32.mrb[244].mxu0  ;;  %v5333_v44 = vpack.c.bf16 %v5274_v58, %v5271_v28  ;;  %v18882_v28 = vpop.f32.mrb[138].mxu1 }
 0x850   :  { %v18801_v59 = vpop.f32.mrb[245].mxu0  ;;  %v18883_v27 = vpop.f32.mrb[139].mxu1 }
 0x851   :  { %v18802_v51 = vadd.f32 %v18801_v59, %v18800_v36  ;;  %v18803_v54 = vpop.f32.mrb[246].mxu0  ;;  %20365 = vmatprep.mubr.msk.bf16.mxu0 %vm934_vm2, %v5333_v44  ;;  %v25570_v58 = vadd.f32 %v18883_v27, %v18882_v28  ;;  %v18885_v36 = vpop.f32.mrb[140].mxu1 }
 0x852   :  { %v18804_v0 = vpop.f32.mrb[247].mxu0  ;;  %v18886_v59 = vpop.f32.mrb[141].mxu1 }
 0x853   :  { %v5279_v19 = vadd.f32 %v18802_v51, %v25440_v35  ;;  %v18805_v18 = vadd.f32 %v18804_v0, %v18803_v54  ;;  %v25572_v33 = vadd.f32 %v18886_v59, %v18885_v36  ;;  %v18888_v47 = vpop.f32.mrb[142].mxu1 }
 0x854   :  { %v18889_v53 = vpop.f32.mrb[143].mxu1 }
 0x855   :  { %v5282_v23 = vadd.f32 %v18805_v18, %v25442_v7  ;;  %v25575_v35 = vadd.f32 %v18889_v53, %v18888_v47  ;;  %v18891_v54 = vpop.f32.mrb[144].mxu1 }
 0x856   :  { %v18892_v7 = vpop.f32.mrb[145].mxu1 }
 0x857   :  { %v5334_v46 = vpack.c.bf16 %v5282_v23, %v5279_v19  ;;  %v18806_v44 = vpop.f32.mrb[248].mxu0  ;;  %v25580_v19 = vadd.f32 %v18892_v7, %v18891_v54  ;;  %v18894_v18 = vpop.f32.mrb[146].mxu1 }
 0x858   :  { %v18807_v6 = vpop.f32.mrb[249].mxu0  ;;  %v18895_v28 = vpop.f32.mrb[147].mxu1 }
 0x859   :  { %v18808_v13 = vadd.f32 %v18807_v6, %v18806_v44  ;;  %v18809_v51 = vpop.f32.mrb[250].mxu0  ;;  %20366 = vmatmul.mubr.msk.bf16.vlgmr.msra.gmra.mrb[64].mxu0 %vm934_vm2, %v5334_v46  ;;  %v25583_v23 = vadd.f32 %v18895_v28, %v18894_v18  ;;  %v18897_v53 = vpop.f32.mrb[148].mxu1 }
 0x85a   :  { %v18810_v25 = vpop.f32.mrb[251].mxu0  ;;  %18916 = vmatpush3.bf16.msra.mxu0 %v23133_v12  ;;  %v18898_v36 = vpop.f32.mrb[149].mxu1 }
 0x85b   :  { %v5287_v0 = vadd.f32 %v18808_v13, %v25454_v3  ;;  %v18811_v2 = vadd.f32 %v18810_v25, %v18809_v51  ;;  %18917 = vmatprep.subr.bf16.mxu0 %v28531_v57  ;;  %v25587_v3 = vadd.f32 %v18898_v36, %v18897_v53  ;;  %v18900_v13 = vpop.f32.mrb[150].mxu1 }
 0x85c   :  { %v18901_v47 = vpop.f32.mrb[151].mxu1 }
 0x85d   :  { %v5290_v27 = vadd.f32 %v18811_v2, %v25457_v43  ;;  %v25590_v43 = vadd.f32 %v18901_v47, %v18900_v13  ;;  %v18903_v54 = vpop.f32.mrb[152].mxu1 }
 0x85e   :  { %18918 = vmatpush3.bf16.msra.mxu0 %v28532_v48  ;;  %v18904_v7 = vpop.f32.mrb[153].mxu1  ;;  %v22591_v48 = vld [vmem:[%s28356_s1 + $0xccc] ss:$16 sps:$4 sm:$0xff]  }
 0x85f   :  { %v18812_v59 = vpop.f32.mrb[252].mxu0  ;;  %v5335_v46 = vpack.c.bf16 %v5290_v27, %v5287_v0  ;;  %18919 = vmatprep.subr.bf16.mxu0 %v28533_v55  ;;  %v25595_v18 = vadd.f32 %v18904_v7, %v18903_v54  ;;  %v18906_v28 = vpop.f32.mrb[154].mxu1 }
 0x860   :  { %v18813_v44 = vpop.f32.mrb[253].mxu0  ;;  %v18907_v27 = vpop.f32.mrb[155].mxu1 }
 0x861   :  { %v18814_v6 = vadd.f32 %v18813_v44, %v18812_v59  ;;  %v18815_v51 = vpop.f32.mrb[254].mxu0  ;;  %20369 = vmatprep.mubr.msk.bf16.mxu0 %vm934_vm2, %v5335_v46  ;;  %v25598_v36 = vadd.f32 %v18907_v27, %v18906_v28  ;;  %v18909_v59 = vpop.f32.mrb[156].mxu1 }
 0x862   :  { %v18816_v25 = vpop.f32.mrb[255].mxu0  ;;  %18920 = vmatpush3.bf16.msra.mxu0 %v28534_v37  ;;  %v18910_v46 = vpop.f32.mrb[157].mxu1 }
 0x863   :  { %v5295_v0 = vadd.f32 %v18814_v6, %v25465_v14  ;;  %v18817_v2 = vadd.f32 %v18816_v25, %v18815_v51  ;;  %18921 = vmatprep.subr.bf16.mxu0 %v28535_v61  ;;  %v25602_v14 = vadd.f32 %v18910_v46, %v18909_v59  ;;  %v18912_v47 = vpop.f32.mrb[158].mxu1 }
 0x864   :  { %v18913_v51 = vpop.f32.mrb[159].mxu1 }
 0x865   :  { %v5298_v53 = vadd.f32 %v18817_v2, %v25467_v42  ;;  %v25605_v42 = vadd.f32 %v18913_v51, %v18912_v47  ;;  %v19004_v7 = vpop.f32.mrb[160].mxu1 }
 0x866   :  { %18922 = vmatpush3.bf16.msra.mxu0 %v28536_v30  ;;  %v19005_v28 = vpop.f32.mrb[161].mxu1 }
 0x867   :  { %v18818_v13 = vpop.f32.mrb[0].mxu0  ;;  %v5336_v44 = vpack.c.bf16 %v5298_v53, %v5295_v0  ;;  %18923 = vmatprep.subr.bf16.mxu0 %v28537_v45  ;;  %v25610_v53 = vadd.f32 %v19005_v28, %v19004_v7  ;;  %v19007_v59 = vpop.f32.mrb[162].mxu1 }
 0x868   :  { %v18819_v6 = vpop.f32.mrb[1].mxu0  ;;  %v19008_v46 = vpop.f32.mrb[163].mxu1 }
 0x869   :  { %v18820_v54 = vadd.f32 %v18819_v6, %v18818_v13  ;;  %v18821_v25 = vpop.f32.mrb[2].mxu0  ;;  %20370 = vmatmul.mubr.msk.bf16.gmra.mrb[68].mxu0 %vm934_vm2, %v5336_v44  ;;  %v25613_v6 = vadd.f32 %v19008_v46, %v19007_v59  ;;  %v19010_v44 = vpop.f32.mrb[164].mxu1 }
 0x86a   :  { %v18822_v2 = vpop.f32.mrb[3].mxu0  ;;  %18924 = vmatpush3.bf16.msra.mxu0 %v28538_v20  ;;  %v19011_v47 = vpop.f32.mrb[165].mxu1 }
 0x86b   :  { %v5303_v0 = vadd.f32 %v18820_v54, %v25475_v22  ;;  %v18823_v27 = vadd.f32 %v18822_v2, %v18821_v25  ;;  %18925 = vmatprep.subr.bf16.mxu0 %v28539_v31  ;;  %v25617_v22 = vadd.f32 %v19011_v47, %v19010_v44  ;;  %v19013_v54 = vpop.f32.mrb[166].mxu1 }
 0x86c   :  { %v19014_v7 = vpop.f32.mrb[167].mxu1 }
 0x86d   :  { %v5306_v13 = vadd.f32 %v18823_v27, %v25477_v5  ;;  %v25620_v5 = vadd.f32 %v19014_v7, %v19013_v54  ;;  %v19016_v27 = vpop.f32.mrb[168].mxu1 }
 0x86e   :  { %18926 = vmatpush3.bf16.msra.mxu0 %v28540_v29  ;;  %v19017_v46 = vpop.f32.mrb[169].mxu1 }
 0x86f   :  { %v18824_v51 = vpop.f32.mrb[4].mxu0  ;;  %v5337_v20 = vpack.c.bf16 %v5306_v13, %v5303_v0  ;;  %18927 = vmatprep.subr.bf16.mxu0 %v28541_v60  ;;  %v25625_v44 = vadd.f32 %v19017_v46, %v19016_v27  ;;  %v19019_v47 = vpop.f32.mrb[170].mxu1 }
 0x870   :  { %v18825_v25 = vpop.f32.mrb[5].mxu0  ;;  %v19020_v60 = vpop.f32.mrb[171].mxu1 }
 0x871   :  { %v18826_v2 = vadd.f32 %v18825_v25, %v18824_v51  ;;  %v18827_v28 = vpop.f32.mrb[6].mxu0  ;;  %20373 = vmatprep.mubr.msk.bf16.mxu0 %vm934_vm2, %v5337_v20  ;;  %v25628_v25 = vadd.f32 %v19020_v60, %v19019_v47  ;;  %v19022_v20 = vpop.f32.mrb[172].mxu1 }
 0x872   :  { %v18828_v59 = vpop.f32.mrb[7].mxu0  ;;  %18928 = vmatpush3.bf16.msra.mxu0 %v28542_v11  ;;  %v19023_v54 = vpop.f32.mrb[173].mxu1 }
 0x873   :  { %v5311_v0 = vadd.f32 %v18826_v2, %v25485_v10  ;;  %v18829_v13 = vadd.f32 %v18828_v59, %v18827_v28  ;;  %18929 = vmatprep.subr.bf16.mxu0 %v28543_v15  ;;  %v25631_v29 = vadd.f32 %v19023_v54, %v19022_v20  ;;  %v19025_v10 = vpop.f32.mrb[174].mxu1 }
 0x874   :  { %v19026_v28 = vpop.f32.mrb[175].mxu1 }
 0x875   :  { %v5314_v51 = vadd.f32 %v18829_v13, %v25488_v24  ;;  %v25634_v46 = vadd.f32 %v19026_v28, %v19025_v10  ;;  %v22540_v28 = vld [vmem:[%s28356_s1 + $0xa6c] ss:$16 sps:$4 sm:$0xff]  }
 0x876   :  { %18930 = vmatpush3.bf16.msra.mxu0 %v28544_v56 }
 0x877   :  { %v18830_v7 = vpop.f32.mrb[8].mxu0  ;;  %v5338_v11 = vpack.c.bf16 %v5314_v51, %v5311_v0 }
 0x878   :  { %v18831_v2 = vpop.f32.mrb[9].mxu0 }
 0x879   :  { %v18832_v59 = vadd.f32 %v18831_v2, %v18830_v7  ;;  %v18833_v27 = vpop.f32.mrb[10].mxu0  ;;  %20374 = vmatmul.mubr.msk.bf16.gmra.mrb[72].mxu0 %vm934_vm2, %v5338_v11 }
 0x87a   :  { %v18834_v24 = vpop.f32.mrb[11].mxu0 }
 0x87b   :  { %v5319_v60 = vadd.f32 %v18832_v59, %v25499_v41  ;;  %v18835_v13 = vadd.f32 %v18834_v24, %v18833_v27  ;;  %v22522_v41 = vld [vmem:[%s28356_s1 + $0xa0c] ss:$16 sps:$4 sm:$0xff]   ;;  %v19028_v59 = vpop.f32.mrb[176].mxu1 }
 0x87c   :  { %v19029_v27 = vpop.f32.mrb[177].mxu1 }
 0x87d   :  { %v5322_v47 = vadd.f32 %v18835_v13, %v25502_v17  ;;  %v22526_v17 = vld [vmem:[%s28356_s1 + $0xa28] ss:$16 sps:$4 sm:$0xff]   ;;  %v25663_v24 = vadd.f32 %v19029_v27, %v19028_v59 }
 0x87e   :  { %v22544_v59 = vld [vmem:[%s28356_s1 + $0xaa8] ss:$16 sps:$4 sm:$0xff]  }
 0x87f   :  { %v18836_v56 = vpop.f32.mrb[12].mxu0  ;;  %v5339_v15 = vpack.c.bf16 %v5322_v47, %v5319_v60  ;;  %v19031_v60 = vpop.f32.mrb[178].mxu1  ;;  %v22538_v47 = vld [vmem:[%s28356_s1 + $0xa68] ss:$16 sps:$4 sm:$0xff]  }
 0x880   :  { %v18837_v0 = vpop.f32.mrb[13].mxu0  ;;  %v19032_v13 = vpop.f32.mrb[179].mxu1 }
 0x881   :  { %v18838_v51 = vadd.f32 %v18837_v0, %v18836_v56  ;;  %v18839_v20 = vpop.f32.mrb[14].mxu0  ;;  %20377 = vmatprep.mubr.msk.bf16.mxu0 %vm934_vm2, %v5339_v15  ;;  %v22520_v56 = vld [vmem:[%s28356_s1 + $0xa08] ss:$16 sps:$4 sm:$0xff]   ;;  %v22528_v15 = vld [vmem:[%s28356_s1 + $0xa2c] ss:$16 sps:$4 sm:$0xff]   ;;  %v25668_v0 = vadd.f32 %v19032_v13, %v19031_v60 }
 0x882   :  { %v18840_v54 = vpop.f32.mrb[15].mxu0  ;;  %v22549_v60 = vld [vmem:[%s28356_s1 + $0xacc] ss:$16 sps:$4 sm:$0xff]  }
 0x883   :  { %v5327_v7 = vadd.f32 %v18838_v51, %v25513_v9  ;;  %v18841_v2 = vadd.f32 %v18840_v54, %v18839_v20  ;;  %v22534_v9 = vld [vmem:[%s28356_s1 + $0xa4c] ss:$16 sps:$4 sm:$0xff]   ;;  %v19034_v20 = vpop.f32.mrb[180].mxu1 }
 0x884   :  { %v22543_v51 = vld [vmem:[%s28356_s1 + $0xa8c] ss:$16 sps:$4 sm:$0xff]   ;;  %v19035_v54 = vpop.f32.mrb[181].mxu1 }
 0x885   :  { %v5330_v11 = vadd.f32 %v18841_v2, %v25516_v49  ;;  %v22532_v49 = vld [vmem:[%s28356_s1 + $0xa48] ss:$16 sps:$4 sm:$0xff]   ;;  %v19037_v2 = vpop.f32.mrb[182].mxu1 }
 0x887   :  { %v5340_v10 = vpack.c.bf16 %v5330_v11, %v5327_v7  ;;  %v25673_v7 = vadd.f32 %v19035_v54, %v19034_v20  ;;  %v19038_v11 = vpop.f32.mrb[183].mxu1 }
 0x889   :  { %20378 = vmatmul.mubr.msk.bf16.gmra.mrb[76].mxu0 %vm934_vm2, %v5340_v10  ;;  %v25678_v10 = vadd.f32 %v19038_v11, %v19037_v2  ;;  %v22547_v2 = vld [vmem:[%s28356_s1 + $0xac8] ss:$16 sps:$4 sm:$0xff]  }
 0x88a   :  { %5805 = vmatprep.mubr.bf16.mxu0 %v22522_v41  ;;  %v22541_v41 = vld [vmem:[%s28356_s1 + $0xa88] ss:$16 sps:$4 sm:$0xff]  }
 0x891   :  { %5806 = vmatmul.mubr.bf16.vlgmr.msra.gmra.mrb[16].mxu0 %v22520_v56  ;;  %v22546_v56 = vld [vmem:[%s28356_s1 + $0xaac] ss:$16 sps:$4 sm:$0xff]  }
 0x892   :  { %5813 = vmatprep.mubr.bf16.mxu0 %v22528_v15  ;;  %v19040_v15 = vpop.f32.mrb[184].mxu1 }
 0x899   :  { %5814 = vmatmul.mubr.bf16.gmra.mrb[20].mxu0 %v22526_v17  ;;  %v19041_v17 = vpop.f32.mrb[185].mxu1 }
 0x89a   :  { %5821 = vmatprep.mubr.bf16.mxu0 %v22534_v9  ;;  %v25683_v9 = vadd.f32 %v19041_v17, %v19040_v15 }
 0x8a1   :  { %5822 = vmatmul.mubr.bf16.gmra.mrb[24].mxu0 %v22532_v49  ;;  %v19043_v49 = vpop.f32.mrb[186].mxu1 }
 0x8a2   :  { %5829 = vmatprep.mubr.bf16.mxu0 %v22540_v28  ;;  %v19044_v28 = vpop.f32.mrb[187].mxu1 }
 0x8a3   :  { %v25688_v27 = vadd.f32 %v19044_v28, %v19043_v49  ;;  %v19046_v13 = vpop.f32.mrb[188].mxu1 }
 0x8a9   :  { %5830 = vmatmul.mubr.bf16.gmra.mrb[28].mxu0 %v22538_v47  ;;  %v19047_v47 = vpop.f32.mrb[189].mxu1 }
 0x8aa   :  { %5837 = vmatprep.mubr.bf16.mxu0 %v22543_v51  ;;  %v25693_v51 = vadd.f32 %v19047_v47, %v19046_v13  ;;  %v19049_v20 = vpop.f32.mrb[190].mxu1 }
 0x8ab   :  { %v19050_v54 = vpop.f32.mrb[191].mxu1 }
 0x8ac   :  { %v25698_v11 = vadd.f32 %v19050_v54, %v19049_v20 }
 0x8b1   :  { %5838 = vmatmul.mubr.bf16.gmra.mrb[32].mxu0 %v22541_v41  ;;  %v22552_v41 = vld [vmem:[%s28356_s1 + $0xaec] ss:$16 sps:$4 sm:$0xff]  }
 0x8b2   :  { %5845 = vmatprep.mubr.bf16.mxu0 %v22546_v56  ;;  %v19068_v56 = vpop.f32.mrb[192].mxu1 }
 0x8b3   :  { %v19069_v15 = vpop.f32.mrb[193].mxu1 }
 0x8b4   :  { %v19070_v17 = vadd.f32 %v19069_v15, %v19068_v56  ;;  %v19071_v49 = vpop.f32.mrb[194].mxu1 }
 0x8b5   :  { %v19072_v28 = vpop.f32.mrb[195].mxu1 }
 0x8b6   :  { %v19073_v13 = vadd.f32 %v19072_v28, %v19071_v49  ;;  %v19074_v20 = vpop.f32.mrb[196].mxu1 }
 0x8b8   :  { %v25710_v47 = vadd.f32 %v19073_v13, %v25613_v6 }
 0x8b9   :  { %5846 = vmatmul.mubr.bf16.gmra.mrb[36].mxu0 %v22544_v59  ;;  %v22550_v59 = vld [vmem:[%s28356_s1 + $0xae8] ss:$16 sps:$4 sm:$0xff]  }
 0x8ba   :  { %5853 = vmatprep.mubr.bf16.mxu0 %v22549_v60  ;;  %v25707_v60 = vadd.f32 %v19070_v17, %v25610_v53 }
 0x8c1   :  { %5854 = vmatmul.mubr.bf16.gmra.mrb[40].mxu0 %v22547_v2  ;;  %v19075_v2 = vpop.f32.mrb[197].mxu1 }
 0x8c2   :  { %5861 = vmatprep.mubr.bf16.mxu0 %v22552_v41  ;;  %v19076_v41 = vadd.f32 %v19075_v2, %v19074_v20  ;;  %v19077_v56 = vpop.f32.mrb[198].mxu1 }
 0x8c3   :  { %v19078_v15 = vpop.f32.mrb[199].mxu1 }
 0x8c4   :  { %v25715_v31 = vadd.f32 %v19076_v41, %v25617_v22  ;;  %v19079_v45 = vadd.f32 %v19078_v15, %v19077_v56  ;;  %v19080_v17 = vpop.f32.mrb[200].mxu1 }
 0x8c5   :  { %v19081_v49 = vpop.f32.mrb[201].mxu1 }
 0x8c6   :  { %v25718_v53 = vadd.f32 %v19079_v45, %v25620_v5  ;;  %v19082_v28 = vadd.f32 %v19081_v49, %v19080_v17 }
 0x8c8   :  { %v25723_v54 = vadd.f32 %v19082_v28, %v25625_v44 }
 0x8c9   :  { %5862 = vmatmul.mubr.bf16.gmra.mrb[44].mxu0 %v22550_v59  ;;  %v19083_v59 = vpop.f32.mrb[202].mxu1 }
 0x8ca   :  { %v19084_v13 = vpop.f32.mrb[203].mxu1 }
 0x8cb   :  { %v19085_v20 = vadd.f32 %v19084_v13, %v19083_v59  ;;  %v19086_v22 = vpop.f32.mrb[204].mxu1 }
 0x8cc   :  { %v19087_v5 = vpop.f32.mrb[205].mxu1 }
 0x8cd   :  { %v25726_v2 = vadd.f32 %v19085_v20, %v25628_v25  ;;  %v19088_v41 = vadd.f32 %v19087_v5, %v19086_v22  ;;  %v19089_v56 = vpop.f32.mrb[206].mxu1 }
 0x8ce   :  { %v19090_v15 = vpop.f32.mrb[207].mxu1 }
 0x8cf   :  { %v25731_v6 = vadd.f32 %v19088_v41, %v25631_v29  ;;  %v19091_v17 = vadd.f32 %v19090_v15, %v19089_v56  ;;  %v19092_v44 = vpop.f32.mrb[208].mxu1 }
 0x8d0   :  { %v19093_v28 = vpop.f32.mrb[209].mxu1 }
 0x8d1   :  { %v25734_v49 = vadd.f32 %v19091_v17, %v25634_v46  ;;  %v19094_v59 = vadd.f32 %v19093_v28, %v19092_v44  ;;  %v19095_v13 = vpop.f32.mrb[210].mxu1 }
 0x8d2   :  { %v19096_v20 = vpop.f32.mrb[211].mxu1 }
 0x8d3   :  { %v25739_v45 = vadd.f32 %v19094_v59, %v25663_v24  ;;  %v19097_v22 = vadd.f32 %v19096_v20, %v19095_v13  ;;  %v19098_v29 = vpop.f32.mrb[212].mxu1  ;;  %v16257_v24 = vld [vmem:[%s28357_s2 + $0x14] sm:$0x3] }
 0x8d4   :  { %v19099_v41 = vpop.f32.mrb[213].mxu1 }
 0x8d5   :  { %v25742_v5 = vadd.f32 %v19097_v22, %v25668_v0  ;;  %v19100_v56 = vadd.f32 %v19099_v41, %v19098_v29  ;;  %v19101_v15 = vpop.f32.mrb[214].mxu1  ;;  %v5905_v0 = vand.u32 %v16257_v24, %v23679_v4 }
 0x8d6   :  { %v19102_v17 = vpop.f32.mrb[215].mxu1 }
 0x8d7   :  { %v25747_v25 = vadd.f32 %v19100_v56, %v25673_v7  ;;  %v19103_v44 = vadd.f32 %v19102_v17, %v19101_v15  ;;  %v19104_v59 = vpop.f32.mrb[216].mxu1  ;;  %20381 = vmatprep.subr.bf16.mxu0 %v5905_v0  ;;  %v28551_v17 = vld [vmem:[#allocation5_spill] sm:$0xff] }
 0x8d8   :  { %v19105_v20 = vpop.f32.mrb[217].mxu1  ;;  %20382 = vmatpush3.bf16.msra.mxu0 %v5905_v0 }
 0x8d9   :  { %v25750_v28 = vadd.f32 %v19103_v44, %v25678_v10  ;;  %v19107_v22 = vpop.f32.mrb[218].mxu1  ;;  %v19106_v7 = vadd.f32 %v19105_v20, %v19104_v59 }
 0x8da   :  { %v19108_v29 = vpop.f32.mrb[219].mxu1 }
 0x8db   :  { %v19109_v41 = vadd.f32 %v19108_v29, %v19107_v22  ;;  %v25759_v10 = vadd.f32 %v19106_v7, %v25683_v9  ;;  %v19110_v15 = vpop.f32.mrb[220].mxu1  ;;  %v22567_v7 = vld [vmem:[%s28356_s1 + $0xc4c] ss:$16 sps:$4 sm:$0xff]   ;;  %v22565_v29 = vld [vmem:[%s28356_s1 + $0xc48] ss:$16 sps:$4 sm:$0xff]  }
 0x8dc   :  { %v19111_v44 = vpop.f32.mrb[221].mxu1  ;;  %v28550_v9 = vld [vmem:[#allocation25_spill] sm:$0xff] }
 0x8dd   :  { %v25762_v56 = vadd.f32 %v19109_v41, %v25688_v27  ;;  %v19112_v24 = vadd.f32 %v19111_v44, %v19110_v15  ;;  %v19113_v13 = vpop.f32.mrb[222].mxu1  ;;  %v16330_v27 = vld [vmem:[%s28357_s2 + $0x16] sm:$0x3]  ;;  %v22573_v41 = vld [vmem:[%s28356_s1 + $0xc6c] ss:$16 sps:$4 sm:$0xff]  }
 0x8de   :  { %v19114_v46 = vpop.f32.mrb[223].mxu1  ;;  %v25778_v22 = vand.u32 %v16330_v27, %v23679_v4  ;;  %v22571_v15 = vld [vmem:[%s28356_s1 + $0xc68] ss:$16 sps:$4 sm:$0xff]  }
 0x8df   :  { %v25767_v0 = vadd.f32 %v19112_v24, %v25693_v51  ;;  %v19115_v59 = vadd.f32 %v19114_v46, %v19113_v13  ;;  %v22553_v51 = vld [vmem:[%s28356_s1 + $0xc08] ss:$16 sps:$4 sm:$0xff]   ;;  %v22561_v46 = vld [vmem:[%s28356_s1 + $0xc2c] ss:$16 sps:$4 sm:$0xff]  }
 0x8e0   :  { %20399 = vmatprep.subr.bf16.mxu0 %v25778_v22  ;;  %v22559_v13 = vld [vmem:[%s28356_s1 + $0xc28] ss:$16 sps:$4 sm:$0xff]  }
 0x8e1   :  { %v25770_v20 = vadd.f32 %v19115_v59, %v25698_v11  ;;  %v22555_v11 = vld [vmem:[%s28356_s1 + $0xc0c] ss:$16 sps:$4 sm:$0xff]   ;;  %v28547_v44 = vld [vmem:[#allocation19_spill] sm:$0xff]  ;;  %v28548_v59 = vld [vmem:[#allocation21_spill] sm:$0xff] }
 0x8e2   :  { %6879 = vmatprep.mubr.bf16.mxu1 %v22555_v11 }
 0x8e3   :  { %6880 = vmatmul.mubr.bf16.vlgmr.msra.gmra.mrb[224].mxu1 %v22553_v51  ;;  %v28549_v51 = vld [vmem:[#allocation23_spill] sm:$0xff] }
 0x8e4   :  { %19263 = vmatpush3.bf16.msra.mxu1 %v23121_v8  ;;  %6887 = vmatprep.mubr.bf16.mxu1 %v22561_v46 }
 0x8e5   :  { %19264 = vmatprep.subr.bf16.mxu1 %v23146_v16 }
 0x8e8   :  { %19265 = vmatpush3.bf16.msra.mxu1 %v23160_v21 }
 0x8e9   :  { %19266 = vmatprep.subr.bf16.mxu1 %v23175_v26 }
 0x8eb   :  { %6888 = vmatmul.mubr.bf16.gmra.mrb[228].mxu1 %v22559_v13  ;;  %v22579_v13 = vld [vmem:[%s28356_s1 + $0xc8c] ss:$16 sps:$4 sm:$0xff]  }
 0x8ec   :  { %19267 = vmatpush3.bf16.msra.mxu1 %v23198_v34  ;;  %6895 = vmatprep.mubr.bf16.mxu1 %v22567_v7 }
 0x8ed   :  { %19268 = vmatprep.subr.bf16.mxu1 %v23213_v39 }
 0x8f0   :  { %19269 = vmatpush3.bf16.msra.mxu1 %v23246_v50 }
 0x8f1   :  { %19270 = vmatprep.subr.bf16.mxu1 %v23252_v52 }
 0x8f3   :  { %6896 = vmatmul.mubr.bf16.gmra.mrb[232].mxu1 %v22565_v29  ;;  %v22577_v29 = vld [vmem:[%s28356_s1 + $0xc88] ss:$16 sps:$4 sm:$0xff]  }
 0x8f4   :  { %19271 = vmatpush3.bf16.msra.mxu1 %v23282_v62  ;;  %6903 = vmatprep.mubr.bf16.mxu1 %v22573_v41 }
 0x8f5   :  { %19272 = vmatprep.subr.bf16.mxu1 %v28483_v63 }
 0x8f8   :  { %19273 = vmatpush3.bf16.msra.mxu1 %v28484_v1 }
 0x8f9   :  { %19274 = vmatprep.subr.bf16.mxu1 %v28547_v44 }
 0x8fb   :  { %6904 = vmatmul.mubr.bf16.gmra.mrb[236].mxu1 %v22571_v15 }
 0x8fc   :  { %19275 = vmatpush3.bf16.msra.mxu1 %v28548_v59  ;;  %6911 = vmatprep.mubr.bf16.mxu1 %v22579_v13  ;;  %v28552_v13 = vld [vmem:[#allocation15_spill] sm:$0xff] }
 0x8fd   :  { %19276 = vmatprep.subr.bf16.mxu1 %v28549_v51 }
 0x900   :  { %19277 = vmatpush3.bf16.msra.mxu1 %v28550_v9 }
 0x901   :  { %19399 = vmatprep.subr.bf16.mxu1 %v28551_v17 }
 0x903   :  { %6912 = vmatmul.mubr.bf16.gmra.mrb[240].mxu1 %v22577_v29  ;;  %v28553_v29 = vld [vmem:[#allocation17_spill] sm:$0xff] }
 0x964   :  { %v18931_v24 = vpop.f32.mrb[16].mxu0 }
 0x965   :  { %v18932_v27 = vpop.f32.mrb[17].mxu0 }
 0x966   :  { %v18933_v11 = vadd.f32 %v18932_v27, %v18931_v24  ;;  %v18934_v46 = vpop.f32.mrb[18].mxu0 }
 0x967   :  { %v18935_v7 = vpop.f32.mrb[19].mxu0 }
 0x968   :  { %v5808_v41 = vadd.f32 %v18933_v11, %v25556_v38  ;;  %v18936_v15 = vadd.f32 %v18935_v7, %v18934_v46  ;;  %v22585_v38 = vld [vmem:[%s28356_s1 + $0xcac] ss:$16 sps:$4 sm:$0xff]   ;;  %v22583_v46 = vld [vmem:[%s28356_s1 + $0xca8] ss:$16 sps:$4 sm:$0xff]  }
 0x969   :  { %6919 = vmatprep.mubr.bf16.mxu1 %v22585_v38 }
 0x96a   :  { %v5811_v24 = vadd.f32 %v18936_v15, %v25559_v32  ;;  %6920 = vmatmul.mubr.bf16.gmra.mrb[244].mxu1 %v22583_v46 }
 0x96b   :  { %6927 = vmatprep.mubr.bf16.mxu1 %v22591_v48 }
 0x96c   :  { %v18937_v27 = vpop.f32.mrb[20].mxu0  ;;  %v5870_v30 = vpack.c.bf16 %v5811_v24, %v5808_v41 }
 0x96d   :  { %v18938_v61 = vpop.f32.mrb[21].mxu0 }
 0x96e   :  { %v18939_v37 = vadd.f32 %v18938_v61, %v18937_v27  ;;  %v18940_v55 = vpop.f32.mrb[22].mxu0  ;;  %20383 = vmatprep.mubr.msk.bf16.mxu0 %vm934_vm2, %v5870_v30 }
 0x96f   :  { %v18941_v11 = vpop.f32.mrb[23].mxu0 }
 0x970   :  { %v5816_v7 = vadd.f32 %v18939_v37, %v28552_v13  ;;  %v18942_v32 = vadd.f32 %v18941_v11, %v18940_v55  ;;  %v22589_v55 = vld [vmem:[%s28356_s1 + $0xcc8] ss:$16 sps:$4 sm:$0xff]  }
 0x972   :  { %v5819_v41 = vadd.f32 %v18942_v32, %v28553_v29  ;;  %6928 = vmatmul.mubr.bf16.gmra.mrb[248].mxu1 %v22589_v55 }
 0x974   :  { %v5871_v61 = vpack.c.bf16 %v5819_v41, %v5816_v7  ;;  %v18943_v15 = vpop.f32.mrb[24].mxu0 }
 0x975   :  { %v18944_v24 = vpop.f32.mrb[25].mxu0 }
 0x976   :  { %v18945_v30 = vadd.f32 %v18944_v24, %v18943_v15  ;;  %v18946_v27 = vpop.f32.mrb[26].mxu0  ;;  %20384 = vmatmul.mubr.msk.bf16.vlgmr.msra.gmra.mrb[64].mxu0 %vm934_vm2, %v5871_v61 }
 0x977   :  { %v18947_v57 = vpop.f32.mrb[27].mxu0  ;;  %20400 = vmatpush3.bf16.msra.mxu0 %v25778_v22  ;;  %v22597_v22 = vld [vmem:[%s28356_s1 + $0xcec] ss:$16 sps:$4 sm:$0xff]  }
 0x978   :  { %v5824_v37 = vadd.f32 %v18945_v30, %v25567_v40  ;;  %v18948_v38 = vadd.f32 %v18947_v57, %v18946_v27  ;;  %19125 = vmatprep.subr.bf16.mxu0 %v28551_v17  ;;  %v22595_v57 = vld [vmem:[%s28356_s1 + $0xce8] ss:$16 sps:$4 sm:$0xff]   ;;  %6935 = vmatprep.mubr.bf16.mxu1 %v22597_v22 }
 0x97a   :  { %v5827_v11 = vadd.f32 %v18948_v38, %v25570_v58  ;;  %6936 = vmatmul.mubr.bf16.gmra.mrb[252].mxu1 %v22595_v57 }
 0x97c   :  { %v18949_v46 = vpop.f32.mrb[28].mxu0  ;;  %v5872_v13 = vpack.c.bf16 %v5827_v11, %v5824_v37 }
 0x97d   :  { %v18950_v7 = vpop.f32.mrb[29].mxu0 }
 0x97e   :  { %v18951_v32 = vadd.f32 %v18950_v7, %v18949_v46  ;;  %v18952_v29 = vpop.f32.mrb[30].mxu0  ;;  %20387 = vmatprep.mubr.msk.bf16.mxu0 %vm934_vm2, %v5872_v13 }
 0x97f   :  { %v18953_v41 = vpop.f32.mrb[31].mxu0 }
 0x980   :  { %v5832_v48 = vadd.f32 %v18951_v32, %v25572_v33  ;;  %v18954_v40 = vadd.f32 %v18953_v41, %v18952_v29 }
 0x982   :  { %v5835_v58 = vadd.f32 %v18954_v40, %v25575_v35 }
 0x984   :  { %v18955_v61 = vpop.f32.mrb[32].mxu0  ;;  %v5873_v15 = vpack.c.bf16 %v5835_v58, %v5832_v48 }
 0x985   :  { %v18956_v24 = vpop.f32.mrb[33].mxu0 }
 0x986   :  { %v18957_v30 = vadd.f32 %v18956_v24, %v18955_v61  ;;  %v18958_v27 = vpop.f32.mrb[34].mxu0  ;;  %20388 = vmatmul.mubr.msk.bf16.gmra.mrb[68].mxu0 %vm934_vm2, %v5873_v15 }
 0x987   :  { %v18959_v55 = vpop.f32.mrb[35].mxu0 }
 0x988   :  { %v5840_v37 = vadd.f32 %v18957_v30, %v25580_v19  ;;  %v18960_v38 = vadd.f32 %v18959_v55, %v18958_v27 }
 0x98a   :  { %v5843_v11 = vadd.f32 %v18960_v38, %v25583_v23 }
 0x98c   :  { %v18961_v46 = vpop.f32.mrb[36].mxu0  ;;  %v5874_v33 = vpack.c.bf16 %v5843_v11, %v5840_v37 }
 0x98d   :  { %v18962_v13 = vpop.f32.mrb[37].mxu0 }
 0x98e   :  { %v18963_v7 = vadd.f32 %v18962_v13, %v18961_v46  ;;  %v18964_v32 = vpop.f32.mrb[38].mxu0  ;;  %20391 = vmatprep.mubr.msk.bf16.mxu0 %vm934_vm2, %v5874_v33  ;;  %v28556_v13 = vpack.c.bf16 %v25726_v2, %v25723_v54  ;;  %v28561_v54 = vpack.c.bf16 %v25770_v20, %v25767_v0  ;;  %v22562_v2 = vld [vmem:[%s28356_s1 + $0xc20] ss:$16 sps:$4 sm:$0xff]   ;;  %v22594_v20 = vld [vmem:[%s28356_s1 + $0xcc4] ss:$16 sps:$4 sm:$0xff]  }
 0x98f   :  { %v18965_v35 = vpop.f32.mrb[39].mxu0  ;;  %v22586_v0 = vld [vmem:[%s28356_s1 + $0xca0] ss:$16 sps:$4 sm:$0xff]  }
 0x990   :  { %v5848_v29 = vadd.f32 %v18963_v7, %v25587_v3  ;;  %v18966_v22 = vadd.f32 %v18965_v35, %v18964_v32  ;;  %v22592_v7 = vld [vmem:[%s28356_s1 + $0xcc0] ss:$16 sps:$4 sm:$0xff]   ;;  %v22600_v32 = vld [vmem:[%s28356_s1 + $0xce4] ss:$16 sps:$4 sm:$0xff]  }
 0x991   :  { %v22598_v35 = vld [vmem:[%s28356_s1 + $0xce0] ss:$16 sps:$4 sm:$0xff]  }
 0x992   :  { %v5851_v41 = vadd.f32 %v18966_v22, %v25590_v43 }
 0x994   :  { %v18967_v57 = vpop.f32.mrb[40].mxu0  ;;  %v5875_v48 = vpack.c.bf16 %v5851_v41, %v5848_v29 }
 0x995   :  { %v18968_v40 = vpop.f32.mrb[41].mxu0 }
 0x996   :  { %v18969_v19 = vadd.f32 %v18968_v40, %v18967_v57  ;;  %v18970_v58 = vpop.f32.mrb[42].mxu0  ;;  %20392 = vmatmul.mubr.msk.bf16.gmra.mrb[72].mxu0 %vm934_vm2, %v5875_v48 }
 0x997   :  { %v18971_v23 = vpop.f32.mrb[43].mxu0 }
 0x998   :  { %v5856_v61 = vadd.f32 %v18969_v19, %v25595_v18  ;;  %v18972_v15 = vadd.f32 %v18971_v23, %v18970_v58  ;;  %v28554_v18 = vpack.c.bf16 %v25710_v47, %v25707_v60  ;;  %v28560_v60 = vpack.c.bf16 %v25762_v56, %v25759_v10  ;;  %v22558_v47 = vld [vmem:[%s28356_s1 + $0xc04] ss:$16 sps:$4 sm:$0xff]   ;;  %v22580_v10 = vld [vmem:[%s28356_s1 + $0xc80] ss:$16 sps:$4 sm:$0xff]  }
 0x999   :  { %v22588_v56 = vld [vmem:[%s28356_s1 + $0xca4] ss:$16 sps:$4 sm:$0xff]  }
 0x99a   :  { %v5859_v24 = vadd.f32 %v18972_v15, %v25598_v36  ;;  %v28555_v36 = vpack.c.bf16 %v25718_v53, %v25715_v31  ;;  %v28558_v31 = vpack.c.bf16 %v25742_v5, %v25739_v45  ;;  %v22556_v53 = vld [vmem:[%s28356_s1 + $0xc00] ss:$16 sps:$4 sm:$0xff]   ;;  %v22570_v45 = vld [vmem:[%s28356_s1 + $0xc44] ss:$16 sps:$4 sm:$0xff]  }
 0x99b   :  { %v22574_v5 = vld [vmem:[%s28356_s1 + $0xc60] ss:$16 sps:$4 sm:$0xff]  }
 0x99c   :  { %v18973_v30 = vpop.f32.mrb[44].mxu0  ;;  %v5876_v27 = vpack.c.bf16 %v5859_v24, %v5856_v61 }
 0x99d   :  { %v18974_v55 = vpop.f32.mrb[45].mxu0 }
 0x99e   :  { %v18975_v3 = vadd.f32 %v18974_v55, %v18973_v30  ;;  %v18976_v37 = vpop.f32.mrb[46].mxu0  ;;  %20395 = vmatprep.mubr.msk.bf16.mxu0 %vm934_vm2, %v5876_v27  ;;  %v16403_v30 = vld [vmem:[%s28357_s2 + $0x18] sm:$0x3] }
 0x99f   :  { %v18977_v43 = vpop.f32.mrb[47].mxu0  ;;  %v6979_v27 = vand.u32 %v16403_v30, %v23679_v4  ;;  %v22609_v30 = vld [vmem:[%s28356_s1 + $0xd24] ss:$16 sps:$4 sm:$0xff]  }
 0x9a0   :  { %v5864_v38 = vadd.f32 %v18975_v3, %v25602_v14  ;;  %v18978_v11 = vadd.f32 %v18977_v43, %v18976_v37  ;;  %v28557_v14 = vpack.c.bf16 %v25734_v49, %v25731_v6  ;;  %v22564_v6 = vld [vmem:[%s28356_s1 + $0xc24] ss:$16 sps:$4 sm:$0xff]   ;;  %v22568_v49 = vld [vmem:[%s28356_s1 + $0xc40] ss:$16 sps:$4 sm:$0xff]  }
 0x9a2   :  { %v5867_v46 = vadd.f32 %v18978_v11, %v25605_v42  ;;  %v28559_v42 = vpack.c.bf16 %v25750_v28, %v25747_v25  ;;  %v22576_v25 = vld [vmem:[%s28356_s1 + $0xc64] ss:$16 sps:$4 sm:$0xff]   ;;  %v28562_v11 = vld [vmem:[#allocation6_spill] sm:$0xff] }
 0x9a3   :  { %v22582_v28 = vld [vmem:[%s28356_s1 + $0xc84] ss:$16 sps:$4 sm:$0xff]  }
 0x9a4   :  { %v5877_v33 = vpack.c.bf16 %v5867_v46, %v5864_v38 }
 0x9a6   :  { %20396 = vmatmul.mubr.msk.bf16.gmra.mrb[76].mxu0 %vm934_vm2, %v5877_v33 }
 0x9a7   :  { %20401 = vmatprep.mubr.msk.bf16.mxu0 %vm934_vm2, %v28554_v18 }
 0x9ae   :  { %20402 = vmatmul.mubr.msk.bf16.vlgmr.msra.gmra.mrb[64].mxu0 %vm934_vm2, %v28555_v36 }
 0x9af   :  { %20405 = vmatprep.mubr.msk.bf16.mxu0 %vm934_vm2, %v28556_v13  ;;  %19126 = vmatpush3.bf16.msra.mxu0 %v23121_v8 }
 0x9b0   :  { %19127 = vmatprep.subr.bf16.mxu0 %v23146_v16 }
 0x9b3   :  { %19128 = vmatpush3.bf16.msra.mxu0 %v23160_v21 }
 0x9b4   :  { %19129 = vmatprep.subr.bf16.mxu0 %v23175_v26 }
 0x9b6   :  { %20406 = vmatmul.mubr.msk.bf16.gmra.mrb[68].mxu0 %vm934_vm2, %v28557_v14  ;;  %v19205_v29 = vpop.f32.mrb[224].mxu1 }
 0x9b7   :  { %20409 = vmatprep.mubr.msk.bf16.mxu0 %vm934_vm2, %v28558_v31  ;;  %19130 = vmatpush3.bf16.msra.mxu0 %v23198_v34  ;;  %v19206_v22 = vpop.f32.mrb[225].mxu1 }
 0x9b8   :  { %19131 = vmatprep.subr.bf16.mxu0 %v23213_v39  ;;  %v25966_v41 = vadd.f32 %v19206_v22, %v19205_v29  ;;  %v19208_v57 = vpop.f32.mrb[226].mxu1 }
 0x9b9   :  { %v19209_v48 = vpop.f32.mrb[227].mxu1 }
 0x9ba   :  { %v25968_v40 = vadd.f32 %v19209_v48, %v19208_v57 }
 0x9bb   :  { %19132 = vmatpush3.bf16.msra.mxu0 %v23246_v50 }
 0x9bc   :  { %19133 = vmatprep.subr.bf16.mxu0 %v23252_v52 }
 0x9be   :  { %20410 = vmatmul.mubr.msk.bf16.gmra.mrb[72].mxu0 %vm934_vm2, %v28559_v42  ;;  %v19211_v19 = vpop.f32.mrb[228].mxu1 }
 0x9bf   :  { %20413 = vmatprep.mubr.msk.bf16.mxu0 %vm934_vm2, %v28560_v60  ;;  %19134 = vmatpush3.bf16.msra.mxu0 %v23282_v62  ;;  %v19212_v58 = vpop.f32.mrb[229].mxu1 }
 0x9c0   :  { %19135 = vmatprep.subr.bf16.mxu0 %v28483_v63  ;;  %v25970_v23 = vadd.f32 %v19212_v58, %v19211_v19  ;;  %v19214_v61 = vpop.f32.mrb[230].mxu1  ;;  %v22601_v58 = vld [vmem:[%s28356_s1 + $0xd00] ss:$16 sps:$4 sm:$0xff]  }
 0x9c1   :  { %v19215_v15 = vpop.f32.mrb[231].mxu1 }
 0x9c2   :  { %v25972_v24 = vadd.f32 %v19215_v15, %v19214_v61  ;;  %v22603_v61 = vld [vmem:[%s28356_s1 + $0xd04] ss:$16 sps:$4 sm:$0xff]   ;;  %v22607_v15 = vld [vmem:[%s28356_s1 + $0xd20] ss:$16 sps:$4 sm:$0xff]  }
 0x9c3   :  { %19136 = vmatpush3.bf16.msra.mxu0 %v28484_v1  ;;  %7319 = vmatprep.mubr.bf16.mxu1 %v22603_v61 }
 0x9c4   :  { %19137 = vmatprep.subr.bf16.mxu0 %v28547_v44  ;;  %7320 = vmatmul.mubr.bf16.vlgmr.msra.gmra.mrb[0].mxu1 %v22601_v58  ;;  %v22652_v58 = vld [vmem:[%s28356_s1 + $0xe20] ss:$16 sps:$4 sm:$0xff]  }
 0x9c5   :  { %19400 = vmatpush3.bf16.msra.mxu1 %v23121_v8  ;;  %7327 = vmatprep.mubr.bf16.mxu1 %v22609_v30 }
 0x9c6   :  { %20414 = vmatmul.mubr.msk.bf16.gmra.mrb[76].mxu0 %vm934_vm2, %v28561_v54  ;;  %v19217_v55 = vpop.f32.mrb[232].mxu1  ;;  %19401 = vmatprep.subr.bf16.mxu1 %v23146_v16 }
 0x9c7   :  { %19138 = vmatpush3.bf16.msra.mxu0 %v28548_v59  ;;  %6782 = vmatprep.mubr.bf16.mxu0 %v22558_v47  ;;  %v19218_v3 = vpop.f32.mrb[233].mxu1 }
 0x9c8   :  { %19139 = vmatprep.subr.bf16.mxu0 %v28549_v51  ;;  %v19220_v37 = vpop.f32.mrb[234].mxu1  ;;  %v25978_v43 = vadd.f32 %v19218_v3, %v19217_v55  ;;  %v22615_v55 = vld [vmem:[%s28356_s1 + $0xd44] ss:$16 sps:$4 sm:$0xff]   ;;  %v22619_v3 = vld [vmem:[%s28356_s1 + $0xd60] ss:$16 sps:$4 sm:$0xff]  }
 0x9c9   :  { %v19221_v38 = vpop.f32.mrb[235].mxu1  ;;  %19402 = vmatpush3.bf16.msra.mxu1 %v23160_v21 }
 0x9ca   :  { %v25981_v46 = vadd.f32 %v19221_v38, %v19220_v37  ;;  %19403 = vmatprep.subr.bf16.mxu1 %v23175_v26  ;;  %v22621_v37 = vld [vmem:[%s28356_s1 + $0xd64] ss:$16 sps:$4 sm:$0xff]   ;;  %v22625_v38 = vld [vmem:[%s28356_s1 + $0xd80] ss:$16 sps:$4 sm:$0xff]  }
 0x9cb   :  { %19140 = vmatpush3.bf16.msra.mxu0 %v28550_v9 }
 0x9cc   :  { %20417 = vmatprep.subr.bf16.mxu0 %v6979_v27  ;;  %7328 = vmatmul.mubr.bf16.gmra.mrb[4].mxu1 %v22607_v15 }
 0x9cd   :  { %19404 = vmatpush3.bf16.msra.mxu1 %v23198_v34  ;;  %7335 = vmatprep.mubr.bf16.mxu1 %v22615_v55 }
 0x9ce   :  { %6783 = vmatmul.mubr.bf16.vlgmr.msra.gmra.mrb[48].mxu0 %v22556_v53  ;;  %v19223_v33 = vpop.f32.mrb[236].mxu1  ;;  %19405 = vmatprep.subr.bf16.mxu1 %v23213_v39 }
 0x9cf   :  { %6790 = vmatprep.mubr.bf16.mxu0 %v22564_v6  ;;  %20418 = vmatpush3.bf16.msra.mxu0 %v6979_v27  ;;  %v19224_v18 = vpop.f32.mrb[237].mxu1  ;;  %v22613_v27 = vld [vmem:[%s28356_s1 + $0xd40] ss:$16 sps:$4 sm:$0xff]  }
 0x9d0   :  { %19326 = vmatprep.subr.bf16.mxu0 %v28562_v11  ;;  %v25983_v36 = vadd.f32 %v19224_v18, %v19223_v33  ;;  %v19226_v13 = vpop.f32.mrb[238].mxu1  ;;  %v22627_v33 = vld [vmem:[%s28356_s1 + $0xd84] ss:$16 sps:$4 sm:$0xff]   ;;  %v22631_v18 = vld [vmem:[%s28356_s1 + $0xda0] ss:$16 sps:$4 sm:$0xff]  }
 0x9d1   :  { %v19227_v14 = vpop.f32.mrb[239].mxu1  ;;  %19406 = vmatpush3.bf16.msra.mxu1 %v23246_v50 }
 0x9d2   :  { %v25985_v31 = vadd.f32 %v19227_v14, %v19226_v13  ;;  %19407 = vmatprep.subr.bf16.mxu1 %v23252_v52  ;;  %v22633_v13 = vld [vmem:[%s28356_s1 + $0xda4] ss:$16 sps:$4 sm:$0xff]   ;;  %v22637_v14 = vld [vmem:[%s28356_s1 + $0xdc0] ss:$16 sps:$4 sm:$0xff]  }
 0x9d4   :  { %7336 = vmatmul.mubr.bf16.gmra.mrb[8].mxu1 %v22613_v27 }
 0x9d5   :  { %19408 = vmatpush3.bf16.msra.mxu1 %v23282_v62  ;;  %7343 = vmatprep.mubr.bf16.mxu1 %v22621_v37 }
 0x9d6   :  { %6791 = vmatmul.mubr.bf16.gmra.mrb[52].mxu0 %v22562_v2  ;;  %v19229_v42 = vpop.f32.mrb[240].mxu1  ;;  %19409 = vmatprep.subr.bf16.mxu1 %v28483_v63 }
 0x9d7   :  { %6798 = vmatprep.mubr.bf16.mxu0 %v22570_v45  ;;  %v19230_v60 = vpop.f32.mrb[241].mxu1 }
 0x9d8   :  { %v25987_v47 = vadd.f32 %v19230_v60, %v19229_v42  ;;  %v19232_v54 = vpop.f32.mrb[242].mxu1  ;;  %v22643_v42 = vld [vmem:[%s28356_s1 + $0xde0] ss:$16 sps:$4 sm:$0xff]   ;;  %v22645_v60 = vld [vmem:[%s28356_s1 + $0xde4] ss:$16 sps:$4 sm:$0xff]  }
 0x9d9   :  { %v19233_v53 = vpop.f32.mrb[243].mxu1  ;;  %19410 = vmatpush3.bf16.msra.mxu1 %v28484_v1 }
 0x9da   :  { %v25989_v6 = vadd.f32 %v19233_v53, %v19232_v54  ;;  %19411 = vmatprep.subr.bf16.mxu1 %v28547_v44 }
 0x9dc   :  { %7344 = vmatmul.mubr.bf16.gmra.mrb[12].mxu1 %v22619_v3 }
 0x9dd   :  { %19412 = vmatpush3.bf16.msra.mxu1 %v28548_v59  ;;  %7351 = vmatprep.mubr.bf16.mxu1 %v22627_v33 }
 0x9de   :  { %6799 = vmatmul.mubr.bf16.gmra.mrb[56].mxu0 %v22568_v49  ;;  %19413 = vmatprep.subr.bf16.mxu1 %v28549_v51 }
 0x9df   :  { %6806 = vmatprep.mubr.bf16.mxu0 %v22576_v25 }
 0x9e1   :  { %19414 = vmatpush3.bf16.msra.mxu1 %v28550_v9 }
 0x9e2   :  { %19536 = vmatprep.subr.bf16.mxu1 %v28551_v17  ;;  %v22639_v17 = vld [vmem:[%s28356_s1 + $0xdc4] ss:$16 sps:$4 sm:$0xff]  }
 0x9e4   :  { %7352 = vmatmul.mubr.bf16.gmra.mrb[16].mxu1 %v22625_v38  ;;  %v28563_v38 = vld [vmem:[#allocation7_spill] sm:$0xff] }
 0x9e5   :  { %7359 = vmatprep.mubr.bf16.mxu1 %v22633_v13 }
 0x9e6   :  { %6807 = vmatmul.mubr.bf16.gmra.mrb[60].mxu0 %v22574_v5 }
 0x9e7   :  { %6814 = vmatprep.mubr.bf16.mxu0 %v22582_v28 }
 0x9ec   :  { %7360 = vmatmul.mubr.bf16.gmra.mrb[20].mxu1 %v22631_v18  ;;  %v28564_v18 = vld [vmem:[#allocation8_spill] sm:$0xff] }
 0x9ed   :  { %7367 = vmatprep.mubr.bf16.mxu1 %v22639_v17 }
 0x9ee   :  { %6815 = vmatmul.mubr.bf16.gmra.mrb[80].mxu0 %v22580_v10 }
 0x9ef   :  { %6822 = vmatprep.mubr.bf16.mxu0 %v22588_v56 }
 0x9f4   :  { %7368 = vmatmul.mubr.bf16.gmra.mrb[24].mxu1 %v22637_v14  ;;  %v28565_v14 = vld [vmem:[#allocation9_spill] sm:$0xff] }
 0x9f5   :  { %7375 = vmatprep.mubr.bf16.mxu1 %v22645_v60 }
 0x9f6   :  { %6823 = vmatmul.mubr.bf16.gmra.mrb[84].mxu0 %v22586_v0 }
 0x9f7   :  { %6830 = vmatprep.mubr.bf16.mxu0 %v22594_v20 }
 0x9fc   :  { %7376 = vmatmul.mubr.bf16.gmra.mrb[28].mxu1 %v22643_v42 }
 0x9fe   :  { %6831 = vmatmul.mubr.bf16.gmra.mrb[88].mxu0 %v22592_v7 }
 0x9ff   :  { %6838 = vmatprep.mubr.bf16.mxu0 %v22600_v32 }
 0xa06   :  { %6839 = vmatmul.mubr.bf16.gmra.mrb[92].mxu0 %v22598_v35 }
 0xa3d   :  { %v19235_v2 = vpop.f32.mrb[244].mxu1 }
 0xa3e   :  { %v19236_v45 = vpop.f32.mrb[245].mxu1 }
 0xa3f   :  { %v19238_v49 = vpop.f32.mrb[246].mxu1  ;;  %v25991_v25 = vadd.f32 %v19236_v45, %v19235_v2 }
 0xa40   :  { %v19239_v5 = vpop.f32.mrb[247].mxu1 }
 0xa41   :  { %v25993_v28 = vadd.f32 %v19239_v5, %v19238_v49  ;;  %v22649_v49 = vld [vmem:[%s28356_s1 + $0xe00] ss:$16 sps:$4 sm:$0xff]   ;;  %v22651_v5 = vld [vmem:[%s28356_s1 + $0xe04] ss:$16 sps:$4 sm:$0xff]  }
 0xa42   :  { %7856 = vmatprep.mubr.bf16.mxu1 %v22651_v5  ;;  %v28569_v5 = vld [vmem:[#allocation13_spill] sm:$0xff] }
 0xa43   :  { %7857 = vmatmul.mubr.bf16.vlgmr.msra.gmra.mrb[32].mxu1 %v22649_v49 }
 0xa44   :  { %19537 = vmatpush3.bf16.msra.mxu1 %v23121_v8 }
 0xa45   :  { %v19241_v10 = vpop.f32.mrb[248].mxu1  ;;  %19538 = vmatprep.subr.bf16.mxu1 %v23146_v16 }
 0xa46   :  { %v19242_v56 = vpop.f32.mrb[249].mxu1 }
 0xa47   :  { %v19244_v0 = vpop.f32.mrb[250].mxu1  ;;  %v25995_v20 = vadd.f32 %v19242_v56, %v19241_v10  ;;  %v22654_v56 = vld [vmem:[%s28356_s1 + $0xe24] ss:$16 sps:$4 sm:$0xff]  }
 0xa48   :  { %v19245_v7 = vpop.f32.mrb[251].mxu1  ;;  %7864 = vmatprep.mubr.bf16.mxu1 %v22654_v56  ;;  %19539 = vmatpush3.bf16.msra.mxu1 %v23160_v21  ;;  %v22655_v21 = vld [vmem:[%s28356_s1 + $0xe40] ss:$16 sps:$4 sm:$0xff]  }
 0xa49   :  { %v25997_v32 = vadd.f32 %v19245_v7, %v19244_v0  ;;  %19540 = vmatprep.subr.bf16.mxu1 %v23175_v26 }
 0xa4b   :  { %7865 = vmatmul.mubr.bf16.gmra.mrb[36].mxu1 %v22652_v58 }
 0xa4c   :  { %19541 = vmatpush3.bf16.msra.mxu1 %v23198_v34 }
 0xa4d   :  { %v19247_v35 = vpop.f32.mrb[252].mxu1  ;;  %19542 = vmatprep.subr.bf16.mxu1 %v23213_v39 }
 0xa4e   :  { %v19248_v29 = vpop.f32.mrb[253].mxu1 }
 0xa4f   :  { %v19250_v22 = vpop.f32.mrb[254].mxu1  ;;  %v25999_v57 = vadd.f32 %v19248_v29, %v19247_v35 }
 0xa50   :  { %v19251_v48 = vpop.f32.mrb[255].mxu1  ;;  %19543 = vmatpush3.bf16.msra.mxu1 %v23246_v50 }
 0xa51   :  { %v26001_v19 = vadd.f32 %v19251_v48, %v19250_v22  ;;  %19544 = vmatprep.subr.bf16.mxu1 %v23252_v52 }
 0xa54   :  { %19545 = vmatpush3.bf16.msra.mxu1 %v23282_v62  ;;  %v22663_v62 = vld [vmem:[%s28356_s1 + $0xe84] ss:$16 sps:$4 sm:$0xff]  }
 0xa55   :  { %19546 = vmatprep.subr.bf16.mxu1 %v28483_v63 }
 0xa58   :  { %19547 = vmatpush3.bf16.msra.mxu1 %v28484_v1 }
 0xa59   :  { %19548 = vmatprep.subr.bf16.mxu1 %v28547_v44 }
 0xa5c   :  { %19549 = vmatpush3.bf16.msra.mxu1 %v28548_v59  ;;  %v22666_v59 = vld [vmem:[%s28356_s1 + $0xea4] ss:$16 sps:$4 sm:$0xff]  }
 0xa5d   :  { %19550 = vmatprep.subr.bf16.mxu1 %v28549_v51 }
 0xa60   :  { %19551 = vmatpush3.bf16.msra.mxu1 %v28550_v9 }
 0xa61   :  { %19600 = vmatprep.subr.bf16.mxu1 %v28562_v11 }
 0xaa1   :  { %v19141_v54 = vpop.f32.mrb[48].mxu0 }
 0xaa2   :  { %v19142_v53 = vpop.f32.mrb[49].mxu0 }
 0xaa3   :  { %v19143_v2 = vadd.f32 %v19142_v53, %v19141_v54  ;;  %v19144_v45 = vpop.f32.mrb[50].mxu0  ;;  %v28567_v53 = vld [vmem:[#allocation11_spill] sm:$0xff] }
 0xaa4   :  { %v19145_v10 = vpop.f32.mrb[51].mxu0 }
 0xaa5   :  { %v6882_v0 = vadd.f32 %v25966_v41, %v19143_v2  ;;  %v19146_v7 = vadd.f32 %v19145_v10, %v19144_v45  ;;  %v22657_v41 = vld [vmem:[%s28356_s1 + $0xe44] ss:$16 sps:$4 sm:$0xff]   ;;  %v28568_v45 = vld [vmem:[#allocation12_spill] sm:$0xff] }
 0xaa6   :  { %7872 = vmatprep.mubr.bf16.mxu1 %v22657_v41 }
 0xaa7   :  { %v6885_v35 = vadd.f32 %v25968_v40, %v19146_v7  ;;  %7873 = vmatmul.mubr.bf16.gmra.mrb[40].mxu1 %v22655_v21 }
 0xaa9   :  { %v19147_v29 = vpop.f32.mrb[52].mxu0  ;;  %v6944_v22 = vpack.c.bf16 %v6885_v35, %v6882_v0  ;;  %v28571_v35 = vld [vmem:[#allocation16_spill] sm:$0xff] }
 0xaaa   :  { %v19148_v48 = vpop.f32.mrb[53].mxu0 }
 0xaab   :  { %v19149_v61 = vadd.f32 %v19148_v48, %v19147_v29  ;;  %v19150_v15 = vpop.f32.mrb[54].mxu0  ;;  %20419 = vmatprep.mubr.msk.bf16.mxu0 %vm934_vm2, %v6944_v22  ;;  %v28572_v22 = vld [vmem:[#allocation18_spill] sm:$0xff] }
 0xaac   :  { %v19151_v8 = vpop.f32.mrb[55].mxu0 }
 0xaad   :  { %v6890_v16 = vadd.f32 %v25970_v23, %v19149_v61  ;;  %v19152_v40 = vadd.f32 %v19151_v8, %v19150_v15  ;;  %v22660_v23 = vld [vmem:[%s28356_s1 + $0xe64] ss:$16 sps:$4 sm:$0xff]   ;;  %v28573_v61 = vld [vmem:[#allocation20_spill] sm:$0xff] }
 0xaae   :  { %7880 = vmatprep.mubr.bf16.mxu1 %v22660_v23  ;;  %v22664_v15 = vld [vmem:[%s28356_s1 + $0xea0] ss:$16 sps:$4 sm:$0xff]  }
 0xaaf   :  { %v6893_v30 = vadd.f32 %v25972_v24, %v19152_v40  ;;  %v22667_v23 = vld [vmem:[%s28356_s1 + $0xec0] ss:$16 sps:$4 sm:$0xff]  }
 0xab1   :  { %v6945_v27 = vpack.c.bf16 %v6893_v30, %v6890_v16  ;;  %v19153_v55 = vpop.f32.mrb[56].mxu0  ;;  %v28574_v16 = vld [vmem:[#allocation22_spill] sm:$0xff] }
 0xab2   :  { %v19154_v3 = vpop.f32.mrb[57].mxu0 }
 0xab3   :  { %v19155_v37 = vadd.f32 %v19154_v3, %v19153_v55  ;;  %v19156_v26 = vpop.f32.mrb[58].mxu0  ;;  %20420 = vmatmul.mubr.msk.bf16.vlgmr.msra.gmra.mrb[64].mxu0 %vm934_vm2, %v6945_v27  ;;  %v28575_v27 = vld [vmem:[#allocation24_spill] sm:$0xff]  ;;  %v28576_v3 = vld [vmem:[#allocation26_spill] sm:$0xff] }
 0xab4   :  { %v19157_v34 = vpop.f32.mrb[59].mxu0  ;;  %19327 = vmatpush3.bf16.msra.mxu0 %v23133_v12 }
 0xab5   :  { %v6898_v39 = vadd.f32 %v25978_v43, %v19155_v37  ;;  %v19158_v24 = vadd.f32 %v19157_v34, %v19156_v26  ;;  %19328 = vmatprep.subr.bf16.mxu0 %v28563_v38  ;;  %v22658_v43 = vld [vmem:[%s28356_s1 + $0xe60] ss:$16 sps:$4 sm:$0xff]  }
 0xab6   :  { %7881 = vmatmul.mubr.bf16.gmra.mrb[44].mxu1 %v22658_v43 }
 0xab7   :  { %v6901_v33 = vadd.f32 %v25981_v46, %v19158_v24  ;;  %v28566_v46 = vld [vmem:[#allocation10_spill] sm:$0xff]  ;;  %7888 = vmatprep.mubr.bf16.mxu1 %v22663_v62 }
 0xab8   :  { %19329 = vmatpush3.bf16.msra.mxu0 %v28564_v18 }
 0xab9   :  { %v19159_v50 = vpop.f32.mrb[60].mxu0  ;;  %v6946_v13 = vpack.c.bf16 %v6901_v33, %v6898_v39  ;;  %19330 = vmatprep.subr.bf16.mxu0 %v28565_v14 }
 0xaba   :  { %v19160_v52 = vpop.f32.mrb[61].mxu0 }
 0xabb   :  { %v19161_v17 = vadd.f32 %v19160_v52, %v19159_v50  ;;  %v19162_v42 = vpop.f32.mrb[62].mxu0  ;;  %20423 = vmatprep.mubr.msk.bf16.mxu0 %vm934_vm2, %v6946_v13 }
 0xabc   :  { %v19163_v63 = vpop.f32.mrb[63].mxu0  ;;  %19331 = vmatpush3.bf16.msra.mxu0 %v28566_v46 }
 0xabd   :  { %v6906_v60 = vadd.f32 %v25983_v36, %v19161_v17  ;;  %v19164_v54 = vadd.f32 %v19163_v63, %v19162_v42  ;;  %19332 = vmatprep.subr.bf16.mxu0 %v28567_v53  ;;  %v22661_v36 = vld [vmem:[%s28356_s1 + $0xe80] ss:$16 sps:$4 sm:$0xff]  }
 0xabe   :  { %7889 = vmatmul.mubr.bf16.gmra.mrb[48].mxu1 %v22661_v36  ;;  %v22670_v17 = vld [vmem:[%s28356_s1 + $0xee0] ss:$16 sps:$4 sm:$0xff]   ;;  %v22618_v36 = vld [vmem:[%s28356_s1 + $0xd4c] ss:$16 sps:$4 sm:$0xff]  }
 0xabf   :  { %v6909_v2 = vadd.f32 %v25985_v31, %v19164_v54  ;;  %v28570_v31 = vld [vmem:[#allocation14_spill] sm:$0xff]  ;;  %7896 = vmatprep.mubr.bf16.mxu1 %v22666_v59 }
 0xac0   :  { %19333 = vmatpush3.bf16.msra.mxu0 %v28568_v45  ;;  %v22622_v59 = vld [vmem:[%s28356_s1 + $0xd68] ss:$16 sps:$4 sm:$0xff]  }
 0xac1   :  { %v19165_v1 = vpop.f32.mrb[80].mxu0  ;;  %v6947_v49 = vpack.c.bf16 %v6909_v2, %v6906_v60  ;;  %19334 = vmatprep.subr.bf16.mxu0 %v28569_v5  ;;  %v22606_v2 = vld [vmem:[%s28356_s1 + $0xd0c] ss:$16 sps:$4 sm:$0xff]  }
 0xac2   :  { %v19166_v44 = vpop.f32.mrb[81].mxu0 }
 0xac3   :  { %v19167_v10 = vadd.f32 %v19166_v44, %v19165_v1  ;;  %v19168_v56 = vpop.f32.mrb[82].mxu0  ;;  %20424 = vmatmul.mubr.msk.bf16.gmra.mrb[68].mxu0 %vm934_vm2, %v6947_v49  ;;  %v22673_v49 = vld [vmem:[%s28356_s1 + $0xf00] ss:$16 sps:$4 sm:$0xff]   ;;  %v22610_v44 = vld [vmem:[%s28356_s1 + $0xd28] ss:$16 sps:$4 sm:$0xff]  }
 0xac4   :  { %v19169_v51 = vpop.f32.mrb[83].mxu0  ;;  %19335 = vmatpush3.bf16.msra.mxu0 %v28570_v31 }
 0xac5   :  { %v6914_v0 = vadd.f32 %v25987_v47, %v19167_v10  ;;  %v19170_v7 = vadd.f32 %v19169_v51, %v19168_v56  ;;  %19336 = vmatprep.subr.bf16.mxu0 %v28571_v35  ;;  %v22616_v10 = vld [vmem:[%s28356_s1 + $0xd48] ss:$16 sps:$4 sm:$0xff]   ;;  %v22624_v56 = vld [vmem:[%s28356_s1 + $0xd6c] ss:$16 sps:$4 sm:$0xff]  }
 0xac6   :  { %7897 = vmatmul.mubr.bf16.gmra.mrb[52].mxu1 %v22664_v15  ;;  %v22630_v51 = vld [vmem:[%s28356_s1 + $0xd8c] ss:$16 sps:$4 sm:$0xff]   ;;  %v22646_v15 = vld [vmem:[%s28356_s1 + $0xde8] ss:$16 sps:$4 sm:$0xff]  }
 0xac7   :  { %v6917_v29 = vadd.f32 %v25989_v6, %v19170_v7  ;;  %v22669_v6 = vld [vmem:[%s28356_s1 + $0xec4] ss:$16 sps:$4 sm:$0xff]   ;;  %v22636_v7 = vld [vmem:[%s28356_s1 + $0xdac] ss:$16 sps:$4 sm:$0xff]  }
 0xac8   :  { %19337 = vmatpush3.bf16.msra.mxu0 %v28572_v22  ;;  %7904 = vmatprep.mubr.bf16.mxu1 %v22669_v6  ;;  %v22681_v6 = vld [vmem:[%s28356_s1 + $0xf44] ss:$16 sps:$4 sm:$0xff]  }
 0xac9   :  { %v6948_v48 = vpack.c.bf16 %v6917_v29, %v6914_v0  ;;  %v19171_v58 = vpop.f32.mrb[84].mxu0  ;;  %19338 = vmatprep.subr.bf16.mxu0 %v28573_v61  ;;  %v22628_v0 = vld [vmem:[%s28356_s1 + $0xd88] ss:$16 sps:$4 sm:$0xff]  }
 0xaca   :  { %v19172_v9 = vpop.f32.mrb[85].mxu0  ;;  %v22634_v29 = vld [vmem:[%s28356_s1 + $0xda8] ss:$16 sps:$4 sm:$0xff]  }
 0xacb   :  { %v19173_v41 = vadd.f32 %v19172_v9, %v19171_v58  ;;  %v19174_v47 = vpop.f32.mrb[86].mxu0  ;;  %20427 = vmatprep.mubr.msk.bf16.mxu0 %vm934_vm2, %v6948_v48  ;;  %v22642_v48 = vld [vmem:[%s28356_s1 + $0xdcc] ss:$16 sps:$4 sm:$0xff]   ;;  %v22640_v58 = vld [vmem:[%s28356_s1 + $0xdc8] ss:$16 sps:$4 sm:$0xff]  }
 0xacc   :  { %v19175_v8 = vpop.f32.mrb[87].mxu0  ;;  %19339 = vmatpush3.bf16.msra.mxu0 %v28574_v16  ;;  %v22648_v9 = vld [vmem:[%s28356_s1 + $0xdec] ss:$16 sps:$4 sm:$0xff]  }
 0xacd   :  { %v6922_v40 = vadd.f32 %v25991_v25, %v19173_v41  ;;  %v19176_v30 = vadd.f32 %v19175_v8, %v19174_v47  ;;  %19340 = vmatprep.subr.bf16.mxu0 %v28575_v27  ;;  %v22672_v25 = vld [vmem:[%s28356_s1 + $0xee4] ss:$16 sps:$4 sm:$0xff]   ;;  %v22676_v47 = vld [vmem:[%s28356_s1 + $0xf20] ss:$16 sps:$4 sm:$0xff]  }
 0xace   :  { %7905 = vmatmul.mubr.bf16.gmra.mrb[56].mxu1 %v22667_v23  ;;  %v22678_v41 = vld [vmem:[%s28356_s1 + $0xf24] ss:$16 sps:$4 sm:$0xff]   ;;  %v22679_v8 = vld [vmem:[%s28356_s1 + $0xf40] ss:$16 sps:$4 sm:$0xff]  }
 0xacf   :  { %v6925_v55 = vadd.f32 %v25993_v28, %v19176_v30  ;;  %7912 = vmatprep.mubr.bf16.mxu1 %v22672_v25 }
 0xad0   :  { %19341 = vmatpush3.bf16.msra.mxu0 %v28576_v3 }
 0xad1   :  { %v6949_v21 = vpack.c.bf16 %v6925_v55, %v6922_v40  ;;  %v19177_v37 = vpop.f32.mrb[88].mxu0  ;;  %v19278_v40 = vpop.f32.mrb[0].mxu1  ;;  %v22684_v55 = vld [vmem:[%s28356_s1 + $0xf64] ss:$16 sps:$4 sm:$0xff]  }
 0xad2   :  { %v19178_v26 = vpop.f32.mrb[89].mxu0  ;;  %v19279_v30 = vpop.f32.mrb[1].mxu1 }
 0xad3   :  { %v19179_v34 = vadd.f32 %v19178_v26, %v19177_v37  ;;  %v19180_v39 = vpop.f32.mrb[90].mxu0  ;;  %20428 = vmatmul.mubr.msk.bf16.gmra.mrb[72].mxu0 %vm934_vm2, %v6949_v21  ;;  %v26254_v21 = vadd.f32 %v19279_v30, %v19278_v40  ;;  %v19281_v37 = vpop.f32.mrb[2].mxu1  ;;  %v22682_v26 = vld [vmem:[%s28356_s1 + $0xf60] ss:$16 sps:$4 sm:$0xff]  }
 0xad4   :  { %v19181_v24 = vpop.f32.mrb[91].mxu0  ;;  %v19282_v23 = vpop.f32.mrb[3].mxu1 }
 0xad5   :  { %v6930_v28 = vadd.f32 %v25995_v20, %v19179_v34  ;;  %v19182_v33 = vadd.f32 %v19181_v24, %v19180_v39  ;;  %v22675_v20 = vld [vmem:[%s28356_s1 + $0xf04] ss:$16 sps:$4 sm:$0xff]   ;;  %v26259_v34 = vadd.f32 %v19282_v23, %v19281_v37  ;;  %v19284_v25 = vpop.f32.mrb[4].mxu1  ;;  %v22685_v24 = vld [vmem:[%s28356_s1 + $0xf80] ss:$16 sps:$4 sm:$0xff]  }
 0xad6   :  { %7913 = vmatmul.mubr.bf16.gmra.mrb[60].mxu1 %v22670_v17  ;;  %v22687_v39 = vld [vmem:[%s28356_s1 + $0xf84] ss:$16 sps:$4 sm:$0xff]  }
 0xad7   :  { %v6933_v50 = vadd.f32 %v25997_v32, %v19182_v33  ;;  %8393 = vmatprep.mubr.bf16.mxu1 %v22675_v20  ;;  %v22688_v20 = vld [vmem:[%s28356_s1 + $0xfa0] ss:$16 sps:$4 sm:$0xff]  }
 0xad9   :  { %v6950_v13 = vpack.c.bf16 %v6933_v50, %v6930_v28  ;;  %v19183_v52 = vpop.f32.mrb[92].mxu0  ;;  %v19285_v28 = vpop.f32.mrb[5].mxu1 }
 0xada   :  { %v19184_v43 = vpop.f32.mrb[93].mxu0  ;;  %v19287_v33 = vpop.f32.mrb[6].mxu1  ;;  %v26267_v50 = vadd.f32 %v19285_v28, %v19284_v25 }
 0xadb   :  { %v19185_v42 = vadd.f32 %v19184_v43, %v19183_v52  ;;  %v19186_v62 = vpop.f32.mrb[94].mxu0  ;;  %20431 = vmatprep.mubr.msk.bf16.mxu0 %vm934_vm2, %v6950_v13  ;;  %v19288_v13 = vpop.f32.mrb[7].mxu1  ;;  %v16476_v43 = vld [vmem:[%s28357_s2 + $0x1a] sm:$0x3] }
 0xadc   :  { %v19187_v63 = vpop.f32.mrb[95].mxu0  ;;  %v26269_v52 = vadd.f32 %v19288_v13, %v19287_v33  ;;  %v7516_v17 = vand.u32 %v16476_v43, %v23679_v4  ;;  %v22708_v33 = vld [vmem:[%s28356_s1 + $0xf4c] ss:$16 sps:$4 sm:$0xff]   ;;  %v22706_v43 = vld [vmem:[%s28356_s1 + $0xf48] ss:$16 sps:$4 sm:$0xff]  }
 0xadd   :  { %v6938_v60 = vadd.f32 %v25999_v57, %v19185_v42  ;;  %v19188_v32 = vadd.f32 %v19187_v63, %v19186_v62  ;;  %v22604_v57 = vld [vmem:[%s28356_s1 + $0xd08] ss:$16 sps:$4 sm:$0xff]   ;;  %v22690_v42 = vld [vmem:[%s28356_s1 + $0xfa4] ss:$16 sps:$4 sm:$0xff]   ;;  %v19290_v62 = vpop.f32.mrb[8].mxu1 }
 0xade   :  { %8394 = vmatmul.mubr.bf16.vlgmr.msra.gmra.mrb[64].mxu1 %v22673_v49  ;;  %20435 = vmatprep.subr.bf16.mxu0 %v7516_v17  ;;  %v19291_v63 = vpop.f32.mrb[9].mxu1 }
 0xadf   :  { %v6941_v54 = vadd.f32 %v26001_v19, %v19188_v32  ;;  %19601 = vmatpush3.bf16.msra.mxu1 %v23133_v12  ;;  %v22612_v19 = vld [vmem:[%s28356_s1 + $0xd2c] ss:$16 sps:$4 sm:$0xff]   ;;  %8401 = vmatprep.mubr.bf16.mxu1 %v22678_v41  ;;  %v26281_v32 = vadd.f32 %v19291_v63, %v19290_v62  ;;  %v22697_v41 = vld [vmem:[%s28356_s1 + $0xf08] ss:$16 sps:$4 sm:$0xff]  }
 0xae0   :  { %19602 = vmatprep.subr.bf16.mxu1 %v28563_v38 }
 0xae1   :  { %v6951_v1 = vpack.c.bf16 %v6941_v54, %v6938_v60  ;;  %v19293_v60 = vpop.f32.mrb[10].mxu1 }
 0xae2   :  { %v19294_v54 = vpop.f32.mrb[11].mxu1 }
 0xae3   :  { %20432 = vmatmul.mubr.msk.bf16.gmra.mrb[76].mxu0 %vm934_vm2, %v6951_v1  ;;  %19603 = vmatpush3.bf16.msra.mxu1 %v28564_v18  ;;  %v22693_v1 = vld [vmem:[%s28356_s1 + $0xfc4] ss:$16 sps:$4 sm:$0xff]   ;;  %v19296_v49 = vpop.f32.mrb[12].mxu1 }
 0xae4   :  { %7416 = vmatprep.mubr.bf16.mxu0 %v22606_v2  ;;  %19604 = vmatprep.subr.bf16.mxu1 %v28565_v14  ;;  %v26284_v2 = vadd.f32 %v19294_v54, %v19293_v60  ;;  %v22714_v60 = vld [vmem:[%s28356_s1 + $0xf6c] ss:$16 sps:$4 sm:$0xff]   ;;  %v22712_v54 = vld [vmem:[%s28356_s1 + $0xf68] ss:$16 sps:$4 sm:$0xff]  }
 0xae6   :  { %8402 = vmatmul.mubr.bf16.gmra.mrb[68].mxu1 %v22676_v47 }
 0xae7   :  { %19605 = vmatpush3.bf16.msra.mxu1 %v28566_v46  ;;  %8409 = vmatprep.mubr.bf16.mxu1 %v22681_v6 }
 0xae8   :  { %19606 = vmatprep.subr.bf16.mxu1 %v28567_v53 }
 0xaeb   :  { %7417 = vmatmul.mubr.bf16.vlgmr.msra.gmra.mrb[96].mxu0 %v22604_v57  ;;  %19607 = vmatpush3.bf16.msra.mxu1 %v28568_v45  ;;  %v22691_v57 = vld [vmem:[%s28356_s1 + $0xfc0] ss:$16 sps:$4 sm:$0xff]  }
 0xaec   :  { %7424 = vmatprep.mubr.bf16.mxu0 %v22612_v19  ;;  %19608 = vmatprep.subr.bf16.mxu1 %v28569_v5  ;;  %v19297_v19 = vpop.f32.mrb[13].mxu1 }
 0xaed   :  { %20436 = vmatpush3.bf16.msra.mxu0 %v7516_v17 }
 0xaee   :  { %8410 = vmatmul.mubr.bf16.gmra.mrb[72].mxu1 %v22679_v8  ;;  %19463 = vmatprep.subr.bf16.mxu0 %v28562_v11  ;;  %v22696_v11 = vld [vmem:[%s28356_s1 + $0xfe4] ss:$16 sps:$4 sm:$0xff]  }
 0xaef   :  { %19609 = vmatpush3.bf16.msra.mxu1 %v28570_v31  ;;  %8417 = vmatprep.mubr.bf16.mxu1 %v22684_v55  ;;  %v22702_v55 = vld [vmem:[%s28356_s1 + $0xf2c] ss:$16 sps:$4 sm:$0xff]  }
 0xaf0   :  { %19610 = vmatprep.subr.bf16.mxu1 %v28571_v35 }
 0xaf3   :  { %7425 = vmatmul.mubr.bf16.gmra.mrb[100].mxu0 %v22610_v44  ;;  %19611 = vmatpush3.bf16.msra.mxu1 %v28572_v22  ;;  %v19299_v44 = vpop.f32.mrb[14].mxu1 }
 0xaf4   :  { %7432 = vmatprep.mubr.bf16.mxu0 %v22618_v36  ;;  %19612 = vmatprep.subr.bf16.mxu1 %v28573_v61  ;;  %v26292_v36 = vadd.f32 %v19297_v19, %v19296_v49  ;;  %v22718_v49 = vld [vmem:[%s28356_s1 + $0xf88] ss:$16 sps:$4 sm:$0xff]  }
 0xaf5   :  { %v22724_v19 = vld [vmem:[%s28356_s1 + $0xfa8] ss:$16 sps:$4 sm:$0xff]  }
 0xaf6   :  { %8418 = vmatmul.mubr.bf16.gmra.mrb[76].mxu1 %v22682_v26  ;;  %v22700_v26 = vld [vmem:[%s28356_s1 + $0xf28] ss:$16 sps:$4 sm:$0xff]  }
 0xaf7   :  { %19613 = vmatpush3.bf16.msra.mxu1 %v28574_v16  ;;  %8425 = vmatprep.mubr.bf16.mxu1 %v22687_v39 }
 0xaf8   :  { %19614 = vmatprep.subr.bf16.mxu1 %v28575_v27 }
 0xafb   :  { %7433 = vmatmul.mubr.bf16.gmra.mrb[104].mxu0 %v22616_v10  ;;  %19615 = vmatpush3.bf16.msra.mxu1 %v28576_v3  ;;  %v19300_v10 = vpop.f32.mrb[15].mxu1 }
 0xafc   :  { %7440 = vmatprep.mubr.bf16.mxu0 %v22624_v56  ;;  %v26294_v56 = vadd.f32 %v19300_v10, %v19299_v44  ;;  %v22732_v44 = vld [vmem:[%s28356_s1 + $0xfcc] ss:$16 sps:$4 sm:$0xff]   ;;  %v22730_v10 = vld [vmem:[%s28356_s1 + $0xfc8] ss:$16 sps:$4 sm:$0xff]  }
 0xafe   :  { %8426 = vmatmul.mubr.bf16.gmra.mrb[80].mxu1 %v22685_v24 }
 0xaff   :  { %8433 = vmatprep.mubr.bf16.mxu1 %v22690_v42 }
 0xb03   :  { %7441 = vmatmul.mubr.bf16.gmra.mrb[108].mxu0 %v22622_v59  ;;  %v19302_v59 = vpop.f32.mrb[16].mxu1 }
 0xb04   :  { %7448 = vmatprep.mubr.bf16.mxu0 %v22630_v51  ;;  %v22694_v51 = vld [vmem:[%s28356_s1 + $0xfe0] ss:$16 sps:$4 sm:$0xff]  }
 0xb06   :  { %8434 = vmatmul.mubr.bf16.gmra.mrb[84].mxu1 %v22688_v20 }
 0xb07   :  { %8441 = vmatprep.mubr.bf16.mxu1 %v22693_v1  ;;  %v22720_v1 = vld [vmem:[%s28356_s1 + $0xf8c] ss:$16 sps:$4 sm:$0xff]  }
 0xb0b   :  { %7449 = vmatmul.mubr.bf16.gmra.mrb[112].mxu0 %v22628_v0  ;;  %v19303_v0 = vpop.f32.mrb[17].mxu1 }
 0xb0c   :  { %7456 = vmatprep.mubr.bf16.mxu0 %v22636_v7  ;;  %v19305_v7 = vpop.f32.mrb[18].mxu1 }
 0xb0e   :  { %8442 = vmatmul.mubr.bf16.gmra.mrb[88].mxu1 %v22691_v57  ;;  %v22726_v57 = vld [vmem:[%s28356_s1 + $0xfac] ss:$16 sps:$4 sm:$0xff]  }
 0xb0f   :  { %8449 = vmatprep.mubr.bf16.mxu1 %v22696_v11  ;;  %v22738_v11 = vld [vmem:[%s28356_s1 + $0xfec] ss:$16 sps:$4 sm:$0xff]  }
 0xb13   :  { %7457 = vmatmul.mubr.bf16.gmra.mrb[116].mxu0 %v22634_v29  ;;  %v26302_v29 = vadd.f32 %v19303_v0, %v19302_v59  ;;  %v22736_v59 = vld [vmem:[%s28356_s1 + $0xfe8] ss:$16 sps:$4 sm:$0xff]  }
 0xb14   :  { %7464 = vmatprep.mubr.bf16.mxu0 %v22642_v48  ;;  %v19306_v48 = vpop.f32.mrb[19].mxu1 }
 0xb16   :  { %8450 = vmatmul.mubr.bf16.gmra.mrb[92].mxu1 %v22694_v51 }
 0xb1b   :  { %7465 = vmatmul.mubr.bf16.gmra.mrb[120].mxu0 %v22640_v58  ;;  %v26304_v58 = vadd.f32 %v19306_v48, %v19305_v7 }
 0xb1c   :  { %7472 = vmatprep.mubr.bf16.mxu0 %v22648_v9  ;;  %v22699_v9 = vld [vmem:[%s28356_s1 + $0xf0c] ss:$16 sps:$4 sm:$0xff]  }
 0xb1d   :  { %8490 = vmatprep.mubr.bf16.mxu1 %v22699_v9 }
 0xb1e   :  { %8491 = vmatmul.mubr.bf16.vlgmr.msra.gmra.mrb[96].mxu1 %v22697_v41 }
 0xb1f   :  { %8498 = vmatprep.mubr.bf16.mxu1 %v22702_v55 }
 0xb23   :  { %7473 = vmatmul.mubr.bf16.gmra.mrb[124].mxu0 %v22646_v15  ;;  %v19308_v15 = vpop.f32.mrb[20].mxu1 }
 0xb24   :  { %v19309_v47 = vpop.f32.mrb[21].mxu1 }
 0xb25   :  { %v19311_v6 = vpop.f32.mrb[22].mxu1  ;;  %v26312_v8 = vadd.f32 %v19309_v47, %v19308_v15 }
 0xb26   :  { %v19312_v40 = vpop.f32.mrb[23].mxu1  ;;  %8499 = vmatmul.mubr.bf16.gmra.mrb[100].mxu1 %v22700_v26 }
 0xb27   :  { %v26314_v30 = vadd.f32 %v19312_v40, %v19311_v6  ;;  %v19314_v37 = vpop.f32.mrb[24].mxu1  ;;  %8506 = vmatprep.mubr.bf16.mxu1 %v22708_v33 }
 0xb28   :  { %v19315_v23 = vpop.f32.mrb[25].mxu1 }
 0xb29   :  { %v19317_v39 = vpop.f32.mrb[26].mxu1  ;;  %v26322_v25 = vadd.f32 %v19315_v23, %v19314_v37 }
 0xb2a   :  { %v19318_v24 = vpop.f32.mrb[27].mxu1 }
 0xb2b   :  { %v26324_v28 = vadd.f32 %v19318_v24, %v19317_v39  ;;  %v19320_v13 = vpop.f32.mrb[28].mxu1 }
 0xb2c   :  { %v19321_v17 = vpop.f32.mrb[29].mxu1 }
 0xb2d   :  { %v19323_v42 = vpop.f32.mrb[30].mxu1  ;;  %v26332_v62 = vadd.f32 %v19321_v17, %v19320_v13 }
 0xb2e   :  { %8507 = vmatmul.mubr.bf16.gmra.mrb[104].mxu1 %v22706_v43  ;;  %v19324_v20 = vpop.f32.mrb[31].mxu1 }
 0xb2f   :  { %v26334_v63 = vadd.f32 %v19324_v20, %v19323_v42  ;;  %8514 = vmatprep.mubr.bf16.mxu1 %v22714_v60  ;;  %v19415_v9 = vpop.f32.mrb[32].mxu1 }
 0xb30   :  { %v19416_v41 = vpop.f32.mrb[33].mxu1 }
 0xb31   :  { %v26367_v40 = vadd.f32 %v19416_v41, %v19415_v9  ;;  %v19418_v55 = vpop.f32.mrb[34].mxu1 }
 0xb32   :  { %v19419_v37 = vpop.f32.mrb[35].mxu1 }
 0xb33   :  { %v26370_v23 = vadd.f32 %v19419_v37, %v19418_v55  ;;  %v19421_v39 = vpop.f32.mrb[36].mxu1 }
 0xb34   :  { %v19422_v24 = vpop.f32.mrb[37].mxu1 }
 0xb35   :  { %v26372_v43 = vadd.f32 %v19422_v24, %v19421_v39  ;;  %v19424_v17 = vpop.f32.mrb[38].mxu1 }
 0xb36   :  { %8515 = vmatmul.mubr.bf16.gmra.mrb[108].mxu1 %v22712_v54  ;;  %v19425_v20 = vpop.f32.mrb[39].mxu1 }
 0xb37   :  { %8522 = vmatprep.mubr.bf16.mxu1 %v22720_v1  ;;  %v26375_v54 = vadd.f32 %v19425_v20, %v19424_v17 }
 0xb3e   :  { %8523 = vmatmul.mubr.bf16.gmra.mrb[112].mxu1 %v22718_v49 }
 0xb3f   :  { %8530 = vmatprep.mubr.bf16.mxu1 %v22726_v57 }
 0xb46   :  { %8531 = vmatmul.mubr.bf16.gmra.mrb[116].mxu1 %v22724_v19 }
 0xb47   :  { %8538 = vmatprep.mubr.bf16.mxu1 %v22732_v44 }
 0xb4e   :  { %8539 = vmatmul.mubr.bf16.gmra.mrb[120].mxu1 %v22730_v10 }
 0xb4f   :  { %8546 = vmatprep.mubr.bf16.mxu1 %v22738_v11 }
 0xb56   :  { %8547 = vmatmul.mubr.bf16.gmra.mrb[124].mxu1 %v22736_v59 }
 0xb7a   :  { %v19427_v1 = vpop.f32.mrb[40].mxu1 }
 0xbbe   :  { %v19342_v51 = vpop.f32.mrb[96].mxu0 }
 0xbbf   :  { %v19343_v0 = vpop.f32.mrb[97].mxu0 }
 0xbc0   :  { %v19344_v7 = vadd.f32 %v19343_v0, %v19342_v51  ;;  %v19345_v48 = vpop.f32.mrb[98].mxu0 }
 0xbc1   :  { %v19346_v15 = vpop.f32.mrb[99].mxu0 }
 0xbc2   :  { %v7419_v47 = vadd.f32 %v19344_v7, %v26254_v21  ;;  %v19347_v6 = vadd.f32 %v19346_v15, %v19345_v48 }
 0xbc4   :  { %v7422_v26 = vadd.f32 %v19347_v6, %v26259_v34  ;;  %v19428_v34 = vpop.f32.mrb[41].mxu1 }
 0xbc5   :  { %v26378_v44 = vadd.f32 %v19428_v34, %v19427_v1  ;;  %v19430_v10 = vpop.f32.mrb[42].mxu1 }
 0xbc6   :  { %v7481_v33 = vpack.c.bf16 %v7422_v26, %v7419_v47  ;;  %v19348_v13 = vpop.f32.mrb[100].mxu0  ;;  %v19431_v11 = vpop.f32.mrb[43].mxu1 }
 0xbc7   :  { %v19349_v42 = vpop.f32.mrb[101].mxu0  ;;  %v26381_v51 = vadd.f32 %v19431_v11, %v19430_v10  ;;  %v19433_v0 = vpop.f32.mrb[44].mxu1 }
 0xbc8   :  { %v19350_v60 = vadd.f32 %v19349_v42, %v19348_v13  ;;  %v19351_v21 = vpop.f32.mrb[102].mxu0  ;;  %20437 = vmatprep.mubr.msk.bf16.mxu0 %vm934_vm2, %v7481_v33  ;;  %v19434_v7 = vpop.f32.mrb[45].mxu1 }
 0xbc9   :  { %v19352_v49 = vpop.f32.mrb[103].mxu0  ;;  %v26383_v15 = vadd.f32 %v19434_v7, %v19433_v0  ;;  %v19436_v41 = vpop.f32.mrb[46].mxu1 }
 0xbca   :  { %v7427_v57 = vadd.f32 %v19350_v60, %v26267_v50  ;;  %v19353_v19 = vadd.f32 %v19352_v49, %v19351_v21  ;;  %v19437_v6 = vpop.f32.mrb[47].mxu1 }
 0xbcb   :  { %v26386_v37 = vadd.f32 %v19437_v6, %v19436_v41  ;;  %v19439_v26 = vpop.f32.mrb[48].mxu1 }
 0xbcc   :  { %v7430_v59 = vadd.f32 %v19353_v19, %v26269_v52  ;;  %v19440_v52 = vpop.f32.mrb[49].mxu1 }
 0xbcd   :  { %v26391_v13 = vadd.f32 %v19440_v52, %v19439_v26  ;;  %v19442_v17 = vpop.f32.mrb[50].mxu1 }
 0xbce   :  { %v7482_v48 = vpack.c.bf16 %v7430_v59, %v7427_v57  ;;  %v19354_v9 = vpop.f32.mrb[104].mxu0  ;;  %v19443_v42 = vpop.f32.mrb[51].mxu1 }
 0xbcf   :  { %v19355_v47 = vpop.f32.mrb[105].mxu0  ;;  %v26394_v60 = vadd.f32 %v19443_v42, %v19442_v17  ;;  %v19445_v21 = vpop.f32.mrb[52].mxu1 }
 0xbd0   :  { %v19356_v55 = vadd.f32 %v19355_v47, %v19354_v9  ;;  %v19357_v50 = vpop.f32.mrb[106].mxu0  ;;  %20438 = vmatmul.mubr.msk.bf16.vlgmr.msra.gmra.mrb[64].mxu0 %vm934_vm2, %v7482_v48  ;;  %v19446_v1 = vpop.f32.mrb[53].mxu1 }
 0xbd1   :  { %v19358_v39 = vpop.f32.mrb[107].mxu0  ;;  %19464 = vmatpush3.bf16.msra.mxu0 %v23133_v12  ;;  %v19448_v34 = vpop.f32.mrb[54].mxu1 }
 0xbd2   :  { %v7435_v24 = vadd.f32 %v19356_v55, %v26281_v32  ;;  %v19359_v33 = vadd.f32 %v19358_v39, %v19357_v50  ;;  %19465 = vmatprep.subr.bf16.mxu0 %v28563_v38  ;;  %v26398_v32 = vadd.f32 %v19446_v1, %v19445_v21  ;;  %v19449_v57 = vpop.f32.mrb[55].mxu1 }
 0xbd3   :  { %v19451_v11 = vpop.f32.mrb[56].mxu1 }
 0xbd4   :  { %v7438_v20 = vadd.f32 %v19359_v33, %v26284_v2  ;;  %v26401_v2 = vadd.f32 %v19449_v57, %v19448_v34 }
 0xbd5   :  { %19466 = vmatpush3.bf16.msra.mxu0 %v28564_v18  ;;  %v19452_v18 = vpop.f32.mrb[57].mxu1 }
 0xbd6   :  { %v7483_v49 = vpack.c.bf16 %v7438_v20, %v7435_v24  ;;  %v19360_v12 = vpop.f32.mrb[108].mxu0  ;;  %19467 = vmatprep.subr.bf16.mxu0 %v28565_v14  ;;  %v26406_v14 = vadd.f32 %v19452_v18, %v19451_v11  ;;  %v19454_v48 = vpop.f32.mrb[58].mxu1 }
 0xbd7   :  { %v19361_v38 = vpop.f32.mrb[109].mxu0  ;;  %v19455_v9 = vpop.f32.mrb[59].mxu1 }
 0xbd8   :  { %v19362_v19 = vadd.f32 %v19361_v38, %v19360_v12  ;;  %v19363_v10 = vpop.f32.mrb[110].mxu0  ;;  %20441 = vmatprep.mubr.msk.bf16.mxu0 %vm934_vm2, %v7483_v49  ;;  %v26409_v47 = vadd.f32 %v19455_v9, %v19454_v48  ;;  %v19457_v6 = vpop.f32.mrb[60].mxu1 }
 0xbd9   :  { %v19364_v59 = vpop.f32.mrb[111].mxu0  ;;  %19468 = vmatpush3.bf16.msra.mxu0 %v28566_v46  ;;  %v19458_v55 = vpop.f32.mrb[61].mxu1 }
 0xbda   :  { %v7443_v0 = vadd.f32 %v19362_v19, %v26292_v36  ;;  %v19365_v7 = vadd.f32 %v19364_v59, %v19363_v10  ;;  %19469 = vmatprep.subr.bf16.mxu0 %v28567_v53  ;;  %v26413_v36 = vadd.f32 %v19458_v55, %v19457_v6  ;;  %v19460_v26 = vpop.f32.mrb[62].mxu1 }
 0xbdb   :  { %v19461_v39 = vpop.f32.mrb[63].mxu1 }
 0xbdc   :  { %v7446_v41 = vadd.f32 %v19365_v7, %v26294_v56  ;;  %v26416_v56 = vadd.f32 %v19461_v39, %v19460_v26  ;;  %v19552_v33 = vpop.f32.mrb[64].mxu1 }
 0xbdd   :  { %19470 = vmatpush3.bf16.msra.mxu0 %v28568_v45  ;;  %v19553_v45 = vpop.f32.mrb[65].mxu1 }
 0xbde   :  { %v7484_v50 = vpack.c.bf16 %v7446_v41, %v7443_v0  ;;  %v19366_v46 = vpop.f32.mrb[112].mxu0  ;;  %19471 = vmatprep.subr.bf16.mxu0 %v28569_v5  ;;  %v26421_v5 = vadd.f32 %v19553_v45, %v19552_v33  ;;  %v19555_v21 = vpop.f32.mrb[66].mxu1 }
 0xbdf   :  { %v19367_v53 = vpop.f32.mrb[113].mxu0  ;;  %v19556_v1 = vpop.f32.mrb[67].mxu1 }
 0xbe0   :  { %v19368_v52 = vadd.f32 %v19367_v53, %v19366_v46  ;;  %v19369_v24 = vpop.f32.mrb[114].mxu0  ;;  %20442 = vmatmul.mubr.msk.bf16.gmra.mrb[68].mxu0 %vm934_vm2, %v7484_v50  ;;  %v26424_v12 = vadd.f32 %v19556_v1, %v19555_v21  ;;  %v22709_v21 = vld [vmem:[%s28356_s1 + $0xe28] ss:$16 sps:$4 sm:$0xff]  }
 0xbe1   :  { %v19370_v17 = vpop.f32.mrb[115].mxu0  ;;  %19472 = vmatpush3.bf16.msra.mxu0 %v28570_v31 }
 0xbe2   :  { %v7451_v42 = vadd.f32 %v19368_v52, %v26302_v29  ;;  %v19371_v20 = vadd.f32 %v19370_v17, %v19369_v24  ;;  %19473 = vmatprep.subr.bf16.mxu0 %v28571_v35 }
 0xbe4   :  { %v7454_v49 = vadd.f32 %v19371_v20, %v26304_v58 }
 0xbe5   :  { %19474 = vmatpush3.bf16.msra.mxu0 %v28572_v22 }
 0xbe6   :  { %v7485_v34 = vpack.c.bf16 %v7454_v49, %v7451_v42  ;;  %v19372_v38 = vpop.f32.mrb[116].mxu0  ;;  %19475 = vmatprep.subr.bf16.mxu0 %v28573_v61  ;;  %v22717_v49 = vld [vmem:[%s28356_s1 + $0xe4c] ss:$16 sps:$4 sm:$0xff]  }
 0xbe7   :  { %v19373_v31 = vpop.f32.mrb[117].mxu0 }
 0xbe8   :  { %v19374_v57 = vadd.f32 %v19373_v31, %v19372_v38  ;;  %v19375_v29 = vpop.f32.mrb[118].mxu0  ;;  %20445 = vmatprep.mubr.msk.bf16.mxu0 %vm934_vm2, %v7485_v34 }
 0xbe9   :  { %v19376_v35 = vpop.f32.mrb[119].mxu0  ;;  %19476 = vmatpush3.bf16.msra.mxu0 %v28574_v16 }
 0xbea   :  { %v7459_v19 = vadd.f32 %v19374_v57, %v26312_v8  ;;  %v19377_v10 = vadd.f32 %v19376_v35, %v19375_v29  ;;  %19477 = vmatprep.subr.bf16.mxu0 %v28575_v27  ;;  %v22715_v35 = vld [vmem:[%s28356_s1 + $0xe48] ss:$16 sps:$4 sm:$0xff]  }
 0xbec   :  { %v7462_v58 = vadd.f32 %v19377_v10, %v26314_v30  ;;  %v22723_v10 = vld [vmem:[%s28356_s1 + $0xe6c] ss:$16 sps:$4 sm:$0xff]  }
 0xbed   :  { %19478 = vmatpush3.bf16.msra.mxu0 %v28576_v3 }
 0xbee   :  { %v7486_v22 = vpack.c.bf16 %v7462_v58, %v7459_v19  ;;  %v19378_v11 = vpop.f32.mrb[120].mxu0 }
 0xbef   :  { %v19379_v61 = vpop.f32.mrb[121].mxu0 }
 0xbf0   :  { %v19380_v59 = vadd.f32 %v19379_v61, %v19378_v11  ;;  %v19381_v18 = vpop.f32.mrb[122].mxu0  ;;  %20446 = vmatmul.mubr.msk.bf16.gmra.mrb[72].mxu0 %vm934_vm2, %v7486_v22 }
 0xbf1   :  { %v19382_v0 = vpop.f32.mrb[123].mxu0 }
 0xbf2   :  { %v7467_v7 = vadd.f32 %v19380_v59, %v26322_v25  ;;  %v19383_v16 = vadd.f32 %v19382_v0, %v19381_v18  ;;  %v22705_v25 = vld [vmem:[%s28356_s1 + $0xe0c] ss:$16 sps:$4 sm:$0xff]   ;;  %v22721_v18 = vld [vmem:[%s28356_s1 + $0xe68] ss:$16 sps:$4 sm:$0xff]  }
 0xbf4   :  { %v7470_v8 = vadd.f32 %v19383_v16, %v26324_v28  ;;  %v19558_v28 = vpop.f32.mrb[68].mxu1 }
 0xbf5   :  { %v19559_v26 = vpop.f32.mrb[69].mxu1 }
 0xbf6   :  { %v7487_v48 = vpack.c.bf16 %v7470_v8, %v7467_v7  ;;  %v19384_v9 = vpop.f32.mrb[124].mxu0  ;;  %v26444_v53 = vadd.f32 %v19559_v26, %v19558_v28  ;;  %v19561_v39 = vpop.f32.mrb[70].mxu1  ;;  %v22729_v7 = vld [vmem:[%s28356_s1 + $0xe8c] ss:$16 sps:$4 sm:$0xff]   ;;  %v22733_v28 = vld [vmem:[%s28356_s1 + $0xea8] ss:$16 sps:$4 sm:$0xff]  }
 0xbf7   :  { %v19385_v27 = vpop.f32.mrb[125].mxu0  ;;  %v19562_v52 = vpop.f32.mrb[71].mxu1 }
 0xbf8   :  { %v19386_v41 = vadd.f32 %v19385_v27, %v19384_v9  ;;  %v19387_v30 = vpop.f32.mrb[126].mxu0  ;;  %20449 = vmatprep.mubr.msk.bf16.mxu0 %vm934_vm2, %v7487_v48  ;;  %v26449_v24 = vadd.f32 %v19562_v52, %v19561_v39  ;;  %v19564_v33 = vpop.f32.mrb[72].mxu1  ;;  %v22741_v39 = vld [vmem:[%s28356_s1 + $0xecc] ss:$16 sps:$4 sm:$0xff]  }
 0xbf9   :  { %v19388_v3 = vpop.f32.mrb[127].mxu0  ;;  %v19565_v17 = vpop.f32.mrb[73].mxu1 }
 0xbfa   :  { %v7475_v6 = vadd.f32 %v19386_v41, %v26332_v62  ;;  %v19389_v55 = vadd.f32 %v19388_v3, %v19387_v30  ;;  %v22703_v62 = vld [vmem:[%s28356_s1 + $0xe08] ss:$16 sps:$4 sm:$0xff]   ;;  %v26454_v45 = vadd.f32 %v19565_v17, %v19564_v33  ;;  %v19567_v42 = vpop.f32.mrb[74].mxu1  ;;  %v22735_v3 = vld [vmem:[%s28356_s1 + $0xeac] ss:$16 sps:$4 sm:$0xff]  }
 0xbfb   :  { %v19568_v20 = vpop.f32.mrb[75].mxu1  ;;  %v22727_v41 = vld [vmem:[%s28356_s1 + $0xe88] ss:$16 sps:$4 sm:$0xff]  }
 0xbfc   :  { %v7478_v50 = vadd.f32 %v19389_v55, %v26334_v63  ;;  %v22711_v63 = vld [vmem:[%s28356_s1 + $0xe2c] ss:$16 sps:$4 sm:$0xff]   ;;  %v26459_v1 = vadd.f32 %v19568_v20, %v19567_v42  ;;  %v19570_v34 = vpop.f32.mrb[76].mxu1  ;;  %v22739_v42 = vld [vmem:[%s28356_s1 + $0xec8] ss:$16 sps:$4 sm:$0xff]  }
 0xbfd   :  { %v19571_v38 = vpop.f32.mrb[77].mxu1 }
 0xbfe   :  { %v7488_v46 = vpack.c.bf16 %v7478_v50, %v7475_v6  ;;  %v26464_v31 = vadd.f32 %v19571_v38, %v19570_v34  ;;  %v19573_v57 = vpop.f32.mrb[78].mxu1 }
 0xbff   :  { %v19574_v29 = vpop.f32.mrb[79].mxu1 }
 0xc00   :  { %20450 = vmatmul.mubr.msk.bf16.gmra.mrb[76].mxu0 %vm934_vm2, %v7488_v46  ;;  %v26469_v19 = vadd.f32 %v19574_v29, %v19573_v57  ;;  %v19576_v58 = vpop.f32.mrb[80].mxu1 }
 0xc01   :  { %7953 = vmatprep.mubr.bf16.mxu0 %v22705_v25  ;;  %v19577_v22 = vpop.f32.mrb[81].mxu1 }
 0xc02   :  { %v26474_v11 = vadd.f32 %v19577_v22, %v19576_v58  ;;  %v19579_v61 = vpop.f32.mrb[82].mxu1 }
 0xc03   :  { %v19580_v59 = vpop.f32.mrb[83].mxu1 }
 0xc04   :  { %v26479_v0 = vadd.f32 %v19580_v59, %v19579_v61  ;;  %v19582_v16 = vpop.f32.mrb[84].mxu1 }
 0xc05   :  { %v19583_v8 = vpop.f32.mrb[85].mxu1 }
 0xc06   :  { %v26484_v48 = vadd.f32 %v19583_v8, %v19582_v16  ;;  %v19585_v9 = vpop.f32.mrb[86].mxu1 }
 0xc07   :  { %v19586_v27 = vpop.f32.mrb[87].mxu1 }
 0xc08   :  { %7954 = vmatmul.mubr.bf16.vlgmr.msra.gmra.mrb[128].mxu0 %v22703_v62  ;;  %v26489_v30 = vadd.f32 %v19586_v27, %v19585_v9  ;;  %v19588_v6 = vpop.f32.mrb[88].mxu1 }
 0xc09   :  { %7961 = vmatprep.mubr.bf16.mxu0 %v22711_v63  ;;  %v19589_v55 = vpop.f32.mrb[89].mxu1 }
 0xc0a   :  { %v26494_v50 = vadd.f32 %v19589_v55, %v19588_v6  ;;  %v19591_v25 = vpop.f32.mrb[90].mxu1 }
 0xc0b   :  { %v19592_v46 = vpop.f32.mrb[91].mxu1 }
 0xc0c   :  { %v26499_v26 = vadd.f32 %v19592_v46, %v19591_v25  ;;  %v19594_v52 = vpop.f32.mrb[92].mxu1 }
 0xc0d   :  { %v19595_v62 = vpop.f32.mrb[93].mxu1 }
 0xc0e   :  { %v26504_v63 = vadd.f32 %v19595_v62, %v19594_v52  ;;  %v19597_v33 = vpop.f32.mrb[94].mxu1 }
 0xc0f   :  { %v19598_v17 = vpop.f32.mrb[95].mxu1 }
 0xc10   :  { %7962 = vmatmul.mubr.bf16.gmra.mrb[132].mxu0 %v22709_v21  ;;  %v26509_v20 = vadd.f32 %v19598_v17, %v19597_v33  ;;  %v22744_v21 = vld [vmem:[%s28356_s1 + $0xeec] ss:$16 sps:$4 sm:$0xff]  }
 0xc11   :  { %7969 = vmatprep.mubr.bf16.mxu0 %v22717_v49  ;;  %v19616_v49 = vpop.f32.mrb[96].mxu1 }
 0xc12   :  { %v19617_v34 = vpop.f32.mrb[97].mxu1 }
 0xc13   :  { %v19618_v38 = vadd.f32 %v19617_v34, %v19616_v49  ;;  %v19619_v57 = vpop.f32.mrb[98].mxu1 }
 0xc14   :  { %v19620_v29 = vpop.f32.mrb[99].mxu1 }
 0xc15   :  { %v19621_v58 = vadd.f32 %v19620_v29, %v19619_v57  ;;  %v19622_v59 = vpop.f32.mrb[100].mxu1 }
 0xc17   :  { %v26521_v22 = vadd.f32 %v19621_v58, %v26424_v12 }
 0xc18   :  { %7970 = vmatmul.mubr.bf16.gmra.mrb[136].mxu0 %v22715_v35  ;;  %v22742_v35 = vld [vmem:[%s28356_s1 + $0xee8] ss:$16 sps:$4 sm:$0xff]  }
 0xc19   :  { %7977 = vmatprep.mubr.bf16.mxu0 %v22723_v10  ;;  %v26518_v10 = vadd.f32 %v19618_v38, %v26421_v5 }
 0xc1b   :  { %v8555_v61 = vpack.c.bf16 %v26521_v22, %v26518_v10 }
 0xc20   :  { %7978 = vmatmul.mubr.bf16.gmra.mrb[140].mxu0 %v22721_v18  ;;  %v19623_v18 = vpop.f32.mrb[101].mxu1 }
 0xc21   :  { %7985 = vmatprep.mubr.bf16.mxu0 %v22729_v7  ;;  %v19624_v7 = vadd.f32 %v19623_v18, %v19622_v59  ;;  %v19625_v16 = vpop.f32.mrb[102].mxu1 }
 0xc22   :  { %v19626_v8 = vpop.f32.mrb[103].mxu1 }
 0xc23   :  { %v26526_v9 = vadd.f32 %v19624_v7, %v26444_v53  ;;  %v19627_v27 = vadd.f32 %v19626_v8, %v19625_v16 }
 0xc25   :  { %v26529_v5 = vadd.f32 %v19627_v27, %v26449_v24 }
 0xc27   :  { %v8556_v12 = vpack.c.bf16 %v26529_v5, %v26526_v9 }
 0xc28   :  { %7986 = vmatmul.mubr.bf16.gmra.mrb[144].mxu0 %v22727_v41  ;;  %v19628_v41 = vpop.f32.mrb[104].mxu1 }
 0xc29   :  { %7993 = vmatprep.mubr.bf16.mxu0 %v22735_v3  ;;  %v19629_v3 = vpop.f32.mrb[105].mxu1 }
 0xc2a   :  { %v19631_v6 = vpop.f32.mrb[106].mxu1  ;;  %v19630_v25 = vadd.f32 %v19629_v3, %v19628_v41  ;;  %v16549_v41 = vld [vmem:[%s28357_s2 + $0x1c] sm:$0x3] }
 0xc2b   :  { %v19632_v55 = vpop.f32.mrb[107].mxu1 }
 0xc2c   :  { %v19633_v46 = vadd.f32 %v19632_v55, %v19631_v6  ;;  %v19634_v24 = vpop.f32.mrb[108].mxu1 }
 0xc2d   :  { %v19635_v52 = vpop.f32.mrb[109].mxu1 }
 0xc2e   :  { %v19637_v62 = vpop.f32.mrb[110].mxu1  ;;  %v19636_v17 = vadd.f32 %v19635_v52, %v19634_v24 }
 0xc2f   :  { %v19638_v33 = vpop.f32.mrb[111].mxu1 }
 0xc30   :  { %7994 = vmatmul.mubr.bf16.gmra.mrb[148].mxu0 %v22733_v28  ;;  %v26534_v28 = vadd.f32 %v19630_v25, %v26454_v45 }
 0xc31   :  { %8001 = vmatprep.mubr.bf16.mxu0 %v22741_v39  ;;  %v26537_v39 = vadd.f32 %v19633_v46, %v26459_v1  ;;  %v19640_v1 = vpop.f32.mrb[112].mxu1 }
 0xc32   :  { %v19641_v34 = vpop.f32.mrb[113].mxu1 }
 0xc33   :  { %v8557_v53 = vpack.c.bf16 %v26537_v39, %v26534_v28  ;;  %v19643_v38 = vpop.f32.mrb[114].mxu1  ;;  %v19642_v29 = vadd.f32 %v19641_v34, %v19640_v1 }
 0xc34   :  { %v19644_v57 = vpop.f32.mrb[115].mxu1 }
 0xc35   :  { %v26550_v58 = vadd.f32 %v19642_v29, %v26474_v11 }
 0xc38   :  { %8002 = vmatmul.mubr.bf16.gmra.mrb[152].mxu0 %v22739_v42  ;;  %v19639_v42 = vadd.f32 %v19638_v33, %v19637_v62 }
 0xc39   :  { %8009 = vmatprep.mubr.bf16.mxu0 %v22744_v21  ;;  %v26542_v21 = vadd.f32 %v19636_v17, %v26464_v31 }
 0xc3a   :  { %v26545_v49 = vadd.f32 %v19639_v42, %v26469_v19  ;;  %v19646_v19 = vpop.f32.mrb[116].mxu1 }
 0xc3b   :  { %v19647_v18 = vpop.f32.mrb[117].mxu1 }
 0xc3c   :  { %v8558_v45 = vpack.c.bf16 %v26545_v49, %v26542_v21  ;;  %v19649_v7 = vpop.f32.mrb[118].mxu1  ;;  %v19648_v8 = vadd.f32 %v19647_v18, %v19646_v19 }
 0xc3d   :  { %v19650_v16 = vpop.f32.mrb[119].mxu1 }
 0xc3e   :  { %v19651_v27 = vadd.f32 %v19650_v16, %v19649_v7  ;;  %v26561_v3 = vadd.f32 %v19648_v8, %v26484_v48  ;;  %v19652_v55 = vpop.f32.mrb[120].mxu1 }
 0xc3f   :  { %v19653_v25 = vpop.f32.mrb[121].mxu1 }
 0xc40   :  { %8010 = vmatmul.mubr.bf16.gmra.mrb[156].mxu0 %v22742_v35  ;;  %v19645_v35 = vadd.f32 %v19644_v57, %v19643_v38  ;;  %v26564_v11 = vadd.f32 %v19651_v27, %v26489_v30  ;;  %v19655_v46 = vpop.f32.mrb[122].mxu1  ;;  %v19654_v52 = vadd.f32 %v19653_v25, %v19652_v55 }
 0xc41   :  { %v19656_v24 = vpop.f32.mrb[123].mxu1 }
 0xc42   :  { %v26553_v59 = vadd.f32 %v19645_v35, %v26479_v0  ;;  %v8053_v0 = vand.u32 %v16549_v41, %v23679_v4  ;;  %v8560_v6 = vpack.c.bf16 %v26564_v11, %v26561_v3  ;;  %v19657_v62 = vadd.f32 %v19656_v24, %v19655_v46  ;;  %v19658_v17 = vpop.f32.mrb[124].mxu1 }
 0xc43   :  { %v26570_v33 = vadd.f32 %v19654_v52, %v26494_v50  ;;  %v19659_v42 = vpop.f32.mrb[125].mxu1 }
 0xc44   :  { %v8559_v31 = vpack.c.bf16 %v26553_v59, %v26550_v58  ;;  %20453 = vmatprep.subr.bf16.mxu0 %v8053_v0  ;;  %v26573_v48 = vadd.f32 %v19657_v62, %v26499_v26  ;;  %v19661_v1 = vpop.f32.mrb[126].mxu1  ;;  %v19660_v38 = vadd.f32 %v19659_v42, %v19658_v17  ;;  %v16622_v26 = vld [vmem:[%s28357_s2 + $0x1e] sm:$0x3] }
 0xc45   :  { %20454 = vmatpush3.bf16.msra.mxu0 %v8053_v0  ;;  %v19662_v34 = vpop.f32.mrb[127].mxu1  ;;  %v8590_v19 = vand.u32 %v16622_v26, %v23679_v4 }
 0xc46   :  { %v8561_v30 = vpack.c.bf16 %v26573_v48, %v26570_v33  ;;  %v19663_v57 = vadd.f32 %v19662_v34, %v19661_v1  ;;  %v26578_v29 = vadd.f32 %v19660_v38, %v26504_v63 }
 0xc47   :  { %20471 = vmatprep.subr.bf16.mxu0 %v8590_v19 }
 0xc48   :  { %v26581_v35 = vadd.f32 %v19663_v57, %v26509_v20 }
 0xc4a   :  { %v8562_v50 = vpack.c.bf16 %v26581_v35, %v26578_v29 }
 0xcdb   :  { %v19479_v18 = vpop.f32.mrb[128].mxu0 }
 0xcdc   :  { %v19480_v7 = vpop.f32.mrb[129].mxu0 }
 0xcdd   :  { %v19481_v16 = vadd.f32 %v19480_v7, %v19479_v18  ;;  %v19482_v8 = vpop.f32.mrb[130].mxu0 }
 0xcde   :  { %v19483_v27 = vpop.f32.mrb[131].mxu0 }
 0xcdf   :  { %v7956_v63 = vadd.f32 %v19481_v16, %v26367_v40  ;;  %v19484_v41 = vadd.f32 %v19483_v27, %v19482_v8 }
 0xce1   :  { %v7959_v20 = vadd.f32 %v19484_v41, %v26370_v23 }
 0xce3   :  { %v8018_v0 = vpack.c.bf16 %v7959_v20, %v7956_v63  ;;  %v19485_v55 = vpop.f32.mrb[132].mxu0 }
 0xce4   :  { %v19486_v25 = vpop.f32.mrb[133].mxu0 }
 0xce5   :  { %v19487_v46 = vadd.f32 %v19486_v25, %v19485_v55  ;;  %v19488_v24 = vpop.f32.mrb[134].mxu0  ;;  %20455 = vmatprep.mubr.msk.bf16.mxu0 %vm934_vm2, %v8018_v0 }
 0xce6   :  { %v19489_v52 = vpop.f32.mrb[135].mxu0 }
 0xce7   :  { %v7964_v4 = vadd.f32 %v19487_v46, %v26372_v43  ;;  %v19490_v62 = vadd.f32 %v19489_v52, %v19488_v24 }
 0xce9   :  { %v7967_v17 = vadd.f32 %v19490_v62, %v26375_v54 }
 0xceb   :  { %v8019_v42 = vpack.c.bf16 %v7967_v17, %v7964_v4  ;;  %v19491_v1 = vpop.f32.mrb[136].mxu0 }
 0xcec   :  { %v19492_v34 = vpop.f32.mrb[137].mxu0 }
 0xced   :  { %v19493_v40 = vadd.f32 %v19492_v34, %v19491_v1  ;;  %v19494_v38 = vpop.f32.mrb[138].mxu0  ;;  %20456 = vmatmul.mubr.msk.bf16.vlgmr.msra.gmra.mrb[64].mxu0 %vm934_vm2, %v8019_v42 }
 0xcee   :  { %v19495_v23 = vpop.f32.mrb[139].mxu0  ;;  %20472 = vmatpush3.bf16.msra.mxu0 %v8590_v19 }
 0xcef   :  { %v7972_v57 = vadd.f32 %v19493_v40, %v26378_v44  ;;  %v19496_v26 = vadd.f32 %v19495_v23, %v19494_v38 }
 0xcf1   :  { %v7975_v18 = vadd.f32 %v19496_v26, %v26381_v51 }
 0xcf3   :  { %v8020_v7 = vpack.c.bf16 %v7975_v18, %v7972_v57  ;;  %v19497_v16 = vpop.f32.mrb[140].mxu0 }
 0xcf4   :  { %v19498_v43 = vpop.f32.mrb[141].mxu0 }
 0xcf5   :  { %v19499_v8 = vadd.f32 %v19498_v43, %v19497_v16  ;;  %v19500_v27 = vpop.f32.mrb[142].mxu0  ;;  %20459 = vmatprep.mubr.msk.bf16.mxu0 %vm934_vm2, %v8020_v7 }
 0xcf6   :  { %v19501_v54 = vpop.f32.mrb[143].mxu0 }
 0xcf7   :  { %v7980_v63 = vadd.f32 %v19499_v8, %v26383_v15  ;;  %v19502_v41 = vadd.f32 %v19501_v54, %v19500_v27 }
 0xcf9   :  { %v7983_v20 = vadd.f32 %v19502_v41, %v26386_v37 }
 0xcfb   :  { %v8021_v0 = vpack.c.bf16 %v7983_v20, %v7980_v63  ;;  %v19503_v19 = vpop.f32.mrb[144].mxu0 }
 0xcfc   :  { %v19504_v55 = vpop.f32.mrb[145].mxu0 }
 0xcfd   :  { %v19505_v44 = vadd.f32 %v19504_v55, %v19503_v19  ;;  %v19506_v25 = vpop.f32.mrb[146].mxu0  ;;  %20460 = vmatmul.mubr.msk.bf16.gmra.mrb[68].mxu0 %vm934_vm2, %v8021_v0 }
 0xcfe   :  { %v19507_v51 = vpop.f32.mrb[147].mxu0 }
 0xcff   :  { %v7988_v46 = vadd.f32 %v19505_v44, %v26391_v13  ;;  %v19508_v24 = vadd.f32 %v19507_v51, %v19506_v25 }
 0xd01   :  { %v7991_v52 = vadd.f32 %v19508_v24, %v26394_v60 }
 0xd03   :  { %v8022_v4 = vpack.c.bf16 %v7991_v52, %v7988_v46  ;;  %v19509_v62 = vpop.f32.mrb[148].mxu0 }
 0xd04   :  { %v19510_v17 = vpop.f32.mrb[149].mxu0 }
 0xd05   :  { %v19511_v15 = vadd.f32 %v19510_v17, %v19509_v62  ;;  %v19512_v42 = vpop.f32.mrb[150].mxu0  ;;  %20463 = vmatprep.mubr.msk.bf16.mxu0 %vm934_vm2, %v8022_v4 }
 0xd06   :  { %v19513_v37 = vpop.f32.mrb[151].mxu0 }
 0xd07   :  { %v7996_v1 = vadd.f32 %v19511_v15, %v26398_v32  ;;  %v19514_v34 = vadd.f32 %v19513_v37, %v19512_v42 }
 0xd09   :  { %v7999_v40 = vadd.f32 %v19514_v34, %v26401_v2 }
 0xd0b   :  { %v8023_v38 = vpack.c.bf16 %v7999_v40, %v7996_v1  ;;  %v19515_v23 = vpop.f32.mrb[152].mxu0 }
 0xd0c   :  { %v19516_v57 = vpop.f32.mrb[153].mxu0 }
 0xd0d   :  { %v19517_v13 = vadd.f32 %v19516_v57, %v19515_v23  ;;  %v19518_v26 = vpop.f32.mrb[154].mxu0  ;;  %20464 = vmatmul.mubr.msk.bf16.gmra.mrb[72].mxu0 %vm934_vm2, %v8023_v38 }
 0xd0e   :  { %v19519_v60 = vpop.f32.mrb[155].mxu0 }
 0xd0f   :  { %v8004_v18 = vadd.f32 %v19517_v13, %v26406_v14  ;;  %v19520_v7 = vadd.f32 %v19519_v60, %v19518_v26  ;;  %v22745_v14 = vld [vmem:[%s28359_s4] sm:$0xff]  }
 0xd11   :  { %v8007_v16 = vadd.f32 %v19520_v7, %v26409_v47  ;;  %v22746_v47 = vld [vmem:[%s28359_s4 + $0x10] sm:$0xff]  }
 0xd12   :  { %20525 = vmatprep.mubr.bf16.mxu1 %v22746_v47  ;;  %v22753_v47 = vld [vmem:[%s28360_s5 + $0x20] sm:$0xff]  }
 0xd13   :  { %v8024_v43 = vpack.c.bf16 %v8007_v16, %v8004_v18  ;;  %v19521_v8 = vpop.f32.mrb[156].mxu0 }
 0xd14   :  { %v19522_v27 = vpop.f32.mrb[157].mxu0 }
 0xd15   :  { %v19523_v32 = vadd.f32 %v19522_v27, %v19521_v8  ;;  %v19524_v54 = vpop.f32.mrb[158].mxu0  ;;  %20467 = vmatprep.mubr.msk.bf16.mxu0 %vm934_vm2, %v8024_v43 }
 0xd16   :  { %v19525_v2 = vpop.f32.mrb[159].mxu0 }
 0xd17   :  { %v8012_v63 = vadd.f32 %v19523_v32, %v26413_v36  ;;  %v19526_v41 = vadd.f32 %v19525_v2, %v19524_v54  ;;  %v26654_v36 = vld [vmem:[%s28358_s3] ss:$0 sm:$0xff]  ;;  %v22749_v2 = vld [vmem:[%s28360_s5 + $0x10] sm:$0xff]  }
 0xd19   :  { %v8015_v20 = vadd.f32 %v19526_v41, %v26416_v56  ;;  %v22747_v41 = vld [vmem:[%s28359_s4 + $0x8] sm:$0xff]  }
 0xd1b   :  { %v8025_v0 = vpack.c.bf16 %v8015_v20, %v8012_v63  ;;  %v22751_v63 = vld [vmem:[%s28360_s5] sm:$0xff]   ;;  %v22748_v20 = vld [vmem:[%s28359_s4 + $0x18] sm:$0xff]  }
 0xd1d   :  { %20468 = vmatmul.mubr.msk.bf16.gmra.mrb[76].mxu0 %vm934_vm2, %v8025_v0  ;;  %v22750_v0 = vld [vmem:[%s28360_s5 + $0x18] sm:$0xff]  }
 0xd1e   :  { %20473 = vmatprep.mubr.msk.bf16.mxu0 %vm934_vm2, %v8555_v61 }
 0xd25   :  { %20474 = vmatmul.mubr.msk.bf16.vlgmr.msra.gmra.mrb[64].mxu0 %vm934_vm2, %v8556_v12 }
 0xd26   :  { %20477 = vmatprep.mubr.msk.bf16.mxu0 %vm934_vm2, %v8557_v53 }
 0xd2d   :  { %20478 = vmatmul.mubr.msk.bf16.gmra.mrb[68].mxu0 %vm934_vm2, %v8558_v45 }
 0xd2e   :  { %20481 = vmatprep.mubr.msk.bf16.mxu0 %vm934_vm2, %v8559_v31 }
 0xd35   :  { %20482 = vmatmul.mubr.msk.bf16.gmra.mrb[72].mxu0 %vm934_vm2, %v8560_v6 }
 0xd36   :  { %20485 = vmatprep.mubr.msk.bf16.mxu0 %vm934_vm2, %v8561_v30 }
 0xd3d   :  { %20486 = vmatmul.mubr.msk.bf16.gmra.mrb[76].mxu0 %vm934_vm2, %v8562_v50 }
 0xd3e   :  { %20505 = vmatprep.mubr.bf16.mxu0 %v22745_v14  ;;  %v22752_v14 = vld [vmem:[%s28360_s5 + $0x8] sm:$0xff]  }
 0xdf8   :  { %v20475_v56 = vpop.f32.mrb[64].mxu0 }
 0xdf9   :  { %v8714_v10 = vadd.f32 %v20475_v56, %v26654_v36  ;;  %v8626_v22 = vpop.f32.mrb[65].mxu0 }
 0xdfa   :  { %v8712_v61 = vadd.f32 %v26654_v36, %v8626_v22  ;;  %v20476_v9 = vpop.f32.mrb[66].mxu0 }
 0xdfb   :  { %v8715_v5 = vadd.f32 %v20476_v9, %v26654_v36  ;;  %v8629_v12 = vpop.f32.mrb[67].mxu0  ;;  %v8730_v39 = vmax.f32 %v8714_v10, 0.0 }
 0xdfc   :  { %v8713_v28 = vadd.f32 %v26654_v36, %v8629_v12  ;;  %v8728_v21 = vmax.f32 %v8712_v61, 0.0 }
 0xdfd   :  { %v8731_v53 = vmax.f32 %v8715_v5, 0.0 }
 0xdfe   :  { %v8729_v49 = vmax.f32 %v8713_v28, 0.0 }
 0xdff   :  { %v26660_v45 = vpack.c.bf16 %v8731_v53, %v8730_v39 }
 0xe00   :  { %v26662_v58 = vpack.c.bf16 %v8729_v49, %v8728_v21  ;;  %v20479_v59 = vpop.f32.mrb[68].mxu0  ;;  %v22754_v49 = vld [vmem:[%s28360_s5 + $0x28] sm:$0xff]  }
 0xe01   :  { %v8718_v31 = vadd.f32 %v20479_v59, %v26654_v36  ;;  %v8642_v3 = vpop.f32.mrb[69].mxu0  ;;  %v22755_v59 = vld [vmem:[%s28359_s4 + $0x20] sm:$0xff]  }
 0xe02   :  { %v8716_v11 = vadd.f32 %v26654_v36, %v8642_v3  ;;  %v20480_v6 = vpop.f32.mrb[70].mxu0  ;;  %20489 = vmatprep.subr.bf16.mxu0 %v26662_v58  ;;  %20509 = vmatprep.subr.bf16.mxu1 %v26662_v58  ;;  %v22757_v3 = vld [vmem:[%s28359_s4 + $0x40] sm:$0xff]  }
 0xe03   :  { %v8719_v33 = vadd.f32 %v20480_v6, %v26654_v36  ;;  %v8645_v48 = vpop.f32.mrb[71].mxu0  ;;  %20490 = vmatpush3.bf16.msra.mxu0 %v26662_v58  ;;  %20510 = vmatpush3.bf16.msra.mxu1 %v26662_v58  ;;  %v8734_v29 = vmax.f32 %v8718_v31, 0.0  ;;  %v22756_v31 = vld [vmem:[%s28359_s4 + $0x28] sm:$0xff]   ;;  %v22759_v6 = vld [vmem:[%s28359_s4 + $0x50] sm:$0xff]  }
 0xe04   :  { %v8717_v30 = vadd.f32 %v26654_v36, %v8645_v48  ;;  %20491 = vmatprep.subr.bf16.mxu0 %v26660_v45  ;;  %20511 = vmatprep.subr.bf16.mxu1 %v26660_v45  ;;  %v8732_v50 = vmax.f32 %v8716_v11, 0.0  ;;  %v22758_v11 = vld [vmem:[%s28359_s4 + $0x48] sm:$0xff]   ;;  %v22761_v48 = vld [vmem:[%s28359_s4 + $0x70] sm:$0xff]  }
 0xe05   :  { %v8735_v35 = vmax.f32 %v8719_v33, 0.0  ;;  %v22760_v33 = vld [vmem:[%s28359_s4 + $0x58] sm:$0xff]  }
 0xe06   :  { %v8733_v19 = vmax.f32 %v8717_v30, 0.0  ;;  %v22762_v30 = vld [vmem:[%s28359_s4 + $0x78] sm:$0xff]  }
 0xe07   :  { %v26674_v55 = vpack.c.bf16 %v8735_v35, %v8734_v29  ;;  %20492 = vmatpush3.bf16.msra.mxu0 %v26660_v45  ;;  %20512 = vmatpush3.bf16.msra.mxu1 %v26660_v45  ;;  %v22763_v29 = vld [vmem:[%s28359_s4 + $0x90] sm:$0xff]   ;;  %v22764_v35 = vld [vmem:[%s28359_s4 + $0x98] sm:$0xff]  }
 0xe08   :  { %v26678_v44 = vpack.c.bf16 %v8733_v19, %v8732_v50  ;;  %v20483_v25 = vpop.f32.mrb[72].mxu0  ;;  %v22765_v50 = vld [vmem:[%s28359_s4 + $0xa0] sm:$0xff]   ;;  %v22766_v19 = vld [vmem:[%s28359_s4 + $0xa8] sm:$0xff]  }
 0xe09   :  { %v8722_v51 = vadd.f32 %v20483_v25, %v26654_v36  ;;  %v8658_v46 = vpop.f32.mrb[73].mxu0  ;;  %v22767_v25 = vld [vmem:[%s28359_s4 + $0xc0] sm:$0xff]  }
 0xe0a   :  { %v8720_v24 = vadd.f32 %v26654_v36, %v8658_v46  ;;  %v20484_v52 = vpop.f32.mrb[74].mxu0  ;;  %20493 = vmatprep.subr.bf16.mxu0 %v26678_v44  ;;  %20513 = vmatprep.subr.bf16.mxu1 %v26678_v44 }
 0xe0b   :  { %v8723_v4 = vadd.f32 %v20484_v52, %v26654_v36  ;;  %v8661_v62 = vpop.f32.mrb[75].mxu0  ;;  %20494 = vmatpush3.bf16.msra.mxu0 %v26678_v44  ;;  %20514 = vmatpush3.bf16.msra.mxu1 %v26678_v44  ;;  %v8738_v15 = vmax.f32 %v8722_v51, 0.0 }
 0xe0c   :  { %v8721_v17 = vadd.f32 %v26654_v36, %v8661_v62  ;;  %20495 = vmatprep.subr.bf16.mxu0 %v26674_v55  ;;  %20515 = vmatprep.subr.bf16.mxu1 %v26674_v55  ;;  %v8736_v37 = vmax.f32 %v8720_v24, 0.0  ;;  %v22769_v62 = vld [vmem:[%s28359_s4 + $0xd0] sm:$0xff]  }
 0xe0d   :  { %v8739_v42 = vmax.f32 %v8723_v4, 0.0  ;;  %v22768_v4 = vld [vmem:[%s28359_s4 + $0xc8] sm:$0xff]  }
 0xe0e   :  { %v8737_v1 = vmax.f32 %v8721_v17, 0.0 }
 0xe0f   :  { %v26690_v34 = vpack.c.bf16 %v8739_v42, %v8738_v15  ;;  %20496 = vmatpush3.bf16.msra.mxu0 %v26674_v55  ;;  %20516 = vmatpush3.bf16.msra.mxu1 %v26674_v55 }
 0xe10   :  { %v26694_v40 = vpack.c.bf16 %v8737_v1, %v8736_v37  ;;  %v20487_v38 = vpop.f32.mrb[76].mxu0 }
 0xe11   :  { %v8726_v23 = vadd.f32 %v20487_v38, %v26654_v36  ;;  %v8674_v57 = vpop.f32.mrb[77].mxu0 }
 0xe12   :  { %v8724_v13 = vadd.f32 %v26654_v36, %v8674_v57  ;;  %v20488_v26 = vpop.f32.mrb[78].mxu0  ;;  %20497 = vmatprep.subr.bf16.mxu0 %v26694_v40  ;;  %20517 = vmatprep.subr.bf16.mxu1 %v26694_v40  ;;  %v22770_v57 = vld [vmem:[%s28359_s4 + $0xd8] sm:$0xff]  }
 0xe13   :  { %v8727_v60 = vadd.f32 %v20488_v26, %v26654_v36  ;;  %v8677_v18 = vpop.f32.mrb[79].mxu0  ;;  %20498 = vmatpush3.bf16.msra.mxu0 %v26694_v40  ;;  %20518 = vmatpush3.bf16.msra.mxu1 %v26694_v40  ;;  %v8742_v16 = vmax.f32 %v8726_v23, 0.0  ;;  %v22771_v23 = vld [vmem:[%s28359_s4 + $0x30] sm:$0xff]   ;;  %v22772_v26 = vld [vmem:[%s28359_s4 + $0x38] sm:$0xff]  }
 0xe14   :  { %v8725_v7 = vadd.f32 %v26654_v36, %v8677_v18  ;;  %20499 = vmatprep.subr.bf16.mxu0 %v26690_v34  ;;  %20519 = vmatprep.subr.bf16.mxu1 %v26690_v34  ;;  %v8740_v8 = vmax.f32 %v8724_v13, 0.0  ;;  %v22773_v13 = vld [vmem:[%s28360_s5 + $0x30] sm:$0xff]  }
 0xe15   :  { %v8743_v43 = vmax.f32 %v8727_v60, 0.0 }
 0xe16   :  { %v8741_v27 = vmax.f32 %v8725_v7, 0.0 }
 0xe17   :  { %v26706_v32 = vpack.c.bf16 %v8743_v43, %v8742_v16  ;;  %20500 = vmatpush3.bf16.msra.mxu0 %v26690_v34  ;;  %20520 = vmatpush3.bf16.msra.mxu1 %v26690_v34 }
 0xe18   :  { %v26710_v54 = vpack.c.bf16 %v8741_v27, %v8740_v8  ;;  %v22774_v27 = vld [vmem:[%s28360_s5 + $0x38] sm:$0xff]  }
 0xe1a   :  { %20501 = vmatprep.subr.bf16.mxu0 %v26710_v54  ;;  %20521 = vmatprep.subr.bf16.mxu1 %v26710_v54 }
 0xe1b   :  { %20502 = vmatpush3.bf16.msra.mxu0 %v26710_v54  ;;  %20522 = vmatpush3.bf16.msra.mxu1 %v26710_v54 }
 0xe1c   :  { %20503 = vmatprep.subr.bf16.mxu0 %v26706_v32  ;;  %20523 = vmatprep.subr.bf16.mxu1 %v26706_v32 }
 0xe1f   :  { %20504 = vmatpush3.bf16.msra.mxu0 %v26706_v32  ;;  %20524 = vmatpush3.bf16.msra.mxu1 %v26706_v32 }
 0xe20   :  { %20529 = vmatprep.subr.bf16.mxu1 %v22749_v2  ;;  %20537 = vmatprep.subr.bf16.mxu0 %v22751_v63 }
 0xe22   :  { %20506 = vmatmul.mubr.bf16.vlgmr.msra.gmra.mrb[160].mxu0 %v22747_v41  ;;  %20526 = vmatmul.mubr.bf16.vlgmr.msra.gmra.mrb[128].mxu1 %v22748_v20 }
 0xe23   :  { %20530 = vmatpush3.bf16.msra.mxu1 %v22749_v2  ;;  %20538 = vmatpush3.bf16.msra.mxu0 %v22751_v63  ;;  %v22775_v2 = vld [vmem:[%s28360_s5 + $0x40] sm:$0xff]  }
 0xe24   :  { %20531 = vmatprep.subr.bf16.mxu1 %v22750_v0  ;;  %20539 = vmatprep.subr.bf16.mxu0 %v22752_v14 }
 0xe27   :  { %20532 = vmatpush3.bf16.msra.mxu1 %v22750_v0  ;;  %20540 = vmatpush3.bf16.msra.mxu0 %v22752_v14 }
 0xe28   :  { %20545 = vmatprep.subr.bf16.mxu1 %v26662_v58  ;;  %20565 = vmatprep.subr.bf16.mxu0 %v22753_v47 }
 0xef5   :  { %v20507_v36 = vpop.f32.mrb[160].mxu0  ;;  %v20527_v56 = vpop.f32.mrb[128].mxu1 }
 0xef6   :  { %v8802_v10 = vpop.f32.mrb[161].mxu0  ;;  %v8874_v22 = vpop.f32.mrb[129].mxu1 }
 0xef7   :  { %v20508_v61 = vpop.f32.mrb[162].mxu0  ;;  %v20528_v9 = vpop.f32.mrb[130].mxu1 }
 0xef8   :  { %v8818_v5 = vpack.c.bf16 %v20508_v61, %v20507_v36  ;;  %v8890_v12 = vpack.c.bf16 %v20528_v9, %v20527_v56  ;;  %v8805_v28 = vpop.f32.mrb[163].mxu0  ;;  %v8877_v39 = vpop.f32.mrb[131].mxu1 }
 0xef9   :  { %v8817_v53 = vpack.c.bf16 %v8805_v28, %v8802_v10  ;;  %v8889_v21 = vpack.c.bf16 %v8877_v39, %v8874_v22  ;;  %v22778_v28 = vld [vmem:[%s28360_s5 + $0x58] sm:$0xff]   ;;  %v22779_v39 = vld [vmem:[%s28359_s4 + $0x60] sm:$0xff]  }
 0xefb   :  { %20533 = vmatprep.mubr.msk.bf16.mxu1 %vm8908_vm3, %v8889_v21  ;;  %20541 = vmatprep.mubr.msk.bf16.mxu0 %vm8908_vm3, %v8817_v53  ;;  %v22781_v53 = vld [vmem:[%s28360_s5 + $0x60] sm:$0xff]   ;;  %v22780_v21 = vld [vmem:[%s28359_s4 + $0x68] sm:$0xff]  }
 0xefc   :  { %20534 = vmatmul.mubr.msk.bf16.vlgmr.msra.gmra.mrb[132].mxu1 %vm8908_vm3, %v8890_v12  ;;  %20542 = vmatmul.mubr.msk.bf16.vlgmr.msra.gmra.mrb[164].mxu0 %vm8908_vm3, %v8818_v5  ;;  %v22776_v5 = vld [vmem:[%s28360_s5 + $0x48] sm:$0xff]   ;;  %v22777_v12 = vld [vmem:[%s28360_s5 + $0x50] sm:$0xff]  }
 0xefd   :  { %20546 = vmatpush3.bf16.msra.mxu1 %v26662_v58  ;;  %20566 = vmatpush3.bf16.msra.mxu0 %v22753_v47 }
 0xefe   :  { %20547 = vmatprep.subr.bf16.mxu1 %v26660_v45  ;;  %20567 = vmatprep.subr.bf16.mxu0 %v22754_v49 }
 0xeff   :  { %20561 = vmatprep.mubr.bf16.mxu1 %v22755_v59  ;;  %v22783_v59 = vld [vmem:[%s28360_s5 + $0x70] sm:$0xff]  }
 0xf01   :  { %20548 = vmatpush3.bf16.msra.mxu1 %v26660_v45  ;;  %20568 = vmatpush3.bf16.msra.mxu0 %v22754_v49  ;;  %v22782_v49 = vld [vmem:[%s28360_s5 + $0x68] sm:$0xff]  }
 0xf02   :  { %20549 = vmatprep.subr.bf16.mxu1 %v26678_v44  ;;  %20573 = vmatprep.subr.bf16.mxu0 %v26662_v58 }
 0xf05   :  { %20550 = vmatpush3.bf16.msra.mxu1 %v26678_v44 }
 0xf06   :  { %20551 = vmatprep.subr.bf16.mxu1 %v26674_v55 }
 0xf09   :  { %20552 = vmatpush3.bf16.msra.mxu1 %v26674_v55 }
 0xf0a   :  { %20553 = vmatprep.subr.bf16.mxu1 %v26694_v40 }
 0xf0d   :  { %20554 = vmatpush3.bf16.msra.mxu1 %v26694_v40 }
 0xf0e   :  { %20555 = vmatprep.subr.bf16.mxu1 %v26690_v34 }
 0xf11   :  { %20556 = vmatpush3.bf16.msra.mxu1 %v26690_v34 }
 0xf12   :  { %20557 = vmatprep.subr.bf16.mxu1 %v26710_v54 }
 0xf15   :  { %20558 = vmatpush3.bf16.msra.mxu1 %v26710_v54 }
 0xf16   :  { %20559 = vmatprep.subr.bf16.mxu1 %v26706_v32 }
 0xf19   :  { %20560 = vmatpush3.bf16.msra.mxu1 %v26706_v32 }
 0xf1a   :  { %20601 = vmatprep.subr.bf16.mxu1 %v26662_v58 }
 0xf1c   :  { %20562 = vmatmul.mubr.bf16.vlgmr.msra.gmra.mrb[136].mxu1 %v22756_v31 }
 0xf1d   :  { %20602 = vmatpush3.bf16.msra.mxu1 %v26662_v58  ;;  %20617 = vmatprep.mubr.bf16.mxu1 %v22757_v3 }
 0xf1e   :  { %20603 = vmatprep.subr.bf16.mxu1 %v26660_v45 }
 0xf21   :  { %20604 = vmatpush3.bf16.msra.mxu1 %v26660_v45 }
 0xf22   :  { %20605 = vmatprep.subr.bf16.mxu1 %v26678_v44 }
 0xf25   :  { %20606 = vmatpush3.bf16.msra.mxu1 %v26678_v44 }
 0xf26   :  { %20607 = vmatprep.subr.bf16.mxu1 %v26674_v55 }
 0xf29   :  { %20608 = vmatpush3.bf16.msra.mxu1 %v26674_v55 }
 0xf2a   :  { %20609 = vmatprep.subr.bf16.mxu1 %v26694_v40 }
 0xf2d   :  { %20610 = vmatpush3.bf16.msra.mxu1 %v26694_v40 }
 0xf2e   :  { %20611 = vmatprep.subr.bf16.mxu1 %v26690_v34 }
 0xf31   :  { %20612 = vmatpush3.bf16.msra.mxu1 %v26690_v34 }
 0xf32   :  { %20613 = vmatprep.subr.bf16.mxu1 %v26710_v54 }
 0xf35   :  { %20614 = vmatpush3.bf16.msra.mxu1 %v26710_v54 }
 0xf36   :  { %20615 = vmatprep.subr.bf16.mxu1 %v26706_v32 }
 0xf39   :  { %20616 = vmatpush3.bf16.msra.mxu1 %v26706_v32 }
 0xf3a   :  { %20629 = vmatprep.subr.bf16.mxu1 %v26662_v58 }
 0xf3c   :  { %20618 = vmatmul.mubr.bf16.vlgmr.msra.gmra.mrb[140].mxu1 %v22758_v11 }
 0xf3d   :  { %20630 = vmatpush3.bf16.msra.mxu1 %v26662_v58  ;;  %20645 = vmatprep.mubr.bf16.mxu1 %v22759_v6 }
 0xf3e   :  { %20631 = vmatprep.subr.bf16.mxu1 %v26660_v45 }
 0xf41   :  { %20632 = vmatpush3.bf16.msra.mxu1 %v26660_v45 }
 0xf42   :  { %20633 = vmatprep.subr.bf16.mxu1 %v26678_v44 }
 0xf45   :  { %20634 = vmatpush3.bf16.msra.mxu1 %v26678_v44 }
 0xf46   :  { %20635 = vmatprep.subr.bf16.mxu1 %v26674_v55 }
 0xf49   :  { %20636 = vmatpush3.bf16.msra.mxu1 %v26674_v55 }
 0xf4a   :  { %20637 = vmatprep.subr.bf16.mxu1 %v26694_v40 }
 0xf4d   :  { %20638 = vmatpush3.bf16.msra.mxu1 %v26694_v40 }
 0xf4e   :  { %20639 = vmatprep.subr.bf16.mxu1 %v26690_v34 }
 0xf51   :  { %20640 = vmatpush3.bf16.msra.mxu1 %v26690_v34 }
 0xf52   :  { %20641 = vmatprep.subr.bf16.mxu1 %v26710_v54 }
 0xf55   :  { %20642 = vmatpush3.bf16.msra.mxu1 %v26710_v54 }
 0xf56   :  { %20643 = vmatprep.subr.bf16.mxu1 %v26706_v32 }
 0xf59   :  { %20644 = vmatpush3.bf16.msra.mxu1 %v26706_v32 }
 0xf5a   :  { %20685 = vmatprep.subr.bf16.mxu1 %v26662_v58 }
 0xf5c   :  { %20646 = vmatmul.mubr.bf16.vlgmr.msra.gmra.mrb[144].mxu1 %v22760_v33 }
 0xf5d   :  { %20686 = vmatpush3.bf16.msra.mxu1 %v26662_v58  ;;  %20701 = vmatprep.mubr.bf16.mxu1 %v22761_v48 }
 0xf5e   :  { %20687 = vmatprep.subr.bf16.mxu1 %v26660_v45 }
 0xf61   :  { %20688 = vmatpush3.bf16.msra.mxu1 %v26660_v45 }
 0xf62   :  { %20689 = vmatprep.subr.bf16.mxu1 %v26678_v44 }
 0xf65   :  { %20690 = vmatpush3.bf16.msra.mxu1 %v26678_v44 }
 0xf66   :  { %20691 = vmatprep.subr.bf16.mxu1 %v26674_v55 }
 0xf69   :  { %20692 = vmatpush3.bf16.msra.mxu1 %v26674_v55 }
 0xf6a   :  { %20693 = vmatprep.subr.bf16.mxu1 %v26694_v40 }
 0xf6d   :  { %20694 = vmatpush3.bf16.msra.mxu1 %v26694_v40 }
 0xf6e   :  { %20695 = vmatprep.subr.bf16.mxu1 %v26690_v34 }
 0xf71   :  { %20696 = vmatpush3.bf16.msra.mxu1 %v26690_v34 }
 0xf72   :  { %20697 = vmatprep.subr.bf16.mxu1 %v26710_v54 }
 0xf75   :  { %20698 = vmatpush3.bf16.msra.mxu1 %v26710_v54 }
 0xf76   :  { %20699 = vmatprep.subr.bf16.mxu1 %v26706_v32 }
 0xf79   :  { %20700 = vmatpush3.bf16.msra.mxu1 %v26706_v32 }
 0xf7a   :  { %20741 = vmatprep.subr.bf16.mxu1 %v26662_v58 }
 0xf7c   :  { %20702 = vmatmul.mubr.bf16.vlgmr.msra.gmra.mrb[148].mxu1 %v22762_v30 }
 0xf7d   :  { %20742 = vmatpush3.bf16.msra.mxu1 %v26662_v58  ;;  %20757 = vmatprep.mubr.bf16.mxu1 %v22763_v29 }
 0xf7e   :  { %20743 = vmatprep.subr.bf16.mxu1 %v26660_v45 }
 0xf81   :  { %20744 = vmatpush3.bf16.msra.mxu1 %v26660_v45 }
 0xf82   :  { %20745 = vmatprep.subr.bf16.mxu1 %v26678_v44 }
 0xf85   :  { %20746 = vmatpush3.bf16.msra.mxu1 %v26678_v44 }
 0xf86   :  { %20747 = vmatprep.subr.bf16.mxu1 %v26674_v55 }
 0xf89   :  { %20748 = vmatpush3.bf16.msra.mxu1 %v26674_v55 }
 0xf8a   :  { %20749 = vmatprep.subr.bf16.mxu1 %v26694_v40 }
 0xf8d   :  { %20750 = vmatpush3.bf16.msra.mxu1 %v26694_v40 }
 0xf8e   :  { %20751 = vmatprep.subr.bf16.mxu1 %v26690_v34 }
 0xf91   :  { %20752 = vmatpush3.bf16.msra.mxu1 %v26690_v34 }
 0xf92   :  { %20753 = vmatprep.subr.bf16.mxu1 %v26710_v54 }
 0xf95   :  { %20754 = vmatpush3.bf16.msra.mxu1 %v26710_v54 }
 0xf96   :  { %20755 = vmatprep.subr.bf16.mxu1 %v26706_v32 }
 0xf99   :  { %20756 = vmatpush3.bf16.msra.mxu1 %v26706_v32 }
 0xf9a   :  { %20769 = vmatprep.subr.bf16.mxu1 %v26662_v58 }
 0xf9c   :  { %20758 = vmatmul.mubr.bf16.vlgmr.msra.gmra.mrb[152].mxu1 %v22764_v35 }
 0xf9d   :  { %20770 = vmatpush3.bf16.msra.mxu1 %v26662_v58  ;;  %20785 = vmatprep.mubr.bf16.mxu1 %v22765_v50 }
 0xf9e   :  { %20771 = vmatprep.subr.bf16.mxu1 %v26660_v45 }
 0xfa1   :  { %20772 = vmatpush3.bf16.msra.mxu1 %v26660_v45 }
 0xfa2   :  { %20773 = vmatprep.subr.bf16.mxu1 %v26678_v44 }
 0xfa5   :  { %20774 = vmatpush3.bf16.msra.mxu1 %v26678_v44 }
 0xfa6   :  { %20775 = vmatprep.subr.bf16.mxu1 %v26674_v55 }
 0xfa9   :  { %20776 = vmatpush3.bf16.msra.mxu1 %v26674_v55 }
 0xfaa   :  { %20777 = vmatprep.subr.bf16.mxu1 %v26694_v40 }
 0xfad   :  { %20778 = vmatpush3.bf16.msra.mxu1 %v26694_v40 }
 0xfae   :  { %20779 = vmatprep.subr.bf16.mxu1 %v26690_v34 }
 0xfb1   :  { %20780 = vmatpush3.bf16.msra.mxu1 %v26690_v34 }
 0xfb2   :  { %20781 = vmatprep.subr.bf16.mxu1 %v26710_v54 }
 0xfb5   :  { %20782 = vmatpush3.bf16.msra.mxu1 %v26710_v54 }
 0xfb6   :  { %20783 = vmatprep.subr.bf16.mxu1 %v26706_v32 }
 0xfb9   :  { %20784 = vmatpush3.bf16.msra.mxu1 %v26706_v32 }
 0xfba   :  { %20825 = vmatprep.subr.bf16.mxu1 %v26662_v58 }
 0xfbc   :  { %20786 = vmatmul.mubr.bf16.vlgmr.msra.gmra.mrb[156].mxu1 %v22766_v19 }
 0xfbd   :  { %20826 = vmatpush3.bf16.msra.mxu1 %v26662_v58  ;;  %20841 = vmatprep.mubr.bf16.mxu1 %v22767_v25 }
 0xfbe   :  { %20827 = vmatprep.subr.bf16.mxu1 %v26660_v45 }
 0xfc1   :  { %20828 = vmatpush3.bf16.msra.mxu1 %v26660_v45 }
 0xfc2   :  { %20829 = vmatprep.subr.bf16.mxu1 %v26678_v44 }
 0xfc5   :  { %20830 = vmatpush3.bf16.msra.mxu1 %v26678_v44 }
 0xfc6   :  { %20831 = vmatprep.subr.bf16.mxu1 %v26674_v55 }
 0xfc9   :  { %20832 = vmatpush3.bf16.msra.mxu1 %v26674_v55 }
 0xfca   :  { %20833 = vmatprep.subr.bf16.mxu1 %v26694_v40 }
 0xfcd   :  { %20834 = vmatpush3.bf16.msra.mxu1 %v26694_v40 }
 0xfce   :  { %20835 = vmatprep.subr.bf16.mxu1 %v26690_v34 }
 0xfcf   :  { %v26895_v51 = vpop.f32.mrb[132].mxu1 }
 0xfd0   :  { %v26897_v46 = vpop.f32.mrb[133].mxu1 }
 0xfd1   :  { %20836 = vmatpush3.bf16.msra.mxu1 %v26690_v34  ;;  %v26900_v24 = vpop.f32.mrb[134].mxu1 }
 0xfd2   :  { %20837 = vmatprep.subr.bf16.mxu1 %v26710_v54  ;;  %v26903_v52 = vpop.f32.mrb[135].mxu1 }
 0xfd5   :  { %20838 = vmatpush3.bf16.msra.mxu1 %v26710_v54 }
 0xfd6   :  { %20839 = vmatprep.subr.bf16.mxu1 %v26706_v32 }
 0xfd9   :  { %20840 = vmatpush3.bf16.msra.mxu1 %v26706_v32 }
 0xfda   :  { %20853 = vmatprep.subr.bf16.mxu1 %v26662_v58 }
 0xfdc   :  { %20842 = vmatmul.mubr.bf16.vlgmr.msra.gmra.mrb[160].mxu1 %v22768_v4  ;;  %v22784_v4 = vld [vmem:[%s28360_s5 + $0x78] sm:$0xff]  }
 0xfdd   :  { %20854 = vmatpush3.bf16.msra.mxu1 %v26662_v58  ;;  %20869 = vmatprep.mubr.bf16.mxu1 %v22769_v62  ;;  %v22785_v62 = vld [vmem:[%s28359_s4 + $0x80] sm:$0xff]  }
 0xfde   :  { %20855 = vmatprep.subr.bf16.mxu1 %v26660_v45 }
 0xfe1   :  { %20856 = vmatpush3.bf16.msra.mxu1 %v26660_v45 }
 0xfe2   :  { %20857 = vmatprep.subr.bf16.mxu1 %v26678_v44 }
 0xfe5   :  { %20858 = vmatpush3.bf16.msra.mxu1 %v26678_v44 }
 0xfe6   :  { %20859 = vmatprep.subr.bf16.mxu1 %v26674_v55 }
 0xfe9   :  { %20860 = vmatpush3.bf16.msra.mxu1 %v26674_v55 }
 0xfea   :  { %20861 = vmatprep.subr.bf16.mxu1 %v26694_v40 }
 0xfed   :  { %20862 = vmatpush3.bf16.msra.mxu1 %v26694_v40 }
 0xfee   :  { %20863 = vmatprep.subr.bf16.mxu1 %v26690_v34 }
 0xfef   :  { %v20563_v17 = vpop.f32.mrb[136].mxu1 }
 0xff0   :  { %v9082_v15 = vpop.f32.mrb[137].mxu1 }
 0xff1   :  { %v20564_v42 = vpop.f32.mrb[138].mxu1  ;;  %20864 = vmatpush3.bf16.msra.mxu1 %v26690_v34 }
 0xff2   :  { %v9098_v37 = vpack.c.bf16 %v20564_v42, %v20563_v17  ;;  %v9085_v1 = vpop.f32.mrb[139].mxu1  ;;  %20865 = vmatprep.subr.bf16.mxu1 %v26710_v54  ;;  %v22787_v17 = vld [vmem:[%s28360_s5 + $0x80] sm:$0xff]  }
 0xff3   :  { %v9097_v38 = vpack.c.bf16 %v9085_v1, %v9082_v15  ;;  %v22786_v15 = vld [vmem:[%s28359_s4 + $0x88] sm:$0xff]  }
 0xff5   :  { %20569 = vmatprep.mubr.msk.bf16.mxu0 %vm8908_vm3, %v9097_v38  ;;  %20866 = vmatpush3.bf16.msra.mxu1 %v26710_v54 }
 0xff6   :  { %20570 = vmatmul.mubr.msk.bf16.vlgmr.msra.gmra.mrb[164].mxu0 %vm8908_vm3, %v9098_v37  ;;  %20867 = vmatprep.subr.bf16.mxu1 %v26706_v32 }
 0xff7   :  { %20574 = vmatpush3.bf16.msra.mxu0 %v26662_v58  ;;  %20589 = vmatprep.mubr.bf16.mxu0 %v22771_v23 }
 0xff8   :  { %20575 = vmatprep.subr.bf16.mxu0 %v26660_v45 }
 0xff9   :  { %20868 = vmatpush3.bf16.msra.mxu1 %v26706_v32 }
 0xffa   :  { %20909 = vmatprep.subr.bf16.mxu1 %v26662_v58 }
 0xffb   :  { %20576 = vmatpush3.bf16.msra.mxu0 %v26660_v45 }
 0xffc   :  { %20577 = vmatprep.subr.bf16.mxu0 %v26678_v44  ;;  %20870 = vmatmul.mubr.bf16.vlgmr.msra.gmra.mrb[164].mxu1 %v22770_v57 }
 0xffd   :  { %20910 = vmatpush3.bf16.msra.mxu1 %v26662_v58 }
 0xffe   :  { %20911 = vmatprep.subr.bf16.mxu1 %v26660_v45 }
 0xfff   :  { %20578 = vmatpush3.bf16.msra.mxu0 %v26678_v44 }
0x1000   :  { %20579 = vmatprep.subr.bf16.mxu0 %v26674_v55 }
0x1001   :  { %20912 = vmatpush3.bf16.msra.mxu1 %v26660_v45 }
0x1002   :  { %20913 = vmatprep.subr.bf16.mxu1 %v26678_v44 }
0x1003   :  { %20580 = vmatpush3.bf16.msra.mxu0 %v26674_v55 }
0x1004   :  { %20581 = vmatprep.subr.bf16.mxu0 %v26694_v40 }
0x1005   :  { %20914 = vmatpush3.bf16.msra.mxu1 %v26678_v44 }
0x1006   :  { %20915 = vmatprep.subr.bf16.mxu1 %v26674_v55 }
0x1007   :  { %20582 = vmatpush3.bf16.msra.mxu0 %v26694_v40 }
0x1008   :  { %20583 = vmatprep.subr.bf16.mxu0 %v26690_v34 }
0x1009   :  { %20916 = vmatpush3.bf16.msra.mxu1 %v26674_v55 }
0x100a   :  { %20917 = vmatprep.subr.bf16.mxu1 %v26694_v40 }
0x100b   :  { %20584 = vmatpush3.bf16.msra.mxu0 %v26690_v34 }
0x100c   :  { %20585 = vmatprep.subr.bf16.mxu0 %v26710_v54 }
0x100d   :  { %20918 = vmatpush3.bf16.msra.mxu1 %v26694_v40 }
0x100e   :  { %20919 = vmatprep.subr.bf16.mxu1 %v26690_v34 }
0x100f   :  { %20586 = vmatpush3.bf16.msra.mxu0 %v26710_v54  ;;  %v20619_v60 = vpop.f32.mrb[140].mxu1 }
0x1010   :  { %20587 = vmatprep.subr.bf16.mxu0 %v26706_v32  ;;  %v9370_v18 = vpop.f32.mrb[141].mxu1 }
0x1011   :  { %20920 = vmatpush3.bf16.msra.mxu1 %v26690_v34  ;;  %v20620_v7 = vpop.f32.mrb[142].mxu1 }
0x1012   :  { %20921 = vmatprep.subr.bf16.mxu1 %v26710_v54  ;;  %v9373_v16 = vpop.f32.mrb[143].mxu1  ;;  %v9386_v43 = vpack.c.bf16 %v20620_v7, %v20619_v60 }
0x1013   :  { %20588 = vmatpush3.bf16.msra.mxu0 %v26706_v32  ;;  %v9385_v8 = vpack.c.bf16 %v9373_v16, %v9370_v18 }
0x1014   :  { %20593 = vmatprep.subr.bf16.mxu0 %v22773_v13 }
0x1015   :  { %20922 = vmatpush3.bf16.msra.mxu1 %v26710_v54 }
0x1016   :  { %20590 = vmatmul.mubr.bf16.vlgmr.msra.gmra.mrb[168].mxu0 %v22772_v26  ;;  %20923 = vmatprep.subr.bf16.mxu1 %v26706_v32  ;;  %v22789_v26 = vld [vmem:[%s28360_s5 + $0x90] sm:$0xff]  }
0x1017   :  { %20594 = vmatpush3.bf16.msra.mxu0 %v22773_v13  ;;  %v22788_v13 = vld [vmem:[%s28360_s5 + $0x88] sm:$0xff]  }
0x1018   :  { %20595 = vmatprep.subr.bf16.mxu0 %v22774_v27 }
0x1019   :  { %20924 = vmatpush3.bf16.msra.mxu1 %v26706_v32 }
0x101b   :  { %20596 = vmatpush3.bf16.msra.mxu0 %v22774_v27 }
0x101c   :  { %20621 = vmatprep.subr.bf16.mxu0 %v22775_v2 }
0x102f   :  { %v20647_v63 = vpop.f32.mrb[144].mxu1 }
0x1030   :  { %v9514_v41 = vpop.f32.mrb[145].mxu1 }
0x1031   :  { %v20648_v20 = vpop.f32.mrb[146].mxu1 }
0x1032   :  { %v9530_v0 = vpack.c.bf16 %v20648_v20, %v20647_v63  ;;  %v9517_v14 = vpop.f32.mrb[147].mxu1 }
0x1033   :  { %v9529_v47 = vpack.c.bf16 %v9517_v14, %v9514_v41  ;;  %v22790_v14 = vld [vmem:[%s28360_s5 + $0x98] sm:$0xff]  }
0x104f   :  { %v20703_v31 = vpop.f32.mrb[148].mxu1 }
0x1050   :  { %v9802_v3 = vpop.f32.mrb[149].mxu1 }
0x1051   :  { %v20704_v11 = vpop.f32.mrb[150].mxu1 }
0x1052   :  { %v9818_v6 = vpack.c.bf16 %v20704_v11, %v20703_v31  ;;  %v9805_v33 = vpop.f32.mrb[151].mxu1 }
0x1053   :  { %v9817_v48 = vpack.c.bf16 %v9805_v33, %v9802_v3  ;;  %v22803_v33 = vld [vmem:[%s28359_s4 + $0xf0] sm:$0xff]  }
0x1054   :  { %20925 = vmatprep.mubr.bf16.mxu1 %v22803_v33  ;;  %v22817_v33 = vld [vmem:[%s28363_s8 + $0x40] sm:$0xff]  }
0x106f   :  { %v20759_v42 = vpop.f32.mrb[152].mxu1 }
0x1070   :  { %v10090_v37 = vpop.f32.mrb[153].mxu1 }
0x1071   :  { %v20760_v1 = vpop.f32.mrb[154].mxu1 }
0x1072   :  { %v10093_v38 = vpop.f32.mrb[155].mxu1  ;;  %v10106_v23 = vpack.c.bf16 %v20760_v1, %v20759_v42 }
0x1073   :  { %v10105_v57 = vpack.c.bf16 %v10093_v38, %v10090_v37 }
0x108f   :  { %v20787_v60 = vpop.f32.mrb[156].mxu1 }
0x1090   :  { %v10234_v18 = vpop.f32.mrb[157].mxu1 }
0x1091   :  { %v20788_v7 = vpop.f32.mrb[158].mxu1 }
0x1092   :  { %v10250_v16 = vpack.c.bf16 %v20788_v7, %v20787_v60  ;;  %v22808_v60 = vld [vmem:[%s28360_s5 + $0xf8] sm:$0xff]  }
0x10e9   :  { %v20591_v36 = vpop.f32.mrb[168].mxu0 }
0x10ea   :  { %v9226_v56 = vpop.f32.mrb[169].mxu0 }
0x10eb   :  { %v20592_v10 = vpop.f32.mrb[170].mxu0 }
0x10ec   :  { %v9242_v22 = vpack.c.bf16 %v20592_v10, %v20591_v36  ;;  %v9229_v61 = vpop.f32.mrb[171].mxu0  ;;  %v22792_v36 = vld [vmem:[%s28360_s5 + $0xa8] sm:$0xff]   ;;  %v22795_v10 = vld [vmem:[%s28360_s5 + $0xb0] sm:$0xff]  }
0x10ed   :  { %v9241_v9 = vpack.c.bf16 %v9229_v61, %v9226_v56  ;;  %v22793_v56 = vld [vmem:[%s28359_s4 + $0xb0] sm:$0xff]  }
0x10ef   :  { %20597 = vmatprep.mubr.msk.bf16.mxu0 %vm8908_vm3, %v9241_v9 }
0x10f0   :  { %20598 = vmatmul.mubr.msk.bf16.vlgmr.msra.gmra.mrb[164].mxu0 %vm8908_vm3, %v9242_v22  ;;  %v22794_v22 = vld [vmem:[%s28359_s4 + $0xb8] sm:$0xff]  }
0x10f1   :  { %20622 = vmatpush3.bf16.msra.mxu0 %v22775_v2  ;;  %20625 = vmatprep.mubr.msk.bf16.mxu0 %vm8908_vm3, %v9385_v8 }
0x10f2   :  { %20623 = vmatprep.subr.bf16.mxu0 %v22776_v5 }
0x10f5   :  { %20624 = vmatpush3.bf16.msra.mxu0 %v22776_v5 }
0x10f6   :  { %20649 = vmatprep.subr.bf16.mxu0 %v22777_v12 }
0x10fc   :  { %20626 = vmatmul.mubr.msk.bf16.vlgmr.msra.gmra.mrb[164].mxu0 %vm8908_vm3, %v9386_v43  ;;  %v10237_v43 = vpop.f32.mrb[159].mxu1 }
0x10fd   :  { %20650 = vmatpush3.bf16.msra.mxu0 %v22777_v12  ;;  %20653 = vmatprep.mubr.msk.bf16.mxu0 %vm8908_vm3, %v9529_v47  ;;  %v10249_v8 = vpack.c.bf16 %v10237_v43, %v10234_v18  ;;  %v22791_v47 = vld [vmem:[%s28360_s5 + $0xa0] sm:$0xff]   ;;  %v20843_v61 = vpop.f32.mrb[160].mxu1  ;;  %v23026_v18 = vmov 0.0  }
0x10fe   :  { %20651 = vmatprep.subr.bf16.mxu0 %v22778_v28  ;;  %v10522_v9 = vpop.f32.mrb[161].mxu1  ;;  %20945 = vmatprep.subr.bf16.mxu1 %v23026_v18 }
0x10ff   :  { %v20844_v5 = vpop.f32.mrb[162].mxu1 }
0x1100   :  { %v10525_v12 = vpop.f32.mrb[163].mxu1 }
0x1101   :  { %20652 = vmatpush3.bf16.msra.mxu0 %v22778_v28  ;;  %v10538_v28 = vpack.c.bf16 %v20844_v5, %v20843_v61  ;;  %v22810_v5 = vld [vmem:[%s28363_s8 + $0x28] sm:$0xff]  }
0x1102   :  { %20657 = vmatprep.subr.bf16.mxu0 %v26662_v58 }
0x1108   :  { %20654 = vmatmul.mubr.msk.bf16.vlgmr.msra.gmra.mrb[164].mxu0 %vm8908_vm3, %v9530_v0 }
0x1109   :  { %20658 = vmatpush3.bf16.msra.mxu0 %v26662_v58  ;;  %20673 = vmatprep.mubr.bf16.mxu0 %v22779_v39  ;;  %v10537_v39 = vpack.c.bf16 %v10525_v12, %v10522_v9  ;;  %v22811_v12 = vld [vmem:[%s28363_s8 + $0x30] sm:$0xff]  }
0x110a   :  { %20659 = vmatprep.subr.bf16.mxu0 %v26660_v45 }
0x110d   :  { %20660 = vmatpush3.bf16.msra.mxu0 %v26660_v45 }
0x110e   :  { %20661 = vmatprep.subr.bf16.mxu0 %v26678_v44 }
0x1111   :  { %20662 = vmatpush3.bf16.msra.mxu0 %v26678_v44 }
0x1112   :  { %20663 = vmatprep.subr.bf16.mxu0 %v26674_v55 }
0x1115   :  { %20664 = vmatpush3.bf16.msra.mxu0 %v26674_v55 }
0x1116   :  { %20665 = vmatprep.subr.bf16.mxu0 %v26694_v40 }
0x1119   :  { %20666 = vmatpush3.bf16.msra.mxu0 %v26694_v40 }
0x111a   :  { %20667 = vmatprep.subr.bf16.mxu0 %v26690_v34 }
0x111d   :  { %20668 = vmatpush3.bf16.msra.mxu0 %v26690_v34 }
0x111e   :  { %20669 = vmatprep.subr.bf16.mxu0 %v26710_v54 }
0x1121   :  { %20670 = vmatpush3.bf16.msra.mxu0 %v26710_v54 }
0x1122   :  { %20671 = vmatprep.subr.bf16.mxu0 %v26706_v32 }
0x1125   :  { %20672 = vmatpush3.bf16.msra.mxu0 %v26706_v32 }
0x1126   :  { %20677 = vmatprep.subr.bf16.mxu0 %v22781_v53 }
0x1128   :  { %20674 = vmatmul.mubr.bf16.vlgmr.msra.gmra.mrb[172].mxu0 %v22780_v21  ;;  %v22797_v21 = vld [vmem:[%s28360_s5 + $0xc0] sm:$0xff]  }
0x1129   :  { %20678 = vmatpush3.bf16.msra.mxu0 %v22781_v53  ;;  %v22796_v53 = vld [vmem:[%s28360_s5 + $0xb8] sm:$0xff]  }
0x112a   :  { %20679 = vmatprep.subr.bf16.mxu0 %v22782_v49 }
0x112d   :  { %20680 = vmatpush3.bf16.msra.mxu0 %v22782_v49  ;;  %v20871_v49 = vpop.f32.mrb[164].mxu1 }
0x112e   :  { %20705 = vmatprep.subr.bf16.mxu0 %v22783_v59 }
0x11fb   :  { %v20675_v30 = vpop.f32.mrb[172].mxu0 }
0x11fc   :  { %v9658_v29 = vpop.f32.mrb[173].mxu0 }
0x11fd   :  { %v20676_v35 = vpop.f32.mrb[174].mxu0 }
0x11fe   :  { %v9674_v50 = vpack.c.bf16 %v20676_v35, %v20675_v30  ;;  %v9661_v19 = vpop.f32.mrb[175].mxu0 }
0x11ff   :  { %v9673_v25 = vpack.c.bf16 %v9661_v19, %v9658_v29 }
0x1201   :  { %20681 = vmatprep.mubr.msk.bf16.mxu0 %vm8908_vm3, %v9673_v25 }
0x1202   :  { %20682 = vmatmul.mubr.msk.bf16.vlgmr.msra.gmra.mrb[164].mxu0 %vm8908_vm3, %v9674_v50 }
0x1203   :  { %20706 = vmatpush3.bf16.msra.mxu0 %v22783_v59  ;;  %20709 = vmatprep.mubr.msk.bf16.mxu0 %vm8908_vm3, %v9817_v48  ;;  %v10666_v59 = vpop.f32.mrb[165].mxu1  ;;  %v22804_v48 = vld [vmem:[%s28359_s4 + $0xf8] sm:$0xff]  }
0x1204   :  { %20707 = vmatprep.subr.bf16.mxu0 %v22784_v4  ;;  %v20872_v31 = vpop.f32.mrb[166].mxu1  ;;  %20926 = vmatmul.mubr.bf16.vlgmr.msra.gmra.mrb[168].mxu1 %v22804_v48 }
0x1205   :  { %v10682_v3 = vpack.c.bf16 %v20872_v31, %v20871_v49  ;;  %v10669_v11 = vpop.f32.mrb[167].mxu1  ;;  %20949 = vmatprep.mubr.msk.bf16.mxu1 %vm23027_vm4, %v23026_v18  ;;  %v22816_v49 = vld [vmem:[%s28363_s8 + $0x18] sm:$0xff]  }
0x1207   :  { %20708 = vmatpush3.bf16.msra.mxu0 %v22784_v4  ;;  %v22798_v4 = vld [vmem:[%s28360_s5 + $0xc8] sm:$0xff]  }
0x1208   :  { %20713 = vmatprep.subr.bf16.mxu0 %v26662_v58 }
0x120e   :  { %20710 = vmatmul.mubr.msk.bf16.vlgmr.msra.gmra.mrb[164].mxu0 %vm8908_vm3, %v9818_v6  ;;  %v10681_v6 = vpack.c.bf16 %v10669_v11, %v10666_v59 }
0x120f   :  { %20714 = vmatpush3.bf16.msra.mxu0 %v26662_v58  ;;  %20729 = vmatprep.mubr.bf16.mxu0 %v22785_v62  ;;  %v22799_v62 = vld [vmem:[%s28360_s5 + $0xd0] sm:$0xff]  }
0x1210   :  { %20715 = vmatprep.subr.bf16.mxu0 %v26660_v45 }
0x1213   :  { %20716 = vmatpush3.bf16.msra.mxu0 %v26660_v45 }
0x1214   :  { %20717 = vmatprep.subr.bf16.mxu0 %v26678_v44 }
0x1217   :  { %20718 = vmatpush3.bf16.msra.mxu0 %v26678_v44 }
0x1218   :  { %20719 = vmatprep.subr.bf16.mxu0 %v26674_v55 }
0x121b   :  { %20720 = vmatpush3.bf16.msra.mxu0 %v26674_v55 }
0x121c   :  { %20721 = vmatprep.subr.bf16.mxu0 %v26694_v40 }
0x121f   :  { %20722 = vmatpush3.bf16.msra.mxu0 %v26694_v40 }
0x1220   :  { %20723 = vmatprep.subr.bf16.mxu0 %v26690_v34 }
0x1223   :  { %20724 = vmatpush3.bf16.msra.mxu0 %v26690_v34 }
0x1224   :  { %20725 = vmatprep.subr.bf16.mxu0 %v26710_v54 }
0x1227   :  { %20726 = vmatpush3.bf16.msra.mxu0 %v26710_v54 }
0x1228   :  { %20727 = vmatprep.subr.bf16.mxu0 %v26706_v32 }
0x122b   :  { %20728 = vmatpush3.bf16.msra.mxu0 %v26706_v32 }
0x122c   :  { %20733 = vmatprep.subr.bf16.mxu0 %v22787_v17 }
0x122e   :  { %20730 = vmatmul.mubr.bf16.vlgmr.msra.gmra.mrb[176].mxu0 %v22786_v15  ;;  %v22801_v15 = vld [vmem:[%s28359_s4 + $0xe0] sm:$0xff]  }
0x122f   :  { %20734 = vmatpush3.bf16.msra.mxu0 %v22787_v17  ;;  %v22800_v17 = vld [vmem:[%s28360_s5 + $0xd8] sm:$0xff]  }
0x1230   :  { %20735 = vmatprep.subr.bf16.mxu0 %v22788_v13 }
0x1233   :  { %20736 = vmatpush3.bf16.msra.mxu0 %v22788_v13 }
0x1234   :  { %20761 = vmatprep.subr.bf16.mxu0 %v22789_v26 }
0x1301   :  { %v20731_v27 = vpop.f32.mrb[176].mxu0 }
0x1302   :  { %v9946_v2 = vpop.f32.mrb[177].mxu0 }
0x1303   :  { %v20732_v63 = vpop.f32.mrb[178].mxu0 }
0x1304   :  { %v9962_v41 = vpack.c.bf16 %v20732_v63, %v20731_v27  ;;  %v9949_v20 = vpop.f32.mrb[179].mxu0 }
0x1305   :  { %v9961_v0 = vpack.c.bf16 %v9949_v20, %v9946_v2 }
0x1307   :  { %20737 = vmatprep.mubr.msk.bf16.mxu0 %vm8908_vm3, %v9961_v0 }
0x1308   :  { %20738 = vmatmul.mubr.msk.bf16.vlgmr.msra.gmra.mrb[164].mxu0 %vm8908_vm3, %v9962_v41 }
0x1309   :  { %20762 = vmatpush3.bf16.msra.mxu0 %v22789_v26  ;;  %20765 = vmatprep.mubr.msk.bf16.mxu0 %vm8908_vm3, %v10105_v57 }
0x130a   :  { %20763 = vmatprep.subr.bf16.mxu0 %v22790_v14 }
0x130d   :  { %20764 = vmatpush3.bf16.msra.mxu0 %v22790_v14 }
0x130e   :  { %20789 = vmatprep.subr.bf16.mxu0 %v22791_v47 }
0x1314   :  { %20766 = vmatmul.mubr.msk.bf16.vlgmr.msra.gmra.mrb[164].mxu0 %vm8908_vm3, %v10106_v23 }
0x1315   :  { %20790 = vmatpush3.bf16.msra.mxu0 %v22791_v47  ;;  %20793 = vmatprep.mubr.msk.bf16.mxu0 %vm8908_vm3, %v10249_v8 }
0x1316   :  { %20791 = vmatprep.subr.bf16.mxu0 %v22792_v36 }
0x1319   :  { %20792 = vmatpush3.bf16.msra.mxu0 %v22792_v36 }
0x131a   :  { %20797 = vmatprep.subr.bf16.mxu0 %v26662_v58 }
0x1320   :  { %20794 = vmatmul.mubr.msk.bf16.vlgmr.msra.gmra.mrb[164].mxu0 %vm8908_vm3, %v10250_v16  ;;  %v16848_v16 = vld [vmem:[%s28361_s6] ss:$0 sm:$0xff] }
0x1321   :  { %20798 = vmatpush3.bf16.msra.mxu0 %v26662_v58  ;;  %20813 = vmatprep.mubr.bf16.mxu0 %v22793_v56 }
0x1322   :  { %20799 = vmatprep.subr.bf16.mxu0 %v26660_v45 }
0x1325   :  { %20800 = vmatpush3.bf16.msra.mxu0 %v26660_v45 }
0x1326   :  { %20801 = vmatprep.subr.bf16.mxu0 %v26678_v44 }
0x1329   :  { %20802 = vmatpush3.bf16.msra.mxu0 %v26678_v44 }
0x132a   :  { %20803 = vmatprep.subr.bf16.mxu0 %v26674_v55 }
0x132d   :  { %20804 = vmatpush3.bf16.msra.mxu0 %v26674_v55 }
0x132e   :  { %20805 = vmatprep.subr.bf16.mxu0 %v26694_v40 }
0x1331   :  { %20806 = vmatpush3.bf16.msra.mxu0 %v26694_v40 }
0x1332   :  { %20807 = vmatprep.subr.bf16.mxu0 %v26690_v34 }
0x1335   :  { %20808 = vmatpush3.bf16.msra.mxu0 %v26690_v34 }
0x1336   :  { %20809 = vmatprep.subr.bf16.mxu0 %v26710_v54 }
0x1339   :  { %20810 = vmatpush3.bf16.msra.mxu0 %v26710_v54 }
0x133a   :  { %20811 = vmatprep.subr.bf16.mxu0 %v26706_v32 }
0x133d   :  { %20812 = vmatpush3.bf16.msra.mxu0 %v26706_v32 }
0x133e   :  { %20817 = vmatprep.subr.bf16.mxu0 %v22795_v10 }
0x1340   :  { %20814 = vmatmul.mubr.bf16.vlgmr.msra.gmra.mrb[180].mxu0 %v22794_v22 }
0x1341   :  { %20818 = vmatpush3.bf16.msra.mxu0 %v22795_v10 }
0x1342   :  { %20819 = vmatprep.subr.bf16.mxu0 %v22796_v53 }
0x1345   :  { %20820 = vmatpush3.bf16.msra.mxu0 %v22796_v53  ;;  %v22814_v53 = vld [vmem:[%s28363_s8 + $0x8] sm:$0xff]  }
0x1346   :  { %20845 = vmatprep.subr.bf16.mxu0 %v22797_v21 }
0x1413   :  { %v20815_v30 = vpop.f32.mrb[180].mxu0 }
0x1414   :  { %v10378_v29 = vpop.f32.mrb[181].mxu0 }
0x1415   :  { %v20816_v35 = vpop.f32.mrb[182].mxu0 }
0x1416   :  { %v10394_v50 = vpack.c.bf16 %v20816_v35, %v20815_v30  ;;  %v10381_v19 = vpop.f32.mrb[183].mxu0 }
0x1417   :  { %v10393_v25 = vpack.c.bf16 %v10381_v19, %v10378_v29  ;;  %v22818_v19 = vld [vmem:[%s28363_s8 + $0x48] sm:$0xff]  }
0x1419   :  { %20821 = vmatprep.mubr.msk.bf16.mxu0 %vm8908_vm3, %v10393_v25  ;;  %v16870_v25 = vld [vmem:[%s28362_s7 + $0x8] sm:$0xf] }
0x141a   :  { %20822 = vmatmul.mubr.msk.bf16.vlgmr.msra.gmra.mrb[164].mxu0 %vm8908_vm3, %v10394_v50 }
0x141b   :  { %20846 = vmatpush3.bf16.msra.mxu0 %v22797_v21  ;;  %20849 = vmatprep.mubr.msk.bf16.mxu0 %vm8908_vm3, %v10537_v39  ;;  %v22813_v39 = vld [vmem:[%s28363_s8] sm:$0xff]   ;;  %v22815_v21 = vld [vmem:[%s28363_s8 + $0x10] sm:$0xff]  }
0x141c   :  { %20847 = vmatprep.subr.bf16.mxu0 %v22798_v4 }
0x141f   :  { %20848 = vmatpush3.bf16.msra.mxu0 %v22798_v4  ;;  %v22819_v4 = vld [vmem:[%s28363_s8 + $0x50] sm:$0xff]  }
0x1420   :  { %20873 = vmatprep.subr.bf16.mxu0 %v22799_v62 }
0x1426   :  { %20850 = vmatmul.mubr.msk.bf16.vlgmr.msra.gmra.mrb[164].mxu0 %vm8908_vm3, %v10538_v28  ;;  %v22812_v28 = vld [vmem:[%s28363_s8 + $0x38] sm:$0xff]  }
0x1427   :  { %20874 = vmatpush3.bf16.msra.mxu0 %v22799_v62  ;;  %20877 = vmatprep.mubr.msk.bf16.mxu0 %vm8908_vm3, %v10681_v6  ;;  %v16885_v62 = vld [vmem:[%s28362_s7 + $0xc] sm:$0xf] }
0x1428   :  { %20875 = vmatprep.subr.bf16.mxu0 %v22800_v17 }
0x142b   :  { %20876 = vmatpush3.bf16.msra.mxu0 %v22800_v17  ;;  %v22820_v17 = vld [vmem:[%s28363_s8 + $0x60] sm:$0xff]  }
0x142c   :  { %20881 = vmatprep.subr.bf16.mxu0 %v26662_v58 }
0x1432   :  { %20878 = vmatmul.mubr.msk.bf16.vlgmr.msra.gmra.mrb[164].mxu0 %vm8908_vm3, %v10682_v3 }
0x1433   :  { %20882 = vmatpush3.bf16.msra.mxu0 %v26662_v58  ;;  %20897 = vmatprep.mubr.bf16.mxu0 %v22801_v15  ;;  %v22802_v58 = vld [vmem:[%s28359_s4 + $0xe8] sm:$0xff]   ;;  %v22821_v15 = vld [vmem:[%s28363_s8 + $0x58] sm:$0xff]  }
0x1434   :  { %20883 = vmatprep.subr.bf16.mxu0 %v26660_v45 }
0x1437   :  { %20884 = vmatpush3.bf16.msra.mxu0 %v26660_v45  ;;  %v22805_v45 = vld [vmem:[%s28360_s5 + $0xe0] sm:$0xff]  }
0x1438   :  { %20885 = vmatprep.subr.bf16.mxu0 %v26678_v44 }
0x143b   :  { %20886 = vmatpush3.bf16.msra.mxu0 %v26678_v44  ;;  %v22807_v44 = vld [vmem:[%s28360_s5 + $0xf0] sm:$0xff]  }
0x143c   :  { %20887 = vmatprep.subr.bf16.mxu0 %v26674_v55 }
0x143f   :  { %20888 = vmatpush3.bf16.msra.mxu0 %v26674_v55  ;;  %v22806_v55 = vld [vmem:[%s28360_s5 + $0xe8] sm:$0xff]  }
0x1440   :  { %20889 = vmatprep.subr.bf16.mxu0 %v26694_v40 }
0x1443   :  { %20890 = vmatpush3.bf16.msra.mxu0 %v26694_v40 }
0x1444   :  { %20891 = vmatprep.subr.bf16.mxu0 %v26690_v34 }
0x1447   :  { %20892 = vmatpush3.bf16.msra.mxu0 %v26690_v34  ;;  %v20927_v34 = vpop.f32.mrb[168].mxu1 }
0x1448   :  { %20893 = vmatprep.subr.bf16.mxu0 %v26710_v54  ;;  %v10954_v40 = vpop.f32.mrb[169].mxu1 }
0x144b   :  { %20894 = vmatpush3.bf16.msra.mxu0 %v26710_v54  ;;  %v20928_v54 = vpop.f32.mrb[170].mxu1 }
0x144c   :  { %20895 = vmatprep.subr.bf16.mxu0 %v26706_v32  ;;  %v10970_v42 = vpack.c.bf16 %v20928_v54, %v20927_v34  ;;  %v10957_v37 = vpop.f32.mrb[171].mxu1 }
0x144f   :  { %20896 = vmatpush3.bf16.msra.mxu0 %v26706_v32  ;;  %v10969_v32 = vpack.c.bf16 %v10957_v37, %v10954_v40 }
0x1450   :  { %20901 = vmatprep.subr.bf16.mxu0 %v22805_v45 }
0x1452   :  { %20898 = vmatmul.mubr.bf16.vlgmr.msra.gmra.mrb[184].mxu0 %v22802_v58  ;;  %v22823_v58 = vld [vmem:[%s28363_s8 + $0x70] sm:$0xff]  }
0x1453   :  { %20902 = vmatpush3.bf16.msra.mxu0 %v22805_v45  ;;  %v22822_v45 = vld [vmem:[%s28363_s8 + $0x68] sm:$0xff]  }
0x1454   :  { %20903 = vmatprep.subr.bf16.mxu0 %v22806_v55 }
0x1457   :  { %20904 = vmatpush3.bf16.msra.mxu0 %v22806_v55  ;;  %v22824_v55 = vld [vmem:[%s28363_s8 + $0x78] sm:$0xff]  }
0x1458   :  { %20929 = vmatprep.subr.bf16.mxu0 %v22807_v44 }
0x1525   :  { %v20899_v1 = vpop.f32.mrb[184].mxu0 }
0x1526   :  { %v10810_v38 = vpop.f32.mrb[185].mxu0 }
0x1527   :  { %v20900_v23 = vpop.f32.mrb[186].mxu0 }
0x1528   :  { %v10826_v57 = vpack.c.bf16 %v20900_v23, %v20899_v1  ;;  %v10813_v13 = vpop.f32.mrb[187].mxu0 }
0x1529   :  { %v10825_v26 = vpack.c.bf16 %v10813_v13, %v10810_v38 }
0x152b   :  { %20905 = vmatprep.mubr.msk.bf16.mxu0 %vm8908_vm3, %v10825_v26 }
0x152c   :  { %20906 = vmatmul.mubr.msk.bf16.vlgmr.msra.gmra.mrb[164].mxu0 %vm8908_vm3, %v10826_v57 }
0x152d   :  { %20930 = vmatpush3.bf16.msra.mxu0 %v22807_v44  ;;  %20933 = vmatprep.mubr.msk.bf16.mxu0 %vm8908_vm3, %v10969_v32 }
0x152e   :  { %20931 = vmatprep.subr.bf16.mxu0 %v22808_v60 }
0x1531   :  { %20932 = vmatpush3.bf16.msra.mxu0 %v22808_v60 }
0x1532   :  { %20937 = vmatprep.subr.bf16.mxu0 %v23026_v18 }
0x1538   :  { %20934 = vmatmul.mubr.msk.bf16.vlgmr.msra.gmra.mrb[164].mxu0 %vm8908_vm3, %v10970_v42 }
0x1539   :  { %20941 = vmatprep.mubr.msk.bf16.mxu0 %vm23027_vm4, %v23026_v18 }
0x160b   :  { %v20935_v7 = vpop.f32.mrb[164].mxu0 }
0x160c   :  { %v21673_v43 = vadd.f32 %v20935_v7, %v26895_v51  ;;  %v11028_v8 = vpop.f32.mrb[165].mxu0 }
0x160d   :  { %v21674_v27 = vadd.f32 %v11028_v8, %v26897_v46  ;;  %v20936_v2 = vpop.f32.mrb[166].mxu0  ;;  %v16850_v46 = vld [vmem:[%s28362_s7 + $0x4] sm:$0xf] }
0x160e   :  { %v11056_v63 = vadd.f32 %v21673_v43, %v16848_v16  ;;  %v21675_v41 = vadd.f32 %v20936_v2, %v26900_v24  ;;  %v11031_v20 = vpop.f32.mrb[167].mxu0  ;;  %v11064_v24 = vld [vmem:[%s28362_s7] sm:$0xf] }
0x160f   :  { %v11054_v0 = vadd.f32 %v21674_v27, %v16848_v16  ;;  %v21676_v14 = vadd.f32 %v11031_v20, %v26903_v52  ;;  %v22809_v52 = vld [vmem:[%s28363_s8 + $0x20] sm:$0xff]   ;;  %v16915_v20 = vld [vmem:[%s28362_s7 + $0x14] sm:$0xf] }
0x1610   :  { %v11057_v47 = vadd.f32 %v21675_v41, %v16848_v16  ;;  %v11060_v56 = vmax.f32 %v11056_v63, 0.0  ;;  %v22825_v27 = vld [vmem:[%s28363_s8 + $0x80] sm:$0xff]   ;;  %v22826_v41 = vld [vmem:[%s28363_s8 + $0x88] sm:$0xff]  }
0x1611   :  { %v11055_v36 = vadd.f32 %v21676_v14, %v16848_v16  ;;  %v11058_v22 = vmax.f32 %v11054_v0, 0.0  ;;  %v16900_v16 = vld [vmem:[%s28362_s7 + $0x10] sm:$0xf]  ;;  %v22828_v14 = vld [vmem:[%s28363_s8 + $0xa0] sm:$0xff]  }
0x1612   :  { %v11061_v10 = vmax.f32 %v11057_v47, 0.0  ;;  %v22827_v0 = vld [vmem:[%s28363_s8 + $0x90] sm:$0xff]   ;;  %v22829_v47 = vld [vmem:[%s28363_s8 + $0x98] sm:$0xff]  }
0x1613   :  { %v11059_v61 = vmax.f32 %v11055_v36, 0.0  ;;  %v22830_v36 = vld [vmem:[%s28363_s8 + $0xa8] sm:$0xff]  }
0x1614   :  { %v27183_v9 = vpack.c.bf16 %v11061_v10, %v11060_v56  ;;  %v22831_v56 = vld [vmem:[%s28363_s8 + $0xb0] sm:$0xff]   ;;  %v22832_v10 = vld [vmem:[%s28363_s8 + $0xb8] sm:$0xff]  }
0x1615   :  { %v27185_v51 = vpack.c.bf16 %v11059_v61, %v11058_v22 }
0x1617   :  { %20938 = vmatpush3.bf16.msra.mxu0 %v27185_v51  ;;  %20946 = vmatpush3.bf16.msra.mxu1 %v27185_v51 }
0x1618   :  { %20939 = vmatprep.subr.bf16.mxu0 %v23026_v18  ;;  %20947 = vmatprep.subr.bf16.mxu1 %v23026_v18 }
0x161b   :  { %20940 = vmatpush3.bf16.msra.mxu0 %v27183_v9  ;;  %20948 = vmatpush3.bf16.msra.mxu1 %v27183_v9 }
0x161c   :  { %20953 = vmatprep.subr.bf16.mxu0 %v23026_v18  ;;  %20965 = vmatprep.subr.bf16.mxu1 %v23026_v18 }
0x161e   :  { %20950 = vmatmul.mubr.msk.bf16.vlgmr.msra.gmra.mrb[172].mxu1 %vm8908_vm3, %v16850_v46  ;;  %20942 = vmatmul.mubr.msk.bf16.vlgmr.msra.gmra.mrb[188].mxu0 %vm8908_vm3, %v11064_v24 }
0x161f   :  { %20954 = vmatpush3.bf16.msra.mxu0 %v22809_v52  ;;  %20961 = vmatprep.mubr.msk.bf16.mxu0 %vm23027_vm4, %v23026_v18 }
0x1620   :  { %20955 = vmatprep.subr.bf16.mxu0 %v23026_v18  ;;  %20973 = vmatprep.mubr.msk.bf16.mxu1 %vm23027_vm4, %v23026_v18 }
0x1621   :  { %20966 = vmatpush3.bf16.msra.mxu1 %v22813_v39 }
0x1622   :  { %20967 = vmatprep.subr.bf16.mxu1 %v23026_v18 }
0x1623   :  { %20956 = vmatpush3.bf16.msra.mxu0 %v22810_v5 }
0x1624   :  { %20957 = vmatprep.subr.bf16.mxu0 %v23026_v18 }
0x1625   :  { %20968 = vmatpush3.bf16.msra.mxu1 %v22814_v53 }
0x1626   :  { %20969 = vmatprep.subr.bf16.mxu1 %v23026_v18 }
0x1627   :  { %20958 = vmatpush3.bf16.msra.mxu0 %v22811_v12 }
0x1628   :  { %20959 = vmatprep.subr.bf16.mxu0 %v23026_v18 }
0x1629   :  { %20970 = vmatpush3.bf16.msra.mxu1 %v22815_v21 }
0x162a   :  { %20971 = vmatprep.subr.bf16.mxu1 %v23026_v18 }
0x162b   :  { %20960 = vmatpush3.bf16.msra.mxu0 %v22812_v28 }
0x162c   :  { %20977 = vmatprep.subr.bf16.mxu0 %v23026_v18 }
0x162d   :  { %20972 = vmatpush3.bf16.msra.mxu1 %v22816_v49 }
0x162e   :  { %20985 = vmatprep.subr.bf16.mxu1 %v23026_v18 }
0x16f1   :  { %v11156_v59 = vpop.f32.mrb[172].mxu1  ;;  %v11102_v31 = vpop.f32.mrb[188].mxu0 }
0x16f2   :  { %v11162_v3 = vpack.c.bf16 %v11156_v59, %v11156_v59  ;;  %v20951_v11 = vpop.f32.mrb[173].mxu1  ;;  %v11108_v6 = vpack.c.bf16 %v11102_v31, %v11102_v31  ;;  %v20943_v48 = vpop.f32.mrb[189].mxu0 }
0x16f3   :  { %v11159_v30 = vpop.f32.mrb[174].mxu1  ;;  %v11105_v29 = vpop.f32.mrb[190].mxu0 }
0x16f4   :  { %20962 = vmatmul.mubr.msk.bf16.vlgmr.msra.gmra.mrb[192].mxu0 %vm11196_vm5, %v11162_v3  ;;  %v20952_v35 = vpop.f32.mrb[175].mxu1  ;;  %20974 = vmatmul.mubr.msk.bf16.vlgmr.msra.gmra.mrb[176].mxu1 %vm11196_vm5, %v11108_v6  ;;  %v20944_v50 = vpop.f32.mrb[191].mxu0  ;;  %v16930_v6 = vld [vmem:[%s28362_s7 + $0x18] sm:$0xf]  ;;  %v22833_v30 = vld [vmem:[%s28363_s8 + $0xc0] sm:$0xff]  }
0x16f5   :  { %20978 = vmatpush3.bf16.msra.mxu0 %v27185_v51  ;;  %20981 = vmatprep.mubr.msk.bf16.mxu0 %vm23027_vm4, %v23026_v18  ;;  %v22834_v50 = vld [vmem:[%s28363_s8 + $0xc8] sm:$0xff]  }
0x16f6   :  { %20979 = vmatprep.subr.bf16.mxu0 %v23026_v18  ;;  %20986 = vmatpush3.bf16.msra.mxu1 %v22817_v33 }
0x16f7   :  { %20987 = vmatprep.subr.bf16.mxu1 %v23026_v18  ;;  %20993 = vmatprep.mubr.msk.bf16.mxu1 %vm23027_vm4, %v23026_v18 }
0x16f9   :  { %20980 = vmatpush3.bf16.msra.mxu0 %v27183_v9 }
0x16fa   :  { %20997 = vmatprep.subr.bf16.mxu0 %v23026_v18  ;;  %20988 = vmatpush3.bf16.msra.mxu1 %v22818_v19  ;;  %v16945_v19 = vld [vmem:[%s28362_s7 + $0x1c] sm:$0xf] }
0x16fb   :  { %20989 = vmatprep.subr.bf16.mxu1 %v23026_v18 }
0x16fc   :  { %20982 = vmatmul.mubr.msk.bf16.vlgmr.msra.gmra.mrb[196].mxu0 %vm8908_vm3, %v16870_v25  ;;  %v22835_v25 = vld [vmem:[%s28363_s8 + $0xd0] sm:$0xff]  }
0x16fd   :  { %20998 = vmatpush3.bf16.msra.mxu0 %v27185_v51  ;;  %21001 = vmatprep.mubr.msk.bf16.mxu0 %vm23027_vm4, %v23026_v18 }
0x16fe   :  { %20999 = vmatprep.subr.bf16.mxu0 %v23026_v18  ;;  %20990 = vmatpush3.bf16.msra.mxu1 %v22819_v4  ;;  %v22836_v4 = vld [vmem:[%s28363_s8 + $0xe0] sm:$0xff]  }
0x16ff   :  { %20991 = vmatprep.subr.bf16.mxu1 %v23026_v18 }
0x1701   :  { %21000 = vmatpush3.bf16.msra.mxu0 %v27183_v9 }
0x1702   :  { %21005 = vmatprep.subr.bf16.mxu0 %v23026_v18  ;;  %20992 = vmatpush3.bf16.msra.mxu1 %v22821_v15  ;;  %v22839_v15 = vld [vmem:[%s28363_s8 + $0xf0] sm:$0xff]  }
0x1703   :  { %21017 = vmatprep.subr.bf16.mxu1 %v23026_v18 }
0x1704   :  { %21002 = vmatmul.mubr.msk.bf16.vlgmr.msra.gmra.mrb[200].mxu0 %vm8908_vm3, %v16885_v62  ;;  %v22837_v62 = vld [vmem:[%s28363_s8 + $0xd8] sm:$0xff]  }
0x1705   :  { %21006 = vmatpush3.bf16.msra.mxu0 %v22820_v17  ;;  %21013 = vmatprep.mubr.msk.bf16.mxu0 %vm23027_vm4, %v23026_v18  ;;  %v22838_v17 = vld [vmem:[%s28363_s8 + $0xe8] sm:$0xff]  }
0x1706   :  { %21007 = vmatprep.subr.bf16.mxu0 %v23026_v18 }
0x1709   :  { %21008 = vmatpush3.bf16.msra.mxu0 %v22822_v45  ;;  %v22840_v45 = vld [vmem:[%s28363_s8 + $0xf8] sm:$0xff]  }
0x170a   :  { %21009 = vmatprep.subr.bf16.mxu0 %v23026_v18 }
0x170d   :  { %21010 = vmatpush3.bf16.msra.mxu0 %v22823_v58 }
0x170e   :  { %21011 = vmatprep.subr.bf16.mxu0 %v23026_v18 }
0x1711   :  { %21012 = vmatpush3.bf16.msra.mxu0 %v22824_v55 }
0x1712   :  { %21037 = vmatprep.subr.bf16.mxu0 %v23026_v18 }
0x17c7   :  { %v11234_v44 = vpop.f32.mrb[192].mxu0  ;;  %v11301_v34 = vpop.f32.mrb[176].mxu1 }
0x17c8   :  { %v20963_v40 = vpop.f32.mrb[193].mxu0  ;;  %v11302_v54 = vadd.f32 %v11301_v34, %v11234_v44  ;;  %v20975_v42 = vpop.f32.mrb[177].mxu1 }
0x17c9   :  { %v11237_v37 = vpop.f32.mrb[194].mxu0  ;;  %v11304_v32 = vpop.f32.mrb[178].mxu1 }
0x17ca   :  { %v20964_v1 = vpop.f32.mrb[195].mxu0  ;;  %v20976_v38 = vpop.f32.mrb[179].mxu1 }
0x17cf   :  { %v11346_v23 = vpop.f32.mrb[196].mxu0 }
0x17d0   :  { %v11352_v57 = vpack.c.bf16 %v11346_v23, %v11346_v23  ;;  %v20983_v13 = vpop.f32.mrb[197].mxu0 }
0x17d1   :  { %v11349_v26 = vpop.f32.mrb[198].mxu0 }
0x17d2   :  { %20994 = vmatmul.mubr.msk.bf16.vlgmr.msra.gmra.mrb[180].mxu1 %vm11196_vm5, %v11352_v57  ;;  %v20984_v60 = vpop.f32.mrb[199].mxu0 }
0x17d3   :  { %21018 = vmatpush3.bf16.msra.mxu1 %v27185_v51  ;;  %21021 = vmatprep.mubr.msk.bf16.mxu1 %vm23027_vm4, %v23026_v18 }
0x17d4   :  { %21019 = vmatprep.subr.bf16.mxu1 %v23026_v18 }
0x17d7   :  { %21020 = vmatpush3.bf16.msra.mxu1 %v27183_v9  ;;  %v11469_v7 = vpop.f32.mrb[200].mxu0 }
0x17d8   :  { %v11475_v43 = vpack.c.bf16 %v11469_v7, %v11469_v7  ;;  %v21003_v8 = vpop.f32.mrb[201].mxu0  ;;  %21025 = vmatprep.subr.bf16.mxu1 %v23026_v18  ;;  %v16960_v7 = vld [vmem:[%s28362_s7 + $0x20] sm:$0xf] }
0x17d9   :  { %v11472_v2 = vpop.f32.mrb[202].mxu0  ;;  %v22841_v8 = vld [vmem:[%s28363_s8 + $0x100] sm:$0xff]  }
0x17da   :  { %21014 = vmatmul.mubr.msk.bf16.vlgmr.msra.gmra.mrb[204].mxu0 %vm11196_vm5, %v11475_v43  ;;  %21022 = vmatmul.mubr.msk.bf16.vlgmr.msra.gmra.mrb[184].mxu1 %vm8908_vm3, %v16900_v16  ;;  %v21004_v63 = vpop.f32.mrb[203].mxu0 }
0x17db   :  { %21038 = vmatpush3.bf16.msra.mxu0 %v27185_v51  ;;  %21041 = vmatprep.mubr.msk.bf16.mxu0 %vm23027_vm4, %v23026_v18  ;;  %v22842_v63 = vld [vmem:[%s28363_s8 + $0x108] sm:$0xff]  }
0x17dc   :  { %21039 = vmatprep.subr.bf16.mxu0 %v23026_v18  ;;  %21026 = vmatpush3.bf16.msra.mxu1 %v22825_v27 }
0x17dd   :  { %21027 = vmatprep.subr.bf16.mxu1 %v23026_v18  ;;  %21033 = vmatprep.mubr.msk.bf16.mxu1 %vm23027_vm4, %v23026_v18 }
0x17df   :  { %21040 = vmatpush3.bf16.msra.mxu0 %v27183_v9 }
0x17e0   :  { %21028 = vmatpush3.bf16.msra.mxu1 %v22826_v41  ;;  %21045 = vmatprep.subr.bf16.mxu0 %v23026_v18  ;;  %v16975_v41 = vld [vmem:[%s28362_s7 + $0x24] sm:$0xf] }
0x17e1   :  { %21029 = vmatprep.subr.bf16.mxu1 %v23026_v18 }
0x17e2   :  { %21042 = vmatmul.mubr.msk.bf16.vlgmr.msra.gmra.mrb[208].mxu0 %vm8908_vm3, %v16915_v20  ;;  %v22843_v20 = vld [vmem:[%s28363_s8 + $0x110] sm:$0xff]  }
0x17e3   :  { %21053 = vmatprep.mubr.msk.bf16.mxu0 %vm23027_vm4, %v23026_v18  ;;  %21046 = vmatpush3.bf16.msra.mxu0 %v22828_v14  ;;  %v22845_v14 = vld [vmem:[%s28363_s8 + $0x118] sm:$0xff]  }
0x17e4   :  { %21030 = vmatpush3.bf16.msra.mxu1 %v22827_v0  ;;  %21047 = vmatprep.subr.bf16.mxu0 %v23026_v18  ;;  %v22844_v0 = vld [vmem:[%s28363_s8 + $0x120] sm:$0xff]  }
0x17e5   :  { %21031 = vmatprep.subr.bf16.mxu1 %v23026_v18 }
0x17e7   :  { %21048 = vmatpush3.bf16.msra.mxu0 %v22830_v36  ;;  %v22847_v36 = vld [vmem:[%s28363_s8 + $0x130] sm:$0xff]  }
0x17e8   :  { %21032 = vmatpush3.bf16.msra.mxu1 %v22829_v47  ;;  %21049 = vmatprep.subr.bf16.mxu0 %v23026_v18  ;;  %v22846_v47 = vld [vmem:[%s28363_s8 + $0x128] sm:$0xff]  }
0x17e9   :  { %21057 = vmatprep.subr.bf16.mxu1 %v23026_v18 }
0x17eb   :  { %21050 = vmatpush3.bf16.msra.mxu0 %v22831_v56  ;;  %v22848_v56 = vld [vmem:[%s28363_s8 + $0x138] sm:$0xff]  }
0x17ec   :  { %21051 = vmatprep.subr.bf16.mxu0 %v23026_v18 }
0x17ef   :  { %21052 = vmatpush3.bf16.msra.mxu0 %v22832_v10 }
0x17f0   :  { %21077 = vmatprep.subr.bf16.mxu0 %v23026_v18 }
0x18a5   :  { %v11423_v22 = vpop.f32.mrb[180].mxu1 }
0x18a6   :  { %v11429_v61 = vadd.f32 %v11423_v22, %v11302_v54  ;;  %v20995_v46 = vpop.f32.mrb[181].mxu1 }
0x18a7   :  { %v11426_v24 = vpop.f32.mrb[182].mxu1 }
0x18a8   :  { %v20996_v52 = vpop.f32.mrb[183].mxu1 }
0x18ad   :  { %v11546_v5 = vpop.f32.mrb[204].mxu0  ;;  %v11592_v12 = vpop.f32.mrb[184].mxu1 }
0x18ae   :  { %v11552_v28 = vadd.f32 %v11546_v5, %v11429_v61  ;;  %v11598_v39 = vpack.c.bf16 %v11592_v12, %v11592_v12  ;;  %v21015_v53 = vpop.f32.mrb[205].mxu0  ;;  %v21023_v21 = vpop.f32.mrb[185].mxu1 }
0x18af   :  { %v11549_v49 = vpop.f32.mrb[206].mxu0  ;;  %v11595_v59 = vpop.f32.mrb[186].mxu1 }
0x18b0   :  { %21034 = vmatmul.mubr.msk.bf16.vlgmr.msra.gmra.mrb[188].mxu1 %vm11196_vm5, %v11598_v39  ;;  %v21016_v31 = vpop.f32.mrb[207].mxu0  ;;  %v21024_v3 = vpop.f32.mrb[187].mxu1 }
0x18b1   :  { %21058 = vmatpush3.bf16.msra.mxu1 %v27185_v51  ;;  %21061 = vmatprep.mubr.msk.bf16.mxu1 %vm23027_vm4, %v23026_v18 }
0x18b2   :  { %21059 = vmatprep.subr.bf16.mxu1 %v23026_v18 }
0x18b5   :  { %21060 = vmatpush3.bf16.msra.mxu1 %v27183_v9  ;;  %v11715_v11 = vpop.f32.mrb[208].mxu0 }
0x18b6   :  { %v11721_v33 = vpack.c.bf16 %v11715_v11, %v11715_v11  ;;  %v21043_v48 = vpop.f32.mrb[209].mxu0  ;;  %21065 = vmatprep.subr.bf16.mxu1 %v23026_v18  ;;  %v16990_v11 = vld [vmem:[%s28362_s7 + $0x28] sm:$0xf] }
0x18b7   :  { %v11718_v29 = vpop.f32.mrb[210].mxu0  ;;  %v22849_v48 = vld [vmem:[%s28363_s8 + $0x140] sm:$0xff]  }
0x18b8   :  { %21054 = vmatmul.mubr.msk.bf16.vlgmr.msra.gmra.mrb[212].mxu0 %vm11196_vm5, %v11721_v33  ;;  %21062 = vmatmul.mubr.msk.bf16.vlgmr.msra.gmra.mrb[192].mxu1 %vm8908_vm3, %v16930_v6  ;;  %v21044_v35 = vpop.f32.mrb[211].mxu0 }
0x18b9   :  { %21078 = vmatpush3.bf16.msra.mxu0 %v27185_v51  ;;  %21081 = vmatprep.mubr.msk.bf16.mxu0 %vm23027_vm4, %v23026_v18  ;;  %v22850_v35 = vld [vmem:[%s28363_s8 + $0x148] sm:$0xff]  }
0x18ba   :  { %21079 = vmatprep.subr.bf16.mxu0 %v23026_v18  ;;  %21066 = vmatpush3.bf16.msra.mxu1 %v22833_v30 }
0x18bb   :  { %21067 = vmatprep.subr.bf16.mxu1 %v23026_v18  ;;  %21073 = vmatprep.mubr.msk.bf16.mxu1 %vm23027_vm4, %v23026_v18 }
0x18bd   :  { %21080 = vmatpush3.bf16.msra.mxu0 %v27183_v9 }
0x18be   :  { %21068 = vmatpush3.bf16.msra.mxu1 %v22834_v50  ;;  %21085 = vmatprep.subr.bf16.mxu0 %v23026_v18  ;;  %v17005_v50 = vld [vmem:[%s28362_s7 + $0x2c] sm:$0xf] }
0x18bf   :  { %21069 = vmatprep.subr.bf16.mxu1 %v23026_v18 }
0x18c0   :  { %21082 = vmatmul.mubr.msk.bf16.vlgmr.msra.gmra.mrb[216].mxu0 %vm8908_vm3, %v16945_v19  ;;  %v22851_v19 = vld [vmem:[%s28363_s8 + $0x150] sm:$0xff]  }
0x18c1   :  { %21093 = vmatprep.mubr.msk.bf16.mxu0 %vm23027_vm4, %v23026_v18  ;;  %21086 = vmatpush3.bf16.msra.mxu0 %v22836_v4  ;;  %v22853_v4 = vld [vmem:[%s28363_s8 + $0x158] sm:$0xff]  }
0x18c2   :  { %21070 = vmatpush3.bf16.msra.mxu1 %v22835_v25  ;;  %21087 = vmatprep.subr.bf16.mxu0 %v23026_v18  ;;  %v22852_v25 = vld [vmem:[%s28363_s8 + $0x160] sm:$0xff]  }
0x18c3   :  { %21071 = vmatprep.subr.bf16.mxu1 %v23026_v18 }
0x18c5   :  { %21088 = vmatpush3.bf16.msra.mxu0 %v22838_v17  ;;  %v22855_v17 = vld [vmem:[%s28363_s8 + $0x170] sm:$0xff]  }
0x18c6   :  { %21072 = vmatpush3.bf16.msra.mxu1 %v22837_v62  ;;  %21089 = vmatprep.subr.bf16.mxu0 %v23026_v18  ;;  %v22854_v62 = vld [vmem:[%s28363_s8 + $0x168] sm:$0xff]  }
0x18c7   :  { %21097 = vmatprep.subr.bf16.mxu1 %v23026_v18 }
0x18c9   :  { %21090 = vmatpush3.bf16.msra.mxu0 %v22839_v15  ;;  %v22856_v15 = vld [vmem:[%s28363_s8 + $0x178] sm:$0xff]  }
0x18ca   :  { %21091 = vmatprep.subr.bf16.mxu0 %v23026_v18 }
0x18cd   :  { %21092 = vmatpush3.bf16.msra.mxu0 %v22840_v45 }
0x18ce   :  { %21117 = vmatprep.subr.bf16.mxu0 %v23026_v18 }
0x1983   :  { %v11669_v58 = vpop.f32.mrb[188].mxu1 }
0x1984   :  { %v11675_v55 = vadd.f32 %v11669_v58, %v11552_v28  ;;  %v21035_v44 = vpop.f32.mrb[189].mxu1 }
0x1985   :  { %v11672_v34 = vpop.f32.mrb[190].mxu1 }
0x1986   :  { %v21036_v40 = vpop.f32.mrb[191].mxu1 }
0x198b   :  { %v11792_v54 = vpop.f32.mrb[212].mxu0  ;;  %v11838_v42 = vpop.f32.mrb[192].mxu1 }
0x198c   :  { %v11798_v37 = vadd.f32 %v11792_v54, %v11675_v55  ;;  %v11844_v32 = vpack.c.bf16 %v11838_v42, %v11838_v42  ;;  %v21055_v1 = vpop.f32.mrb[213].mxu0  ;;  %v21063_v38 = vpop.f32.mrb[193].mxu1 }
0x198d   :  { %v11795_v23 = vpop.f32.mrb[214].mxu0  ;;  %v11841_v57 = vpop.f32.mrb[194].mxu1 }
0x198e   :  { %21074 = vmatmul.mubr.msk.bf16.vlgmr.msra.gmra.mrb[196].mxu1 %vm11196_vm5, %v11844_v32  ;;  %v21056_v13 = vpop.f32.mrb[215].mxu0  ;;  %v21064_v26 = vpop.f32.mrb[195].mxu1 }
0x198f   :  { %21098 = vmatpush3.bf16.msra.mxu1 %v27185_v51  ;;  %21101 = vmatprep.mubr.msk.bf16.mxu1 %vm23027_vm4, %v23026_v18 }
0x1990   :  { %21099 = vmatprep.subr.bf16.mxu1 %v23026_v18 }
0x1993   :  { %21100 = vmatpush3.bf16.msra.mxu1 %v27183_v9  ;;  %v11961_v60 = vpop.f32.mrb[216].mxu0 }
0x1994   :  { %v11967_v16 = vpack.c.bf16 %v11961_v60, %v11961_v60  ;;  %v21083_v43 = vpop.f32.mrb[217].mxu0  ;;  %21105 = vmatprep.subr.bf16.mxu1 %v23026_v18  ;;  %v17020_v60 = vld [vmem:[%s28362_s7 + $0x30] sm:$0xf] }
0x1995   :  { %v11964_v27 = vpop.f32.mrb[218].mxu0  ;;  %v22857_v43 = vld [vmem:[%s28363_s8 + $0x180] sm:$0xff]  }
0x1996   :  { %21094 = vmatmul.mubr.msk.bf16.vlgmr.msra.gmra.mrb[220].mxu0 %vm11196_vm5, %v11967_v16  ;;  %21102 = vmatmul.mubr.msk.bf16.vlgmr.msra.gmra.mrb[200].mxu1 %vm8908_vm3, %v16960_v7  ;;  %v21084_v2 = vpop.f32.mrb[219].mxu0 }
0x1997   :  { %21118 = vmatpush3.bf16.msra.mxu0 %v27185_v51  ;;  %21121 = vmatprep.mubr.msk.bf16.mxu0 %vm23027_vm4, %v23026_v18  ;;  %v22858_v2 = vld [vmem:[%s28363_s8 + $0x188] sm:$0xff]  }
0x1998   :  { %21119 = vmatprep.subr.bf16.mxu0 %v23026_v18  ;;  %21106 = vmatpush3.bf16.msra.mxu1 %v22841_v8 }
0x1999   :  { %21107 = vmatprep.subr.bf16.mxu1 %v23026_v18  ;;  %21113 = vmatprep.mubr.msk.bf16.mxu1 %vm23027_vm4, %v23026_v18 }
0x199b   :  { %21120 = vmatpush3.bf16.msra.mxu0 %v27183_v9 }
0x199c   :  { %21108 = vmatpush3.bf16.msra.mxu1 %v22842_v63  ;;  %21125 = vmatprep.subr.bf16.mxu0 %v23026_v18  ;;  %v17035_v63 = vld [vmem:[%s28362_s7 + $0x34] sm:$0xf] }
0x199d   :  { %21109 = vmatprep.subr.bf16.mxu1 %v23026_v18 }
0x199e   :  { %21122 = vmatmul.mubr.msk.bf16.vlgmr.msra.gmra.mrb[224].mxu0 %vm8908_vm3, %v16975_v41  ;;  %v22859_v41 = vld [vmem:[%s28363_s8 + $0x190] sm:$0xff]  }
0x199f   :  { %21133 = vmatprep.mubr.msk.bf16.mxu0 %vm23027_vm4, %v23026_v18  ;;  %21126 = vmatpush3.bf16.msra.mxu0 %v22844_v0  ;;  %v22861_v0 = vld [vmem:[%s28363_s8 + $0x198] sm:$0xff]  }
0x19a0   :  { %21110 = vmatpush3.bf16.msra.mxu1 %v22843_v20  ;;  %21127 = vmatprep.subr.bf16.mxu0 %v23026_v18  ;;  %v22860_v20 = vld [vmem:[%s28363_s8 + $0x1a0] sm:$0xff]  }
0x19a1   :  { %21111 = vmatprep.subr.bf16.mxu1 %v23026_v18 }
0x19a3   :  { %21128 = vmatpush3.bf16.msra.mxu0 %v22846_v47  ;;  %v22863_v47 = vld [vmem:[%s28363_s8 + $0x1b0] sm:$0xff]  }
0x19a4   :  { %21112 = vmatpush3.bf16.msra.mxu1 %v22845_v14  ;;  %21129 = vmatprep.subr.bf16.mxu0 %v23026_v18  ;;  %v22862_v14 = vld [vmem:[%s28363_s8 + $0x1a8] sm:$0xff]  }
0x19a5   :  { %21137 = vmatprep.subr.bf16.mxu1 %v23026_v18 }
0x19a7   :  { %21130 = vmatpush3.bf16.msra.mxu0 %v22847_v36  ;;  %v22864_v36 = vld [vmem:[%s28363_s8 + $0x1b8] sm:$0xff]  }
0x19a8   :  { %21131 = vmatprep.subr.bf16.mxu0 %v23026_v18 }
0x19ab   :  { %21132 = vmatpush3.bf16.msra.mxu0 %v22848_v56 }
0x19ac   :  { %21157 = vmatprep.subr.bf16.mxu0 %v23026_v18 }
0x1a61   :  { %v11915_v10 = vpop.f32.mrb[196].mxu1 }
0x1a62   :  { %v11921_v22 = vadd.f32 %v11915_v10, %v11798_v37  ;;  %v21075_v61 = vpop.f32.mrb[197].mxu1 }
0x1a63   :  { %v11918_v46 = vpop.f32.mrb[198].mxu1 }
0x1a64   :  { %v21076_v24 = vpop.f32.mrb[199].mxu1 }
0x1a69   :  { %v12038_v52 = vpop.f32.mrb[220].mxu0  ;;  %v12084_v5 = vpop.f32.mrb[200].mxu1 }
0x1a6a   :  { %v12044_v12 = vadd.f32 %v12038_v52, %v11921_v22  ;;  %v12090_v28 = vpack.c.bf16 %v12084_v5, %v12084_v5  ;;  %v21095_v39 = vpop.f32.mrb[221].mxu0  ;;  %v21103_v53 = vpop.f32.mrb[201].mxu1 }
0x1a6b   :  { %v12041_v21 = vpop.f32.mrb[222].mxu0  ;;  %v12087_v49 = vpop.f32.mrb[202].mxu1 }
0x1a6c   :  { %21114 = vmatmul.mubr.msk.bf16.vlgmr.msra.gmra.mrb[204].mxu1 %vm11196_vm5, %v12090_v28  ;;  %v21096_v59 = vpop.f32.mrb[223].mxu0  ;;  %v21104_v31 = vpop.f32.mrb[203].mxu1 }
0x1a6d   :  { %21138 = vmatpush3.bf16.msra.mxu1 %v27185_v51  ;;  %21141 = vmatprep.mubr.msk.bf16.mxu1 %vm23027_vm4, %v23026_v18 }
0x1a6e   :  { %21139 = vmatprep.subr.bf16.mxu1 %v23026_v18 }
0x1a71   :  { %21140 = vmatpush3.bf16.msra.mxu1 %v27183_v9  ;;  %v12207_v3 = vpop.f32.mrb[224].mxu0 }
0x1a72   :  { %v12213_v6 = vpack.c.bf16 %v12207_v3, %v12207_v3  ;;  %v21123_v33 = vpop.f32.mrb[225].mxu0  ;;  %21145 = vmatprep.subr.bf16.mxu1 %v23026_v18  ;;  %v17050_v3 = vld [vmem:[%s28362_s7 + $0x38] sm:$0xf] }
0x1a73   :  { %v12210_v30 = vpop.f32.mrb[226].mxu0  ;;  %v22865_v33 = vld [vmem:[%s28363_s8 + $0x1c0] sm:$0xff]  }
0x1a74   :  { %21134 = vmatmul.mubr.msk.bf16.vlgmr.msra.gmra.mrb[228].mxu0 %vm11196_vm5, %v12213_v6  ;;  %21142 = vmatmul.mubr.msk.bf16.vlgmr.msra.gmra.mrb[208].mxu1 %vm8908_vm3, %v16990_v11  ;;  %v21124_v29 = vpop.f32.mrb[227].mxu0 }
0x1a75   :  { %21158 = vmatpush3.bf16.msra.mxu0 %v27185_v51  ;;  %21161 = vmatprep.mubr.msk.bf16.mxu0 %vm23027_vm4, %v23026_v18  ;;  %v17065_v29 = vld [vmem:[%s28362_s7 + $0x3c] sm:$0xf] }
0x1a76   :  { %21159 = vmatprep.subr.bf16.mxu0 %v23026_v18  ;;  %21146 = vmatpush3.bf16.msra.mxu1 %v22849_v48 }
0x1a77   :  { %21147 = vmatprep.subr.bf16.mxu1 %v23026_v18  ;;  %21153 = vmatprep.mubr.msk.bf16.mxu1 %vm23027_vm4, %v23026_v18 }
0x1a79   :  { %21160 = vmatpush3.bf16.msra.mxu0 %v27183_v9 }
0x1a7a   :  { %21148 = vmatpush3.bf16.msra.mxu1 %v22850_v35  ;;  %21165 = vmatprep.subr.bf16.mxu0 %v23026_v18  ;;  %v22868_v35 = vld [vmem:[%s28363_s8 + $0x1e0] sm:$0xff]  }
0x1a7b   :  { %21149 = vmatprep.subr.bf16.mxu1 %v23026_v18 }
0x1a7c   :  { %21162 = vmatmul.mubr.msk.bf16.vlgmr.msra.gmra.mrb[232].mxu0 %vm8908_vm3, %v17005_v50  ;;  %v22869_v50 = vld [vmem:[%s28363_s8 + $0x1d8] sm:$0xff]  }
0x1a7d   :  { %21173 = vmatprep.mubr.msk.bf16.mxu0 %vm23027_vm4, %v23026_v18  ;;  %21166 = vmatpush3.bf16.msra.mxu0 %v22852_v25  ;;  %v22871_v25 = vld [vmem:[%s28363_s8 + $0x1f0] sm:$0xff]  }
0x1a7e   :  { %21150 = vmatpush3.bf16.msra.mxu1 %v22851_v19  ;;  %21167 = vmatprep.subr.bf16.mxu0 %v23026_v18  ;;  %v22870_v19 = vld [vmem:[%s28363_s8 + $0x1e8] sm:$0xff]  }
0x1a7f   :  { %21151 = vmatprep.subr.bf16.mxu1 %v23026_v18 }
0x1a81   :  { %21168 = vmatpush3.bf16.msra.mxu0 %v22854_v62 }
0x1a82   :  { %21152 = vmatpush3.bf16.msra.mxu1 %v22853_v4  ;;  %21169 = vmatprep.subr.bf16.mxu0 %v23026_v18  ;;  %v22872_v4 = vld [vmem:[%s28363_s8 + $0x1f8] sm:$0xff]  }
0x1a83   :  { %21177 = vmatprep.subr.bf16.mxu1 %v23026_v18 }
0x1a85   :  { %21170 = vmatpush3.bf16.msra.mxu0 %v22855_v17 }
0x1a86   :  { %21171 = vmatprep.subr.bf16.mxu0 %v23026_v18 }
0x1a89   :  { %21172 = vmatpush3.bf16.msra.mxu0 %v22856_v15 }
0x1a8a   :  { %21197 = vmatprep.subr.bf16.mxu0 %v23026_v18 }
0x1b3f   :  { %v12161_v45 = vpop.f32.mrb[204].mxu1 }
0x1b40   :  { %v12167_v58 = vadd.f32 %v12161_v45, %v12044_v12  ;;  %v21115_v55 = vpop.f32.mrb[205].mxu1 }
0x1b41   :  { %v12164_v44 = vpop.f32.mrb[206].mxu1 }
0x1b42   :  { %v21116_v34 = vpop.f32.mrb[207].mxu1 }
0x1b47   :  { %v12284_v40 = vpop.f32.mrb[228].mxu0  ;;  %v12330_v54 = vpop.f32.mrb[208].mxu1 }
0x1b48   :  { %v12290_v42 = vadd.f32 %v12284_v40, %v12167_v58  ;;  %v12336_v37 = vpack.c.bf16 %v12330_v54, %v12330_v54  ;;  %v21135_v32 = vpop.f32.mrb[229].mxu0  ;;  %v21143_v1 = vpop.f32.mrb[209].mxu1 }
0x1b49   :  { %v12287_v38 = vpop.f32.mrb[230].mxu0  ;;  %v12333_v23 = vpop.f32.mrb[210].mxu1 }
0x1b4a   :  { %21154 = vmatmul.mubr.msk.bf16.vlgmr.msra.gmra.mrb[212].mxu1 %vm11196_vm5, %v12336_v37  ;;  %v21136_v57 = vpop.f32.mrb[231].mxu0  ;;  %v21144_v13 = vpop.f32.mrb[211].mxu1 }
0x1b4b   :  { %21178 = vmatpush3.bf16.msra.mxu1 %v27185_v51  ;;  %21181 = vmatprep.mubr.msk.bf16.mxu1 %vm23027_vm4, %v23026_v18 }
0x1b4c   :  { %21179 = vmatprep.subr.bf16.mxu1 %v23026_v18 }
0x1b4f   :  { %21180 = vmatpush3.bf16.msra.mxu1 %v27183_v9  ;;  %v12453_v26 = vpop.f32.mrb[232].mxu0 }
0x1b50   :  { %v12459_v7 = vpack.c.bf16 %v12453_v26, %v12453_v26  ;;  %v21163_v16 = vpop.f32.mrb[233].mxu0  ;;  %21185 = vmatprep.subr.bf16.mxu1 %v23026_v18 }
0x1b51   :  { %v12456_v8 = vpop.f32.mrb[234].mxu0  ;;  %v22874_v16 = vld [vmem:[%s28366_s11 + $0x48] sm:$0xff]  }
0x1b52   :  { %21174 = vmatmul.mubr.msk.bf16.vlgmr.msra.gmra.mrb[236].mxu0 %vm11196_vm5, %v12459_v7  ;;  %21182 = vmatmul.mubr.msk.bf16.vlgmr.msra.gmra.mrb[216].mxu1 %vm8908_vm3, %v17020_v60  ;;  %v21164_v27 = vpop.f32.mrb[235].mxu0  ;;  %v22873_v7 = vld [vmem:[%s28366_s11 + $0x40] sm:$0xff]   ;;  %v22876_v8 = vld [vmem:[%s28366_s11 + $0x58] sm:$0xff]  }
0x1b53   :  { %21198 = vmatpush3.bf16.msra.mxu0 %v27185_v51  ;;  %21201 = vmatprep.mubr.msk.bf16.mxu0 %vm23027_vm4, %v23026_v18  ;;  %v22877_v27 = vld [vmem:[%s28366_s11 + $0x60] sm:$0xff]  }
0x1b54   :  { %21199 = vmatprep.subr.bf16.mxu0 %v23026_v18  ;;  %21186 = vmatpush3.bf16.msra.mxu1 %v22857_v43  ;;  %v22875_v43 = vld [vmem:[%s28366_s11 + $0x50] sm:$0xff]  }
0x1b55   :  { %21187 = vmatprep.subr.bf16.mxu1 %v23026_v18  ;;  %21193 = vmatprep.mubr.msk.bf16.mxu1 %vm23027_vm4, %v23026_v18 }
0x1b57   :  { %21200 = vmatpush3.bf16.msra.mxu0 %v27183_v9 }
0x1b58   :  { %21188 = vmatpush3.bf16.msra.mxu1 %v22858_v2  ;;  %21205 = vmatprep.subr.bf16.mxu0 %v23026_v18  ;;  %v22878_v2 = vld [vmem:[%s28366_s11 + $0x68] sm:$0xff]  }
0x1b59   :  { %21189 = vmatprep.subr.bf16.mxu1 %v23026_v18 }
0x1b5a   :  { %21202 = vmatmul.mubr.msk.bf16.vlgmr.msra.gmra.mrb[240].mxu0 %vm8908_vm3, %v17035_v63  ;;  %v22880_v63 = vld [vmem:[%s28366_s11 + $0x70] sm:$0xff]  }
0x1b5b   :  { %21213 = vmatprep.mubr.msk.bf16.mxu0 %vm23027_vm4, %v23026_v18  ;;  %21206 = vmatpush3.bf16.msra.mxu0 %v22860_v20 }
0x1b5c   :  { %21190 = vmatpush3.bf16.msra.mxu1 %v22859_v41  ;;  %21207 = vmatprep.subr.bf16.mxu0 %v23026_v18 }
0x1b5d   :  { %21191 = vmatprep.subr.bf16.mxu1 %v23026_v18 }
0x1b5f   :  { %21208 = vmatpush3.bf16.msra.mxu0 %v22862_v14 }
0x1b60   :  { %21192 = vmatpush3.bf16.msra.mxu1 %v22861_v0  ;;  %21209 = vmatprep.subr.bf16.mxu0 %v23026_v18 }
0x1b61   :  { %21217 = vmatprep.subr.bf16.mxu1 %v23026_v18 }
0x1b63   :  { %21210 = vmatpush3.bf16.msra.mxu0 %v22863_v47 }
0x1b64   :  { %21211 = vmatprep.subr.bf16.mxu0 %v23026_v18 }
0x1b67   :  { %21212 = vmatpush3.bf16.msra.mxu0 %v22864_v36 }
0x1b68   :  { %21237 = vmatprep.subr.bf16.mxu0 %v23026_v18 }
0x1c1d   :  { %v12407_v56 = vpop.f32.mrb[212].mxu1 }
0x1c1e   :  { %v12413_v10 = vadd.f32 %v12407_v56, %v12290_v42  ;;  %v21155_v22 = vpop.f32.mrb[213].mxu1  ;;  %v17080_v56 = vld [vmem:[%s28364_s9] ss:$0 sm:$0xff] }
0x1c1f   :  { %v12410_v61 = vpop.f32.mrb[214].mxu1 }
0x1c20   :  { %v21156_v46 = vpop.f32.mrb[215].mxu1 }
0x1c25   :  { %v12530_v24 = vpop.f32.mrb[236].mxu0  ;;  %v12576_v52 = vpop.f32.mrb[216].mxu1 }
0x1c26   :  { %v12536_v5 = vadd.f32 %v12530_v24, %v12413_v10  ;;  %v12582_v12 = vpack.c.bf16 %v12576_v52, %v12576_v52  ;;  %v21175_v28 = vpop.f32.mrb[237].mxu0  ;;  %v21183_v39 = vpop.f32.mrb[217].mxu1 }
0x1c27   :  { %v12533_v53 = vpop.f32.mrb[238].mxu0  ;;  %v12579_v21 = vpop.f32.mrb[218].mxu1  ;;  %v13039_v28 = vld [vmem:[%s28365_s10] sm:$0x1]  ;;  %v17082_v39 = vld [vmem:[%s28365_s10 + $0x1] sm:$0x1] }
0x1c28   :  { %21194 = vmatmul.mubr.msk.bf16.vlgmr.msra.gmra.mrb[220].mxu1 %vm11196_vm5, %v12582_v12  ;;  %v21176_v49 = vpop.f32.mrb[239].mxu0  ;;  %v21184_v59 = vpop.f32.mrb[219].mxu1  ;;  %v22879_v53 = vld [vmem:[%s28366_s11] sm:$0xff]   ;;  %v22881_v21 = vld [vmem:[%s28366_s11 + $0x8] sm:$0xff]  }
0x1c29   :  { %21218 = vmatpush3.bf16.msra.mxu1 %v27185_v51  ;;  %21221 = vmatprep.mubr.msk.bf16.mxu1 %vm23027_vm4, %v23026_v18  ;;  %v22883_v49 = vld [vmem:[%s28366_s11 + $0x10] sm:$0xff]   ;;  %v22884_v59 = vld [vmem:[%s28366_s11 + $0x18] sm:$0xff]  }
0x1c2a   :  { %21219 = vmatprep.subr.bf16.mxu1 %v23026_v18 }
0x1c2d   :  { %21220 = vmatpush3.bf16.msra.mxu1 %v27183_v9  ;;  %v12699_v31 = vpop.f32.mrb[240].mxu0 }
0x1c2e   :  { %v12705_v11 = vpack.c.bf16 %v12699_v31, %v12699_v31  ;;  %v21203_v6 = vpop.f32.mrb[241].mxu0  ;;  %21225 = vmatprep.subr.bf16.mxu1 %v23026_v18  ;;  %v22885_v31 = vld [vmem:[%s28366_s11 + $0x20] sm:$0xff]  }
0x1c2f   :  { %v12702_v48 = vpop.f32.mrb[242].mxu0  ;;  %v22888_v6 = vld [vmem:[%s28366_s11 + $0x38] sm:$0xff]  }
0x1c30   :  { %21214 = vmatmul.mubr.msk.bf16.vlgmr.msra.gmra.mrb[244].mxu0 %vm11196_vm5, %v12705_v11  ;;  %21222 = vmatmul.mubr.msk.bf16.vlgmr.msra.gmra.mrb[224].mxu1 %vm8908_vm3, %v17050_v3  ;;  %v21204_v30 = vpop.f32.mrb[243].mxu0  ;;  %v22886_v3 = vld [vmem:[%s28366_s11 + $0x28] sm:$0xff]   ;;  %v22887_v11 = vld [vmem:[%s28366_s11 + $0x30] sm:$0xff]  }
0x1c31   :  { %21238 = vmatpush3.bf16.msra.mxu0 %v27185_v51  ;;  %21241 = vmatprep.mubr.msk.bf16.mxu0 %vm23027_vm4, %v23026_v18  ;;  %v22866_v51 = vld [vmem:[%s28363_s8 + $0x1c8] sm:$0xff]   ;;  %v22889_v30 = vld [vmem:[%s28366_s11 + $0x80] sm:$0xff]  }
0x1c32   :  { %21239 = vmatprep.subr.bf16.mxu0 %v23026_v18  ;;  %21226 = vmatpush3.bf16.msra.mxu1 %v22865_v33  ;;  %v22882_v33 = vld [vmem:[%s28366_s11 + $0x78] sm:$0xff]  }
0x1c33   :  { %21227 = vmatprep.subr.bf16.mxu1 %v23026_v18  ;;  %21233 = vmatprep.mubr.msk.bf16.mxu1 %vm23027_vm4, %v23026_v18 }
0x1c35   :  { %21240 = vmatpush3.bf16.msra.mxu0 %v27183_v9  ;;  %v22867_v9 = vld [vmem:[%s28363_s8 + $0x1d0] sm:$0xff]  }
0x1c36   :  { %21245 = vmatprep.subr.bf16.mxu0 %v23026_v18  ;;  %21228 = vmatpush3.bf16.msra.mxu1 %v22866_v51 }
0x1c37   :  { %21229 = vmatprep.subr.bf16.mxu1 %v23026_v18 }
0x1c38   :  { %21242 = vmatmul.mubr.msk.bf16.vlgmr.msra.gmra.mrb[248].mxu0 %vm8908_vm3, %v17065_v29 }
0x1c39   :  { %21253 = vmatprep.mubr.msk.bf16.mxu0 %vm23027_vm4, %v23026_v18  ;;  %21246 = vmatpush3.bf16.msra.mxu0 %v22868_v35 }
0x1c3a   :  { %21247 = vmatprep.subr.bf16.mxu0 %v23026_v18  ;;  %21230 = vmatpush3.bf16.msra.mxu1 %v22867_v9 }
0x1c3b   :  { %21231 = vmatprep.subr.bf16.mxu1 %v23026_v18 }
0x1c3d   :  { %21248 = vmatpush3.bf16.msra.mxu0 %v22870_v19 }
0x1c3e   :  { %21232 = vmatpush3.bf16.msra.mxu1 %v22869_v50  ;;  %21249 = vmatprep.subr.bf16.mxu0 %v23026_v18  ;;  %v22890_v50 = vld [vmem:[%s28366_s11 + $0x88] sm:$0xff]  }
0x1c3f   :  { %21257 = vmatprep.subr.bf16.mxu1 %v23026_v18 }
0x1c41   :  { %21250 = vmatpush3.bf16.msra.mxu0 %v22871_v25 }
0x1c42   :  { %21251 = vmatprep.subr.bf16.mxu0 %v23026_v18 }
0x1c45   :  { %21252 = vmatpush3.bf16.msra.mxu0 %v22872_v4 }
0x1c46   :  { %21269 = vmatprep.subr.bf16.mxu0 %v23026_v18 }
0x1cfb   :  { %v12653_v62 = vpop.f32.mrb[220].mxu1 }
0x1cfc   :  { %v12659_v17 = vadd.f32 %v12653_v62, %v12536_v5  ;;  %v21195_v15 = vpop.f32.mrb[221].mxu1  ;;  %v22891_v62 = vld [vmem:[%s28366_s11 + $0x90] sm:$0xff]  }
0x1cfd   :  { %v12656_v45 = vpop.f32.mrb[222].mxu1 }
0x1cfe   :  { %v21196_v58 = vpop.f32.mrb[223].mxu1  ;;  %v22893_v45 = vld [vmem:[%s28366_s11 + $0x98] sm:$0xff]  }
0x1cff   :  { %v17116_v58 = vld [vmem:[%s28365_s10 + $0x2] sm:$0x1] }
0x1d03   :  { %v12776_v55 = vpop.f32.mrb[244].mxu0  ;;  %v12822_v44 = vpop.f32.mrb[224].mxu1 }
0x1d04   :  { %v12782_v34 = vadd.f32 %v12776_v55, %v12659_v17  ;;  %v12828_v40 = vpack.c.bf16 %v12822_v44, %v12822_v44  ;;  %v21215_v54 = vpop.f32.mrb[245].mxu0  ;;  %v21223_v42 = vpop.f32.mrb[225].mxu1  ;;  %v22895_v55 = vld [vmem:[%s28366_s11 + $0xa0] sm:$0xff]   ;;  %v22897_v44 = vld [vmem:[%s28366_s11 + $0xa8] sm:$0xff]  }
0x1d05   :  { %v12779_v37 = vpop.f32.mrb[246].mxu0  ;;  %v12825_v32 = vpop.f32.mrb[226].mxu1  ;;  %v22899_v54 = vld [vmem:[%s28366_s11 + $0xb0] sm:$0xff]   ;;  %v22894_v42 = vld [vmem:[%s28366_s11 + $0xc8] sm:$0xff]  }
0x1d06   :  { %21234 = vmatmul.mubr.msk.bf16.vlgmr.msra.gmra.mrb[228].mxu1 %vm11196_vm5, %v12828_v40  ;;  %v21216_v1 = vpop.f32.mrb[247].mxu0  ;;  %v21224_v38 = vpop.f32.mrb[227].mxu1  ;;  %v22892_v40 = vld [vmem:[%s28366_s11 + $0xc0] sm:$0xff]   ;;  %v22896_v37 = vld [vmem:[%s28366_s11 + $0xd0] sm:$0xff]   ;;  %v22898_v32 = vld [vmem:[%s28366_s11 + $0xd8] sm:$0xff]  }
0x1d07   :  { %21259 = vmatprep.mubr.msk.bf16.mxu1 %vm23027_vm4, %v23026_v18  ;;  %v22900_v1 = vld [vmem:[%s28366_s11 + $0xe0] sm:$0xff]   ;;  %v22901_v38 = vld [vmem:[%s28366_s11 + $0xb8] sm:$0xff]  }
0x1d0b   :  { %v12945_v23 = vpop.f32.mrb[248].mxu0 }
0x1d0c   :  { %v12951_v57 = vpack.c.bf16 %v12945_v23, %v12945_v23  ;;  %v21243_v13 = vpop.f32.mrb[249].mxu0  ;;  %v22902_v23 = vld [vmem:[%s28366_s11 + $0xe8] sm:$0xff]  }
0x1d0d   :  { %v12948_v26 = vpop.f32.mrb[250].mxu0  ;;  %v22904_v13 = vld [vmem:[%s28366_s11 + $0xf8] sm:$0xff]  }
0x1d0e   :  { %21254 = vmatmul.mubr.msk.bf16.vlgmr.msra.gmra.mrb[252].mxu0 %vm11196_vm5, %v12951_v57  ;;  %v21244_v60 = vpop.f32.mrb[251].mxu0  ;;  %v22903_v57 = vld [vmem:[%s28366_s11 + $0xf0] sm:$0xff]  }
0x1d0f   :  { %21285 = vmatprep.mubr.msk.bf16.mxu0 %vm23027_vm4, %v23026_v18  ;;  %21270 = vmatpush3.bf16.msra.mxu0 %v22873_v7 }
0x1d10   :  { %21271 = vmatprep.subr.bf16.mxu0 %v23026_v18 }
0x1d13   :  { %21272 = vmatpush3.bf16.msra.mxu0 %v22874_v16 }
0x1d14   :  { %21273 = vmatprep.subr.bf16.mxu0 %v23026_v18 }
0x1d17   :  { %21274 = vmatpush3.bf16.msra.mxu0 %v22875_v43 }
0x1d18   :  { %21275 = vmatprep.subr.bf16.mxu0 %v23026_v18 }
0x1d1b   :  { %21276 = vmatpush3.bf16.msra.mxu0 %v22876_v8 }
0x1d1c   :  { %21277 = vmatprep.subr.bf16.mxu0 %v23026_v18 }
0x1d1f   :  { %21278 = vmatpush3.bf16.msra.mxu0 %v22877_v27 }
0x1d20   :  { %21279 = vmatprep.subr.bf16.mxu0 %v23026_v18 }
0x1d23   :  { %21280 = vmatpush3.bf16.msra.mxu0 %v22878_v2 }
0x1d24   :  { %21281 = vmatprep.subr.bf16.mxu0 %v23026_v18 }
0x1d27   :  { %21282 = vmatpush3.bf16.msra.mxu0 %v22880_v63 }
0x1d28   :  { %21283 = vmatprep.subr.bf16.mxu0 %v23026_v18 }
0x1d2b   :  { %21284 = vmatpush3.bf16.msra.mxu0 %v22882_v33  ;;  %v22917_v33 = vld [vmem:[%s28366_s11 + $0x138] sm:$0xff]  }
0x1d2c   :  { %21309 = vmatprep.subr.bf16.mxu0 %v23026_v18 }
0x1dd9   :  { %v12899_v41 = vpop.f32.mrb[228].mxu1 }
0x1dda   :  { %v12905_v20 = vadd.f32 %v12899_v41, %v12782_v34  ;;  %v21235_v0 = vpop.f32.mrb[229].mxu1  ;;  %v17142_v34 = vld [vmem:[%s28365_s10 + $0x3] sm:$0x1] }
0x1ddb   :  { %v12902_v14 = vpop.f32.mrb[230].mxu1 }
0x1ddc   :  { %v21236_v47 = vpop.f32.mrb[231].mxu1 }
0x1de1   :  { %v13022_v36 = vpop.f32.mrb[252].mxu0 }
0x1de2   :  { %v13028_v10 = vadd.f32 %v13022_v36, %v12905_v20  ;;  %v21255_v22 = vpop.f32.mrb[253].mxu0 }
0x1de3   :  { %v13025_v61 = vpop.f32.mrb[254].mxu0 }
0x1de4   :  { %v13036_v46 = vadd.f32 %v17080_v56, %v13028_v10  ;;  %v21256_v24 = vpop.f32.mrb[255].mxu0  ;;  %v17168_v56 = vld [vmem:[%s28365_s10 + $0x4] sm:$0x1] }
0x1de5   :  { %v22905_v61 = vld [vmem:[%s28366_s11 + $0x100] sm:$0xff]  }
0x1de6   :  { %v13037_v52 = vmax.f32 %v13036_v46, 0.0 }
0x1de8   :  { %v13038_v5 = vpack.c.bf16 %v13037_v52, %v13037_v52  ;;  %v22906_v52 = vld [vmem:[%s28366_s11 + $0x108] sm:$0xff]  }
0x1dea   :  { %v27682_v12 = vsel %vm13044_vm6, %v13038_v5, 0  ;;  %v17194_v5 = vld [vmem:[%s28365_s10 + $0x5] sm:$0x1] }
0x1deb   :  { %21258 = vmatpush3.bf16.msra.mxu1 %v27682_v12 }
0x1dec   :  { %21263 = vmatprep.subr.bf16.mxu1 %v23026_v18 }
0x1dee   :  { %21260 = vmatmul.mubr.msk.bf16.vlgmr.msra.gmra.mrb[232].mxu1 %vm13040_vm7, %v13039_v28  ;;  %v22908_v28 = vld [vmem:[%s28366_s11 + $0x140] sm:$0xff]  }
0x1def   :  { %21264 = vmatpush3.bf16.msra.mxu1 %v27682_v12  ;;  %21265 = vmatprep.mubr.msk.bf16.mxu1 %vm23027_vm4, %v23026_v18 }
0x1df0   :  { %21289 = vmatprep.subr.bf16.mxu1 %v23026_v18 }
0x1df6   :  { %21266 = vmatmul.mubr.msk.bf16.vlgmr.msra.gmra.mrb[236].mxu1 %vm13040_vm7, %v17082_v39  ;;  %v22907_v39 = vld [vmem:[%s28366_s11 + $0x110] sm:$0xff]  }
0x1df7   :  { %21290 = vmatpush3.bf16.msra.mxu1 %v22879_v53  ;;  %21305 = vmatprep.mubr.msk.bf16.mxu1 %vm23027_vm4, %v23026_v18  ;;  %v22910_v53 = vld [vmem:[%s28366_s11 + $0x148] sm:$0xff]  }
0x1df8   :  { %21291 = vmatprep.subr.bf16.mxu1 %v23026_v18 }
0x1dfb   :  { %21292 = vmatpush3.bf16.msra.mxu1 %v22881_v21  ;;  %v22909_v21 = vld [vmem:[%s28366_s11 + $0x118] sm:$0xff]  }
0x1dfc   :  { %21293 = vmatprep.subr.bf16.mxu1 %v23026_v18 }
0x1dff   :  { %21294 = vmatpush3.bf16.msra.mxu1 %v22883_v49  ;;  %v22912_v49 = vld [vmem:[%s28366_s11 + $0x150] sm:$0xff]  }
0x1e00   :  { %21295 = vmatprep.subr.bf16.mxu1 %v23026_v18 }
0x1e03   :  { %21296 = vmatpush3.bf16.msra.mxu1 %v22884_v59  ;;  %v22911_v59 = vld [vmem:[%s28366_s11 + $0x120] sm:$0xff]  }
0x1e04   :  { %21297 = vmatprep.subr.bf16.mxu1 %v23026_v18 }
0x1e07   :  { %21298 = vmatpush3.bf16.msra.mxu1 %v22885_v31  ;;  %v22914_v31 = vld [vmem:[%s28366_s11 + $0x158] sm:$0xff]  }
0x1e08   :  { %21299 = vmatprep.subr.bf16.mxu1 %v23026_v18 }
0x1e0b   :  { %21300 = vmatpush3.bf16.msra.mxu1 %v22886_v3  ;;  %v22913_v3 = vld [vmem:[%s28366_s11 + $0x128] sm:$0xff]  }
0x1e0c   :  { %21301 = vmatprep.subr.bf16.mxu1 %v23026_v18 }
0x1e0f   :  { %21302 = vmatpush3.bf16.msra.mxu1 %v22887_v11  ;;  %v22915_v11 = vld [vmem:[%s28366_s11 + $0x130] sm:$0xff]  }
0x1e10   :  { %21303 = vmatprep.subr.bf16.mxu1 %v23026_v18 }
0x1e13   :  { %21304 = vmatpush3.bf16.msra.mxu1 %v22888_v6  ;;  %v22916_v6 = vld [vmem:[%s28366_s11 + $0x160] sm:$0xff]  }
0x1e14   :  { %21315 = vmatprep.subr.bf16.mxu1 %v23026_v18 }
0x1ec1   :  { %v13082_v48 = vpop.f32.mrb[232].mxu1 }
0x1ec2   :  { %v13088_v29 = vpack.c.bf16 %v13082_v48, %v13082_v48  ;;  %v21261_v51 = vpop.f32.mrb[233].mxu1  ;;  %v22918_v48 = vld [vmem:[%s28366_s11 + $0x168] sm:$0xff]  }
0x1ec3   :  { %v13085_v9 = vpop.f32.mrb[234].mxu1 }
0x1ec4   :  { %v21262_v35 = vpop.f32.mrb[235].mxu1  ;;  %21306 = vmatmul.mubr.bf16.vlgmr.msra.gmra.mrb[240].mxu1 %v13088_v29  ;;  %v22920_v29 = vld [vmem:[%s28366_s11 + $0x178] sm:$0xff]  }
0x1ec5   :  { %21316 = vmatpush3.bf16.msra.mxu1 %v22889_v30  ;;  %21331 = vmatprep.mubr.msk.bf16.mxu1 %vm23027_vm4, %v23026_v18  ;;  %v22919_v30 = vld [vmem:[%s28366_s11 + $0x170] sm:$0xff]  }
0x1ec6   :  { %21317 = vmatprep.subr.bf16.mxu1 %v23026_v18 }
0x1ec9   :  { %v13144_v19 = vpop.f32.mrb[236].mxu1  ;;  %21318 = vmatpush3.bf16.msra.mxu1 %v22890_v50 }
0x1eca   :  { %v13150_v25 = vpack.c.bf16 %v13144_v19, %v13144_v19  ;;  %v21267_v4 = vpop.f32.mrb[237].mxu1  ;;  %21319 = vmatprep.subr.bf16.mxu1 %v23026_v18 }
0x1ecb   :  { %v13147_v17 = vpop.f32.mrb[238].mxu1 }
0x1ecc   :  { %21286 = vmatmul.mubr.bf16.vlgmr.msra.gmra.mrb[0].mxu0 %v13150_v25  ;;  %v21268_v15 = vpop.f32.mrb[239].mxu1 }
0x1ecd   :  { %21310 = vmatpush3.bf16.msra.mxu0 %v27682_v12  ;;  %21311 = vmatprep.mubr.msk.bf16.mxu0 %vm23027_vm4, %v23026_v18 }
0x1ece   :  { %21335 = vmatprep.subr.bf16.mxu0 %v23026_v18  ;;  %21320 = vmatpush3.bf16.msra.mxu1 %v22891_v62 }
0x1ecf   :  { %21321 = vmatprep.subr.bf16.mxu1 %v23026_v18 }
0x1ed2   :  { %21322 = vmatpush3.bf16.msra.mxu1 %v22893_v45 }
0x1ed3   :  { %21323 = vmatprep.subr.bf16.mxu1 %v23026_v18 }
0x1ed4   :  { %21312 = vmatmul.mubr.msk.bf16.vlgmr.msra.gmra.mrb[4].mxu0 %vm13040_vm7, %v17116_v58 }
0x1ed5   :  { %21336 = vmatpush3.bf16.msra.mxu0 %v27682_v12  ;;  %21337 = vmatprep.mubr.msk.bf16.mxu0 %vm23027_vm4, %v23026_v18 }
0x1ed6   :  { %21341 = vmatprep.subr.bf16.mxu0 %v23026_v18  ;;  %21324 = vmatpush3.bf16.msra.mxu1 %v22895_v55 }
0x1ed7   :  { %21325 = vmatprep.subr.bf16.mxu1 %v23026_v18 }
0x1eda   :  { %21326 = vmatpush3.bf16.msra.mxu1 %v22897_v44 }
0x1edb   :  { %21327 = vmatprep.subr.bf16.mxu1 %v23026_v18 }
0x1edc   :  { %21338 = vmatmul.mubr.msk.bf16.vlgmr.msra.gmra.mrb[8].mxu0 %vm13040_vm7, %v17142_v34 }
0x1edd   :  { %21342 = vmatpush3.bf16.msra.mxu0 %v22892_v40  ;;  %21357 = vmatprep.mubr.msk.bf16.mxu0 %vm23027_vm4, %v23026_v18 }
0x1ede   :  { %21343 = vmatprep.subr.bf16.mxu0 %v23026_v18  ;;  %21328 = vmatpush3.bf16.msra.mxu1 %v22899_v54  ;;  %v17220_v54 = vld [vmem:[%s28365_s10 + $0x6] sm:$0x1] }
0x1edf   :  { %21329 = vmatprep.subr.bf16.mxu1 %v23026_v18 }
0x1ee1   :  { %21344 = vmatpush3.bf16.msra.mxu0 %v22894_v42 }
0x1ee2   :  { %21345 = vmatprep.subr.bf16.mxu0 %v23026_v18  ;;  %21330 = vmatpush3.bf16.msra.mxu1 %v22901_v38 }
0x1ee3   :  { %21361 = vmatprep.subr.bf16.mxu1 %v23026_v18 }
0x1ee5   :  { %21346 = vmatpush3.bf16.msra.mxu0 %v22896_v37 }
0x1ee6   :  { %21347 = vmatprep.subr.bf16.mxu0 %v23026_v18 }
0x1ee9   :  { %21348 = vmatpush3.bf16.msra.mxu0 %v22898_v32  ;;  %v22921_v32 = vld [vmem:[%s28366_s11 + $0x180] sm:$0xff]  }
0x1eea   :  { %21349 = vmatprep.subr.bf16.mxu0 %v23026_v18 }
0x1eed   :  { %21350 = vmatpush3.bf16.msra.mxu0 %v22900_v1 }
0x1eee   :  { %21351 = vmatprep.subr.bf16.mxu0 %v23026_v18 }
0x1ef1   :  { %21352 = vmatpush3.bf16.msra.mxu0 %v22902_v23  ;;  %v22922_v23 = vld [vmem:[%s28366_s11 + $0x188] sm:$0xff]  }
0x1ef2   :  { %21353 = vmatprep.subr.bf16.mxu0 %v23026_v18 }
0x1ef5   :  { %21354 = vmatpush3.bf16.msra.mxu0 %v22903_v57  ;;  %v17246_v57 = vld [vmem:[%s28365_s10 + $0x7] sm:$0x1] }
0x1ef6   :  { %21355 = vmatprep.subr.bf16.mxu0 %v23026_v18 }
0x1ef9   :  { %21356 = vmatpush3.bf16.msra.mxu0 %v22904_v13  ;;  %v22924_v13 = vld [vmem:[%s28366_s11 + $0x1c0] sm:$0xff]  }
0x1efa   :  { %21387 = vmatprep.subr.bf16.mxu0 %v23026_v18 }
0x1f97   :  { %v13338_v26 = vpop.f32.mrb[240].mxu1 }
0x1f98   :  { %v21307_v60 = vpop.f32.mrb[241].mxu1 }
0x1f99   :  { %v13341_v7 = vpop.f32.mrb[242].mxu1  ;;  %v22926_v60 = vld [vmem:[%s28366_s11 + $0x1c8] sm:$0xff]  }
0x1f9a   :  { %v21308_v16 = vpop.f32.mrb[243].mxu1  ;;  %v22925_v7 = vld [vmem:[%s28366_s11 + $0x198] sm:$0xff]  }
0x1f9b   :  { %v22928_v16 = vld [vmem:[%s28366_s11 + $0x1d0] sm:$0xff]  }
0x1f9f   :  { %v13250_v43 = vpop.f32.mrb[0].mxu0 }
0x1fa0   :  { %v21287_v8 = vpop.f32.mrb[1].mxu0  ;;  %v27820_v27 = vadd.f32 %v13338_v26, %v13250_v43  ;;  %v22923_v26 = vld [vmem:[%s28366_s11 + $0x190] sm:$0xff]   ;;  %v22927_v43 = vld [vmem:[%s28366_s11 + $0x1a0] sm:$0xff]  }
0x1fa1   :  { %v13253_v2 = vpop.f32.mrb[2].mxu0  ;;  %v22930_v8 = vld [vmem:[%s28366_s11 + $0x1d8] sm:$0xff]  }
0x1fa2   :  { %v21288_v63 = vpop.f32.mrb[3].mxu0  ;;  %v22931_v2 = vld [vmem:[%s28366_s11 + $0x1b0] sm:$0xff]  }
0x1fa3   :  { %v22932_v63 = vld [vmem:[%s28366_s11 + $0x1e0] sm:$0xff]  }
0x1fa7   :  { %v13383_v41 = vpop.f32.mrb[4].mxu0 }
0x1fa8   :  { %v13389_v20 = vpack.c.bf16 %v13383_v41, %v13383_v41  ;;  %v21313_v0 = vpop.f32.mrb[5].mxu0  ;;  %v22933_v41 = vld [vmem:[%s28366_s11 + $0x1b8] sm:$0xff]  }
0x1fa9   :  { %v13386_v14 = vpop.f32.mrb[6].mxu0  ;;  %v22935_v0 = vld [vmem:[%s28366_s11 + $0x1f0] sm:$0xff]  }
0x1faa   :  { %21332 = vmatmul.mubr.bf16.vlgmr.msra.gmra.mrb[244].mxu1 %v13389_v20  ;;  %v21314_v47 = vpop.f32.mrb[7].mxu0  ;;  %v22934_v20 = vld [vmem:[%s28366_s11 + $0x1e8] sm:$0xff]   ;;  %v22936_v14 = vld [vmem:[%s28366_s11 + $0x1f8] sm:$0xff]  }
0x1fab   :  { %21362 = vmatpush3.bf16.msra.mxu1 %v27682_v12  ;;  %21363 = vmatprep.mubr.msk.bf16.mxu1 %vm23027_vm4, %v23026_v18 }
0x1fac   :  { %21367 = vmatprep.subr.bf16.mxu1 %v23026_v18 }
0x1faf   :  { %v13535_v36 = vpop.f32.mrb[8].mxu0 }
0x1fb0   :  { %v13541_v10 = vpack.c.bf16 %v13535_v36, %v13535_v36  ;;  %v21339_v22 = vpop.f32.mrb[9].mxu0 }
0x1fb1   :  { %v13538_v46 = vpop.f32.mrb[10].mxu0 }
0x1fb2   :  { %21358 = vmatmul.mubr.bf16.vlgmr.msra.gmra.mrb[12].mxu0 %v13541_v10  ;;  %21364 = vmatmul.mubr.msk.bf16.vlgmr.msra.gmra.mrb[248].mxu1 %vm13040_vm7, %v17168_v56  ;;  %v21340_v24 = vpop.f32.mrb[11].mxu0 }
0x1fb3   :  { %21388 = vmatpush3.bf16.msra.mxu0 %v27682_v12  ;;  %21389 = vmatprep.mubr.msk.bf16.mxu0 %vm23027_vm4, %v23026_v18 }
0x1fb4   :  { %21368 = vmatpush3.bf16.msra.mxu1 %v22905_v61  ;;  %21393 = vmatprep.subr.bf16.mxu0 %v23026_v18 }
0x1fb5   :  { %21369 = vmatprep.subr.bf16.mxu1 %v23026_v18  ;;  %21383 = vmatprep.mubr.msk.bf16.mxu1 %vm23027_vm4, %v23026_v18 }
0x1fb8   :  { %21370 = vmatpush3.bf16.msra.mxu1 %v22906_v52 }
0x1fb9   :  { %21371 = vmatprep.subr.bf16.mxu1 %v23026_v18 }
0x1fba   :  { %21390 = vmatmul.mubr.msk.bf16.vlgmr.msra.gmra.mrb[16].mxu0 %vm13040_vm7, %v17194_v5 }
0x1fbb   :  { %21394 = vmatpush3.bf16.msra.mxu0 %v22908_v28  ;;  %21409 = vmatprep.mubr.msk.bf16.mxu0 %vm23027_vm4, %v23026_v18 }
0x1fbc   :  { %21372 = vmatpush3.bf16.msra.mxu1 %v22907_v39  ;;  %21395 = vmatprep.subr.bf16.mxu0 %v23026_v18 }
0x1fbd   :  { %21373 = vmatprep.subr.bf16.mxu1 %v23026_v18 }
0x1fbf   :  { %21396 = vmatpush3.bf16.msra.mxu0 %v22910_v53 }
0x1fc0   :  { %21374 = vmatpush3.bf16.msra.mxu1 %v22909_v21  ;;  %21397 = vmatprep.subr.bf16.mxu0 %v23026_v18 }
0x1fc1   :  { %21375 = vmatprep.subr.bf16.mxu1 %v23026_v18 }
0x1fc3   :  { %21398 = vmatpush3.bf16.msra.mxu0 %v22912_v49 }
0x1fc4   :  { %21376 = vmatpush3.bf16.msra.mxu1 %v22911_v59  ;;  %21399 = vmatprep.subr.bf16.mxu0 %v23026_v18 }
0x1fc5   :  { %21377 = vmatprep.subr.bf16.mxu1 %v23026_v18 }
0x1fc7   :  { %21400 = vmatpush3.bf16.msra.mxu0 %v22914_v31  ;;  %v17272_v31 = vld [vmem:[%s28365_s10 + $0x8] sm:$0x1] }
0x1fc8   :  { %21378 = vmatpush3.bf16.msra.mxu1 %v22913_v3  ;;  %21401 = vmatprep.subr.bf16.mxu0 %v23026_v18 }
0x1fc9   :  { %21379 = vmatprep.subr.bf16.mxu1 %v23026_v18 }
0x1fcb   :  { %21402 = vmatpush3.bf16.msra.mxu0 %v22916_v6  ;;  %v22937_v6 = vld [vmem:[%s28366_s11 + $0x200] sm:$0xff]  }
0x1fcc   :  { %21380 = vmatpush3.bf16.msra.mxu1 %v22915_v11  ;;  %21403 = vmatprep.subr.bf16.mxu0 %v23026_v18 }
0x1fcd   :  { %21381 = vmatprep.subr.bf16.mxu1 %v23026_v18 }
0x1fcf   :  { %21404 = vmatpush3.bf16.msra.mxu0 %v22918_v48 }
0x1fd0   :  { %21382 = vmatpush3.bf16.msra.mxu1 %v22917_v33  ;;  %21405 = vmatprep.subr.bf16.mxu0 %v23026_v18 }
0x1fd1   :  { %21413 = vmatprep.subr.bf16.mxu1 %v23026_v18 }
0x1fd3   :  { %21406 = vmatpush3.bf16.msra.mxu0 %v22919_v30  ;;  %v22938_v30 = vld [vmem:[%s28366_s11 + $0x208] sm:$0xff]  }
0x1fd4   :  { %21407 = vmatprep.subr.bf16.mxu0 %v23026_v18 }
0x1fd7   :  { %21408 = vmatpush3.bf16.msra.mxu0 %v22920_v29  ;;  %v17298_v29 = vld [vmem:[%s28365_s10 + $0x9] sm:$0x1] }
0x1fd8   :  { %21439 = vmatprep.subr.bf16.mxu0 %v23026_v18 }
0x207d   :  { %v13489_v51 = vpop.f32.mrb[244].mxu1 }
0x207e   :  { %v13495_v9 = vadd.f32 %v13489_v51, %v27820_v27  ;;  %v21333_v35 = vpop.f32.mrb[245].mxu1  ;;  %v22929_v27 = vld [vmem:[%s28366_s11 + $0x1a8] sm:$0xff]   ;;  %v22940_v51 = vld [vmem:[%s28366_s11 + $0x240] sm:$0xff]  }
0x207f   :  { %v13492_v50 = vpop.f32.mrb[246].mxu1  ;;  %v22942_v35 = vld [vmem:[%s28366_s11 + $0x248] sm:$0xff]  }
0x2080   :  { %v21334_v19 = vpop.f32.mrb[247].mxu1  ;;  %v22941_v50 = vld [vmem:[%s28366_s11 + $0x218] sm:$0xff]  }
0x2081   :  { %v22944_v19 = vld [vmem:[%s28366_s11 + $0x250] sm:$0xff]  }
0x2085   :  { %v13641_v25 = vpop.f32.mrb[12].mxu0  ;;  %v13687_v4 = vpop.f32.mrb[248].mxu1 }
0x2086   :  { %v27907_v62 = vadd.f32 %v13641_v25, %v13495_v9  ;;  %v13693_v17 = vpack.c.bf16 %v13687_v4, %v13687_v4  ;;  %v21359_v15 = vpop.f32.mrb[13].mxu0  ;;  %v21365_v45 = vpop.f32.mrb[249].mxu1  ;;  %v22939_v9 = vld [vmem:[%s28366_s11 + $0x210] sm:$0xff]   ;;  %v22943_v25 = vld [vmem:[%s28366_s11 + $0x220] sm:$0xff]   ;;  %v22946_v4 = vld [vmem:[%s28366_s11 + $0x258] sm:$0xff]  }
0x2087   :  { %v13644_v58 = vpop.f32.mrb[14].mxu0  ;;  %v13690_v55 = vpop.f32.mrb[250].mxu1  ;;  %v22948_v15 = vld [vmem:[%s28366_s11 + $0x260] sm:$0xff]   ;;  %v22949_v45 = vld [vmem:[%s28366_s11 + $0x238] sm:$0xff]  }
0x2088   :  { %21384 = vmatmul.mubr.bf16.vlgmr.msra.gmra.mrb[252].mxu1 %v13693_v17  ;;  %v21360_v44 = vpop.f32.mrb[15].mxu0  ;;  %v21366_v34 = vpop.f32.mrb[251].mxu1  ;;  %v22947_v17 = vld [vmem:[%s28366_s11 + $0x230] sm:$0xff]   ;;  %v22950_v58 = vld [vmem:[%s28366_s11 + $0x268] sm:$0xff]  }
0x2089   :  { %21414 = vmatpush3.bf16.msra.mxu1 %v27682_v12  ;;  %21415 = vmatprep.mubr.msk.bf16.mxu1 %vm23027_vm4, %v23026_v18  ;;  %v22951_v55 = vld [vmem:[%s28366_s11 + $0x270] sm:$0xff]   ;;  %v22952_v44 = vld [vmem:[%s28366_s11 + $0x278] sm:$0xff]  }
0x208a   :  { %21419 = vmatprep.subr.bf16.mxu1 %v23026_v18 }
0x208d   :  { %v13839_v40 = vpop.f32.mrb[16].mxu0 }
0x208e   :  { %v13845_v42 = vpack.c.bf16 %v13839_v40, %v13839_v40  ;;  %v21391_v37 = vpop.f32.mrb[17].mxu0 }
0x208f   :  { %v13842_v1 = vpop.f32.mrb[18].mxu0 }
0x2090   :  { %21410 = vmatmul.mubr.bf16.vlgmr.msra.gmra.mrb[20].mxu0 %v13845_v42  ;;  %21416 = vmatmul.mubr.msk.bf16.vlgmr.msra.gmra.mrb[0].mxu1 %vm13040_vm7, %v17220_v54  ;;  %v21392_v38 = vpop.f32.mrb[19].mxu0 }
0x2091   :  { %21440 = vmatpush3.bf16.msra.mxu0 %v27682_v12  ;;  %21441 = vmatprep.mubr.msk.bf16.mxu0 %vm23027_vm4, %v23026_v18 }
0x2092   :  { %21420 = vmatpush3.bf16.msra.mxu1 %v22921_v32  ;;  %21445 = vmatprep.subr.bf16.mxu0 %v23026_v18 }
0x2093   :  { %21421 = vmatprep.subr.bf16.mxu1 %v23026_v18  ;;  %21435 = vmatprep.mubr.msk.bf16.mxu1 %vm23027_vm4, %v23026_v18 }
0x2096   :  { %21422 = vmatpush3.bf16.msra.mxu1 %v22922_v23 }
0x2097   :  { %21423 = vmatprep.subr.bf16.mxu1 %v23026_v18 }
0x2098   :  { %21442 = vmatmul.mubr.msk.bf16.vlgmr.msra.gmra.mrb[24].mxu0 %vm13040_vm7, %v17246_v57 }
0x2099   :  { %21446 = vmatpush3.bf16.msra.mxu0 %v22924_v13  ;;  %21461 = vmatprep.mubr.msk.bf16.mxu0 %vm23027_vm4, %v23026_v18 }
0x209a   :  { %21424 = vmatpush3.bf16.msra.mxu1 %v22923_v26  ;;  %21447 = vmatprep.subr.bf16.mxu0 %v23026_v18 }
0x209b   :  { %21425 = vmatprep.subr.bf16.mxu1 %v23026_v18 }
0x209d   :  { %21448 = vmatpush3.bf16.msra.mxu0 %v22926_v60 }
0x209e   :  { %21426 = vmatpush3.bf16.msra.mxu1 %v22925_v7  ;;  %21449 = vmatprep.subr.bf16.mxu0 %v23026_v18 }
0x209f   :  { %21427 = vmatprep.subr.bf16.mxu1 %v23026_v18 }
0x20a1   :  { %21450 = vmatpush3.bf16.msra.mxu0 %v22928_v16 }
0x20a2   :  { %21428 = vmatpush3.bf16.msra.mxu1 %v22927_v43  ;;  %21451 = vmatprep.subr.bf16.mxu0 %v23026_v18 }
0x20a3   :  { %21429 = vmatprep.subr.bf16.mxu1 %v23026_v18 }
0x20a5   :  { %21452 = vmatpush3.bf16.msra.mxu0 %v22930_v8  ;;  %v17324_v8 = vld [vmem:[%s28365_s10 + $0xa] sm:$0x1] }
0x20a6   :  { %21430 = vmatpush3.bf16.msra.mxu1 %v22929_v27  ;;  %21453 = vmatprep.subr.bf16.mxu0 %v23026_v18 }
0x20a7   :  { %21431 = vmatprep.subr.bf16.mxu1 %v23026_v18 }
0x20a9   :  { %21454 = vmatpush3.bf16.msra.mxu0 %v22932_v63  ;;  %v22953_v63 = vld [vmem:[%s28366_s11 + $0x280] sm:$0xff]  }
0x20aa   :  { %21432 = vmatpush3.bf16.msra.mxu1 %v22931_v2  ;;  %21455 = vmatprep.subr.bf16.mxu0 %v23026_v18 }
0x20ab   :  { %21433 = vmatprep.subr.bf16.mxu1 %v23026_v18 }
0x20ad   :  { %21456 = vmatpush3.bf16.msra.mxu0 %v22934_v20 }
0x20ae   :  { %21434 = vmatpush3.bf16.msra.mxu1 %v22933_v41  ;;  %21457 = vmatprep.subr.bf16.mxu0 %v23026_v18 }
0x20af   :  { %21465 = vmatprep.subr.bf16.mxu1 %v23026_v18 }
0x20b1   :  { %21458 = vmatpush3.bf16.msra.mxu0 %v22935_v0  ;;  %v22954_v0 = vld [vmem:[%s28366_s11 + $0x288] sm:$0xff]  }
0x20b2   :  { %21459 = vmatprep.subr.bf16.mxu0 %v23026_v18 }
0x20b5   :  { %21460 = vmatpush3.bf16.msra.mxu0 %v22936_v14  ;;  %v17350_v14 = vld [vmem:[%s28365_s10 + $0xb] sm:$0x1] }
0x20b6   :  { %21491 = vmatprep.subr.bf16.mxu0 %v23026_v18 }
0x215b   :  { %v13793_v47 = vpop.f32.mrb[252].mxu1 }
0x215c   :  { %v13799_v36 = vadd.f32 %v13793_v47, %v27907_v62  ;;  %v21385_v56 = vpop.f32.mrb[253].mxu1  ;;  %v22945_v62 = vld [vmem:[%s28366_s11 + $0x228] sm:$0xff]   ;;  %v22956_v47 = vld [vmem:[%s28366_s11 + $0x2c0] sm:$0xff]  }
0x215d   :  { %v13796_v10 = vpop.f32.mrb[254].mxu1  ;;  %v22958_v56 = vld [vmem:[%s28366_s11 + $0x2c8] sm:$0xff]  }
0x215e   :  { %v21386_v22 = vpop.f32.mrb[255].mxu1  ;;  %v22957_v10 = vld [vmem:[%s28366_s11 + $0x298] sm:$0xff]  }
0x215f   :  { %v22960_v22 = vld [vmem:[%s28366_s11 + $0x2d0] sm:$0xff]  }
0x2163   :  { %v13945_v61 = vpop.f32.mrb[20].mxu0  ;;  %v13991_v46 = vpop.f32.mrb[0].mxu1 }
0x2164   :  { %v27994_v24 = vadd.f32 %v13945_v61, %v13799_v36  ;;  %v13997_v52 = vpack.c.bf16 %v13991_v46, %v13991_v46  ;;  %v21411_v5 = vpop.f32.mrb[21].mxu0  ;;  %v21417_v28 = vpop.f32.mrb[1].mxu1  ;;  %v22955_v36 = vld [vmem:[%s28366_s11 + $0x290] sm:$0xff]   ;;  %v22959_v61 = vld [vmem:[%s28366_s11 + $0x2a0] sm:$0xff]   ;;  %v22962_v46 = vld [vmem:[%s28366_s11 + $0x2d8] sm:$0xff]  }
0x2165   :  { %v13948_v39 = vpop.f32.mrb[22].mxu0  ;;  %v13994_v53 = vpop.f32.mrb[2].mxu1  ;;  %v22964_v5 = vld [vmem:[%s28366_s11 + $0x2e0] sm:$0xff]   ;;  %v22965_v28 = vld [vmem:[%s28366_s11 + $0x2b8] sm:$0xff]  }
0x2166   :  { %21436 = vmatmul.mubr.bf16.vlgmr.msra.gmra.mrb[4].mxu1 %v13997_v52  ;;  %v21412_v21 = vpop.f32.mrb[23].mxu0  ;;  %v21418_v49 = vpop.f32.mrb[3].mxu1  ;;  %v22963_v52 = vld [vmem:[%s28366_s11 + $0x2b0] sm:$0xff]   ;;  %v22966_v39 = vld [vmem:[%s28366_s11 + $0x2e8] sm:$0xff]  }
0x2167   :  { %21466 = vmatpush3.bf16.msra.mxu1 %v27682_v12  ;;  %21467 = vmatprep.mubr.msk.bf16.mxu1 %vm23027_vm4, %v23026_v18  ;;  %v22967_v53 = vld [vmem:[%s28366_s11 + $0x2f0] sm:$0xff]   ;;  %v22968_v21 = vld [vmem:[%s28366_s11 + $0x2f8] sm:$0xff]  }
0x2168   :  { %21471 = vmatprep.subr.bf16.mxu1 %v23026_v18 }
0x216b   :  { %v14143_v59 = vpop.f32.mrb[24].mxu0 }
0x216c   :  { %v14149_v3 = vpack.c.bf16 %v14143_v59, %v14143_v59  ;;  %v21443_v11 = vpop.f32.mrb[25].mxu0 }
0x216d   :  { %v14146_v33 = vpop.f32.mrb[26].mxu0 }
0x216e   :  { %21462 = vmatmul.mubr.bf16.vlgmr.msra.gmra.mrb[28].mxu0 %v14149_v3  ;;  %21468 = vmatmul.mubr.msk.bf16.vlgmr.msra.gmra.mrb[8].mxu1 %vm13040_vm7, %v17272_v31  ;;  %v21444_v48 = vpop.f32.mrb[27].mxu0 }
0x216f   :  { %21492 = vmatpush3.bf16.msra.mxu0 %v27682_v12  ;;  %21493 = vmatprep.mubr.msk.bf16.mxu0 %vm23027_vm4, %v23026_v18 }
0x2170   :  { %21472 = vmatpush3.bf16.msra.mxu1 %v22937_v6  ;;  %21497 = vmatprep.subr.bf16.mxu0 %v23026_v18 }
0x2171   :  { %21473 = vmatprep.subr.bf16.mxu1 %v23026_v18  ;;  %21487 = vmatprep.mubr.msk.bf16.mxu1 %vm23027_vm4, %v23026_v18 }
0x2174   :  { %21474 = vmatpush3.bf16.msra.mxu1 %v22938_v30 }
0x2175   :  { %21475 = vmatprep.subr.bf16.mxu1 %v23026_v18 }
0x2176   :  { %21494 = vmatmul.mubr.msk.bf16.vlgmr.msra.gmra.mrb[32].mxu0 %vm13040_vm7, %v17298_v29 }
0x2177   :  { %21498 = vmatpush3.bf16.msra.mxu0 %v22940_v51  ;;  %21513 = vmatprep.mubr.msk.bf16.mxu0 %vm23027_vm4, %v23026_v18 }
0x2178   :  { %21476 = vmatpush3.bf16.msra.mxu1 %v22939_v9  ;;  %21499 = vmatprep.subr.bf16.mxu0 %v23026_v18 }
0x2179   :  { %21477 = vmatprep.subr.bf16.mxu1 %v23026_v18 }
0x217b   :  { %21500 = vmatpush3.bf16.msra.mxu0 %v22942_v35 }
0x217c   :  { %21478 = vmatpush3.bf16.msra.mxu1 %v22941_v50  ;;  %21501 = vmatprep.subr.bf16.mxu0 %v23026_v18 }
0x217d   :  { %21479 = vmatprep.subr.bf16.mxu1 %v23026_v18 }
0x217f   :  { %21502 = vmatpush3.bf16.msra.mxu0 %v22944_v19 }
0x2180   :  { %21480 = vmatpush3.bf16.msra.mxu1 %v22943_v25  ;;  %21503 = vmatprep.subr.bf16.mxu0 %v23026_v18 }
0x2181   :  { %21481 = vmatprep.subr.bf16.mxu1 %v23026_v18 }
0x2183   :  { %21504 = vmatpush3.bf16.msra.mxu0 %v22946_v4  ;;  %v17376_v4 = vld [vmem:[%s28365_s10 + $0xc] sm:$0x1] }
0x2184   :  { %21482 = vmatpush3.bf16.msra.mxu1 %v22945_v62  ;;  %21505 = vmatprep.subr.bf16.mxu0 %v23026_v18 }
0x2185   :  { %21483 = vmatprep.subr.bf16.mxu1 %v23026_v18 }
0x2187   :  { %21506 = vmatpush3.bf16.msra.mxu0 %v22948_v15  ;;  %v22969_v15 = vld [vmem:[%s28366_s11 + $0x300] sm:$0xff]  }
0x2188   :  { %21484 = vmatpush3.bf16.msra.mxu1 %v22947_v17  ;;  %21507 = vmatprep.subr.bf16.mxu0 %v23026_v18 }
0x2189   :  { %21485 = vmatprep.subr.bf16.mxu1 %v23026_v18 }
0x218b   :  { %21508 = vmatpush3.bf16.msra.mxu0 %v22950_v58 }
0x218c   :  { %21486 = vmatpush3.bf16.msra.mxu1 %v22949_v45  ;;  %21509 = vmatprep.subr.bf16.mxu0 %v23026_v18 }
0x218d   :  { %21517 = vmatprep.subr.bf16.mxu1 %v23026_v18 }
0x218f   :  { %21510 = vmatpush3.bf16.msra.mxu0 %v22951_v55  ;;  %v22970_v55 = vld [vmem:[%s28366_s11 + $0x308] sm:$0xff]  }
0x2190   :  { %21511 = vmatprep.subr.bf16.mxu0 %v23026_v18 }
0x2193   :  { %21512 = vmatpush3.bf16.msra.mxu0 %v22952_v44  ;;  %v17402_v44 = vld [vmem:[%s28365_s10 + $0xd] sm:$0x1] }
0x2194   :  { %21543 = vmatprep.subr.bf16.mxu0 %v23026_v18 }
0x2239   :  { %v14097_v34 = vpop.f32.mrb[4].mxu1 }
0x223a   :  { %v14103_v40 = vadd.f32 %v14097_v34, %v27994_v24  ;;  %v21437_v54 = vpop.f32.mrb[5].mxu1  ;;  %v22961_v24 = vld [vmem:[%s28366_s11 + $0x2a8] sm:$0xff]   ;;  %v22972_v34 = vld [vmem:[%s28366_s11 + $0x340] sm:$0xff]  }
0x223b   :  { %v14100_v42 = vpop.f32.mrb[6].mxu1  ;;  %v22974_v54 = vld [vmem:[%s28366_s11 + $0x348] sm:$0xff]  }
0x223c   :  { %v21438_v37 = vpop.f32.mrb[7].mxu1  ;;  %v22973_v42 = vld [vmem:[%s28366_s11 + $0x318] sm:$0xff]  }
0x223d   :  { %v22976_v37 = vld [vmem:[%s28366_s11 + $0x350] sm:$0xff]  }
0x2241   :  { %v14249_v32 = vpop.f32.mrb[28].mxu0  ;;  %v14295_v1 = vpop.f32.mrb[8].mxu1 }
0x2242   :  { %v28081_v38 = vadd.f32 %v14249_v32, %v14103_v40  ;;  %v14301_v23 = vpack.c.bf16 %v14295_v1, %v14295_v1  ;;  %v21463_v57 = vpop.f32.mrb[29].mxu0  ;;  %v21469_v13 = vpop.f32.mrb[9].mxu1  ;;  %v22971_v40 = vld [vmem:[%s28366_s11 + $0x310] sm:$0xff]   ;;  %v22975_v32 = vld [vmem:[%s28366_s11 + $0x320] sm:$0xff]   ;;  %v22978_v1 = vld [vmem:[%s28366_s11 + $0x358] sm:$0xff]  }
0x2243   :  { %v14252_v26 = vpop.f32.mrb[30].mxu0  ;;  %v14298_v60 = vpop.f32.mrb[10].mxu1  ;;  %v22980_v57 = vld [vmem:[%s28366_s11 + $0x360] sm:$0xff]   ;;  %v22981_v13 = vld [vmem:[%s28366_s11 + $0x338] sm:$0xff]  }
0x2244   :  { %21488 = vmatmul.mubr.bf16.vlgmr.msra.gmra.mrb[12].mxu1 %v14301_v23  ;;  %v21464_v7 = vpop.f32.mrb[31].mxu0  ;;  %v21470_v16 = vpop.f32.mrb[11].mxu1  ;;  %v22979_v23 = vld [vmem:[%s28366_s11 + $0x330] sm:$0xff]   ;;  %v22982_v26 = vld [vmem:[%s28366_s11 + $0x368] sm:$0xff]  }
0x2245   :  { %21518 = vmatpush3.bf16.msra.mxu1 %v27682_v12  ;;  %21519 = vmatprep.mubr.msk.bf16.mxu1 %vm23027_vm4, %v23026_v18  ;;  %v22983_v60 = vld [vmem:[%s28366_s11 + $0x370] sm:$0xff]   ;;  %v22984_v7 = vld [vmem:[%s28366_s11 + $0x378] sm:$0xff]  }
0x2246   :  { %21523 = vmatprep.subr.bf16.mxu1 %v23026_v18 }
0x2249   :  { %v14447_v43 = vpop.f32.mrb[32].mxu0 }
0x224a   :  { %v14453_v27 = vpack.c.bf16 %v14447_v43, %v14447_v43  ;;  %v21495_v2 = vpop.f32.mrb[33].mxu0 }
0x224b   :  { %v14450_v41 = vpop.f32.mrb[34].mxu0 }
0x224c   :  { %21514 = vmatmul.mubr.bf16.vlgmr.msra.gmra.mrb[36].mxu0 %v14453_v27  ;;  %21520 = vmatmul.mubr.msk.bf16.vlgmr.msra.gmra.mrb[16].mxu1 %vm13040_vm7, %v17324_v8  ;;  %v21496_v20 = vpop.f32.mrb[35].mxu0 }
0x224d   :  { %21544 = vmatpush3.bf16.msra.mxu0 %v27682_v12  ;;  %21545 = vmatprep.mubr.msk.bf16.mxu0 %vm23027_vm4, %v23026_v18 }
0x224e   :  { %21524 = vmatpush3.bf16.msra.mxu1 %v22953_v63  ;;  %21549 = vmatprep.subr.bf16.mxu0 %v23026_v18 }
0x224f   :  { %21525 = vmatprep.subr.bf16.mxu1 %v23026_v18  ;;  %21539 = vmatprep.mubr.msk.bf16.mxu1 %vm23027_vm4, %v23026_v18 }
0x2252   :  { %21526 = vmatpush3.bf16.msra.mxu1 %v22954_v0 }
0x2253   :  { %21527 = vmatprep.subr.bf16.mxu1 %v23026_v18 }
0x2254   :  { %21546 = vmatmul.mubr.msk.bf16.vlgmr.msra.gmra.mrb[40].mxu0 %vm13040_vm7, %v17350_v14 }
0x2255   :  { %21550 = vmatpush3.bf16.msra.mxu0 %v22956_v47  ;;  %21565 = vmatprep.mubr.msk.bf16.mxu0 %vm23027_vm4, %v23026_v18 }
0x2256   :  { %21528 = vmatpush3.bf16.msra.mxu1 %v22955_v36  ;;  %21551 = vmatprep.subr.bf16.mxu0 %v23026_v18 }
0x2257   :  { %21529 = vmatprep.subr.bf16.mxu1 %v23026_v18 }
0x2259   :  { %21552 = vmatpush3.bf16.msra.mxu0 %v22958_v56 }
0x225a   :  { %21530 = vmatpush3.bf16.msra.mxu1 %v22957_v10  ;;  %21553 = vmatprep.subr.bf16.mxu0 %v23026_v18 }
0x225b   :  { %21531 = vmatprep.subr.bf16.mxu1 %v23026_v18 }
0x225d   :  { %21554 = vmatpush3.bf16.msra.mxu0 %v22960_v22 }
0x225e   :  { %21532 = vmatpush3.bf16.msra.mxu1 %v22959_v61  ;;  %21555 = vmatprep.subr.bf16.mxu0 %v23026_v18 }
0x225f   :  { %21533 = vmatprep.subr.bf16.mxu1 %v23026_v18 }
0x2261   :  { %21556 = vmatpush3.bf16.msra.mxu0 %v22962_v46  ;;  %v17428_v46 = vld [vmem:[%s28365_s10 + $0xe] sm:$0x1] }
0x2262   :  { %21534 = vmatpush3.bf16.msra.mxu1 %v22961_v24  ;;  %21557 = vmatprep.subr.bf16.mxu0 %v23026_v18 }
0x2263   :  { %21535 = vmatprep.subr.bf16.mxu1 %v23026_v18 }
0x2265   :  { %21558 = vmatpush3.bf16.msra.mxu0 %v22964_v5  ;;  %v22985_v5 = vld [vmem:[%s28366_s11 + $0x380] sm:$0xff]  }
0x2266   :  { %21536 = vmatpush3.bf16.msra.mxu1 %v22963_v52  ;;  %21559 = vmatprep.subr.bf16.mxu0 %v23026_v18 }
0x2267   :  { %21537 = vmatprep.subr.bf16.mxu1 %v23026_v18 }
0x2269   :  { %21560 = vmatpush3.bf16.msra.mxu0 %v22966_v39 }
0x226a   :  { %21538 = vmatpush3.bf16.msra.mxu1 %v22965_v28  ;;  %21561 = vmatprep.subr.bf16.mxu0 %v23026_v18 }
0x226b   :  { %21569 = vmatprep.subr.bf16.mxu1 %v23026_v18 }
0x226d   :  { %21562 = vmatpush3.bf16.msra.mxu0 %v22967_v53  ;;  %v22986_v53 = vld [vmem:[%s28366_s11 + $0x388] sm:$0xff]  }
0x226e   :  { %21563 = vmatprep.subr.bf16.mxu0 %v23026_v18 }
0x2271   :  { %21564 = vmatpush3.bf16.msra.mxu0 %v22968_v21  ;;  %v17454_v21 = vld [vmem:[%s28365_s10 + $0xf] sm:$0x1] }
0x2272   :  { %21595 = vmatprep.subr.bf16.mxu0 %v23026_v18 }
0x2317   :  { %v14401_v49 = vpop.f32.mrb[12].mxu1 }
0x2318   :  { %v14407_v59 = vadd.f32 %v14401_v49, %v28081_v38  ;;  %v21489_v31 = vpop.f32.mrb[13].mxu1  ;;  %v22977_v38 = vld [vmem:[%s28366_s11 + $0x328] sm:$0xff]   ;;  %v22987_v49 = vld [vmem:[%s28366_s11 + $0x390] sm:$0xff]  }
0x2319   :  { %v14404_v3 = vpop.f32.mrb[14].mxu1  ;;  %v22989_v31 = vld [vmem:[%s28366_s11 + $0x398] sm:$0xff]  }
0x231a   :  { %v21490_v11 = vpop.f32.mrb[15].mxu1  ;;  %v22992_v3 = vld [vmem:[%s28366_s11 + $0x3d0] sm:$0xff]  }
0x231b   :  { %v22991_v11 = vld [vmem:[%s28366_s11 + $0x3a0] sm:$0xff]  }
0x231f   :  { %v14553_v6 = vpop.f32.mrb[36].mxu0  ;;  %v14599_v33 = vpop.f32.mrb[16].mxu1 }
0x2320   :  { %v28168_v48 = vadd.f32 %v14553_v6, %v14407_v59  ;;  %v14605_v30 = vpack.c.bf16 %v14599_v33, %v14599_v33  ;;  %v21515_v29 = vpop.f32.mrb[37].mxu0  ;;  %v21521_v51 = vpop.f32.mrb[17].mxu1  ;;  %v22990_v59 = vld [vmem:[%s28366_s11 + $0x3c8] sm:$0xff]   ;;  %v22994_v33 = vld [vmem:[%s28366_s11 + $0x3d8] sm:$0xff]  }
0x2321   :  { %v14556_v9 = vpop.f32.mrb[38].mxu0  ;;  %v14602_v35 = vpop.f32.mrb[18].mxu1  ;;  %v22993_v6 = vld [vmem:[%s28366_s11 + $0x3a8] sm:$0xff]   ;;  %v22997_v29 = vld [vmem:[%s28366_s11 + $0x3b8] sm:$0xff]  }
0x2322   :  { %21540 = vmatmul.mubr.bf16.vlgmr.msra.gmra.mrb[20].mxu1 %v14605_v30  ;;  %v21516_v50 = vpop.f32.mrb[39].mxu0  ;;  %v21522_v19 = vpop.f32.mrb[19].mxu1  ;;  %v22996_v30 = vld [vmem:[%s28366_s11 + $0x3e0] sm:$0xff]   ;;  %v22998_v51 = vld [vmem:[%s28366_s11 + $0x3e8] sm:$0xff]   ;;  %v22999_v9 = vld [vmem:[%s28366_s11 + $0x3f0] sm:$0xff]  }
0x2323   :  { %21570 = vmatpush3.bf16.msra.mxu1 %v27682_v12  ;;  %21571 = vmatprep.mubr.msk.bf16.mxu1 %vm23027_vm4, %v23026_v18  ;;  %v23000_v35 = vld [vmem:[%s28366_s11 + $0x3f8] sm:$0xff]  }
0x2324   :  { %21575 = vmatprep.subr.bf16.mxu1 %v23026_v18 }
0x2327   :  { %v14751_v25 = vpop.f32.mrb[40].mxu0 }
0x2328   :  { %v14757_v62 = vpack.c.bf16 %v14751_v25, %v14751_v25  ;;  %v21547_v17 = vpop.f32.mrb[41].mxu0 }
0x2329   :  { %v14754_v45 = vpop.f32.mrb[42].mxu0 }
0x232a   :  { %21566 = vmatmul.mubr.bf16.vlgmr.msra.gmra.mrb[44].mxu0 %v14757_v62  ;;  %21572 = vmatmul.mubr.msk.bf16.vlgmr.msra.gmra.mrb[24].mxu1 %vm13040_vm7, %v17376_v4  ;;  %v21548_v58 = vpop.f32.mrb[43].mxu0 }
0x232b   :  { %21596 = vmatpush3.bf16.msra.mxu0 %v27682_v12  ;;  %21597 = vmatprep.mubr.msk.bf16.mxu0 %vm23027_vm4, %v23026_v18 }
0x232c   :  { %21576 = vmatpush3.bf16.msra.mxu1 %v22969_v15  ;;  %21601 = vmatprep.subr.bf16.mxu0 %v23026_v18 }
0x232d   :  { %21577 = vmatprep.subr.bf16.mxu1 %v23026_v18  ;;  %21591 = vmatprep.mubr.msk.bf16.mxu1 %vm23027_vm4, %v23026_v18 }
0x2330   :  { %21578 = vmatpush3.bf16.msra.mxu1 %v22970_v55 }
0x2331   :  { %21579 = vmatprep.subr.bf16.mxu1 %v23026_v18 }
0x2332   :  { %21598 = vmatmul.mubr.msk.bf16.vlgmr.msra.gmra.mrb[48].mxu0 %vm13040_vm7, %v17402_v44 }
0x2333   :  { %21602 = vmatpush3.bf16.msra.mxu0 %v22972_v34  ;;  %21617 = vmatprep.mubr.msk.bf16.mxu0 %vm23027_vm4, %v23026_v18 }
0x2334   :  { %21580 = vmatpush3.bf16.msra.mxu1 %v22971_v40  ;;  %21603 = vmatprep.subr.bf16.mxu0 %v23026_v18 }
0x2335   :  { %21581 = vmatprep.subr.bf16.mxu1 %v23026_v18 }
0x2337   :  { %21604 = vmatpush3.bf16.msra.mxu0 %v22974_v54 }
0x2338   :  { %21582 = vmatpush3.bf16.msra.mxu1 %v22973_v42  ;;  %21605 = vmatprep.subr.bf16.mxu0 %v23026_v18 }
0x2339   :  { %21583 = vmatprep.subr.bf16.mxu1 %v23026_v18 }
0x233b   :  { %21606 = vmatpush3.bf16.msra.mxu0 %v22976_v37 }
0x233c   :  { %21584 = vmatpush3.bf16.msra.mxu1 %v22975_v32  ;;  %21607 = vmatprep.subr.bf16.mxu0 %v23026_v18 }
0x233d   :  { %21585 = vmatprep.subr.bf16.mxu1 %v23026_v18 }
0x233f   :  { %21608 = vmatpush3.bf16.msra.mxu0 %v22978_v1 }
0x2340   :  { %21586 = vmatpush3.bf16.msra.mxu1 %v22977_v38  ;;  %21609 = vmatprep.subr.bf16.mxu0 %v23026_v18 }
0x2341   :  { %21587 = vmatprep.subr.bf16.mxu1 %v23026_v18 }
0x2343   :  { %21610 = vmatpush3.bf16.msra.mxu0 %v22980_v57 }
0x2344   :  { %21588 = vmatpush3.bf16.msra.mxu1 %v22979_v23  ;;  %21611 = vmatprep.subr.bf16.mxu0 %v23026_v18 }
0x2345   :  { %21589 = vmatprep.subr.bf16.mxu1 %v23026_v18 }
0x2347   :  { %21612 = vmatpush3.bf16.msra.mxu0 %v22982_v26 }
0x2348   :  { %21590 = vmatpush3.bf16.msra.mxu1 %v22981_v13  ;;  %21613 = vmatprep.subr.bf16.mxu0 %v23026_v18 }
0x2349   :  { %21621 = vmatprep.subr.bf16.mxu1 %v23026_v18 }
0x234b   :  { %21614 = vmatpush3.bf16.msra.mxu0 %v22983_v60 }
0x234c   :  { %21615 = vmatprep.subr.bf16.mxu0 %v23026_v18 }
0x234f   :  { %21616 = vmatpush3.bf16.msra.mxu0 %v22984_v7 }
0x2350   :  { %21647 = vmatprep.subr.bf16.mxu0 %v23026_v18 }
0x23f5   :  { %v14705_v16 = vpop.f32.mrb[20].mxu1 }
0x23f6   :  { %v14711_v43 = vadd.f32 %v14705_v16, %v28168_v48  ;;  %v21541_v8 = vpop.f32.mrb[21].mxu1  ;;  %v22995_v48 = vld [vmem:[%s28366_s11 + $0x3b0] sm:$0xff]   ;;  %v17480_v16 = vld [vmem:[%s28367_s12] ss:$0 sm:$0xff] }
0x23f7   :  { %v14708_v27 = vpop.f32.mrb[22].mxu1 }
0x23f8   :  { %v21542_v2 = vpop.f32.mrb[23].mxu1 }
0x23fd   :  { %v14857_v63 = vpop.f32.mrb[44].mxu0  ;;  %v14903_v41 = vpop.f32.mrb[24].mxu1 }
0x23fe   :  { %v28255_v20 = vadd.f32 %v14857_v63, %v14711_v43  ;;  %v14909_v0 = vpack.c.bf16 %v14903_v41, %v14903_v41  ;;  %v21567_v14 = vpop.f32.mrb[45].mxu0  ;;  %v21573_v47 = vpop.f32.mrb[25].mxu1 }
0x23ff   :  { %v14860_v36 = vpop.f32.mrb[46].mxu0  ;;  %v14906_v56 = vpop.f32.mrb[26].mxu1 }
0x2400   :  { %21592 = vmatmul.mubr.bf16.vlgmr.msra.gmra.mrb[28].mxu1 %v14909_v0  ;;  %v21568_v10 = vpop.f32.mrb[47].mxu0  ;;  %v21574_v22 = vpop.f32.mrb[27].mxu1 }
0x2401   :  { %21622 = vmatpush3.bf16.msra.mxu1 %v27682_v12  ;;  %21623 = vmatprep.mubr.msk.bf16.mxu1 %vm23027_vm4, %v23026_v18 }
0x2402   :  { %21627 = vmatprep.subr.bf16.mxu1 %v23026_v18 }
0x2405   :  { %v15055_v61 = vpop.f32.mrb[48].mxu0 }
0x2406   :  { %v15061_v24 = vpack.c.bf16 %v15055_v61, %v15055_v61  ;;  %v21599_v52 = vpop.f32.mrb[49].mxu0 }
0x2407   :  { %v15058_v28 = vpop.f32.mrb[50].mxu0 }
0x2408   :  { %21618 = vmatmul.mubr.bf16.vlgmr.msra.gmra.mrb[52].mxu0 %v15061_v24  ;;  %21624 = vmatmul.mubr.msk.bf16.vlgmr.msra.gmra.mrb[32].mxu1 %vm13040_vm7, %v17428_v46  ;;  %v21600_v39 = vpop.f32.mrb[51].mxu0 }
0x2409   :  { %21648 = vmatpush3.bf16.msra.mxu0 %v27682_v12  ;;  %21649 = vmatprep.mubr.msk.bf16.mxu0 %vm23027_vm4, %v23026_v18  ;;  %v22988_v12 = vld [vmem:[%s28366_s11 + $0x3c0] sm:$0xff]  }
0x240a   :  { %21628 = vmatpush3.bf16.msra.mxu1 %v22985_v5  ;;  %21653 = vmatprep.subr.bf16.mxu0 %v23026_v18 }
0x240b   :  { %21629 = vmatprep.subr.bf16.mxu1 %v23026_v18  ;;  %21643 = vmatprep.mubr.msk.bf16.mxu1 %vm23027_vm4, %v23026_v18 }
0x240e   :  { %21630 = vmatpush3.bf16.msra.mxu1 %v22986_v53 }
0x240f   :  { %21631 = vmatprep.subr.bf16.mxu1 %v23026_v18 }
0x2410   :  { %21650 = vmatmul.mubr.msk.bf16.vlgmr.msra.gmra.mrb[56].mxu0 %vm13040_vm7, %v17454_v21 }
0x2411   :  { %21654 = vmatpush3.bf16.msra.mxu0 %v22988_v12  ;;  %21669 = vmatprep.mubr.msk.bf16.mxu0 %vm23027_vm4, %v23026_v18 }
0x2412   :  { %21632 = vmatpush3.bf16.msra.mxu1 %v22987_v49  ;;  %21655 = vmatprep.subr.bf16.mxu0 %v23026_v18 }
0x2413   :  { %21633 = vmatprep.subr.bf16.mxu1 %v23026_v18 }
0x2415   :  { %21656 = vmatpush3.bf16.msra.mxu0 %v22990_v59 }
0x2416   :  { %21634 = vmatpush3.bf16.msra.mxu1 %v22989_v31  ;;  %21657 = vmatprep.subr.bf16.mxu0 %v23026_v18 }
0x2417   :  { %21635 = vmatprep.subr.bf16.mxu1 %v23026_v18 }
0x2419   :  { %21658 = vmatpush3.bf16.msra.mxu0 %v22992_v3 }
0x241a   :  { %21636 = vmatpush3.bf16.msra.mxu1 %v22991_v11  ;;  %21659 = vmatprep.subr.bf16.mxu0 %v23026_v18 }
0x241b   :  { %21637 = vmatprep.subr.bf16.mxu1 %v23026_v18 }
0x241d   :  { %21660 = vmatpush3.bf16.msra.mxu0 %v22994_v33 }
0x241e   :  { %21638 = vmatpush3.bf16.msra.mxu1 %v22993_v6  ;;  %21661 = vmatprep.subr.bf16.mxu0 %v23026_v18 }
0x241f   :  { %21639 = vmatprep.subr.bf16.mxu1 %v23026_v18 }
0x2421   :  { %21662 = vmatpush3.bf16.msra.mxu0 %v22996_v30 }
0x2422   :  { %21640 = vmatpush3.bf16.msra.mxu1 %v22995_v48  ;;  %21663 = vmatprep.subr.bf16.mxu0 %v23026_v18 }
0x2423   :  { %21641 = vmatprep.subr.bf16.mxu1 %v23026_v18 }
0x2425   :  { %21664 = vmatpush3.bf16.msra.mxu0 %v22998_v51 }
0x2426   :  { %21642 = vmatpush3.bf16.msra.mxu1 %v22997_v29  ;;  %21665 = vmatprep.subr.bf16.mxu0 %v23026_v18 }
0x2429   :  { %21666 = vmatpush3.bf16.msra.mxu0 %v22999_v9 }
0x242a   :  { %21667 = vmatprep.subr.bf16.mxu0 %v23026_v18 }
0x242d   :  { %21668 = vmatpush3.bf16.msra.mxu0 %v23000_v35 }
0x24d3   :  { %v15009_v50 = vpop.f32.mrb[28].mxu1 }
0x24d4   :  { %v15015_v19 = vadd.f32 %v15009_v50, %v28255_v20  ;;  %v21593_v25 = vpop.f32.mrb[29].mxu1 }
0x24d5   :  { %v15012_v4 = vpop.f32.mrb[30].mxu1 }
0x24d6   :  { %v21594_v62 = vpop.f32.mrb[31].mxu1 }
0x24db   :  { %v15161_v17 = vpop.f32.mrb[52].mxu0  ;;  %v15207_v15 = vpop.f32.mrb[32].mxu1 }
0x24dc   :  { %v15167_v45 = vadd.f32 %v15161_v17, %v15015_v19  ;;  %v15213_v58 = vpack.c.bf16 %v15207_v15, %v15207_v15  ;;  %v21619_v55 = vpop.f32.mrb[53].mxu0  ;;  %v21625_v44 = vpop.f32.mrb[33].mxu1 }
0x24dd   :  { %v15164_v34 = vpop.f32.mrb[54].mxu0  ;;  %v15210_v40 = vpop.f32.mrb[34].mxu1 }
0x24de   :  { %21644 = vmatmul.mubr.bf16.vlgmr.msra.gmra.mrb[36].mxu1 %v15213_v58  ;;  %v21620_v18 = vpop.f32.mrb[55].mxu0  ;;  %v21626_v54 = vpop.f32.mrb[35].mxu1 }
0x24e3   :  { %v15359_v42 = vpop.f32.mrb[56].mxu0 }
0x24e4   :  { %v15365_v37 = vpack.c.bf16 %v15359_v42, %v15359_v42  ;;  %v21651_v32 = vpop.f32.mrb[57].mxu0 }
0x24e5   :  { %v15362_v1 = vpop.f32.mrb[58].mxu0 }
0x24e6   :  { %21670 = vmatmul.mubr.bf16.vlgmr.msra.gmra.mrb[60].mxu0 %v15365_v37  ;;  %v21652_v38 = vpop.f32.mrb[59].mxu0 }
0x25b1   :  { %v15313_v23 = vpop.f32.mrb[36].mxu1 }
0x25b2   :  { %v15319_v57 = vadd.f32 %v15313_v23, %v15167_v45  ;;  %v21645_v13 = vpop.f32.mrb[37].mxu1 }
0x25b3   :  { %v15316_v26 = vpop.f32.mrb[38].mxu1 }
0x25b4   :  { %v21646_v60 = vpop.f32.mrb[39].mxu1 }
0x25b9   :  { %v15465_v7 = vpop.f32.mrb[60].mxu0 }
0x25ba   :  { %v15471_v43 = vadd.f32 %v15465_v7, %v15319_v57  ;;  %v21671_v8 = vpop.f32.mrb[61].mxu0 }
0x25bb   :  { %v15468_v27 = vpop.f32.mrb[62].mxu0 }
0x25bc   :  { %v15479_v2 = vadd.f32 %v17480_v16, %v15471_v43  ;;  %v21672_v63 = vpop.f32.mrb[63].mxu0 }
0x25be   :  { %15481 = vst.msk [vmem:[#allocation2] sm:$0x3] %vm15480_vm8, %v15479_v2 }
0x25bf   :  { %23012 = shalt.err (!%p23009_p4)
}
0x25c0   :  { %s23013_s12 = scalar_lea.hbm %s28368_s13, 32 }
0x25c1   :  { %p23014_p5 = scmp.ne.s32.totalorder %s28368_s13, %s23013_s12  ;;  %p23017_p6 = scmp.lt.u32.totalorder %s23013_s12, %s28368_s13 }
0x25c3   :  { %p23019_p7 = pnand %p23017_p6, %p23014_p5 }
0x25c5   :  { %23022 = shalt.err (!%p23019_p7)
}
0x25c6   :  { %15491 = dma.vmem_to_hbm [thread:$0]  %s15489_s20, 32, %s28368_s13, [#allocation3]  }
0x25c7   :  { %23023 = dma.done.wait [#allocation3], 32  }
0x25c8   :  { %23024 = vsyncadd [#allocation3], 4294967264 }
0x25c9   :  { %15495 = vsyncpa [#allocation3], 1 }

</bundles_post_ra>
